<compile_context>
chip_gen: v5e
topology: v5e:2x2
jax: 0.10.0
libtpu: 0.0.40
codegen_flags: <defaults>
</compile_context>

<pallas_src>
import functools

import jax
import jax.numpy as jnp
from jax.experimental import pallas as pl
from jax.experimental.pallas import tpu as pltpu


# --------------------------- Pallas kernel ----------------------------------

def _window_attention_kernel(x_ref, wqkv_ref, bqkv_ref, bias_ref, mask_ref,
                             wproj_ref, bproj_ref, o_ref,
                             *, num_heads, head_dim, scale, num_mask_windows):
    """One batch tile of TB windows.

    x_ref     : (TB, N, C)        input tokens
    wqkv_ref  : (C, 3C)           qkv weight, already transposed (x @ W^T)
    bqkv_ref  : (1, 3C)           qkv bias
    bias_ref  : (nH, N, N)        relative position bias (gathered in wrapper)
    mask_ref  : (nW, N, N)        per-window mask (zeros when mask is None)
    wproj_ref : (C, C)            proj weight, transposed
    bproj_ref : (1, C)            proj bias
    o_ref     : (TB, N, C)        output
    """
    TB, N, C = x_ref.shape
    nW = num_mask_windows

    # Fused QKV projection: fold (TB, N) into the MXU M dimension.
    x2d = x_ref[...].reshape(TB * N, C)
    qkv = jnp.dot(x2d, wqkv_ref[...], preferred_element_type=jnp.float32)
    qkv = qkv + bqkv_ref[...]                       # (TB*N, 3C)
    qkv = qkv.reshape(TB, N, 3 * C)

    mask = mask_ref[...]                            # (nW, N, N)

    head_outs = []
    for h in range(num_heads):                      # static, small head count
        lo = h * head_dim
        q = qkv[:, :, lo:lo + head_dim] * scale     # (TB, N, hd)
        k = qkv[:, :, C + lo:C + lo + head_dim]     # (TB, N, hd)
        v = qkv[:, :, 2 * C + lo:2 * C + lo + head_dim]

        # attn = q @ k^T  (batched over the TB windows in this tile)
        attn = jnp.einsum('bqd,bkd->bqk', q, k,
                          preferred_element_type=jnp.float32)   # (TB, N, N)
        attn = attn + bias_ref[h][None, :, :]
        # per-window mask: window index of local item i is (i % nW)
        attn = (attn.reshape(TB // nW, nW, N, N) + mask[None]).reshape(TB, N, N)

        # numerically stable softmax along the key axis
        attn = attn - attn.max(axis=-1, keepdims=True)
        attn = jnp.exp(attn)
        attn = attn / attn.sum(axis=-1, keepdims=True)

        head_outs.append(
            jnp.einsum('bqk,bkd->bqd', attn, v,
                       preferred_element_type=jnp.float32))     # (TB, N, hd)

    # concat heads (head-major along C, matches transpose(1,2).reshape)
    out = jnp.concatenate(head_outs, axis=-1)       # (TB, N, C)

    # output projection, again with TB*N folded into M
    y = jnp.dot(out.reshape(TB * N, C), wproj_ref[...],
                preferred_element_type=jnp.float32) + bproj_ref[...]
    o_ref[...] = y.reshape(TB, N, C).astype(o_ref.dtype)


# ------------------------------ wrapper --------------------------------------

def relative_position_index(Wh, Ww):
    """Same construction as the PyTorch module buffer."""
    coords_h = jnp.arange(Wh)
    coords_w = jnp.arange(Ww)
    coords = jnp.stack(jnp.meshgrid(coords_h, coords_w, indexing='ij'))  # (2,Wh,Ww)
    coords_flatten = coords.reshape(2, -1)                               # (2, N)
    rel = coords_flatten[:, :, None] - coords_flatten[:, None, :]        # (2, N, N)
    rel = rel.transpose(1, 2, 0)
    rel = rel.at[:, :, 0].add(Wh - 1)
    rel = rel.at[:, :, 1].add(Ww - 1)
    rel = rel.at[:, :, 0].multiply(2 * Ww - 1)
    return rel.sum(-1)                                                   # (N, N)


def window_attention_forward(x, wqkv, bqkv, wproj, bproj,
                             bias_table, rel_index, num_heads,
                             mask=None, qk_scale=None):
    """JAX/Pallas equivalent of WindowAttention.forward (eval mode)."""
    x = x.astype(jnp.float32)
    B_, N, C = x.shape
    head_dim = C // num_heads
    scale = float(qk_scale) if qk_scale is not None else head_dim ** (-0.5)

    # relative position bias (nH, N, N): parameter gather done once outside.
    rel_bias = bias_table[rel_index.reshape(-1)]
    rel_bias = rel_bias.reshape(N, N, num_heads)
    rel_bias = jnp.transpose(rel_bias, (2, 0, 1)).astype(jnp.float32)

    if mask is None:
        nW = 1
        mask_arr = jnp.zeros((1, N, N), jnp.float32)
    else:
        nW = int(mask.shape[0])
        mask_arr = mask.astype(jnp.float32)
    assert B_ % nW == 0, "batch must be a multiple of the number of mask windows"

    # Batch tile: a multiple of nW that divides B_, targeting >= ~256 MXU rows
    # per grid step so the projection matmuls fill the MXU M dimension.
    groups = B_ // nW
    rows_per_group = nW * N
    gb = max(1, min(groups, max(1, 256 // rows_per_group)))
    while groups % gb:
        gb -= 1
    TB = gb * nW
    grid = (B_ // TB,)

    kernel = functools.partial(
        _window_attention_kernel,
        num_heads=num_heads, head_dim=head_dim, scale=scale,
        num_mask_windows=nW)

    wqkv_t = jnp.transpose(wqkv).astype(jnp.float32)       # (C, 3C)
    wproj_t = jnp.transpose(wproj).astype(jnp.float32)     # (C, C)
    bqkv2 = bqkv.reshape(1, 3 * C).astype(jnp.float32)
    bproj2 = bproj.reshape(1, C).astype(jnp.float32)

    out = pl.pallas_call(
        kernel,
        out_shape=jax.ShapeDtypeStruct((B_, N, C), jnp.float32),
        grid=grid,
        in_specs=[
            pl.BlockSpec((TB, N, C), lambda b: (b, 0, 0)),          # x tile
            pl.BlockSpec((C, 3 * C), lambda b: (0, 0)),             # Wqkv^T
            pl.BlockSpec((1, 3 * C), lambda b: (0, 0)),             # b_qkv
            pl.BlockSpec((num_heads, N, N), lambda b: (0, 0, 0)),   # rel bias
            pl.BlockSpec((nW, N, N), lambda b: (0, 0, 0)),          # mask
            pl.BlockSpec((C, C), lambda b: (0, 0)),                 # Wproj^T
            pl.BlockSpec((1, C), lambda b: (0, 0)),                 # b_proj
        ],
        out_specs=pl.BlockSpec((TB, N, C), lambda b: (b, 0, 0)),
        compiler_params=pltpu.CompilerParams(
            # embarrassingly parallel over batch tiles -> shard across TCs
            dimension_semantics=("parallel",),
            # raise above the 16/32 MiB scoped default; stays within v7x's
            # 64 MiB physical VMEM with headroom.
            vmem_limit_bytes=48 * 1024 * 1024,
        ),
    )(x, wqkv_t, bqkv2, rel_bias, mask_arr, wproj_t, bproj2)

    # TODO(synk): attn_drop / proj_drop are identity (p=0.0 default); stochastic
    # dropout is not implemented in the kernel.
    return out


# --------------------- pure-JAX reference (PyTorch semantics) ----------------

def window_attention_ref(x, wqkv, bqkv, wproj, bproj,
                         bias_table, rel_index, num_heads,
                         mask=None, qk_scale=None):
    p = jax.lax.Precision.HIGHEST
    B_, N, C = x.shape
    hd = C // num_heads
    scale = qk_scale if qk_scale is not None else hd ** (-0.5)

    qkv = jnp.einsum('bnc,dc->bnd', x, wqkv, precision=p) + bqkv    # (B_,N,3C)
    qkv = qkv.reshape(B_, N, 3, num_heads, hd).transpose(2, 0, 3, 1, 4)
    q, k, v = qkv[0] * scale, qkv[1], qkv[2]                        # (B_,nH,N,hd)

    attn = jnp.einsum('bhqd,bhkd->bhqk', q, k, precision=p)
    rel_bias = bias_table[rel_index.reshape(-1)].reshape(N, N, num_heads)
    rel_bias = jnp.transpose(rel_bias, (2, 0, 1))
    attn = attn + rel_bias[None]
    if mask is not None:
        nW = mask.shape[0]
        attn = attn.reshape(B_ // nW, nW, num_heads, N, N) + mask[None, :, None]
        attn = attn.reshape(B_, num_heads, N, N)
    attn = jax.nn.softmax(attn, axis=-1)

    out = jnp.einsum('bhqk,bhkd->bhqd', attn, v, precision=p)
    out = out.transpose(0, 2, 1, 3).reshape(B_, N, C)
    return jnp.einsum('bnc,dc->bnd', out, wproj, precision=p) + bproj


# ------------------------------- demo ----------------------------------------

if __name__ == "__main__":
    # small shapes implied by the module: window 8x8 -> N=64 tokens, dim=32,
    # 4 heads, 4 windows per image, batch 2 -> B_ = 8
    Wh, Ww = 8, 8
    N = Wh * Ww
    C = 32
    num_heads = 4
    nW = 4
    B = 2
    B_ = B * nW

    key = jax.random.PRNGKey(0)
    k1, k2, k3, k4, k5, k6 = jax.random.split(key, 6)
    wqkv = jax.random.normal(k1, (3 * C, C), jnp.float32) * (C ** -0.5)
    bqkv = jax.random.normal(k2, (3 * C,), jnp.float32) * 0.02
    wproj = jax.random.normal(k3, (C, C), jnp.float32) * (C ** -0.5)
    bproj = jax.random.normal(k4, (C,), jnp.float32) * 0.02
    bias_table = jax.random.normal(
        k5, ((2 * Wh - 1) * (2 * Ww - 1), num_heads), jnp.float32) * 0.02
    x = jax.random.normal(k6, (B_, N, C), jnp.float32)

    rel_index = relative_position_index(Wh, Ww)

    # Swin-style (0 / -100) mask, different per window, deterministic.
    q_blk = jnp.arange(N) // (N // 2)
    base = jnp.where(q_blk[:, None] == q_blk[None, :], 0.0, -100.0)
    mask = jnp.stack([base * float(w % 2) for w in range(nW)])      # (nW, N, N)

    # masked path
    out_m = jax.block_until_ready(
        window_attention_forward(x, wqkv, bqkv, wproj, bproj,
                                 bias_table, rel_index, num_heads, mask=mask))
    ref_m = jax.block_until_ready(
        window_attention_ref(x, wqkv, bqkv, wproj, bproj,
                             bias_table, rel_index, num_heads, mask=mask))
    # unmasked path
    out_n = jax.block_until_ready(
        window_attention_forward(x, wqkv, bqkv, wproj, bproj,
                                 bias_table, rel_index, num_heads, mask=None))
    ref_n = jax.block_until_ready(
        window_attention_ref(x, wqkv, bqkv, wproj, bproj,
                             bias_table, rel_index, num_heads, mask=None))

    assert out_m.shape == (B_, N, C) and out_m.dtype == jnp.float32
    if not jnp.allclose(out_m, ref_m, atol=2e-3, rtol=2e-3):
        raise AssertionError(
            f"masked path mismatch, max abs diff = {jnp.abs(out_m - ref_m).max()}")
    if not jnp.allclose(out_n, ref_n, atol=2e-3, rtol=2e-3):
        raise AssertionError(
            f"unmasked path mismatch, max abs diff = {jnp.abs(out_n - ref_n).max()}")
    print("KERNEL_OK")
</pallas_src>

<mosaic_0001>
module attributes {stable_mosaic.version = 11 : i64} {
  func.func @_window_attention_kernel(%arg0: i32, %arg1: memref<4x64x32xf32, #tpu.memory_space<vmem>>, %arg2: memref<32x96xf32, #tpu.memory_space<vmem>>, %arg3: memref<1x96xf32, #tpu.memory_space<vmem>>, %arg4: memref<4x64x64xf32, #tpu.memory_space<vmem>>, %arg5: memref<4x64x64xf32, #tpu.memory_space<vmem>>, %arg6: memref<32x32xf32, #tpu.memory_space<vmem>>, %arg7: memref<1x32xf32, #tpu.memory_space<vmem>>, %arg8: memref<4x64x32xf32, #tpu.memory_space<vmem>>) attributes {dimension_semantics = [#tpu.dimension_semantics<parallel>], iteration_bounds = array<i64: 2>, scalar_prefetch = 0 : i64, scratch_operands = 0 : i64, tpu.core_type = #tpu.core_type<tc>, window_params = [{transform_indices = @transform_0, window_bounds = array<i64: 4, 64, 32>}, {pipeline_mode = #tpu.pipeline_mode<synchronous>, transform_indices = @transform_1, window_bounds = array<i64: 32, 96>}, {pipeline_mode = #tpu.pipeline_mode<synchronous>, transform_indices = @transform_2, window_bounds = array<i64: 1, 96>}, {pipeline_mode = #tpu.pipeline_mode<synchronous>, transform_indices = @transform_3, window_bounds = array<i64: 4, 64, 64>}, {pipeline_mode = #tpu.pipeline_mode<synchronous>, transform_indices = @transform_4, window_bounds = array<i64: 4, 64, 64>}, {pipeline_mode = #tpu.pipeline_mode<synchronous>, transform_indices = @transform_5, window_bounds = array<i64: 32, 32>}, {pipeline_mode = #tpu.pipeline_mode<synchronous>, transform_indices = @transform_6, window_bounds = array<i64: 1, 32>}, {transform_indices = @transform_7, window_bounds = array<i64: 4, 64, 32>}]} {
    %c0 = arith.constant 0 : index
    %c0_0 = arith.constant 0 : index
    %c0_1 = arith.constant 0 : index
    %0 = vector.load %arg1[%c0, %c0_0, %c0_1] : memref<4x64x32xf32, #tpu.memory_space<vmem>>, vector<4x64x32xf32>
    %1 = vector.shape_cast %0 : vector<4x64x32xf32> to vector<256x32xf32>
    %c0_2 = arith.constant 0 : index
    %c0_3 = arith.constant 0 : index
    %2 = vector.load %arg2[%c0_2, %c0_3] : memref<32x96xf32, #tpu.memory_space<vmem>>, vector<32x96xf32>
    %cst = arith.constant dense<0.000000e+00> : vector<256x96xf32>
    %3 = tpu.matmul %1, %2, %cst {dimension_numbers = #tpu.dot_dimension_numbers<[1], [0], [0], [1], [0, 0, 1, 1], [], []>} : vector<256x32xf32>, vector<32x96xf32>, vector<256x96xf32> -> vector<256x96xf32>
    %c0_4 = arith.constant 0 : index
    %c0_5 = arith.constant 0 : index
    %4 = vector.load %arg3[%c0_4, %c0_5] : memref<1x96xf32, #tpu.memory_space<vmem>>, vector<1x96xf32>
    %5 = vector.broadcast %4 : vector<1x96xf32> to vector<256x96xf32>
    %6 = arith.addf %3, %5 : vector<256x96xf32>
    %7 = vector.shape_cast %6 : vector<256x96xf32> to vector<4x64x96xf32>
    %c0_6 = arith.constant 0 : index
    %c0_7 = arith.constant 0 : index
    %c0_8 = arith.constant 0 : index
    %8 = vector.load %arg5[%c0_6, %c0_7, %c0_8] : memref<4x64x64xf32, #tpu.memory_space<vmem>>, vector<4x64x64xf32>
    %9 = vector.extract_strided_slice %7 {offsets = [0, 0, 0], sizes = [4, 64, 8], strides = [1, 1, 1]} : vector<4x64x96xf32> to vector<4x64x8xf32>
    %cst_9 = arith.constant 0.353553385 : f32
    %10 = vector.broadcast %cst_9 : f32 to vector<4x64x8xf32>
    %11 = arith.mulf %9, %10 : vector<4x64x8xf32>
    %12 = vector.extract_strided_slice %7 {offsets = [0, 0, 32], sizes = [4, 64, 8], strides = [1, 1, 1]} : vector<4x64x96xf32> to vector<4x64x8xf32>
    %13 = vector.extract_strided_slice %7 {offsets = [0, 0, 64], sizes = [4, 64, 8], strides = [1, 1, 1]} : vector<4x64x96xf32> to vector<4x64x8xf32>
    "tpu.trace_start"() <{level = 10 : i32, message = "bqd,bkd->bqk"}> : () -> ()
    %cst_10 = arith.constant dense<0.000000e+00> : vector<4x64x64xf32>
    %14 = tpu.matmul %11, %12, %cst_10 {dimension_numbers = #tpu.dot_dimension_numbers<[2], [2], [1], [1], [0, 0, 0, 1, 1, 1], [0], [0]>} : vector<4x64x8xf32>, vector<4x64x8xf32>, vector<4x64x64xf32> -> vector<4x64x64xf32>
    "tpu.trace_stop"() : () -> ()
    %c0_11 = arith.constant 0 : index
    %c0_12 = arith.constant 0 : index
    %c0_13 = arith.constant 0 : index
    %15 = vector.load %arg4[%c0_11, %c0_12, %c0_13] : memref<4x64x64xf32, #tpu.memory_space<vmem>>, vector<1x64x64xf32>
    %16 = vector.shape_cast %15 : vector<1x64x64xf32> to vector<64x64xf32>
    %17 = vector.shape_cast %16 : vector<64x64xf32> to vector<1x64x64xf32>
    %18 = vector.broadcast %17 : vector<1x64x64xf32> to vector<4x64x64xf32>
    %19 = arith.addf %14, %18 : vector<4x64x64xf32>
    %20 = vector.shape_cast %19 : vector<4x64x64xf32> to vector<1x4x64x64xf32>
    %21 = vector.shape_cast %8 : vector<4x64x64xf32> to vector<1x4x64x64xf32>
    %22 = arith.addf %20, %21 : vector<1x4x64x64xf32>
    %23 = vector.shape_cast %22 : vector<1x4x64x64xf32> to vector<4x64x64xf32>
    %cst_14 = arith.constant dense<0xFF800000> : vector<4x64xf32>
    %24 = vector.multi_reduction <maximumf>, %23, %cst_14 [2] : vector<4x64x64xf32> to vector<4x64xf32>
    %25 = vector.shape_cast %24 : vector<4x64xf32> to vector<4x64x1xf32>
    %26 = vector.broadcast %25 : vector<4x64x1xf32> to vector<4x64x64xf32>
    %27 = arith.subf %23, %26 : vector<4x64x64xf32>
    %28 = math.exp %27 : vector<4x64x64xf32>
    %cst_15 = arith.constant dense<0.000000e+00> : vector<4x64xf32>
    %29 = vector.multi_reduction <add>, %28, %cst_15 [2] : vector<4x64x64xf32> to vector<4x64xf32>
    %30 = vector.shape_cast %29 : vector<4x64xf32> to vector<4x64x1xf32>
    %31 = vector.broadcast %30 : vector<4x64x1xf32> to vector<4x64x64xf32>
    %32 = arith.divf %28, %31 : vector<4x64x64xf32>
    "tpu.trace_start"() <{level = 10 : i32, message = "bqk,bkd->bqd"}> : () -> ()
    %cst_16 = arith.constant dense<0.000000e+00> : vector<4x64x8xf32>
    %33 = tpu.matmul %32, %13, %cst_16 {dimension_numbers = #tpu.dot_dimension_numbers<[2], [1], [1], [2], [0, 0, 0, 1, 1, 2], [0], [0]>} : vector<4x64x64xf32>, vector<4x64x8xf32>, vector<4x64x8xf32> -> vector<4x64x8xf32>
    "tpu.trace_stop"() : () -> ()
    %34 = vector.extract_strided_slice %7 {offsets = [0, 0, 8], sizes = [4, 64, 8], strides = [1, 1, 1]} : vector<4x64x96xf32> to vector<4x64x8xf32>
    %cst_17 = arith.constant 0.353553385 : f32
    %35 = vector.broadcast %cst_17 : f32 to vector<4x64x8xf32>
    %36 = arith.mulf %34, %35 : vector<4x64x8xf32>
    %37 = vector.extract_strided_slice %7 {offsets = [0, 0, 40], sizes = [4, 64, 8], strides = [1, 1, 1]} : vector<4x64x96xf32> to vector<4x64x8xf32>
    %38 = vector.extract_strided_slice %7 {offsets = [0, 0, 72], sizes = [4, 64, 8], strides = [1, 1, 1]} : vector<4x64x96xf32> to vector<4x64x8xf32>
    "tpu.trace_start"() <{level = 10 : i32, message = "bqd,bkd->bqk"}> : () -> ()
    %cst_18 = arith.constant dense<0.000000e+00> : vector<4x64x64xf32>
    %39 = tpu.matmul %36, %37, %cst_18 {dimension_numbers = #tpu.dot_dimension_numbers<[2], [2], [1], [1], [0, 0, 0, 1, 1, 1], [0], [0]>} : vector<4x64x8xf32>, vector<4x64x8xf32>, vector<4x64x64xf32> -> vector<4x64x64xf32>
    "tpu.trace_stop"() : () -> ()
    %c1 = arith.constant 1 : index
    %c0_19 = arith.constant 0 : index
    %c0_20 = arith.constant 0 : index
    %40 = vector.load %arg4[%c1, %c0_19, %c0_20] : memref<4x64x64xf32, #tpu.memory_space<vmem>>, vector<1x64x64xf32>
    %41 = vector.shape_cast %40 : vector<1x64x64xf32> to vector<64x64xf32>
    %42 = vector.shape_cast %41 : vector<64x64xf32> to vector<1x64x64xf32>
    %43 = vector.broadcast %42 : vector<1x64x64xf32> to vector<4x64x64xf32>
    %44 = arith.addf %39, %43 : vector<4x64x64xf32>
    %45 = vector.shape_cast %44 : vector<4x64x64xf32> to vector<1x4x64x64xf32>
    %46 = vector.shape_cast %8 : vector<4x64x64xf32> to vector<1x4x64x64xf32>
    %47 = arith.addf %45, %46 : vector<1x4x64x64xf32>
    %48 = vector.shape_cast %47 : vector<1x4x64x64xf32> to vector<4x64x64xf32>
    %cst_21 = arith.constant dense<0xFF800000> : vector<4x64xf32>
    %49 = vector.multi_reduction <maximumf>, %48, %cst_21 [2] : vector<4x64x64xf32> to vector<4x64xf32>
    %50 = vector.shape_cast %49 : vector<4x64xf32> to vector<4x64x1xf32>
    %51 = vector.broadcast %50 : vector<4x64x1xf32> to vector<4x64x64xf32>
    %52 = arith.subf %48, %51 : vector<4x64x64xf32>
    %53 = math.exp %52 : vector<4x64x64xf32>
    %cst_22 = arith.constant dense<0.000000e+00> : vector<4x64xf32>
    %54 = vector.multi_reduction <add>, %53, %cst_22 [2] : vector<4x64x64xf32> to vector<4x64xf32>
    %55 = vector.shape_cast %54 : vector<4x64xf32> to vector<4x64x1xf32>
    %56 = vector.broadcast %55 : vector<4x64x1xf32> to vector<4x64x64xf32>
    %57 = arith.divf %53, %56 : vector<4x64x64xf32>
    "tpu.trace_start"() <{level = 10 : i32, message = "bqk,bkd->bqd"}> : () -> ()
    %cst_23 = arith.constant dense<0.000000e+00> : vector<4x64x8xf32>
    %58 = tpu.matmul %57, %38, %cst_23 {dimension_numbers = #tpu.dot_dimension_numbers<[2], [1], [1], [2], [0, 0, 0, 1, 1, 2], [0], [0]>} : vector<4x64x64xf32>, vector<4x64x8xf32>, vector<4x64x8xf32> -> vector<4x64x8xf32>
    "tpu.trace_stop"() : () -> ()
    %59 = vector.extract_strided_slice %7 {offsets = [0, 0, 16], sizes = [4, 64, 8], strides = [1, 1, 1]} : vector<4x64x96xf32> to vector<4x64x8xf32>
    %cst_24 = arith.constant 0.353553385 : f32
    %60 = vector.broadcast %cst_24 : f32 to vector<4x64x8xf32>
    %61 = arith.mulf %59, %60 : vector<4x64x8xf32>
    %62 = vector.extract_strided_slice %7 {offsets = [0, 0, 48], sizes = [4, 64, 8], strides = [1, 1, 1]} : vector<4x64x96xf32> to vector<4x64x8xf32>
    %63 = vector.extract_strided_slice %7 {offsets = [0, 0, 80], sizes = [4, 64, 8], strides = [1, 1, 1]} : vector<4x64x96xf32> to vector<4x64x8xf32>
    "tpu.trace_start"() <{level = 10 : i32, message = "bqd,bkd->bqk"}> : () -> ()
    %cst_25 = arith.constant dense<0.000000e+00> : vector<4x64x64xf32>
    %64 = tpu.matmul %61, %62, %cst_25 {dimension_numbers = #tpu.dot_dimension_numbers<[2], [2], [1], [1], [0, 0, 0, 1, 1, 1], [0], [0]>} : vector<4x64x8xf32>, vector<4x64x8xf32>, vector<4x64x64xf32> -> vector<4x64x64xf32>
    "tpu.trace_stop"() : () -> ()
    %c2 = arith.constant 2 : index
    %c0_26 = arith.constant 0 : index
    %c0_27 = arith.constant 0 : index
    %65 = vector.load %arg4[%c2, %c0_26, %c0_27] : memref<4x64x64xf32, #tpu.memory_space<vmem>>, vector<1x64x64xf32>
    %66 = vector.shape_cast %65 : vector<1x64x64xf32> to vector<64x64xf32>
    %67 = vector.shape_cast %66 : vector<64x64xf32> to vector<1x64x64xf32>
    %68 = vector.broadcast %67 : vector<1x64x64xf32> to vector<4x64x64xf32>
    %69 = arith.addf %64, %68 : vector<4x64x64xf32>
    %70 = vector.shape_cast %69 : vector<4x64x64xf32> to vector<1x4x64x64xf32>
    %71 = vector.shape_cast %8 : vector<4x64x64xf32> to vector<1x4x64x64xf32>
    %72 = arith.addf %70, %71 : vector<1x4x64x64xf32>
    %73 = vector.shape_cast %72 : vector<1x4x64x64xf32> to vector<4x64x64xf32>
    %cst_28 = arith.constant dense<0xFF800000> : vector<4x64xf32>
    %74 = vector.multi_reduction <maximumf>, %73, %cst_28 [2] : vector<4x64x64xf32> to vector<4x64xf32>
    %75 = vector.shape_cast %74 : vector<4x64xf32> to vector<4x64x1xf32>
    %76 = vector.broadcast %75 : vector<4x64x1xf32> to vector<4x64x64xf32>
    %77 = arith.subf %73, %76 : vector<4x64x64xf32>
    %78 = math.exp %77 : vector<4x64x64xf32>
    %cst_29 = arith.constant dense<0.000000e+00> : vector<4x64xf32>
    %79 = vector.multi_reduction <add>, %78, %cst_29 [2] : vector<4x64x64xf32> to vector<4x64xf32>
    %80 = vector.shape_cast %79 : vector<4x64xf32> to vector<4x64x1xf32>
    %81 = vector.broadcast %80 : vector<4x64x1xf32> to vector<4x64x64xf32>
    %82 = arith.divf %78, %81 : vector<4x64x64xf32>
    "tpu.trace_start"() <{level = 10 : i32, message = "bqk,bkd->bqd"}> : () -> ()
    %cst_30 = arith.constant dense<0.000000e+00> : vector<4x64x8xf32>
    %83 = tpu.matmul %82, %63, %cst_30 {dimension_numbers = #tpu.dot_dimension_numbers<[2], [1], [1], [2], [0, 0, 0, 1, 1, 2], [0], [0]>} : vector<4x64x64xf32>, vector<4x64x8xf32>, vector<4x64x8xf32> -> vector<4x64x8xf32>
    "tpu.trace_stop"() : () -> ()
    %84 = vector.extract_strided_slice %7 {offsets = [0, 0, 24], sizes = [4, 64, 8], strides = [1, 1, 1]} : vector<4x64x96xf32> to vector<4x64x8xf32>
    %cst_31 = arith.constant 0.353553385 : f32
    %85 = vector.broadcast %cst_31 : f32 to vector<4x64x8xf32>
    %86 = arith.mulf %84, %85 : vector<4x64x8xf32>
    %87 = vector.extract_strided_slice %7 {offsets = [0, 0, 56], sizes = [4, 64, 8], strides = [1, 1, 1]} : vector<4x64x96xf32> to vector<4x64x8xf32>
    %88 = vector.extract_strided_slice %7 {offsets = [0, 0, 88], sizes = [4, 64, 8], strides = [1, 1, 1]} : vector<4x64x96xf32> to vector<4x64x8xf32>
    "tpu.trace_start"() <{level = 10 : i32, message = "bqd,bkd->bqk"}> : () -> ()
    %cst_32 = arith.constant dense<0.000000e+00> : vector<4x64x64xf32>
    %89 = tpu.matmul %86, %87, %cst_32 {dimension_numbers = #tpu.dot_dimension_numbers<[2], [2], [1], [1], [0, 0, 0, 1, 1, 1], [0], [0]>} : vector<4x64x8xf32>, vector<4x64x8xf32>, vector<4x64x64xf32> -> vector<4x64x64xf32>
    "tpu.trace_stop"() : () -> ()
    %c3 = arith.constant 3 : index
    %c0_33 = arith.constant 0 : index
    %c0_34 = arith.constant 0 : index
    %90 = vector.load %arg4[%c3, %c0_33, %c0_34] : memref<4x64x64xf32, #tpu.memory_space<vmem>>, vector<1x64x64xf32>
    %91 = vector.shape_cast %90 : vector<1x64x64xf32> to vector<64x64xf32>
    %92 = vector.shape_cast %91 : vector<64x64xf32> to vector<1x64x64xf32>
    %93 = vector.broadcast %92 : vector<1x64x64xf32> to vector<4x64x64xf32>
    %94 = arith.addf %89, %93 : vector<4x64x64xf32>
    %95 = vector.shape_cast %94 : vector<4x64x64xf32> to vector<1x4x64x64xf32>
    %96 = vector.shape_cast %8 : vector<4x64x64xf32> to vector<1x4x64x64xf32>
    %97 = arith.addf %95, %96 : vector<1x4x64x64xf32>
    %98 = vector.shape_cast %97 : vector<1x4x64x64xf32> to vector<4x64x64xf32>
    %cst_35 = arith.constant dense<0xFF800000> : vector<4x64xf32>
    %99 = vector.multi_reduction <maximumf>, %98, %cst_35 [2] : vector<4x64x64xf32> to vector<4x64xf32>
    %100 = vector.shape_cast %99 : vector<4x64xf32> to vector<4x64x1xf32>
    %101 = vector.broadcast %100 : vector<4x64x1xf32> to vector<4x64x64xf32>
    %102 = arith.subf %98, %101 : vector<4x64x64xf32>
    %103 = math.exp %102 : vector<4x64x64xf32>
    %cst_36 = arith.constant dense<0.000000e+00> : vector<4x64xf32>
    %104 = vector.multi_reduction <add>, %103, %cst_36 [2] : vector<4x64x64xf32> to vector<4x64xf32>
    %105 = vector.shape_cast %104 : vector<4x64xf32> to vector<4x64x1xf32>
    %106 = vector.broadcast %105 : vector<4x64x1xf32> to vector<4x64x64xf32>
    %107 = arith.divf %103, %106 : vector<4x64x64xf32>
    "tpu.trace_start"() <{level = 10 : i32, message = "bqk,bkd->bqd"}> : () -> ()
    %cst_37 = arith.constant dense<0.000000e+00> : vector<4x64x8xf32>
    %108 = tpu.matmul %107, %88, %cst_37 {dimension_numbers = #tpu.dot_dimension_numbers<[2], [1], [1], [2], [0, 0, 0, 1, 1, 2], [0], [0]>} : vector<4x64x64xf32>, vector<4x64x8xf32>, vector<4x64x8xf32> -> vector<4x64x8xf32>
    "tpu.trace_stop"() : () -> ()
    %109 = tpu.concatenate %33, %58, %83, %108 in 2 : vector<4x64x8xf32>, vector<4x64x8xf32>, vector<4x64x8xf32>, vector<4x64x8xf32> -> vector<4x64x32xf32>
    %110 = vector.shape_cast %109 : vector<4x64x32xf32> to vector<256x32xf32>
    %c0_38 = arith.constant 0 : index
    %c0_39 = arith.constant 0 : index
    %111 = vector.load %arg6[%c0_38, %c0_39] : memref<32x32xf32, #tpu.memory_space<vmem>>, vector<32x32xf32>
    %cst_40 = arith.constant dense<0.000000e+00> : vector<256x32xf32>
    %112 = tpu.matmul %110, %111, %cst_40 {dimension_numbers = #tpu.dot_dimension_numbers<[1], [0], [0], [1], [0, 0, 1, 1], [], []>} : vector<256x32xf32>, vector<32x32xf32>, vector<256x32xf32> -> vector<256x32xf32>
    %c0_41 = arith.constant 0 : index
    %c0_42 = arith.constant 0 : index
    %113 = vector.load %arg7[%c0_41, %c0_42] : memref<1x32xf32, #tpu.memory_space<vmem>>, vector<1x32xf32>
    %114 = vector.broadcast %113 : vector<1x32xf32> to vector<256x32xf32>
    %115 = arith.addf %112, %114 : vector<256x32xf32>
    %116 = vector.shape_cast %115 : vector<256x32xf32> to vector<4x64x32xf32>
    %c0_43 = arith.constant 0 : index
    %c0_44 = arith.constant 0 : index
    %c0_45 = arith.constant 0 : index
    %117 = vector.load %arg8[%c0_43, %c0_44, %c0_45] : memref<4x64x32xf32, #tpu.memory_space<vmem>>, vector<4x64x32xf32>
    tpu.vector_store %arg8[%c0_43, %c0_44, %c0_45], %116 {strides = array<i32>} : memref<4x64x32xf32, #tpu.memory_space<vmem>>, vector<4x64x32xf32>,
    return
  }
  func.func @transform_0(%arg0: i32) -> (i32, i32, i32) {
    %c0_i32 = arith.constant 0 : i32
    %c0_i32_0 = arith.constant 0 : i32
    %c0_i32_1 = arith.constant 0 : i32
    return %arg0, %c0_i32, %c0_i32_0 : i32, i32, i32
  }
  func.func @transform_1(%arg0: i32) -> (i32, i32) {
    %c0_i32 = arith.constant 0 : i32
    %c0_i32_0 = arith.constant 0 : i32
    %c0_i32_1 = arith.constant 0 : i32
    return %c0_i32, %c0_i32_0 : i32, i32
  }
  func.func @transform_2(%arg0: i32) -> (i32, i32) {
    %c0_i32 = arith.constant 0 : i32
    %c0_i32_0 = arith.constant 0 : i32
    %c0_i32_1 = arith.constant 0 : i32
    return %c0_i32, %c0_i32_0 : i32, i32
  }
  func.func @transform_3(%arg0: i32) -> (i32, i32, i32) {
    %c0_i32 = arith.constant 0 : i32
    %c0_i32_0 = arith.constant 0 : i32
    %c0_i32_1 = arith.constant 0 : i32
    %c0_i32_2 = arith.constant 0 : i32
    return %c0_i32, %c0_i32_0, %c0_i32_1 : i32, i32, i32
  }
  func.func @transform_4(%arg0: i32) -> (i32, i32, i32) {
    %c0_i32 = arith.constant 0 : i32
    %c0_i32_0 = arith.constant 0 : i32
    %c0_i32_1 = arith.constant 0 : i32
    %c0_i32_2 = arith.constant 0 : i32
    return %c0_i32, %c0_i32_0, %c0_i32_1 : i32, i32, i32
  }
  func.func @transform_5(%arg0: i32) -> (i32, i32) {
    %c0_i32 = arith.constant 0 : i32
    %c0_i32_0 = arith.constant 0 : i32
    %c0_i32_1 = arith.constant 0 : i32
    return %c0_i32, %c0_i32_0 : i32, i32
  }
  func.func @transform_6(%arg0: i32) -> (i32, i32) {
    %c0_i32 = arith.constant 0 : i32
    %c0_i32_0 = arith.constant 0 : i32
    %c0_i32_1 = arith.constant 0 : i32
    return %c0_i32, %c0_i32_0 : i32, i32
  }
  func.func @transform_7(%arg0: i32) -> (i32, i32, i32) {
    %c0_i32 = arith.constant 0 : i32
    %c0_i32_0 = arith.constant 0 : i32
    %c0_i32_1 = arith.constant 0 : i32
    return %arg0, %c0_i32, %c0_i32_0 : i32, i32, i32
  }
}

</mosaic_0001>

<bundles_post_ra>
// kernel: tpu_custom_call.1
= control target key start
LH: loop header
LB: loop body
LE: loop exit
PB: predicated region body
PF: predicated region fallthrough
CT: control target
= control target key end

     0   :  { %s9252_s24 = smov 0   ;;  %s16361_s0 = inlined_call_operand.vmem [shape: f32[8,64,32], index: 0, kind: input, shape index: {}]   ;;  %s16362_s1 = inlined_call_operand.vmem [shape: f32[32,96], index: 1, kind: input, shape index: {}]   ;;  %s16363_s2 = inlined_call_operand.vmem [shape: f32[1,96], index: 2, kind: input, shape index: {}]   ;;  %s16364_s3 = inlined_call_operand.vmem [shape: f32[4,64,64], index: 3, kind: input, shape index: {}]   ;;  %s16365_s4 = inlined_call_operand.vmem [shape: f32[4,64,64], index: 4, kind: input, shape index: {}]   ;;  %s16366_s5 = inlined_call_operand.vmem [shape: f32[32,32], index: 5, kind: input, shape index: {}]   ;;  %s16367_s6 = inlined_call_operand.vmem [shape: f32[1,32], index: 6, kind: input, shape index: {}]   ;;  %s16368_s7 = inlined_call_operand.vmem [shape: f32[8,64,32], index: 7, kind: output, shape index: {}]  }
   0x1 LB: > { %s7731_s25 = sadd.s32 4294967295, %s9196_s24   ;;  %p7735_p0 = scmp.ge.s32.totalorder %s9196_s24, 1  ;;  %s9196_s24 = sphi %s9252_s24, %s17_s24  }
   0x2   : > { %p239_p1 = scmp.lt.s32.totalorder %s9196_s24, 3 }
   0x4   : > { %p240_p2 = pnand %p7735_p0, %p239_p1 }
   0x6   : > { %243 = sbr.rel (%p240_p2) target bundleno = 3956 (0xf74), region = 48 }
   0xb   : > { %v322_v0 = vld [vmem:[%s16362_s1 + $0x18] sm:$0xff]  ;;  %v321_v1 = vld [vmem:[%s16362_s1 + $0x10] sm:$0xff]  ;;  %s7736_s30 = sshll.u32 %s7731_s25, 2  ;;  %v320_v2 = vld [vmem:[%s16362_s1 + $0x8] sm:$0xff]  ;;  %vm16598_vm0 = vcmask 261120   ;;  %s9198_s18 = smov 96  }
   0xc   : > { %436 = vmatpush.msra.mxu0 %v322_v0  ;;  %8218 = vmatpush.msra.mxu1 %v322_v0  ;;  %p274_p3 = scmp.lt.s32.totalorder %s7736_s30, 7  ;;  %v319_v3 = vld [vmem:[%s16362_s1] sm:$0xff]  ;;  %s9199_s19 = smov 120   ;;  %vm633_vm1 = vcmask 64512   ;;  %vm1062_vm2 = vcmask 523264  }
   0xd   : > { %8219 = vmatpush.msra.mxu2 %v322_v0  ;;  %8220 = vmatpush.msra.mxu3 %v322_v0  ;;  %v9345_v34 = vld [vmem:[%s16363_s2] ss:$0 sm:$0xff]  ;;  %s9200_s20 = smov 88   ;;  %s9201_s21 = smov 64  }
   0xe   : > { %437 = vmatpush.msra.mxu0 %v321_v1  ;;  %8221 = vmatpush.msra.mxu1 %v321_v1  ;;  %s17654_s30 = smov (!%p274_p3, %s7736_s30), 7  ;;  %s9202_s22 = smov 56  }
   0xf   : > { %8222 = vmatpush.msra.mxu2 %v321_v1  ;;  %8223 = vmatpush.msra.mxu3 %v321_v1  ;;  %s8216_s12 = sshll.u32 %s17654_s30, 6  ;;  %s9203_s23 = smov 112  }
  0x10   : > { %438 = vmatpush.msra.mxu0 %v320_v2  ;;  %8224 = vmatpush.msra.mxu1 %v320_v2  ;;  %s9280_s15 = scalar_lea.vmem %s16361_s0, %s8216_s12  ;;  %s9204_s25 = smov 80  }
  0x11   : > { %8225 = vmatpush.msra.mxu2 %v320_v2  ;;  %8226 = vmatpush.msra.mxu3 %v320_v2  ;;  %v287_v4 = vld [vmem:[%s9280_s15] sm:$0xff]  ;;  %v297_v5 = vld [vmem:[%s9280_s15 + $0x50] sm:$0xff]  ;;  %v306_v6 = vld [vmem:[%s9280_s15 + $0x98] sm:$0xff]  ;;  %s9205_s13 = smov 48   ;;  %s9206_s14 = smov 72  }
  0x12   : > { %439 = vmatpush.msra.mxu0 %v319_v3  ;;  %8227 = vmatpush.msra.mxu1 %v319_v3  ;;  %v314_v7 = vld [vmem:[%s9280_s15 + $0xd8] sm:$0xff]  ;;  %v288_v8 = vld [vmem:[%s9280_s15 + $0x8] sm:$0xff]  ;;  %v307_v10 = vld [vmem:[%s9280_s15 + $0xa0] sm:$0xff]  ;;  %s9208_s26 = smov 40   ;;  %s9209_s29 = smov 8  }
  0x13   : > { %8228 = vmatpush.msra.mxu2 %v319_v3  ;;  %7742 = vmatmul.msk.f32.vlgmr.msra.gmra.mxu0 %vm16598_vm0, %v287_v4  ;;  %v298_v9 = vld [vmem:[%s9280_s15 + $0x58] sm:$0xff]  ;;  %v315_v11 = vld [vmem:[%s9280_s15 + $0xe0] sm:$0xff]  ;;  %v289_v12 = vld [vmem:[%s9280_s15 + $0x10] sm:$0xff]  ;;  %s9210_s8 = smov 16  }
  0x14   : > { %7752 = vmatmul.msk.f32.vlgmr.msra.gmra.mxu1 %vm16598_vm0, %v297_v5  ;;  %7761 = vmatmul.msk.f32.vlgmr.msra.gmra.mxu2 %vm16598_vm0, %v306_v6  ;;  %v299_v13 = vld [vmem:[%s9280_s15 + $0x60] sm:$0xff]  ;;  %v308_v14 = vld [vmem:[%s9280_s15 + $0xa8] sm:$0xff]  ;;  %v290_v16 = vld [vmem:[%s9280_s15 + $0x18] sm:$0xff] }
  0x15   : > { %8229 = vmatpush.msra.mxu3 %v319_v3  ;;  %v316_v15 = vld [vmem:[%s9280_s15 + $0xe8] sm:$0xff]  ;;  %v309_v18 = vld [vmem:[%s9280_s15 + $0xb0] sm:$0xff]  ;;  %v310_v20 = vld [vmem:[%s9280_s15 + $0xb8] sm:$0xff] }
  0x16   : > { %7769 = vmatmul.msk.f32.vlgmr.msra.gmra.mxu3 %vm16598_vm0, %v314_v7  ;;  %v300_v17 = vld [vmem:[%s9280_s15 + $0x68] sm:$0xff]  ;;  %v301_v19 = vld [vmem:[%s9280_s15 + $0x70] sm:$0xff]  ;;  %v291_v22 = vld [vmem:[%s9280_s15 + $0x20] sm:$0xff] }
  0x17   : > { %v317_v21 = vld [vmem:[%s9280_s15 + $0xf0] sm:$0xff]  ;;  %v302_v23 = vld [vmem:[%s9280_s15 + $0x78] sm:$0xff]  ;;  %v311_v24 = vld [vmem:[%s9280_s15 + $0xc0] sm:$0xff] }
  0x18   : > { %v318_v25 = vld [vmem:[%s9280_s15 + $0xf8] sm:$0xff]  ;;  %v292_v26 = vld [vmem:[%s9280_s15 + $0x28] sm:$0xff]  ;;  %v303_v27 = vld [vmem:[%s9280_s15 + $0x80] sm:$0xff] }
  0x19   : > { %v312_v28 = vld [vmem:[%s9280_s15 + $0xc8] sm:$0xff]  ;;  %v313_v30 = vld [vmem:[%s9280_s15 + $0xd0] sm:$0xff]  ;;  %v294_v33 = vld [vmem:[%s9280_s15 + $0x38] sm:$0xff] }
  0x1a   : > { %v304_v29 = vld [vmem:[%s9280_s15 + $0x88] sm:$0xff]  ;;  %v305_v31 = vld [vmem:[%s9280_s15 + $0x90] sm:$0xff]  ;;  %v295_v44 = vld [vmem:[%s9280_s15 + $0x40] sm:$0xff] }
  0x1b   : > { %7743 = vmatmul.msk.f32.gmra.mxu0 %vm16598_vm0, %v288_v8  ;;  %v293_v32 = vld [vmem:[%s9280_s15 + $0x30] sm:$0xff]  ;;  %v296_v50 = vld [vmem:[%s9280_s15 + $0x48] sm:$0xff]  ;;  %s9207_s15 = smov 104  }
  0x1c   : > { %7753 = vmatmul.msk.f32.gmra.mxu1 %vm16598_vm0, %v298_v9  ;;  %7762 = vmatmul.msk.f32.gmra.mxu2 %vm16598_vm0, %v307_v10 }
  0x1e   : > { %7770 = vmatmul.msk.f32.gmra.mxu3 %vm16598_vm0, %v315_v11 }
  0x23   : > { %7744 = vmatmul.msk.f32.gmra.mxu0 %vm16598_vm0, %v289_v12 }
  0x24   : > { %7754 = vmatmul.msk.f32.gmra.mxu1 %vm16598_vm0, %v299_v13  ;;  %7763 = vmatmul.msk.f32.gmra.mxu2 %vm16598_vm0, %v308_v14 }
  0x26   : > { %7771 = vmatmul.msk.f32.gmra.mxu3 %vm16598_vm0, %v316_v15 }
  0x2b   : > { %7745 = vmatmul.msk.f32.gmra.mxu0 %vm16598_vm0, %v290_v16 }
  0x2c   : > { %7755 = vmatmul.msk.f32.gmra.mxu1 %vm16598_vm0, %v300_v17  ;;  %7764 = vmatmul.msk.f32.gmra.mxu2 %vm16598_vm0, %v309_v18 }
  0x2e   : > { %7772 = vmatmul.msk.f32.gmra.mxu3 %vm16598_vm0, %v317_v21 }
  0x33   : > { %7746 = vmatmul.msk.f32.gmra.mxu0 %vm16598_vm0, %v291_v22 }
  0x34   : > { %7756 = vmatmul.msk.f32.gmra.mxu1 %vm16598_vm0, %v301_v19  ;;  %7765 = vmatmul.msk.f32.gmra.mxu2 %vm16598_vm0, %v310_v20 }
  0x36   : > { %7773 = vmatmul.msk.f32.gmra.mxu3 %vm16598_vm0, %v318_v25 }
  0x3b   : > { %7747 = vmatmul.msk.f32.gmra.mxu0 %vm16598_vm0, %v292_v26 }
  0x3c   : > { %7757 = vmatmul.msk.f32.gmra.mxu1 %vm16598_vm0, %v302_v23  ;;  %7766 = vmatmul.msk.f32.gmra.mxu2 %vm16598_vm0, %v311_v24 }
  0x43   : > { %7748 = vmatmul.msk.f32.gmra.mxu0 %vm16598_vm0, %v293_v32 }
  0x44   : > { %7758 = vmatmul.msk.f32.gmra.mxu1 %vm16598_vm0, %v303_v27  ;;  %7767 = vmatmul.msk.f32.gmra.mxu2 %vm16598_vm0, %v312_v28 }
  0x4b   : > { %7749 = vmatmul.msk.f32.gmra.mxu0 %vm16598_vm0, %v294_v33 }
  0x4c   : > { %7759 = vmatmul.msk.f32.gmra.mxu1 %vm16598_vm0, %v304_v29  ;;  %7768 = vmatmul.msk.f32.gmra.mxu2 %vm16598_vm0, %v313_v30 }
  0x53   : > { %7750 = vmatmul.msk.f32.gmra.mxu0 %vm16598_vm0, %v295_v44 }
  0x54   : > { %7760 = vmatmul.msk.f32.gmra.mxu1 %vm16598_vm0, %v305_v31 }
  0x5b   : > { %7751 = vmatmul.msk.f32.gmra.mxu0 %vm16598_vm0, %v296_v50 }
  0x90   : > { %v441_v35 = vpop.f32.mrf.mxu0 }
  0x91   : > { %v9348_v36 = vadd.f32 %v9345_v34, %v441_v35  ;;  %v471_v37 = vpop.f32.mrf.mxu1 }
  0x92   : > { %v9351_v38 = vadd.f32 %v9345_v34, %v471_v37 }
  0x93   : > { %16599 = vst [vmem:[#allocation2_spill] sm:$0xff] %v9348_v36  ;;  %617 = vrot.lane.b32.xlu0 %v9348_v36, %s9198_s18  ;;  %v9356_v39 = vmul.f32 0.35355338, %v9348_v36 }
  0x94   : > { %16600 = vst [vmem:[#allocation3_spill] sm:$0xff] %v9351_v38  ;;  %727 = vrot.lane.b32.xlu1 %v9351_v38, %s9198_s18  ;;  %v9368_v43 = vmul.f32 0.35355338, %v9351_v38 }
  0x95   : > { %16601 = vst [vmem:[#allocation4_spill] sm:$0xff] %v9356_v39  ;;  %2196 = vrot.lane.b32.xlu2 %v9356_v39, %s9199_s19 }
  0x96   : > { %16603 = vst [vmem:[#allocation6_spill] sm:$0xff] %v9368_v43 }
  0x97   : > { %v498_v40 = vpop.f32.mrf.mxu2 }
  0x98   : > { %v9363_v41 = vadd.f32 %v9345_v34, %v498_v40  ;;  %v444_v49 = vpop.f32.mrf.mxu0 }
  0x99   : > { %v474_v42 = vpop.f32.mrf.mxu1  ;;  %v522_v45 = vpop.f32.mrf.mxu3  ;;  %v9395_v51 = vadd.f32 %v9345_v34, %v444_v49 }
  0x9a   : > { %16602 = vst [vmem:[#allocation5_spill] sm:$0xff] %v9363_v41  ;;  %v9377_v46 = vadd.f32 %v9345_v34, %v474_v42  ;;  %v9380_v47 = vadd.f32 %v9345_v34, %v522_v45 }
  0x9b   : > { %2212 = vrot.lane.b32.xlu0 %v9348_v36, %s9200_s20  ;;  %16606 = vst [vmem:[#allocation9_spill] sm:$0xff] %v9395_v51  ;;  %v9398_v52 = vmul.f32 0.35355338, %v9395_v51  ;;  %v9404_v53 = vpack.i.bf16 %v9395_v51, %v9348_v36 }
  0x9c   : > { %834 = vrot.lane.b32.xlu1 %v9363_v41, %s9198_s18  ;;  %16604 = vst [vmem:[#allocation7_spill] sm:$0xff] %v9377_v46  ;;  %v9384_v48 = vpack.i.bf16 %v9377_v46, %v9351_v38  ;;  %v9414_v56 = vmul.f32 0.35355338, %v9377_v46 }
  0x9d   : > { %2305 = vrot.lane.b32.xlu2 %v9368_v43, %s9199_s19  ;;  %16605 = vst [vmem:[#allocation8_spill] sm:$0xff] %v9380_v47 }
  0x9e   : > { %16607 = vst [vmem:[#allocation10_spill] sm:$0xff] %v9398_v52 }
  0x9f   : > { %16609 = vst [vmem:[#allocation12_spill] sm:$0xff] %v9414_v56  ;;  %v501_v61 = vpop.f32.mrf.mxu2 }
  0xa0   : > { %v447_v57 = vpop.f32.mrf.mxu0  ;;  %v9432_v63 = vadd.f32 %v9345_v34, %v501_v61 }
  0xa1   : > { %v477_v54 = vpop.f32.mrf.mxu1  ;;  %v9419_v58 = vadd.f32 %v9345_v34, %v447_v57  ;;  %v525_v59 = vpop.f32.mrf.mxu3 }
  0xa2   : > { %v9411_v55 = vadd.f32 %v9345_v34, %v477_v54  ;;  %v9429_v62 = vadd.f32 %v9345_v34, %v525_v59  ;;  %16613 = vst [vmem:[#allocation16_spill] sm:$0xff] %v9432_v63 }
  0xa3   : > { %939 = vrot.lane.b32.xlu0 %v9380_v47, %s9198_s18  ;;  %16610 = vst [vmem:[#allocation13_spill] sm:$0xff] %v9419_v58  ;;  %v9426_v60 = vmul.f32 0.35355338, %v9419_v58 }
  0xa4   : > { %8266 = vrot.lane.b32.xlu1 %v9384_v48, %s9201_s21  ;;  %16608 = vst [vmem:[#allocation11_spill] sm:$0xff] %v9411_v55  ;;  %v9441_v1 = vmul.f32 0.35355338, %v9411_v55 }
  0xa5   : > { %729 = vrot.lane.b32.xlu2 %v9377_v46, %s9198_s18  ;;  %16611 = vst [vmem:[#allocation14_spill] sm:$0xff] %v9426_v60 }
  0xa6   : > { %16612 = vst [vmem:[#allocation15_spill] sm:$0xff] %v9429_v62 }
  0xa7   : > { %16614 = vst [vmem:[#allocation17_spill] sm:$0xff] %v9441_v1  ;;  %v504_v3 = vpop.f32.mrf.mxu2 }
  0xa8   : > { %v9453_v4 = vadd.f32 %v9345_v34, %v504_v3  ;;  %v450_v5 = vpop.f32.mrf.mxu0 }
  0xa9   : > { %v528_v0 = vpop.f32.mrf.mxu3  ;;  %v9464_v7 = vadd.f32 %v9345_v34, %v450_v5  ;;  %v480_v11 = vpop.f32.mrf.mxu1 }
  0xaa   : > { %v9444_v2 = vadd.f32 %v9345_v34, %v528_v0  ;;  %16616 = vst [vmem:[#allocation19_spill] sm:$0xff] %v9453_v4  ;;  %v9459_v6 = vpack.i.bf16 %v9453_v4, %v9432_v63  ;;  %v9484_v12 = vadd.f32 %v9345_v34, %v480_v11 }
  0xab   : > { %619 = vrot.lane.b32.xlu0 %v9395_v51, %s9198_s18  ;;  %16617 = vst [vmem:[#allocation20_spill] sm:$0xff] %v9464_v7  ;;  %v9470_v8 = vpack.i.bf16 %v9464_v7, %v9419_v58  ;;  %v9479_v10 = vmul.f32 0.35355338, %v9464_v7 }
  0xac   : > { %2198 = vrot.lane.b32.xlu1 %v9398_v52, %s9199_s19  ;;  %16615 = vst [vmem:[#allocation18_spill] sm:$0xff] %v9444_v2  ;;  %v9474_v9 = vpack.i.bf16 %v9444_v2, %v9429_v62  ;;  %v9490_v13 = vpack.i.bf16 %v9484_v12, %v9411_v55  ;;  %v9495_v14 = vmul.f32 0.35355338, %v9484_v12 }
  0xad   : > { %8261 = vrot.lane.b32.xlu2 %v9404_v53, %s9201_s21  ;;  %16619 = vst [vmem:[#allocation22_spill] sm:$0xff] %v9479_v10 }
  0xae   : > { %16618 = vst [vmem:[#allocation21_spill] sm:$0xff] %v9474_v9 }
  0xaf   : > { %16620 = vst [vmem:[#allocation23_spill] sm:$0xff] %v9484_v12  ;;  %v507_v18 = vpop.f32.mrf.mxu2 }
  0xb0   : > { %16621 = vst [vmem:[#allocation24_spill] sm:$0xff] %v9495_v14  ;;  %v453_v15 = vpop.f32.mrf.mxu0  ;;  %v9511_v19 = vadd.f32 %v9345_v34, %v507_v18 }
  0xb1   : > { %v531_v16 = vpop.f32.mrf.mxu3  ;;  %v9502_v17 = vadd.f32 %v9345_v34, %v453_v15  ;;  %v483_v20 = vpop.f32.mrf.mxu1 }
  0xb2   : > { %16623 = vst [vmem:[#allocation26_spill] sm:$0xff] %v9511_v19  ;;  %v9514_v21 = vadd.f32 %v9345_v34, %v483_v20  ;;  %v9517_v22 = vadd.f32 %v9345_v34, %v531_v16 }
  0xb3   : > { %731 = vrot.lane.b32.xlu0 %v9411_v55, %s9198_s18  ;;  %16622 = vst [vmem:[#allocation25_spill] sm:$0xff] %v9502_v17  ;;  %v9531_v26 = vmul.f32 0.35355338, %v9502_v17 }
  0xb4   : > { %2307 = vrot.lane.b32.xlu1 %v9414_v56, %s9199_s19  ;;  %16624 = vst [vmem:[#allocation27_spill] sm:$0xff] %v9514_v21  ;;  %v9549_v33 = vmul.f32 0.35355338, %v9514_v21 }
  0xb5   : > { %2214 = vrot.lane.b32.xlu2 %v9395_v51, %s9200_s20  ;;  %16625 = vst [vmem:[#allocation28_spill] sm:$0xff] %v9517_v22 }
  0xb6   : > { %16628 = vst [vmem:[#allocation31_spill] sm:$0xff] %v9531_v26 }
  0xb7   : > { %v510_v31 = vpop.f32.mrf.mxu2  ;;  %16632 = vst [vmem:[#allocation35_spill] sm:$0xff] %v9549_v33 }
  0xb8   : > { %v456_v32 = vpop.f32.mrf.mxu0  ;;  %v9552_v35 = vadd.f32 %v9345_v34, %v510_v31 }
  0xb9   : > { %v534_v23 = vpop.f32.mrf.mxu3  ;;  %v486_v29 = vpop.f32.mrf.mxu1  ;;  %v9559_v37 = vadd.f32 %v9345_v34, %v456_v32 }
  0xba   : > { %v9526_v24 = vadd.f32 %v9345_v34, %v534_v23  ;;  %v9546_v30 = vadd.f32 %v9345_v34, %v486_v29  ;;  %16633 = vst [vmem:[#allocation36_spill] sm:$0xff] %v9552_v35  ;;  %v9585_v54 = vpack.i.bf16 %v9552_v35, %v9511_v19 }
  0xbb   : > { %2200 = vrot.lane.b32.xlu0 %v9426_v60, %s9199_s19  ;;  %16634 = vst [vmem:[#allocation37_spill] sm:$0xff] %v9559_v37  ;;  %v9566_v42 = vmul.f32 0.35355338, %v9559_v37  ;;  %v9614_v20 = vpack.i.bf16 %v9559_v37, %v9502_v17  ;;  %v9835_v60 = vmul.f32 0.35355338, %v9552_v35 }
  0xbc   : > { %941 = vrot.lane.b32.xlu1 %v9429_v62, %s9198_s18  ;;  %16626 = vst [vmem:[#allocation29_spill] sm:$0xff] %v9526_v24  ;;  %v9535_v27 = vpack.i.bf16 %v9526_v24, %v9517_v22  ;;  %v9581_v50 = vmul.f32 0.35355338, %v9546_v30  ;;  %v9591_v59 = vpack.i.bf16 %v9546_v30, %v9514_v21 }
  0xbd   : > { %836 = vrot.lane.b32.xlu2 %v9432_v63, %s9198_s18  ;;  %16631 = vst [vmem:[#allocation34_spill] sm:$0xff] %v9546_v30 }
  0xbe   : > { %16629 = vst [vmem:[#allocation32_spill] sm:$0xff] %v9535_v27 }
  0xbf   : > { %16635 = vst [vmem:[#allocation38_spill] sm:$0xff] %v9566_v42  ;;  %v513_v61 = vpop.f32.mrf.mxu2 }
  0xc0   : > { %16636 = vst [vmem:[#allocation39_spill] sm:$0xff] %v9581_v50  ;;  %v459_v57 = vpop.f32.mrf.mxu0  ;;  %v9605_v15 = vadd.f32 %v9345_v34, %v513_v61 }
  0xc1   : > { %16637 = vst [vmem:[#allocation40_spill] sm:$0xff] %v9585_v54  ;;  %v9600_v3 = vadd.f32 %v9345_v34, %v459_v57  ;;  %v489_v5 = vpop.f32.mrf.mxu1 }
  0xc2   : > { %16640 = vst [vmem:[#allocation43_spill] sm:$0xff] %v9605_v15 }
  0xc3   : > { %2309 = vrot.lane.b32.xlu0 %v9441_v1, %s9199_s19  ;;  %16639 = vst [vmem:[#allocation42_spill] sm:$0xff] %v9600_v3  ;;  %v9610_v18 = vmul.f32 0.35355338, %v9600_v3 }
  0xc4   : > { %621 = vrot.lane.b32.xlu1 %v9419_v58, %s9198_s18  ;;  %16674 = vst [vmem:[#allocation77_spill] sm:$0xff] %v9835_v60 }
  0xc5   : > { %943 = vrot.lane.b32.xlu2 %v9444_v2, %s9198_s18  ;;  %16642 = vst [vmem:[#allocation45_spill] sm:$0xff] %v9610_v18 }
  0xc9   : > { %v492_v32 = vpop.f32.mrf.mxu1 }
  0xca   : > { %v9629_v57 = vadd.f32 %v9345_v34, %v492_v32  ;;  %v462_v32 = vpop.f32.mrf.mxu0 }
  0xcb   : > { %838 = vrot.lane.b32.xlu0 %v9453_v4, %s9198_s18 }
  0xcc   : > { %2216 = vrot.lane.b32.xlu1 %v9419_v58, %s9200_s20  ;;  %16643 = vst [vmem:[#allocation46_spill] sm:$0xff] %v9629_v57 }
  0xcd   : > { %8271 = vrot.lane.b32.xlu2 %v9459_v6, %s9201_s21 }
  0xd3   : > { %8281 = vrot.lane.b32.xlu0 %v9470_v8, %s9201_s21 }
  0xd4   : > { %8276 = vrot.lane.b32.xlu1 %v9474_v9, %s9201_s21 }
  0xd5   : > { %2202 = vrot.lane.b32.xlu2 %v9479_v10, %s9199_s19 }
  0xdb   : > { %8286 = vrot.lane.b32.xlu0 %v9490_v13, %s9201_s21 }
  0xdc   : > { %623 = vrot.lane.b32.xlu1 %v9464_v7, %s9198_s18 }
  0xdd   : > { %2311 = vrot.lane.b32.xlu2 %v9495_v14, %s9199_s19 }
  0xe3   : > { %2218 = vrot.lane.b32.xlu0 %v9464_v7, %s9200_s20 }
  0xe4   : > { %733 = vrot.lane.b32.xlu1 %v9484_v12, %s9198_s18 }
  0xe5   : > { %625 = vrot.lane.b32.xlu2 %v9502_v17, %s9198_s18 }
  0xeb   : > { %945 = vrot.lane.b32.xlu0 %v9517_v22, %s9198_s18 }
  0xec   : > { %840 = vrot.lane.b32.xlu1 %v9511_v19, %s9198_s18 }
  0xed   : > { %735 = vrot.lane.b32.xlu2 %v9514_v21, %s9198_s18 }
  0xef   : > { %v9528_v25 = vpop.permute.xlu2 %2196 }
  0xf0   : > { %16627 = vst [vmem:[#allocation30_spill] sm:$0xff] %v9528_v25 }
  0xf3   : > { %8296 = vrot.lane.b32.xlu0 %v9535_v27, %s9201_s21 }
  0xf4   : > { %2204 = vrot.lane.b32.xlu1 %v9531_v26, %s9199_s19 }
  0xf5   : > { %2220 = vrot.lane.b32.xlu2 %v9502_v17, %s9200_s20  ;;  %v9644_v17 = vadd.f32 %v9345_v34, %v489_v5 }
  0xf7   : > { %v9543_v28 = vpop.permute.xlu2 %2305  ;;  %16645 = vst [vmem:[#allocation48_spill] sm:$0xff] %v9644_v17  ;;  %v9711_v26 = vpack.i.bf16 %v9629_v57, %v9644_v17 }
  0xf8   : > { %16630 = vst [vmem:[#allocation33_spill] sm:$0xff] %v9543_v28  ;;  %v516_v28 = vpop.f32.mrf.mxu2 }
  0xf9   : > { %16658 = vst [vmem:[#allocation61_spill] sm:$0xff] %v9711_v26 }
  0xfb   : > { %737 = vrot.lane.b32.xlu0 %v9546_v30, %s9198_s18 }
  0xfc   : > { %2313 = vrot.lane.b32.xlu1 %v9549_v33, %s9199_s19 }
  0xfd   : > { %842 = vrot.lane.b32.xlu2 %v9552_v35, %s9198_s18 }
  0xff   : > { %v9563_v40 = vpop.permute.xlu2 %729 }
 0x103   : > { %2206 = vrot.lane.b32.xlu0 %v9566_v42, %s9199_s19  ;;  %v465_v42 = vpop.f32.mrf.mxu0 }
 0x104   : > { %947 = vrot.lane.b32.xlu1 %v9526_v24, %s9198_s18  ;;  %v9707_v1 = vadd.f32 %v9345_v34, %v465_v42 }
 0x105   : > { %v9572_v44 = vpop.permute.xlu0 %617  ;;  %627 = vrot.lane.b32.xlu2 %v9559_v37, %s9198_s18 }
 0x106   : > { %v9576_v45 = vpop.permute.xlu1 %727  ;;  %16657 = vst [vmem:[#allocation60_spill] sm:$0xff] %v9707_v1 }
 0x107   : > { %v9578_v49 = vpop.permute.xlu2 %8261 }
 0x10b   : > { %2315 = vrot.lane.b32.xlu0 %v9581_v50, %s9199_s19  ;;  %v9647_v50 = vadd.f32 %v9345_v34, %v462_v32  ;;  %v519_v32 = vpop.f32.mrf.mxu2 }
 0x10c   : > { %8291 = vrot.lane.b32.xlu1 %v9585_v54, %s9201_s21  ;;  %v9669_v33 = vadd.f32 %v9345_v34, %v519_v32  ;;  %v468_v54 = vpop.f32.mrf.mxu0 }
 0x10d   : > { %v9595_v0 = vpop.permute.xlu0 %2212  ;;  %8306 = vrot.lane.b32.xlu2 %v9591_v59, %s9201_s21  ;;  %16646 = vst [vmem:[#allocation49_spill] sm:$0xff] %v9647_v50  ;;  %v9685_v36 = vpack.i.bf16 %v9647_v50, %v9600_v3  ;;  %v9741_v10 = vadd.f32 %v9345_v34, %v468_v54 }
 0x10e   : > { %16638 = vst [vmem:[#allocation41_spill] sm:$0xff] %v9595_v0  ;;  %v9602_v11 = vpop.permute.xlu1 %834  ;;  %v9691_v32 = vpack.i.bf16 %v9380_v47, %v9669_v33 }
 0x10f   : > { %v9607_v16 = vpop.permute.xlu2 %2214  ;;  %16650 = vst [vmem:[#allocation53_spill] sm:$0xff] %v9669_v33  ;;  %v9763_v27 = vmul.f32 0.35355338, %v9741_v10 }
 0x110   : > { %16641 = vst [vmem:[#allocation44_spill] sm:$0xff] %v9607_v16 }
 0x111   : > { %16653 = vst [vmem:[#allocation56_spill] sm:$0xff] %v9691_v32 }
 0x112   : > { %16661 = vst [vmem:[#allocation64_spill] sm:$0xff] %v9741_v10 }
 0x113   : > { %933 = vrot.lane.b32.xlu0 %v9605_v15, %s9198_s18  ;;  %16663 = vst [vmem:[#allocation66_spill] sm:$0xff] %v9763_v27 }
 0x114   : > { %8301 = vrot.lane.b32.xlu1 %v9614_v20, %s9201_s21 }
 0x115   : > { %v9620_v23 = vpop.permute.xlu0 %939  ;;  %2208 = vrot.lane.b32.xlu2 %v9610_v18, %s9199_s19 }
 0x116   : > { %v9624_v29 = vpop.permute.xlu1 %8266 }
 0x117   : > { %v9626_v31 = vpop.permute.xlu2 %836 }
 0x11b   : > { %629 = vrot.lane.b32.xlu0 %v9600_v3, %s9198_s18 }
 0x11c   : > { %2222 = vrot.lane.b32.xlu1 %v9559_v37, %s9200_s20  ;;  %v9654_v37 = vadd.f32 %v9345_v34, %v516_v28 }
 0x11d   : > { %v9635_v61 = vpop.permute.xlu0 %619  ;;  %830 = vrot.lane.b32.xlu2 %v9629_v57, %s9198_s18 }
 0x11e   : > { %v9639_v25 = vpop.permute.xlu1 %2198  ;;  %16647 = vst [vmem:[#allocation50_spill] sm:$0xff] %v9654_v37  ;;  %v9666_v7 = vpack.i.bf16 %v9654_v37, %v9605_v15 }
 0x11f   : > { %16644 = vst [vmem:[#allocation47_spill] sm:$0xff] %v9639_v25  ;;  %v9641_v58 = vpop.permute.xlu2 %943 }
 0x123   : > { %2224 = vrot.lane.b32.xlu0 %v9600_v3, %s9200_s20 }
 0x124   : > { %828 = vrot.lane.b32.xlu1 %v9644_v17, %s9198_s18 }
 0x125   : > { %v9656_v51 = vpop.permute.xlu0 %731  ;;  %2226 = vrot.lane.b32.xlu2 %v9647_v50, %s9200_s20 }
 0x126   : > { %v9660_v5 = vpop.permute.xlu1 %2307 }
 0x127   : > { %16648 = vst [vmem:[#allocation51_spill] sm:$0xff] %v9660_v5  ;;  %v9662_v25 = vpop.permute.xlu2 %8271 }
 0x128   : > { %16649 = vst [vmem:[#allocation52_spill] sm:$0xff] %v9662_v25  ;;  %v9728_v25 = vmul.f32 0.35355338, %v9647_v50 }
 0x12a   : > { %16660 = vst [vmem:[#allocation63_spill] sm:$0xff] %v9728_v25 }
 0x12b   : > { %8311 = vrot.lane.b32.xlu0 %v9666_v7, %s9201_s21 }
 0x12c   : > { %935 = vrot.lane.b32.xlu1 %v9654_v37, %s9198_s18 }
 0x12d   : > { %v9675_v28 = vpop.permute.xlu0 %2200  ;;  %937 = vrot.lane.b32.xlu2 %v9669_v33, %s9198_s18 }
 0x12e   : > { %16651 = vst [vmem:[#allocation54_spill] sm:$0xff] %v9675_v28  ;;  %v9679_v5 = vpop.permute.xlu1 %941 }
 0x12f   : > { %v9681_v18 = vpop.permute.xlu2 %2202 }
 0x130   : > { %16652 = vst [vmem:[#allocation55_spill] sm:$0xff] %v9681_v18  ;;  %v495_v18 = vpop.f32.mrf.mxu1 }
 0x131   : > { %v9704_v9 = vadd.f32 %v9345_v34, %v495_v18 }
 0x133   : > { %8316 = vrot.lane.b32.xlu0 %v9685_v36, %s9201_s21  ;;  %16656 = vst [vmem:[#allocation59_spill] sm:$0xff] %v9704_v9  ;;  %v9725_v42 = vpack.i.bf16 %v9363_v41, %v9704_v9 }
 0x134   : > { %631 = vrot.lane.b32.xlu1 %v9647_v50, %s9198_s18  ;;  %v9744_v50 = vmul.f32 0.35355338, %v9707_v1 }
 0x135   : > { %v9695_v28 = vpop.permute.xlu0 %2309  ;;  %8326 = vrot.lane.b32.xlu2 %v9691_v32, %s9201_s21 }
 0x136   : > { %16654 = vst [vmem:[#allocation57_spill] sm:$0xff] %v9695_v28  ;;  %v9699_v14 = vpop.permute.xlu1 %621 }
 0x137   : > { %v9701_v3 = vpop.permute.xlu2 %2311  ;;  %16662 = vst [vmem:[#allocation65_spill] sm:$0xff] %v9744_v50 }
 0x138   : > { %16655 = vst [vmem:[#allocation58_spill] sm:$0xff] %v9701_v3 }
 0x13b   : > { %832 = vrot.lane.b32.xlu0 %v9704_v9, %s9198_s18 }
 0x13c   : > { %8321 = vrot.lane.b32.xlu1 %v9711_v26, %s9201_s21 }
 0x13d   : > { %v839_v28 = vpop.permute.xlu0 %838  ;;  %723 = vrot.lane.b32.xlu2 %v9707_v1, %s9198_s18 }
 0x13e   : > { %v9719_v3 = vpop.permute.xlu1 %2216 }
 0x13f   : > { %16659 = vst [vmem:[#allocation62_spill] sm:$0xff] %v9719_v3  ;;  %v9721_v18 = vpop.permute.xlu2 %625 }
 0x143   : > { %8331 = vrot.lane.b32.xlu0 %v9725_v42, %s9201_s21 }
 0x144   : > { %2210 = vrot.lane.b32.xlu1 %v9728_v25, %s9199_s19  ;;  %v9750_v25 = vpack.i.bf16 %v9741_v10, %v9707_v1 }
 0x145   : > { %v9734_v0 = vpop.permute.xlu0 %8281  ;;  %2317 = vrot.lane.b32.xlu2 %v9707_v1, %s9200_s20 }
 0x146   : > { %v9738_v16 = vpop.permute.xlu1 %8276 }
 0x147   : > { %v736_v56 = vpop.permute.xlu2 %735 }
 0x14b   : > { %725 = vrot.lane.b32.xlu0 %v9741_v10, %s9198_s18 }
 0x14c   : > { %2301 = vrot.lane.b32.xlu1 %v9744_v50, %s9199_s19 }
 0x14d   : > { %v9754_v32 = vpop.permute.xlu0 %8286  ;;  %8336 = vrot.lane.b32.xlu2 %v9750_v25, %s9201_s21 }
 0x14e   : > { %v9758_v34 = vpop.permute.xlu1 %623 }
 0x14f   : > { %v9760_v54 = vpop.permute.xlu2 %2220 }
 0x153   : > { %2303 = vrot.lane.b32.xlu0 %v9763_v27, %s9199_s19 }
 0x154   : > { %2319 = vrot.lane.b32.xlu1 %v9741_v10, %s9200_s20 }
 0x155   : > { %v9769_v1 = vpop.permute.xlu0 %2218  ;;  %2323 = vrot.lane.b32.xlu2 %v9377_v46, %s9200_s20 }
 0x156   : > { %16664 = vst [vmem:[#allocation67_spill] sm:$0xff] %v9769_v1  ;;  %v734_v3 = vpop.permute.xlu1 %733  ;;  %v9830_v1 = vmul.f32 0.35355338, %v9453_v4 }
 0x157   : > { %v843_v26 = vpop.permute.xlu2 %842 }
 0x158   : > { %7806 = vmatpush.xpose.msk.msrb.mxu3 %vm633_vm1, %v843_v26  ;;  %v9789_v26 = vmul.f32 0.35355338, %v9629_v57  ;;  %16673 = vst [vmem:[#allocation76_spill] sm:$0xff] %v9830_v1 }
 0x15a   : > { %16665 = vst [vmem:[#allocation68_spill] sm:$0xff] %v9789_v26 }
 0x15b   : > { %2321 = vrot.lane.b32.xlu0 %v9351_v38, %s9200_s20 }
 0x15c   : > { %2325 = vrot.lane.b32.xlu1 %v9411_v55, %s9200_s20 }
 0x15d   : > { %v9778_v43 = vpop.permute.xlu0 %945  ;;  %2329 = vrot.lane.b32.xlu2 %v9514_v21, %s9200_s20 }
 0x15e   : > { %v841_v10 = vpop.permute.xlu1 %840 }
 0x15f   : > { %7807 = vmatpush.xpose.msk.msrb.mxu3 %vm633_vm1, %v841_v10  ;;  %v9783_v46 = vpop.permute.xlu2 %627 }
 0x163   : > { %7808 = vmatpush.xpose.msk.msrb.mxu3 %vm633_vm1, %v839_v28  ;;  %2327 = vrot.lane.b32.xlu0 %v9484_v12, %s9200_s20  ;;  %v9804_v28 = vmul.f32 0.35355338, %v9644_v17  ;;  %v9807_v12 = vmul.f32 0.35355338, %v9704_v9 }
 0x164   : > { %2331 = vrot.lane.b32.xlu1 %v9546_v30, %s9200_s20  ;;  %v9814_v30 = vmul.f32 0.35355338, %v9432_v63 }
 0x165   : > { %v9793_v38 = vpop.permute.xlu0 %8296  ;;  %2408 = vrot.lane.b32.xlu2 %v9789_v26, %s9199_s19  ;;  %16667 = vst [vmem:[#allocation70_spill] sm:$0xff] %v9804_v28 }
 0x166   : > { %v9797_v21 = vpop.permute.xlu1 %2204  ;;  %16668 = vst [vmem:[#allocation71_spill] sm:$0xff] %v9807_v12 }
 0x167   : > { %16666 = vst [vmem:[#allocation69_spill] sm:$0xff] %v9797_v21  ;;  %7809 = vmatpush.xpose.msk.msrb.mxu3 %vm633_vm1, %v9626_v31  ;;  %v9801_v10 = vpop.permute.xlu2 %8306 }
 0x168   : > { %16669 = vst [vmem:[#allocation72_spill] sm:$0xff] %v9814_v30 }
 0x16b   : > { %7810 = vmatpush.xpose.msk.msrb.mxu3 %vm633_vm1, %v9602_v11  ;;  %2406 = vrot.lane.b32.xlu0 %v9804_v28, %s9199_s19  ;;  %v9826_v11 = vmul.f32 0.35355338, %v9363_v41 }
 0x16c   : > { %2410 = vrot.lane.b32.xlu1 %v9807_v12, %s9199_s19 }
 0x16d   : > { %v738_v31 = vpop.permute.xlu0 %737  ;;  %2414 = vrot.lane.b32.xlu2 %v9814_v30, %s9199_s19  ;;  %16672 = vst [vmem:[#allocation75_spill] sm:$0xff] %v9826_v11 }
 0x16e   : > { %v9820_v21 = vpop.permute.xlu1 %2313  ;;  %7790 = vmatpush.xpose.msk.msrb.mxu2 %vm633_vm1, %v738_v31 }
 0x16f   : > { %16670 = vst [vmem:[#allocation73_spill] sm:$0xff] %v9820_v21  ;;  %v9823_v55 = vpop.permute.xlu2 %2208 }
 0x170   : > { %16671 = vst [vmem:[#allocation74_spill] sm:$0xff] %v9823_v55  ;;  %v9847_v55 = vmul.f32 0.35355338, %v9511_v19 }
 0x172   : > { %7791 = vmatpush.xpose.msk.msrb.mxu2 %vm633_vm1, %v736_v56  ;;  %16676 = vst [vmem:[#allocation79_spill] sm:$0xff] %v9847_v55 }
 0x173   : > { %2412 = vrot.lane.b32.xlu0 %v9826_v11, %s9199_s19 }
 0x174   : > { %2416 = vrot.lane.b32.xlu1 %v9830_v1, %s9199_s19 }
 0x175   : > { %v9839_v31 = vpop.permute.xlu0 %2206  ;;  %2420 = vrot.lane.b32.xlu2 %v9835_v60, %s9199_s19 }
 0x176   : > { %16675 = vst [vmem:[#allocation78_spill] sm:$0xff] %v9839_v31  ;;  %v9843_v21 = vpop.permute.xlu1 %947  ;;  %7792 = vmatpush.xpose.msk.msrb.mxu2 %vm633_vm1, %v734_v3 }
 0x177   : > { %v831_v56 = vpop.permute.xlu2 %830 }
 0x17a   : > { %7793 = vmatpush.xpose.msk.msrb.mxu2 %vm633_vm1, %v9656_v51 }
 0x17b   : > { %2418 = vrot.lane.b32.xlu0 %v9847_v55, %s9199_s19  ;;  %v9907_v55 = vmul.f32 0.35355338, %v9669_v33 }
 0x17c   : > { %2422 = vrot.lane.b32.xlu1 %v9644_v17, %s9200_s20 }
 0x17d   : > { %v9855_v31 = vpop.permute.xlu0 %2315  ;;  %2426 = vrot.lane.b32.xlu2 %v9704_v9, %s9200_s20  ;;  %16683 = vst [vmem:[#allocation86_spill] sm:$0xff] %v9907_v55 }
 0x17e   : > { %16677 = vst [vmem:[#allocation80_spill] sm:$0xff] %v9855_v31  ;;  %v9859_v60 = vpop.permute.xlu1 %8291  ;;  %7794 = vmatpush.xpose.msk.msrb.mxu2 %vm633_vm1, %v9563_v40  ;;  %v9882_v40 = vmul.f32 0.35355338, %v9605_v15 }
 0x17f   : > { %16678 = vst [vmem:[#allocation81_spill] sm:$0xff] %v9859_v60  ;;  %v9863_v3 = vpop.permute.xlu2 %2226  ;;  %v9928_v60 = vmul.f32 0.35355338, %v9444_v2 }
 0x180   : > { %16680 = vst [vmem:[#allocation83_spill] sm:$0xff] %v9882_v40 }
 0x181   : > { %16687 = vst [vmem:[#allocation90_spill] sm:$0xff] %v9928_v60 }
 0x182   : > { %7795 = vmatpush.xpose.msk.msrb.mxu2 %vm633_vm1, %v9576_v45 }
 0x183   : > { %2424 = vrot.lane.b32.xlu0 %v9629_v57, %s9200_s20 }
 0x184   : > { %2428 = vrot.lane.b32.xlu1 %v9363_v41, %s9200_s20  ;;  %v9893_v41 = vmul.f32 0.35355338, %v9654_v37 }
 0x185   : > { %v9871_v51 = vpop.permute.xlu0 %933  ;;  %2432 = vrot.lane.b32.xlu2 %v9453_v4, %s9200_s20 }
 0x186   : > { %16679 = vst [vmem:[#allocation82_spill] sm:$0xff] %v9871_v51  ;;  %v9875_v31 = vpop.permute.xlu1 %8301  ;;  %v9910_v51 = vmul.f32 0.35355338, %v9429_v62 }
 0x187   : > { %v9877_v9 = vpop.permute.xlu2 %937  ;;  %16681 = vst [vmem:[#allocation84_spill] sm:$0xff] %v9893_v41 }
 0x188   : > { %16684 = vst [vmem:[#allocation87_spill] sm:$0xff] %v9910_v51 }
 0x18b   : > { %2430 = vrot.lane.b32.xlu0 %v9432_v63, %s9200_s20  ;;  %v9898_v63 = vmul.f32 0.35355338, %v9380_v47 }
 0x18c   : > { %2434 = vrot.lane.b32.xlu1 %v9511_v19, %s9200_s20 }
 0x18d   : > { %v630_v45 = vpop.permute.xlu0 %629  ;;  %2511 = vrot.lane.b32.xlu2 %v9882_v40, %s9199_s19  ;;  %16682 = vst [vmem:[#allocation85_spill] sm:$0xff] %v9898_v63 }
 0x18e   : > { %v9888_v57 = vpop.permute.xlu1 %2222 }
 0x18f   : > { %v9890_v4 = vpop.permute.xlu2 %8326 }
 0x193   : > { %2436 = vrot.lane.b32.xlu0 %v9552_v35, %s9200_s20  ;;  %v9915_v35 = vmul.f32 0.35355338, %v9517_v22 }
 0x194   : > { %2513 = vrot.lane.b32.xlu1 %v9893_v41, %s9199_s19 }
 0x195   : > { %v9902_v19 = vpop.permute.xlu0 %2224  ;;  %2517 = vrot.lane.b32.xlu2 %v9898_v63, %s9199_s19  ;;  %16685 = vst [vmem:[#allocation88_spill] sm:$0xff] %v9915_v35 }
 0x196   : > { %v829_v17 = vpop.permute.xlu1 %828 }
 0x197   : > { %v724_v40 = vpop.permute.xlu2 %723 }
 0x19b   : > { %2515 = vrot.lane.b32.xlu0 %v9907_v55, %s9199_s19  ;;  %v9931_v55 = vmul.f32 0.35355338, %v9526_v24 }
 0x19c   : > { %2519 = vrot.lane.b32.xlu1 %v9910_v51, %s9199_s19 }
 0x19d   : > { %v9919_v41 = vpop.permute.xlu0 %8311  ;;  %2523 = vrot.lane.b32.xlu2 %v9915_v35, %s9199_s19  ;;  %16688 = vst [vmem:[#allocation91_spill] sm:$0xff] %v9931_v55 }
 0x19e   : > { %v9923_v63 = vpop.permute.xlu1 %935 }
 0x19f   : > { %v9925_v1 = vpop.permute.xlu2 %2317 }
 0x1a0   : > { %16686 = vst [vmem:[#allocation89_spill] sm:$0xff] %v9925_v1 }
 0x1a3   : > { %2521 = vrot.lane.b32.xlu0 %v9928_v60, %s9199_s19 }
 0x1a4   : > { %2525 = vrot.lane.b32.xlu1 %v9931_v55, %s9199_s19  ;;  %s16026_s19 = scalar_lea.vmem %s16368_s7, %s8216_s12 }
 0x1a5   : > { %v9937_v51 = vpop.permute.xlu0 %8316  ;;  %2529 = vrot.lane.b32.xlu2 %v9654_v37, %s9200_s20 }
 0x1a6   : > { %v632_v35 = vpop.permute.xlu1 %631 }
 0x1a7   : > { %7774 = vmatpush.xpose.msk.msrb.mxu1 %vm633_vm1, %v632_v35  ;;  %v8337_v1 = vpop.permute.xlu2 %8336 }
 0x1ab   : > { %7775 = vmatpush.xpose.msk.msrb.mxu1 %vm633_vm1, %v630_v45  ;;  %2527 = vrot.lane.b32.xlu0 %v9605_v15, %s9200_s20  ;;  %v8309_v45 = vunpack.i.h.bf16 %v9801_v10 }
 0x1ac   : > { %2531 = vrot.lane.b32.xlu1 %v9669_v33, %s9200_s20 }
 0x1ad   : > { %v833_v60 = vpop.permute.xlu0 %832  ;;  %2535 = vrot.lane.b32.xlu2 %v9429_v62, %s9200_s20  ;;  %v16769_v62 = vld [vmem:[#allocation91_spill] sm:$0xff] }
 0x1ae   : > { %v9949_v55 = vpop.permute.xlu1 %8321  ;;  %7811 = vmatpush.xpose.msk.msrb.mxu3 %vm633_vm1, %v833_v60 }
 0x1af   : > { %7776 = vmatpush.xpose.msk.msrb.mxu1 %vm633_vm1, %v9783_v46  ;;  %v9954_v35 = vpop.permute.xlu2 %2323 }
 0x1b2   : > { %7812 = vmatpush.xpose.msk.msrb.mxu3 %vm633_vm1, %v831_v56  ;;  %v8289_v56 = vunpack.i.h.bf16 %v9754_v32 }
 0x1b3   : > { %7777 = vmatpush.xpose.msk.msrb.mxu1 %vm633_vm1, %v9721_v18  ;;  %2533 = vrot.lane.b32.xlu0 %v9380_v47, %s9200_s20  ;;  %v8308_v18 = vunpack.i.l.bf16 %v9801_v10  ;;  %v8269_v10 = vunpack.i.h.bf16 %v9624_v29  ;;  %v16749_v47 = vld [vmem:[#allocation86_spill] sm:$0xff] }
 0x1b4   : > { %2537 = vrot.lane.b32.xlu1 %v9444_v2, %s9200_s20 }
 0x1b5   : > { %v9964_v15 = vpop.permute.xlu0 %8331  ;;  %2541 = vrot.lane.b32.xlu2 %v9526_v24, %s9200_s20 }
 0x1b6   : > { %v9968_v46 = vpop.permute.xlu1 %2210  ;;  %7813 = vmatpush.xpose.msk.msrb.mxu3 %vm633_vm1, %v829_v17  ;;  %v8288_v17 = vunpack.i.l.bf16 %v9754_v32  ;;  %v8268_v32 = vunpack.i.l.bf16 %v9624_v29  ;;  %v8338_v29 = vunpack.i.l.bf16 %v8337_v1 }
 0x1b7   : > { %16689 = vst [vmem:[#allocation92_spill] sm:$0xff] %v9968_v46  ;;  %7778 = vmatpush.xpose.msk.msrb.mxu1 %vm633_vm1, %v9758_v34  ;;  %v9973_v60 = vpop.permute.xlu2 %2329 }
 0x1b9   : > { %7814 = vmatmul.msk.f32.vlgmr.msrb.gmra.mxu3 %vm633_vm1, %v9804_v28 }
 0x1ba   : > { %1976 = vmatpush.msra.mxu3 %v8309_v45 }
 0x1bb   : > { %7779 = vmatpush.xpose.msk.msrb.mxu1 %vm633_vm1, %v9699_v14  ;;  %2539 = vrot.lane.b32.xlu0 %v9517_v22, %s9200_s20 }
 0x1bc   : > { %1977 = vmatpush.msra.mxu3 %v8308_v18  ;;  %8351 = vrot.lane.b32.xlu1 %v9614_v20, %s9202_s22  ;;  %v8339_v20 = vunpack.i.h.bf16 %v8337_v1  ;;  %v8304_v1 = vunpack.i.h.bf16 %v9875_v31 }
 0x1bd   : > { %v726_v34 = vpop.permute.xlu0 %725  ;;  %8346 = vrot.lane.b32.xlu2 %v9470_v8, %s9202_s22  ;;  %v8319_v8 = vunpack.i.h.bf16 %v9937_v51 }
 0x1be   : > { %1978 = vmatpush.msra.mxu3 %v8289_v56  ;;  %v9989_v45 = vpop.permute.xlu1 %2301  ;;  %7796 = vmatpush.xpose.msk.msrb.mxu2 %vm633_vm1, %v726_v34  ;;  %v16703_v56 = vld [vmem:[#allocation56_spill] sm:$0xff]  ;;  %v16704_v34 = vld [vmem:[#allocation22_spill] sm:$0xff] }
 0x1bf   : > { %16690 = vst [vmem:[#allocation93_spill] sm:$0xff] %v9989_v45  ;;  %7780 = vmatpush.xpose.msk.msrb.mxu1 %vm633_vm1, %v9635_v61  ;;  %v9994_v14 = vpop.permute.xlu2 %2408 }
 0x1c0   : > { %1979 = vmatpush.msra.mxu3 %v8288_v17  ;;  %16691 = vst [vmem:[#allocation94_spill] sm:$0xff] %v9994_v14  ;;  %v8314_v17 = vunpack.i.h.bf16 %v9919_v41 }
 0x1c1   : > { %7815 = vmatmul.msk.f32.gmra.mxu3 %vm633_vm1, %v9789_v26 }
 0x1c2   : > { %1980 = vmatpush.msra.mxu3 %v8269_v10  ;;  %7797 = vmatpush.xpose.msk.msrb.mxu2 %vm633_vm1, %v724_v40  ;;  %v8318_v40 = vunpack.i.l.bf16 %v9937_v51  ;;  %v16705_v10 = vld [vmem:[#allocation12_spill] sm:$0xff] }
 0x1c3   : > { %7781 = vmatpush.xpose.msk.msrb.mxu1 %vm633_vm1, %v9572_v44  ;;  %8341 = vrot.lane.b32.xlu0 %v9404_v53, %s9202_s22 }
 0x1c4   : > { %1981 = vmatpush.msra.mxu3 %v8268_v32  ;;  %8371 = vrot.lane.b32.xlu1 %v9490_v13, %s9202_s22  ;;  %v8303_v13 = vunpack.i.l.bf16 %v9875_v31  ;;  %v16699_v31 = vld [vmem:[#allocation62_spill] sm:$0xff]  ;;  %v16706_v32 = vld [vmem:[#allocation44_spill] sm:$0xff] }
 0x1c5   : > { %v10009_v61 = vpop.permute.xlu0 %2303  ;;  %8361 = vrot.lane.b32.xlu2 %v9750_v25, %s9202_s22  ;;  %7798 = vmatmul.msk.f32.vlgmr.msrb.gmra.mxu2 %vm633_vm1, %v9744_v50  ;;  %v8283_v25 = vunpack.i.l.bf16 %v9734_v0 }
 0x1c6   : > { %1887 = vmatpush.msra.mxu2 %v8319_v8  ;;  %1982 = vmatpush.msra.mxu3 %v8339_v20  ;;  %16692 = vst [vmem:[#allocation95_spill] sm:$0xff] %v10009_v61  ;;  %v10012_v18 = vpop.permute.xlu1 %2319  ;;  %v8313_v20 = vunpack.i.l.bf16 %v9919_v41 }
 0x1c7   : > { %7822 = vmatpush.xpose.msk.msra.mxu1 %vm633_vm1, %v9843_v21  ;;  %v10020_v53 = vpop.permute.xlu2 %2414  ;;  %v8284_v21 = vunpack.i.h.bf16 %v9734_v0  ;;  %v8298_v0 = vunpack.i.l.bf16 %v9793_v38 }
 0x1c8   : > { %7782 = vmatmul.msk.f32.vlgmr.msrb.gmra.mxu1 %vm633_vm1, %v9356_v39  ;;  %1983 = vmatpush.msra.mxu3 %v8338_v29  ;;  %16693 = vst [vmem:[#allocation96_spill] sm:$0xff] %v10020_v53  ;;  %v16708_v29 = vld [vmem:[#allocation76_spill] sm:$0xff] }
 0x1c9   : > { %1888 = vmatpush.msra.mxu2 %v8318_v40  ;;  %7816 = vmatmul.msk.f32.gmra.mxu3 %vm633_vm1, %v9807_v12  ;;  %v16709_v40 = vld [vmem:[#allocation82_spill] sm:$0xff] }
 0x1ca   : > { %7878 = vmatpush.xpose.msk.msrb.mxu3 %vm633_vm1, %v9863_v3  ;;  %v8328_v3 = vunpack.i.l.bf16 %v9890_v4 }
 0x1cb   : > { %7823 = vmatpush.xpose.msk.msra.mxu1 %vm633_vm1, %v9778_v43  ;;  %1889 = vmatpush.msra.mxu2 %v8304_v1 }
 0x1cc   : > { %8356 = vrot.lane.b32.xlu0 %v9685_v36, %s9202_s22  ;;  %8386 = vrot.lane.b32.xlu1 %v9725_v42, %s9202_s22  ;;  %v16696_v42 = vld [vmem:[#allocation6_spill] sm:$0xff] }
 0x1cd   : > { %1890 = vmatpush.msra.mxu2 %v8303_v13  ;;  %v10039_v43 = vpop.permute.xlu0 %2321  ;;  %8376 = vrot.lane.b32.xlu2 %v9591_v59, %s9202_s22  ;;  %v8299_v59 = vunpack.i.h.bf16 %v9793_v38  ;;  %v16710_v13 = vld [vmem:[#allocation41_spill] sm:$0xff] }
 0x1ce   : > { %7879 = vmatpush.xpose.msk.msrb.mxu3 %vm633_vm1, %v9902_v19  ;;  %v10042_v44 = vpop.permute.xlu1 %2325  ;;  %7799 = vmatmul.msk.f32.gmra.mxu2 %vm633_vm1, %v9763_v27  ;;  %v8263_v19 = vunpack.i.l.bf16 %v9578_v49 }
 0x1cf   : > { %7824 = vmatpush.xpose.msk.msra.mxu1 %vm633_vm1, %v9641_v58  ;;  %1891 = vmatpush.msra.mxu2 %v8284_v21  ;;  %v10050_v36 = vpop.permute.xlu2 %2420  ;;  %v8264_v58 = vunpack.i.h.bf16 %v9578_v49  ;;  %v16711_v21 = vld [vmem:[#allocation40_spill] sm:$0xff] }
 0x1d0   : > { %7783 = vmatmul.msk.f32.gmra.mxu1 %vm633_vm1, %v9398_v52  ;;  %16694 = vst [vmem:[#allocation97_spill] sm:$0xff] %v10050_v36 }
 0x1d1   : > { %1892 = vmatpush.msra.mxu2 %v8283_v25  ;;  %7817 = vmatmul.msk.f32.gmra.mxu3 %vm633_vm1, %v9826_v11  ;;  %v16712_v25 = vld [vmem:[#allocation52_spill] sm:$0xff] }
 0x1d2   : > { %7880 = vmatpush.xpose.msk.msrb.mxu3 %vm633_vm1, %v9888_v57 }
 0x1d3   : > { %7825 = vmatpush.xpose.msk.msra.mxu1 %vm633_vm1, %v9679_v5  ;;  %1893 = vmatpush.msra.mxu2 %v8264_v58  ;;  %v16695_v5 = vld [vmem:[#allocation14_spill] sm:$0xff]  ;;  %v8274_v58 = vunpack.i.h.bf16 %v16712_v25 }
 0x1d4   : > { %8366 = vrot.lane.b32.xlu0 %v9384_v48, %s9202_s22  ;;  %8401 = vrot.lane.b32.xlu1 %v9666_v7, %s9202_s22  ;;  %v8279_v48 = vunpack.i.h.bf16 %v9738_v16  ;;  %v16697_v7 = vld [vmem:[#allocation67_spill] sm:$0xff] }
 0x1d5   : > { %1894 = vmatpush.msra.mxu2 %v8263_v19  ;;  %v10068_v57 = vpop.permute.xlu0 %2327  ;;  %8391 = vrot.lane.b32.xlu2 %v9459_v6, %s9202_s22  ;;  %v8329_v6 = vunpack.i.h.bf16 %v9890_v4 }
 0x1d6   : > { %7881 = vmatpush.xpose.msk.msrb.mxu3 %vm633_vm1, %v9760_v54  ;;  %v10072_v49 = vpop.permute.xlu1 %2331  ;;  %7800 = vmatmul.msk.f32.gmra.mxu2 %vm633_vm1, %v16696_v42  ;;  %v16698_v54 = vld [vmem:[#allocation61_spill] sm:$0xff] }
 0x1d7   : > { %2154 = vmatpush.msrb.mxu2 %v8299_v59  ;;  %7826 = vmatpush.xpose.msk.msra.mxu1 %vm633_vm1, %v9620_v23  ;;  %v10079_v38 = vpop.permute.xlu2 %2426  ;;  %v8278_v23 = vunpack.i.l.bf16 %v9738_v16  ;;  %v16700_v16 = vld [vmem:[#allocation32_spill] sm:$0xff]  ;;  %v8273_v59 = vunpack.i.l.bf16 %v16712_v25 }
 0x1d8   : > { %7784 = vmatmul.msk.f32.gmra.mxu1 %vm633_vm1, %v16695_v5  ;;  %v16729_v25 = vld [vmem:[#allocation20_spill] sm:$0xff] }
 0x1d9   : > { %2155 = vmatpush.msrb.mxu2 %v8298_v0  ;;  %7818 = vmatmul.msk.f32.gmra.mxu3 %vm633_vm1, %v9814_v30 }
 0x1da   : > { %7882 = vmatpush.xpose.msk.msrb.mxu3 %vm633_vm1, %v16697_v7  ;;  %v16717_v7 = vld [vmem:[#allocation17_spill] sm:$0xff] }
 0x1db   : > { %2156 = vmatpush.msrb.mxu2 %v8279_v48  ;;  %7827 = vmatpush.xpose.msk.msra.mxu1 %vm633_vm1, %v9877_v9  ;;  %v16716_v48 = vld [vmem:[#allocation31_spill] sm:$0xff] }
 0x1dc   : > { %8381 = vrot.lane.b32.xlu0 %v16698_v54, %s9202_s22  ;;  %8416 = vrot.lane.b32.xlu1 %v16700_v16, %s9202_s22  ;;  %v8333_v54 = vunpack.i.l.bf16 %v9964_v15  ;;  %v16720_v16 = vld [vmem:[#allocation38_spill] sm:$0xff] }
 0x1dd   : > { %2157 = vmatpush.msrb.mxu2 %v8278_v23  ;;  %v10098_v51 = vpop.permute.xlu0 %2406  ;;  %8406 = vrot.lane.b32.xlu2 %v16703_v56, %s9202_s22  ;;  %v8334_v23 = vunpack.i.h.bf16 %v9964_v15 }
 0x1de   : > { %7883 = vmatpush.xpose.msk.msrb.mxu3 %vm633_vm1, %v16699_v31  ;;  %16701 = vst [vmem:[#allocation67_spill] sm:$0xff] %v10098_v51  ;;  %v10102_v9 = vpop.permute.xlu1 %2410  ;;  %7801 = vmatmul.msk.f32.gmra.mxu2 %vm633_vm1, %v16705_v10  ;;  %v16719_v31 = vld [vmem:[#allocation21_spill] sm:$0xff] }
 0x1df   : > { %2158 = vmatpush.msrb.mxu2 %v8329_v6  ;;  %7828 = vmatpush.xpose.msk.msra.mxu1 %vm633_vm1, %v9923_v63  ;;  %16702 = vst [vmem:[#allocation61_spill] sm:$0xff] %v10102_v9  ;;  %v10109_v4 = vpop.permute.xlu2 %2432  ;;  %v16707_v63 = vld [vmem:[#allocation81_spill] sm:$0xff]  ;;  %v16718_v6 = vld [vmem:[#allocation79_spill] sm:$0xff] }
 0x1e0   : > { %7785 = vmatmul.msk.f32.gmra.mxu1 %vm633_vm1, %v16704_v34  ;;  %v8294_v8 = vunpack.i.h.bf16 %v16707_v63  ;;  %v8293_v1 = vunpack.i.l.bf16 %v16707_v63  ;;  %v16723_v63 = vld [vmem:[#allocation24_spill] sm:$0xff]  ;;  %v16739_v9 = vld [vmem:[#allocation13_spill] sm:$0xff] }
 0x1e1   : > { %2159 = vmatpush.msrb.mxu2 %v8328_v3  ;;  %7819 = vmatmul.msk.f32.gmra.mxu3 %vm633_vm1, %v16708_v29  ;;  %v8324_v3 = vunpack.i.h.bf16 %v9949_v55 }
 0x1e2   : > { %7884 = vmatpush.xpose.msk.msrb.mxu3 %vm633_vm1, %v16706_v32  ;;  %v8323_v32 = vunpack.i.l.bf16 %v9949_v55 }
 0x1e3   : > { %2160 = vmatpush.msrb.mxu2 %v8314_v17  ;;  %7829 = vmatpush.xpose.msk.msra.mxu1 %vm633_vm1, %v16709_v40 }
 0x1e4   : > { %8396 = vrot.lane.b32.xlu0 %v16711_v21, %s9202_s22  ;;  %3785 = vrot.lane.b32.xlu1 %v16695_v5, %s9203_s23  ;;  %v16728_v21 = vld [vmem:[#allocation35_spill] sm:$0xff] }
 0x1e5   : > { %2161 = vmatpush.msrb.mxu2 %v8313_v20  ;;  %v10129_v41 = vpop.permute.xlu0 %2412  ;;  %3781 = vrot.lane.b32.xlu2 %v9356_v39, %s9203_s23  ;;  %v16725_v20 = vld [vmem:[#allocation2_spill] sm:$0xff] }
 0x1e6   : > { %7885 = vmatpush.xpose.msk.msrb.mxu3 %vm633_vm1, %v16710_v13  ;;  %16713 = vst [vmem:[#allocation62_spill] sm:$0xff] %v10129_v41  ;;  %v10131_v19 = vpop.permute.xlu1 %2416  ;;  %7802 = vmatmul.msk.f32.gmra.mxu2 %vm633_vm1, %v16717_v7  ;;  %v16738_v41 = vld [vmem:[#allocation83_spill] sm:$0xff] }
 0x1e7   : > { %2065 = vmatpush.msrb.mxu1 %v8294_v8  ;;  %16714 = vst [vmem:[#allocation32_spill] sm:$0xff] %v10131_v19  ;;  %v10136_v0 = vpop.permute.xlu2 %2511  ;;  %v16724_v8 = vld [vmem:[#allocation77_spill] sm:$0xff] }
 0x1e8   : > { %16715 = vst [vmem:[#allocation56_spill] sm:$0xff] %v10136_v0  ;;  %7786 = vmatmul.msk.f32.gmra.mxu1 %vm633_vm1, %v16716_v48  ;;  %v16736_v19 = vld [vmem:[#allocation25_spill] sm:$0xff] }
 0x1e9   : > { %2066 = vmatpush.msrb.mxu1 %v8293_v1  ;;  %7820 = vmatmul.msk.f32.gmra.mxu3 %vm633_vm1, %v16718_v6  ;;  %v16726_v1 = vld [vmem:[#allocation45_spill] sm:$0xff] }
 0x1eb   : > { %2067 = vmatpush.msrb.mxu1 %v8274_v58 }
 0x1ec   : > { %8411 = vrot.lane.b32.xlu0 %v16719_v31, %s9202_s22  ;;  %3791 = vrot.lane.b32.xlu1 %v16720_v16, %s9203_s23  ;;  %v16732_v31 = vld [vmem:[#allocation63_spill] sm:$0xff] }
 0x1ed   : > { %2068 = vmatpush.msrb.mxu1 %v8273_v59  ;;  %v10151_v56 = vpop.permute.xlu0 %2418  ;;  %3787 = vrot.lane.b32.xlu2 %v16704_v34, %s9203_s23  ;;  %v16742_v34 = vld [vmem:[#allocation49_spill] sm:$0xff] }
 0x1ee   : > { %16721 = vst [vmem:[#allocation44_spill] sm:$0xff] %v10151_v56  ;;  %v10153_v17 = vpop.permute.xlu1 %2422  ;;  %7803 = vmatmul.msk.f32.gmra.mxu2 %vm633_vm1, %v16723_v63 }
 0x1ef   : > { %2069 = vmatpush.msrb.mxu1 %v8334_v23  ;;  %v10158_v15 = vpop.permute.xlu2 %2517  ;;  %v16730_v23 = vld [vmem:[#allocation9_spill] sm:$0xff] }
 0x1f0   : > { %16722 = vst [vmem:[#allocation81_spill] sm:$0xff] %v10158_v15  ;;  %7787 = vmatmul.msk.f32.gmra.mxu1 %vm633_vm1, %v16720_v16 }
 0x1f1   : > { %2070 = vmatpush.msrb.mxu1 %v8333_v54  ;;  %7821 = vmatmul.msk.f32.gmra.mxu3 %vm633_vm1, %v16724_v8 }
 0x1f3   : > { %2071 = vmatpush.msrb.mxu1 %v8324_v3  ;;  %v16733_v3 = vld [vmem:[#allocation39_spill] sm:$0xff] }
 0x1f4   : > { %3783 = vrot.lane.b32.xlu0 %v9398_v52, %s9203_s23  ;;  %3797 = vrot.lane.b32.xlu1 %v16725_v20, %s9204_s25  ;;  %v16754_v52 = vld [vmem:[#allocation89_spill] sm:$0xff] }
 0x1f5   : > { %2072 = vmatpush.msrb.mxu1 %v8323_v32  ;;  %v10170_v55 = vpop.permute.xlu0 %2424  ;;  %3793 = vrot.lane.b32.xlu2 %v16726_v1, %s9203_s23  ;;  %v16734_v32 = vld [vmem:[#allocation42_spill] sm:$0xff] }
 0x1f6   : > { %v10172_v40 = vpop.permute.xlu1 %2428  ;;  %7804 = vmatmul.msk.f32.gmra.mxu2 %vm633_vm1, %v16728_v21 }
 0x1f7   : > { %v10176_v13 = vpop.permute.xlu2 %2523 }
 0x1f8   : > { %16727 = vst [vmem:[#allocation82_spill] sm:$0xff] %v10176_v13  ;;  %7788 = vmatmul.msk.f32.gmra.mxu1 %vm633_vm1, %v16726_v1  ;;  %v16752_v1 = vld [vmem:[#allocation85_spill] sm:$0xff] }
 0x1fc   : > { %3789 = vrot.lane.b32.xlu0 %v16716_v48, %s9203_s23  ;;  %3803 = vrot.lane.b32.xlu1 %v16729_v25, %s9204_s25 }
 0x1fd   : > { %v10186_v58 = vpop.permute.xlu0 %2430  ;;  %3799 = vrot.lane.b32.xlu2 %v16730_v23, %s9204_s25  ;;  %v16744_v23 = vld [vmem:[#allocation84_spill] sm:$0xff] }
 0x1fe   : > { %v10188_v59 = vpop.permute.xlu1 %2434  ;;  %7805 = vmatmul.msk.f32.gmra.mxu2 %vm633_vm1, %v16733_v3 }
 0x1ff   : > { %v10192_v54 = vpop.permute.xlu2 %2529 }
 0x200   : > { %16731 = vst [vmem:[#allocation41_spill] sm:$0xff] %v10192_v54  ;;  %7789 = vmatmul.msk.f32.gmra.mxu1 %vm633_vm1, %v16732_v31 }
 0x204   : > { %3795 = vrot.lane.b32.xlu0 %v16732_v31, %s9203_s23  ;;  %3809 = vrot.lane.b32.xlu1 %v16734_v32, %s9204_s25  ;;  %v10289_v31 = vld [vmem:[%s16364_s3] sm:$0xff] }
 0x205   : > { %v10202_v36 = vpop.permute.xlu0 %2436  ;;  %3805 = vrot.lane.b32.xlu2 %v16736_v19, %s9204_s25 }
 0x206   : > { %v10204_v56 = vpop.permute.xlu1 %2513 }
 0x207   : > { %16735 = vst [vmem:[#allocation40_spill] sm:$0xff] %v10204_v56  ;;  %v10208_v53 = vpop.permute.xlu2 %2535 }
 0x208   : > { %16737 = vst [vmem:[#allocation52_spill] sm:$0xff] %v10208_v53  ;;  %7830 = vmatmul.msk.f32.vlgmr.msra.gmra.mxu1 %vm633_vm1, %v16738_v41 }
 0x209   : > { %7894 = vmatpush.xpose.msk.msra.mxu1 %vm633_vm1, %v10072_v49 }
 0x20c   : > { %3801 = vrot.lane.b32.xlu0 %v16739_v9, %s9204_s25  ;;  %3888 = vrot.lane.b32.xlu1 %v9763_v27, %s9203_s23 }
 0x20d   : > { %7895 = vmatpush.xpose.msk.msra.mxu1 %vm633_vm1, %v9973_v60  ;;  %v10220_v14 = vpop.permute.xlu0 %2515  ;;  %3811 = vrot.lane.b32.xlu2 %v16742_v34, %s9204_s25  ;;  %v16745_v60 = vld [vmem:[#allocation37_spill] sm:$0xff] }
 0x20e   : > { %16740 = vst [vmem:[#allocation21_spill] sm:$0xff] %v10220_v14  ;;  %v10222_v51 = vpop.permute.xlu1 %2519 }
 0x20f   : > { %16741 = vst [vmem:[#allocation98_spill] sm:$0xff] %v10222_v51  ;;  %v10226_v39 = vpop.permute.xlu2 %2541 }
 0x210   : > { %16743 = vst [vmem:[#allocation99_spill] sm:$0xff] %v10226_v39  ;;  %7831 = vmatmul.msk.f32.gmra.mxu1 %vm633_vm1, %v16744_v23 }
 0x211   : > { %7896 = vmatpush.xpose.msk.msra.mxu1 %vm633_vm1, %v10068_v57 }
 0x214   : > { %3807 = vrot.lane.b32.xlu0 %v16745_v60, %s9204_s25 }
 0x215   : > { %7897 = vmatpush.xpose.msk.msra.mxu1 %vm633_vm1, %v10042_v44  ;;  %v10236_v49 = vpop.permute.xlu0 %2521 }
 0x216   : > { %16746 = vst [vmem:[#allocation100_spill] sm:$0xff] %v10236_v49  ;;  %v10238_v27 = vpop.permute.xlu1 %2525 }
 0x217   : > { %16747 = vst [vmem:[#allocation101_spill] sm:$0xff] %v10238_v27  ;;  %v10240_v22 = vpop.permute.xlu2 %8346 }
 0x218   : > { %16748 = vst [vmem:[#allocation102_spill] sm:$0xff] %v10240_v22  ;;  %7832 = vmatmul.msk.f32.gmra.mxu1 %vm633_vm1, %v16749_v47  ;;  %v16765_v47 = vld [vmem:[#allocation88_spill] sm:$0xff] }
 0x219   : > { %7898 = vmatpush.xpose.msk.msra.mxu1 %vm633_vm1, %v9954_v35 }
 0x21c   : > { %3886 = vrot.lane.b32.xlu0 %v9744_v50, %s9203_s23  ;;  %v16761_v50 = vld [vmem:[#allocation90_spill] sm:$0xff] }
 0x21d   : > { %7899 = vmatpush.xpose.msk.msra.mxu1 %vm633_vm1, %v10039_v43  ;;  %v10250_v57 = vpop.permute.xlu0 %2527  ;;  %v16757_v43 = vld [vmem:[#allocation87_spill] sm:$0xff] }
 0x21e   : > { %16750 = vst [vmem:[#allocation103_spill] sm:$0xff] %v10250_v57  ;;  %v10252_v44 = vpop.permute.xlu1 %2531 }
 0x21f   : > { %16751 = vst [vmem:[#allocation104_spill] sm:$0xff] %v10252_v44  ;;  %v10256_v48 = vpop.permute.xlu2 %8361 }
 0x220   : > { %7833 = vmatmul.msk.f32.gmra.mxu1 %vm633_vm1, %v16752_v1  ;;  %16753 = vst [vmem:[#allocation105_spill] sm:$0xff] %v10256_v48 }
 0x221   : > { %7900 = vmatpush.xpose.msk.msra.mxu1 %vm633_vm1, %v10012_v18 }
 0x225   : > { %7901 = vmatpush.xpose.msk.msra.mxu1 %vm633_vm1, %v16754_v52  ;;  %v10262_v35 = vpop.permute.xlu0 %2533 }
 0x226   : > { %16755 = vst [vmem:[#allocation89_spill] sm:$0xff] %v10262_v35  ;;  %v10264_v27 = vpop.permute.xlu1 %2537 }
 0x227   : > { %16756 = vst [vmem:[#allocation106_spill] sm:$0xff] %v10264_v27  ;;  %v10268_v13 = vpop.permute.xlu2 %8376 }
 0x228   : > { %7834 = vmatmul.msk.f32.gmra.mxu1 %vm633_vm1, %v16757_v43  ;;  %16758 = vst [vmem:[#allocation107_spill] sm:$0xff] %v10268_v13 }
 0x22d   : > { %v10270_v49 = vpop.permute.xlu0 %2539 }
 0x22e   : > { %16759 = vst [vmem:[#allocation108_spill] sm:$0xff] %v10270_v49  ;;  %v10272_v51 = vpop.permute.xlu1 %8351 }
 0x22f   : > { %16760 = vst [vmem:[#allocation109_spill] sm:$0xff] %v10272_v51  ;;  %v10276_v18 = vpop.permute.xlu2 %8391 }
 0x230   : > { %7835 = vmatmul.msk.f32.gmra.mxu1 %vm633_vm1, %v16761_v50  ;;  %16762 = vst [vmem:[#allocation110_spill] sm:$0xff] %v10276_v18  ;;  %v553_v50 = vld [vmem:[%s16365_s4 + $0x80] sm:$0xff] }
 0x235   : > { %v10278_v32 = vpop.permute.xlu0 %8341 }
 0x236   : > { %16763 = vst [vmem:[#allocation111_spill] sm:$0xff] %v10278_v32  ;;  %v10280_v52 = vpop.permute.xlu1 %8371 }
 0x237   : > { %16764 = vst [vmem:[#allocation112_spill] sm:$0xff] %v10280_v52  ;;  %v10284_v15 = vpop.permute.xlu2 %8406  ;;  %v10514_v52 = vld [vmem:[%s16364_s3 + $0x30] sm:$0xff] }
 0x238   : > { %7836 = vmatmul.msk.f32.gmra.mxu1 %vm633_vm1, %v16765_v47  ;;  %16766 = vst [vmem:[#allocation113_spill] sm:$0xff] %v10284_v15 }
 0x23c   : > { %v901_v60 = vpop.f32.mrf.mxu3 }
 0x23d   : > { %v902_v14 = vadd.f32 %v901_v60, %v10289_v31 }
 0x23e   : > { %v10295_v24 = vpop.permute.xlu0 %8356  ;;  %v10298_v18 = vpop.permute.xlu1 %8386 }
 0x23f   : > { %16767 = vst [vmem:[#allocation114_spill] sm:$0xff] %v10295_v24  ;;  %v16494_v56 = vunpack.i.h.bf16 %v10295_v24  ;;  %v10300_v15 = vadd.f32 %v902_v14, %v553_v50  ;;  %v10304_v0 = vpop.permute.xlu2 %3781  ;;  %v16495_v16 = vunpack.i.l.bf16 %v10295_v24  ;;  %v16497_v50 = vunpack.i.h.bf16 %v10272_v51  ;;  %v10410_v24 = vld [vmem:[%s16364_s3 + $0x18] sm:$0xff] }
 0x240   : > { %16768 = vst [vmem:[#allocation115_spill] sm:$0xff] %v10298_v18  ;;  %7837 = vmatmul.msk.f32.gmra.mxu1 %vm633_vm1, %v16769_v62  ;;  %v537_v18 = vld [vmem:[%s16365_s4] sm:$0xff] }
 0x241   : > { %16770 = vst [vmem:[#allocation116_spill] sm:$0xff] %v10304_v0  ;;  %3472 = vmatpush.msrb.mxu0 %v16494_v56  ;;  %v1111_v60 = vsel %vm1062_vm2, %v10300_v15, -inf  ;;  %v16498_v56 = vunpack.i.l.bf16 %v10272_v51 }
 0x242   : > { %1112 = vmax.xlane.f32.xlu2 %v1111_v60  ;;  %v16499_v60 = vunpack.i.h.bf16 %v10240_v22 }
 0x243   : > { %3473 = vmatpush.msrb.mxu0 %v16495_v16 }
 0x244   : > { %v904_v37 = vpop.f32.mrf.mxu3 }
 0x245   : > { %v691_v14 = vpop.f32.mrf.mxu1  ;;  %3474 = vmatpush.msrb.mxu0 %v16497_v50 }
 0x246   : > { %v692_v0 = vadd.f32 %v691_v14, %v10289_v31  ;;  %v10321_v46 = vpop.permute.xlu0 %8366  ;;  %v10328_v47 = vpop.permute.xlu1 %8401  ;;  %v16501_v14 = vunpack.i.l.bf16 %v10240_v22 }
 0x247   : > { %16771 = vst [vmem:[#allocation117_spill] sm:$0xff] %v10321_v46  ;;  %3475 = vmatpush.msrb.mxu0 %v16498_v56  ;;  %v10330_v5 = vpop.permute.xlu2 %3787 }
 0x248   : > { %v10326_v16 = vadd.f32 %v692_v0, %v537_v18  ;;  %16772 = vst [vmem:[#allocation118_spill] sm:$0xff] %v10328_v47  ;;  %v796_v1 = vpop.f32.mrf.mxu2  ;;  %v16504_v0 = vunpack.i.h.bf16 %v10278_v32  ;;  %v545_v18 = vld [vmem:[%s16365_s4 + $0x40] sm:$0xff] }
 0x249   : > { %16773 = vst [vmem:[#allocation119_spill] sm:$0xff] %v10330_v5  ;;  %3476 = vmatpush.msrb.mxu0 %v16499_v60  ;;  %v797_v56 = vadd.f32 %v796_v1, %v10289_v31  ;;  %v10347_v60 = vld [vmem:[%s16364_s3 + $0x8] sm:$0xff] }
 0x24a   : > { %v1063_v50 = vsel %vm1062_vm2, %v10326_v16, -inf  ;;  %v905_v1 = vadd.f32 %v904_v37, %v10347_v60 }
 0x24b   : > { %1064 = vmax.xlane.f32.xlu2 %v1063_v50  ;;  %3477 = vmatpush.msrb.mxu0 %v16501_v14  ;;  %v16506_v50 = vunpack.i.l.bf16 %v10278_v32  ;;  %v10354_v20 = vadd.f32 %v797_v56, %v545_v18  ;;  %v546_v56 = vld [vmem:[%s16365_s4 + $0x48] sm:$0xff] }
 0x24c   : > { %v907_v47 = vpop.f32.mrf.mxu3 }
 0x24d   : > { %v694_v5 = vpop.f32.mrf.mxu1  ;;  %3478 = vmatpush.msrb.mxu0 %v16504_v0  ;;  %v1087_v19 = vsel %vm1062_vm2, %v10354_v20, -inf  ;;  %v554_v0 = vld [vmem:[%s16365_s4 + $0x88] sm:$0xff] }
 0x24e   : > { %v10352_v14 = vpop.permute.xlu0 %8381  ;;  %v10359_v41 = vpop.permute.xlu1 %8416  ;;  %1088 = vmax.xlane.f32.xlu0 %v1087_v19  ;;  %v10372_v37 = vadd.f32 %v905_v1, %v554_v0  ;;  %v695_v61 = vadd.f32 %v694_v5, %v10347_v60 }
 0x24f   : > { %16774 = vst [vmem:[#allocation120_spill] sm:$0xff] %v10352_v14  ;;  %3479 = vmatpush.msrb.mxu0 %v16506_v50  ;;  %v10363_v22 = vpop.permute.xlu2 %3793  ;;  %v10377_v50 = vld [vmem:[%s16364_s3 + $0x10] sm:$0xff] }
 0x250   : > { %16775 = vst [vmem:[#allocation121_spill] sm:$0xff] %v10359_v41  ;;  %v908_v34 = vadd.f32 %v907_v47, %v10377_v50  ;;  %v1114_v0 = vsel %vm1062_vm2, %v10372_v37, -inf  ;;  %v538_v47 = vld [vmem:[%s16365_s4 + $0x8] sm:$0xff] }
 0x251   : > { %16776 = vst [vmem:[#allocation122_spill] sm:$0xff] %v10363_v22  ;;  %v799_v14 = vpop.f32.mrf.mxu2 }
 0x252   : > { %v800_v18 = vadd.f32 %v799_v14, %v10347_v60 }
 0x254   : > { %v10379_v22 = vadd.f32 %v800_v18, %v546_v56  ;;  %v910_v41 = vpop.f32.mrf.mxu3  ;;  %v555_v56 = vld [vmem:[%s16365_s4 + $0x90] sm:$0xff] }
 0x255   : > { %v697_v19 = vpop.f32.mrf.mxu1  ;;  %v547_v18 = vld [vmem:[%s16365_s4 + $0x50] sm:$0xff] }
 0x256   : > { %v10381_v32 = vpop.permute.xlu0 %8396  ;;  %v10385_v51 = vpop.permute.xlu1 %3785  ;;  %v1090_v14 = vsel %vm1062_vm2, %v10379_v22, -inf  ;;  %1115 = vmax.xlane.f32.xlu0 %v1114_v0  ;;  %v698_v25 = vadd.f32 %v697_v19, %v10377_v50  ;;  %v539_v19 = vld [vmem:[%s16365_s4 + $0x10] sm:$0xff] }
 0x257   : > { %16777 = vst [vmem:[#allocation123_spill] sm:$0xff] %v10381_v32  ;;  %1091 = vmax.xlane.f32.xlu1 %v1090_v14  ;;  %v10391_v1 = vpop.permute.xlu2 %3799  ;;  %v10404_v32 = vadd.f32 %v695_v61, %v538_v47 }
 0x258   : > { %16778 = vst [vmem:[#allocation124_spill] sm:$0xff] %v10385_v51  ;;  %v10402_v51 = vadd.f32 %v908_v34, %v555_v56  ;;  %v911_v56 = vadd.f32 %v910_v41, %v10410_v24  ;;  %v548_v41 = vld [vmem:[%s16365_s4 + $0x58] sm:$0xff] }
 0x259   : > { %v802_v5 = vpop.f32.mrf.mxu2  ;;  %v1066_v34 = vsel %vm1062_vm2, %v10404_v32, -inf }
 0x25a   : > { %v803_v14 = vadd.f32 %v802_v5, %v10377_v50  ;;  %v1117_v61 = vsel %vm1062_vm2, %v10402_v51, -inf }
 0x25c   : > { %v10414_v9 = vadd.f32 %v803_v14, %v547_v18  ;;  %v913_v47 = vpop.f32.mrf.mxu3  ;;  %v556_v14 = vld [vmem:[%s16365_s4 + $0x98] sm:$0xff] }
 0x25d   : > { %v700_v0 = vpop.f32.mrf.mxu1 }
 0x25e   : > { %v10412_v45 = vpop.permute.xlu0 %8411  ;;  %v10417_v2 = vpop.permute.xlu1 %3791  ;;  %v1093_v5 = vsel %vm1062_vm2, %v10414_v9, -inf  ;;  %1067 = vmax.xlane.f32.xlu0 %v1066_v34  ;;  %v10440_v34 = vadd.f32 %v911_v56, %v556_v14  ;;  %v701_v57 = vadd.f32 %v700_v0, %v10410_v24  ;;  %v557_v0 = vld [vmem:[%s16365_s4 + $0xa0] sm:$0xff] }
 0x25f   : > { %16779 = vst [vmem:[#allocation125_spill] sm:$0xff] %v10412_v45  ;;  %1118 = vmax.xlane.f32.xlu1 %v1117_v61  ;;  %v10426_v18 = vpop.permute.xlu2 %3805  ;;  %1094 = vmax.xlane.f32.xlu2 %v1093_v5  ;;  %v10434_v45 = vadd.f32 %v698_v25, %v539_v19  ;;  %v10445_v5 = vld [vmem:[%s16364_s3 + $0x20] sm:$0xff] }
 0x260   : > { %16780 = vst [vmem:[#allocation126_spill] sm:$0xff] %v10417_v2  ;;  %v914_v54 = vadd.f32 %v913_v47, %v10445_v5 }
 0x261   : > { %v805_v2 = vpop.f32.mrf.mxu2  ;;  %v1069_v19 = vsel %vm1062_vm2, %v10434_v45, -inf }
 0x262   : > { %v806_v61 = vadd.f32 %v805_v2, %v10410_v24  ;;  %v1120_v2 = vsel %vm1062_vm2, %v10440_v34, -inf }
 0x264   : > { %v10449_v43 = vadd.f32 %v806_v61, %v548_v41  ;;  %v540_v41 = vld [vmem:[%s16365_s4 + $0x18] sm:$0xff]  ;;  %v916_v61 = vpop.f32.mrf.mxu3 }
 0x265   : > { %v703_v33 = vpop.f32.mrf.mxu1 }
 0x266   : > { %v10447_v62 = vpop.permute.xlu0 %3783  ;;  %v10451_v25 = vpop.permute.xlu1 %3797  ;;  %v1096_v56 = vsel %vm1062_vm2, %v10449_v43, -inf  ;;  %v704_v49 = vadd.f32 %v703_v33, %v10445_v5  ;;  %v558_v33 = vld [vmem:[%s16365_s4 + $0xa8] sm:$0xff] }
 0x267   : > { %16781 = vst [vmem:[#allocation127_spill] sm:$0xff] %v10447_v62  ;;  %1070 = vmax.xlane.f32.xlu1 %v1069_v19  ;;  %v3812_v14 = vpop.permute.xlu2 %3811  ;;  %1121 = vmax.xlane.f32.xlu2 %v1120_v2  ;;  %v549_v62 = vld [vmem:[%s16365_s4 + $0x60] sm:$0xff]  ;;  %v10472_v2 = vadd.f32 %v701_v57, %v540_v41 }
 0x268   : > { %1097 = vmax.xlane.f32.xlu0 %v1096_v56  ;;  %7982 = vmatpush.xpose.msk.msra.mxu0 %vm633_vm1, %v3812_v14  ;;  %v10477_v56 = vld [vmem:[%s16364_s3 + $0x28] sm:$0xff]  ;;  %v10479_v14 = vadd.f32 %v914_v54, %v557_v0 }
 0x269   : > { %v808_v19 = vpop.f32.mrf.mxu2  ;;  %v917_v39 = vadd.f32 %v916_v61, %v10477_v56  ;;  %v1072_v57 = vsel %vm1062_vm2, %v10472_v2, -inf  ;;  %v542_v61 = vld [vmem:[%s16365_s4 + $0x28] sm:$0xff] }
 0x26a   : > { %v809_v47 = vadd.f32 %v808_v19, %v10445_v5  ;;  %v1123_v54 = vsel %vm1062_vm2, %v10479_v14, -inf }
 0x26c   : > { %v10483_v53 = vadd.f32 %v809_v47, %v549_v62  ;;  %v541_v62 = vld [vmem:[%s16365_s4 + $0x20] sm:$0xff] }
 0x26d   : > { %v706_v44 = vpop.f32.mrf.mxu1  ;;  %v10503_v47 = vadd.f32 %v704_v49, %v541_v62  ;;  %v550_v62 = vld [vmem:[%s16365_s4 + $0x68] sm:$0xff] }
 0x26e   : > { %v10481_v35 = vpop.permute.xlu0 %3789  ;;  %v3804_v27 = vpop.permute.xlu1 %3803  ;;  %v1099_v41 = vsel %vm1062_vm2, %v10483_v53, -inf  ;;  %v707_v19 = vadd.f32 %v706_v44, %v10477_v56 }
 0x26f   : > { %16782 = vst [vmem:[#allocation128_spill] sm:$0xff] %v10481_v35  ;;  %1073 = vmax.xlane.f32.xlu2 %v1072_v57  ;;  %1100 = vmax.xlane.f32.xlu1 %v1099_v41  ;;  %v919_v44 = vpop.f32.mrf.mxu3  ;;  %v10505_v57 = vadd.f32 %v917_v39, %v558_v33  ;;  %v1075_v49 = vsel %vm1062_vm2, %v10503_v47, -inf  ;;  %v543_v33 = vld [vmem:[%s16365_s4 + $0x30] sm:$0xff] }
 0x270   : > { %1124 = vmax.xlane.f32.xlu0 %v1123_v54  ;;  %v10507_v35 = vadd.f32 %v707_v19, %v542_v61 }
 0x271   : > { %v811_v0 = vpop.f32.mrf.mxu2  ;;  %v1126_v39 = vsel %vm1062_vm2, %v10505_v57, -inf }
 0x272   : > { %v812_v13 = vadd.f32 %v811_v0, %v10477_v56  ;;  %v1078_v19 = vsel %vm1062_vm2, %v10507_v35, -inf  ;;  %v551_v0 = vld [vmem:[%s16365_s4 + $0x70] sm:$0xff] }
 0x275   : > { %v709_v41 = vpop.f32.mrf.mxu1 }
 0x276   : > { %v10509_v46 = vpop.permute.xlu0 %3795  ;;  %v3810_v54 = vpop.permute.xlu1 %3809  ;;  %v710_v48 = vadd.f32 %v709_v41, %v10514_v52 }
 0x277   : > { %16783 = vst [vmem:[#allocation129_spill] sm:$0xff] %v10509_v46  ;;  %7983 = vmatpush.xpose.msk.msra.mxu0 %vm633_vm1, %v3810_v54  ;;  %1076 = vmax.xlane.f32.xlu2 %v1075_v49  ;;  %v10535_v54 = vadd.f32 %v812_v13, %v550_v62  ;;  %v922_v46 = vpop.f32.mrf.mxu3 }
 0x278   : > { %1127 = vmax.xlane.f32.xlu1 %v1126_v39  ;;  %1079 = vmax.xlane.f32.xlu0 %v1078_v19  ;;  %v10537_v49 = vadd.f32 %v710_v48, %v543_v33  ;;  %v10542_v39 = vld [vmem:[%s16364_s3 + $0x38] sm:$0xff]  ;;  %v920_v19 = vadd.f32 %v919_v44, %v10514_v52  ;;  %v559_v33 = vld [vmem:[%s16365_s4 + $0xb0] sm:$0xff] }
 0x279   : > { %v814_v61 = vpop.f32.mrf.mxu2  ;;  %v1102_v30 = vsel %vm1062_vm2, %v10535_v54, -inf  ;;  %v923_v62 = vadd.f32 %v922_v46, %v10542_v39  ;;  %v560_v44 = vld [vmem:[%s16365_s4 + $0xb8] sm:$0xff] }
 0x27a   : > { %v815_v41 = vadd.f32 %v814_v61, %v10514_v52  ;;  %v1081_v13 = vsel %vm1062_vm2, %v10537_v49, -inf  ;;  %v10560_v61 = vadd.f32 %v920_v19, %v559_v33  ;;  %v544_v33 = vld [vmem:[%s16365_s4 + $0x38] sm:$0xff] }
 0x27c   : > { %v10544_v8 = vadd.f32 %v815_v41, %v551_v0  ;;  %v10562_v0 = vadd.f32 %v923_v62, %v560_v44 }
 0x27e   : > { %v3802_v23 = vpop.permute.xlu0 %3801  ;;  %v1105_v48 = vsel %vm1062_vm2, %v10544_v8, -inf  ;;  %v1132_v46 = vsel %vm1062_vm2, %v10562_v0, -inf }
 0x27f   : > { %1103 = vmax.xlane.f32.xlu2 %v1102_v30  ;;  %v1129_v30 = vsel %vm1062_vm2, %v10560_v61, -inf }
 0x280   : > { %1082 = vmax.xlane.f32.xlu1 %v1081_v13  ;;  %1106 = vmax.xlane.f32.xlu0 %v1105_v48 }
 0x286   : > { %v3808_v41 = vpop.permute.xlu0 %3807 }
 0x287   : > { %7984 = vmatpush.xpose.msk.msra.mxu0 %vm633_vm1, %v3808_v41  ;;  %1130 = vmax.xlane.f32.xlu2 %v1129_v30 }
 0x288   : > { %1133 = vmax.xlane.f32.xlu0 %v1132_v46 }
 0x28b   : > { %7985 = vmatpush.xpose.msk.msra.mxu0 %vm633_vm1, %v10426_v18 }
 0x28f   : > { %7986 = vmatpush.xpose.msk.msra.mxu0 %vm633_vm1, %v3804_v27  ;;  %v712_v27 = vpop.f32.mrf.mxu1 }
 0x290   : > { %v713_v48 = vadd.f32 %v712_v27, %v10542_v39  ;;  %v563_v27 = vld [vmem:[%s16365_s4 + $0xd0] sm:$0xff] }
 0x292   : > { %v10599_v41 = vadd.f32 %v713_v48, %v544_v33  ;;  %v16785_v48 = vld [vmem:[#allocation11_spill] sm:$0xff] }
 0x293   : > { %7987 = vmatpush.xpose.msk.msra.mxu0 %vm633_vm1, %v3802_v23  ;;  %v16784_v23 = vld [vmem:[#allocation64_spill] sm:$0xff] }
 0x294   : > { %v1084_v30 = vsel %vm1062_vm2, %v10599_v41, -inf }
 0x297   : > { %7988 = vmatpush.xpose.msk.msra.mxu0 %vm633_vm1, %v10391_v1  ;;  %v817_v1 = vpop.f32.mrf.mxu2  ;;  %v1006_v18 = vpop.f32.mrf.mxu1 }
 0x298   : > { %v818_v19 = vadd.f32 %v817_v1, %v10542_v39  ;;  %v1007_v33 = vadd.f32 %v1006_v18, %v10289_v31 }
 0x299   : > { %3894 = vrot.lane.b32.xlu1 %v16717_v7, %s9203_s23 }
 0x29b   : > { %7989 = vmatpush.xpose.msk.msra.mxu0 %vm633_vm1, %v10451_v25  ;;  %v552_v25 = vld [vmem:[%s16365_s4 + $0x78] sm:$0xff] }
 0x29c   : > { %3892 = vrot.lane.b32.xlu0 %v16705_v10, %s9203_s23  ;;  %v10591_v13 = vadd.f32 %v818_v19, %v552_v25 }
 0x29e   : > { %v1108_v44 = vsel %vm1062_vm2, %v10591_v13, -inf }
 0x29f   : > { %3890 = vrot.lane.b32.xlu2 %v16696_v42, %s9203_s23  ;;  %v1009_v62 = vpop.f32.mrf.mxu1 }
 0x2a4   : > { %3898 = vrot.lane.b32.xlu0 %v16728_v21, %s9203_s23  ;;  %v10633_v21 = vpop.permute.xlu0 %3886 }
 0x2a5   : > { %16787 = vst [vmem:[#allocation130_spill] sm:$0xff] %v10633_v21 }
 0x2a7   : > { %v1012_v46 = vpop.f32.mrf.mxu1 }
 0x2a8   : > { %v1013_v1 = vadd.f32 %v1012_v46, %v10377_v50  ;;  %v16786_v50 = vld [vmem:[#allocation34_spill] sm:$0xff]  ;;  %v1010_v46 = vadd.f32 %v1009_v62, %v10347_v60 }
 0x2aa   : > { %v10607_v19 = vadd.f32 %v1013_v1, %v563_v27 }
 0x2ac   : > { %3904 = vrot.lane.b32.xlu0 %v16784_v23, %s9204_s25  ;;  %v1141_v25 = vsel %vm1062_vm2, %v10607_v19, -inf }
 0x2b5   : > { %v10628_v27 = vpop.xlane.xlu2 %1112 }
 0x2be   : > { %v1065_v62 = vpop.xlane.xlu2 %1064 }
 0x2bf   : > { %v1159_v21 = vsub.f32 %v10326_v16, %v1065_v62  ;;  %v16791_v62 = vld [vmem:[#allocation3_spill] sm:$0xff] }
 0x2c3   : > { %1109 = vmax.xlane.f32.xlu1 %v1108_v44  ;;  %v10620_v44 = vpop.f32.mrf.mxu1 }
 0x2c8   : > { %1085 = vmax.xlane.f32.xlu2 %v1084_v30  ;;  %v561_v30 = vld [vmem:[%s16365_s4 + $0xc0] sm:$0xff] }
 0x2c9   : > { %v10626_v1 = vadd.f32 %v1007_v33, %v561_v30  ;;  %v10645_v33 = vpop.xlane.xlu0 %1088 }
 0x2cb   : > { %v1135_v31 = vsel %vm1062_vm2, %v10626_v1, -inf  ;;  %v10641_v7 = vpop.f32.mrf.mxu1 }
 0x2d6   : > { %1142 = vmax.xlane.f32.xlu0 %v1141_v25  ;;  %v562_v25 = vld [vmem:[%s16365_s4 + $0xc8] sm:$0xff] }
 0x2d7   : > { %v10637_v18 = vadd.f32 %v1010_v46, %v562_v25  ;;  %v10649_v46 = vpop.xlane.xlu2 %1094  ;;  %v566_v25 = vld [vmem:[%s16365_s4 + $0xe8] sm:$0xff] }
 0x2d9   : > { %16788 = vst [vmem:[#allocation131_spill] sm:$0xff] %v10637_v18  ;;  %v1138_v60 = vsel %vm1062_vm2, %v10637_v18, -inf }
 0x2dc   : > { %3900 = vrot.lane.b32.xlu1 %v16733_v3, %s9203_s23  ;;  %v10639_v3 = vpop.permute.xlu1 %3888 }
 0x2dd   : > { %16789 = vst [vmem:[#allocation132_spill] sm:$0xff] %v10639_v3  ;;  %v1191_v3 = vmul.f32 1.442695, %v1159_v21 }
 0x2df   : > { %8582 = vpow2.f32 %v1191_v3 }
 0x2e0   : > { %3896 = vrot.lane.b32.xlu2 %v16723_v63, %s9203_s23  ;;  %v1021_v63 = vpop.f32.mrf.mxu1 }
 0x2e1   : > { %v1022_v10 = vadd.f32 %v1021_v63, %v10477_v56  ;;  %v10661_v63 = vpop.xlane.xlu2 %1121 }
 0x2e4   : > { %v1092_v30 = vpop.xlane.xlu1 %1091 }
 0x2e5   : > { %v1168_v42 = vsub.f32 %v10379_v22, %v1092_v30  ;;  %v16793_v30 = vld [vmem:[#allocation23_spill] sm:$0xff] }
 0x2e7   : > { %v1209_v56 = vmul.f32 1.442695, %v1168_v42 }
 0x2e9   : > { %8584 = vpow2.f32 %v1209_v56 }
 0x2ea   : > { %3910 = vrot.lane.b32.xlu0 %v16785_v48, %s9204_s25 }
 0x2ec   : > { %v1119_v48 = vpop.xlane.xlu1 %1118 }
 0x2ed   : > { %v1177_v22 = vsub.f32 %v10402_v51, %v1119_v48 }
 0x2ef   : > { %v1227_v42 = vmul.f32 1.442695, %v1177_v22 }
 0x2f1   : > { %8586 = vpow2.f32 %v1227_v42 }
 0x2f2   : > { %3916 = vrot.lane.b32.xlu0 %v16786_v50, %s9204_s25  ;;  %v10667_v50 = vpop.eup %8582 }
 0x2f3   : > { %v1255_v3 = vsel %vm1062_vm2, %v10667_v50, 0.0 }
 0x2f4   : > { %v10669_v21 = vpop.xlane.xlu1 %1070 }
 0x2fc   : > { %v1101_v51 = vpop.xlane.xlu1 %1100 }
 0x304   : > { %v1128_v42 = vpop.xlane.xlu1 %1127 }
 0x306   : > { %1136 = vmax.xlane.f32.xlu1 %v1135_v31  ;;  %v10654_v31 = vpop.xlane.xlu0 %1115 }
 0x309   : > { %1139 = vmax.xlane.f32.xlu2 %v1138_v60  ;;  %v10656_v60 = vadd.f32 %v1022_v10, %v566_v25  ;;  %v16792_v10 = vld [vmem:[#allocation60_spill] sm:$0xff]  ;;  %v1074_v25 = vpop.xlane.xlu2 %1073 }
 0x30a   : > { %v1162_v56 = vsub.f32 %v10472_v2, %v1074_v25  ;;  %v1180_v25 = vsub.f32 %v10505_v57, %v1128_v42  ;;  %v1016_v57 = vadd.f32 %v10620_v44, %v10410_v24 }
 0x30b   : > { %16790 = vst [vmem:[#allocation133_spill] sm:$0xff] %v10656_v60  ;;  %v1150_v16 = vsel %vm1062_vm2, %v10656_v60, -inf  ;;  %v16794_v60 = vld [vmem:[#allocation7_spill] sm:$0xff] }
 0x30c   : > { %v1197_v22 = vmul.f32 1.442695, %v1162_v56 }
 0x30e   : > { %v10665_v23 = vpop.xlane.xlu0 %1067  ;;  %8588 = vpow2.f32 %v1197_v22 }
 0x31c   : > { %1151 = vmax.xlane.f32.xlu0 %v1150_v16  ;;  %v10678_v16 = vpop.eup %8584 }
 0x31d   : > { %v1282_v48 = vsel %vm1062_vm2, %v10678_v16, 0.0 }
 0x31f   : > { %3906 = vrot.lane.b32.xlu1 %v16791_v62, %s9204_s25  ;;  %v10680_v62 = vpop.xlane.xlu0 %1097 }
 0x321   : > { %3902 = vrot.lane.b32.xlu2 %v16792_v10, %s9204_s25 }
 0x324   : > { %1256 = vadd.xlane.f32.xlu0 %v1255_v3  ;;  %v10687_v3 = vpop.eup %8586 }
 0x325   : > { %v1309_v18 = vsel %vm1062_vm2, %v10687_v3, 0.0  ;;  %v10694_v2 = vpop.eup %8588 }
 0x326   : > { %v1264_v56 = vsel %vm1062_vm2, %v10694_v2, 0.0 }
 0x327   : > { %3912 = vrot.lane.b32.xlu1 %v16793_v30, %s9204_s25  ;;  %v1171_v30 = vsub.f32 %v10483_v53, %v1101_v51  ;;  %v10690_v10 = vpop.xlane.xlu0 %1124  ;;  %v1233_v53 = vmul.f32 1.442695, %v1180_v25  ;;  %v1083_v51 = vpop.xlane.xlu1 %1082  ;;  %v564_v25 = vld [vmem:[%s16365_s4 + $0xd8] sm:$0xff] }
 0x328   : > { %v10722_v24 = vadd.f32 %v1016_v57, %v564_v25 }
 0x329   : > { %3908 = vrot.lane.b32.xlu2 %v16794_v60, %s9204_s25  ;;  %v1215_v60 = vmul.f32 1.442695, %v1171_v30 }
 0x32b   : > { %8590 = vpow2.f32 %v1215_v60 }
 0x32c   : > { %1283 = vadd.xlane.f32.xlu0 %v1282_v48  ;;  %8592 = vpow2.f32 %v1233_v53  ;;  %v1019_v53 = vadd.f32 %v10641_v7, %v10445_v5 }
 0x32f   : > { %v10699_v48 = vpop.xlane.xlu0 %1079 }
 0x331   : > { %v10701_v22 = vpop.eup %8590 }
 0x332   : > { %v1291_v30 = vsel %vm1062_vm2, %v10701_v22, 0.0 }
 0x334   : > { %1310 = vadd.xlane.f32.xlu0 %v1309_v18  ;;  %v1165_v18 = vsub.f32 %v10537_v49, %v1083_v51  ;;  %v565_v49 = vld [vmem:[%s16365_s4 + $0xe0] sm:$0xff] }
 0x335   : > { %v10724_v44 = vadd.f32 %v1019_v53, %v565_v49  ;;  %v16799_v53 = vld [vmem:[#allocation27_spill] sm:$0xff] }
 0x336   : > { %v1203_v60 = vmul.f32 1.442695, %v1165_v18  ;;  %v1144_v18 = vsel %vm1062_vm2, %v10722_v24, -inf }
 0x337   : > { %v10708_v42 = vpop.xlane.xlu0 %1106  ;;  %16795 = vst [vmem:[#allocation134_spill] sm:$0xff] %v10724_v44  ;;  %v1147_v5 = vsel %vm1062_vm2, %v10724_v44, -inf }
 0x338   : > { %8594 = vpow2.f32 %v1203_v60 }
 0x33c   : > { %1265 = vadd.xlane.f32.xlu0 %v1264_v56  ;;  %v10710_v56 = vpop.eup %8592 }
 0x33d   : > { %v1318_v51 = vsel %vm1062_vm2, %v10710_v56, 0.0 }
 0x33f   : > { %v10730_v7 = vpop.xlane.xlu0 %1133 }
 0x344   : > { %1292 = vadd.xlane.f32.xlu0 %v1291_v30  ;;  %v10728_v30 = vpop.eup %8594 }
 0x345   : > { %16796 = vst [vmem:[#allocation135_spill] sm:$0xff] %v10728_v30  ;;  %v1273_v60 = vsel %vm1062_vm2, %v10728_v30, 0.0 }
 0x347   : > { %v10736_v57 = vpop.permute.xlu0 %3892 }
 0x348   : > { %16797 = vst [vmem:[#allocation136_spill] sm:$0xff] %v10736_v57 }
 0x34c   : > { %1319 = vadd.xlane.f32.xlu0 %v1318_v51  ;;  %v10750_v51 = vpop.permute.xlu1 %3894 }
 0x34d   : > { %16801 = vst [vmem:[#allocation139_spill] sm:$0xff] %v10750_v51 }
 0x34f   : > { %v10738_v25 = vpop.permute.xlu0 %3898 }
 0x350   : > { %16798 = vst [vmem:[#allocation137_spill] sm:$0xff] %v10738_v25 }
 0x351   : > { %1145 = vmax.xlane.f32.xlu1 %v1144_v18 }
 0x352   : > { %1148 = vmax.xlane.f32.xlu2 %v1147_v5 }
 0x354   : > { %1274 = vadd.xlane.f32.xlu0 %v1273_v60  ;;  %v1110_v5 = vpop.xlane.xlu1 %1109  ;;  %v1024_v60 = vpop.f32.mrf.mxu1 }
 0x355   : > { %v1174_v44 = vsub.f32 %v10591_v13, %v1110_v5  ;;  %v1025_v51 = vadd.f32 %v1024_v60, %v10514_v52  ;;  %v1176_v13 = vsub.f32 %v10372_v37, %v10654_v31 }
 0x357   : > { %v10746_v49 = vpop.permute.xlu0 %3904 }
 0x358   : > { %16800 = vst [vmem:[#allocation138_spill] sm:$0xff] %v10746_v49 }
 0x35c   : > { %v10756_v57 = vpop.permute.xlu1 %3900 }
 0x35d   : > { %16803 = vst [vmem:[#allocation141_spill] sm:$0xff] %v10756_v57  ;;  %v568_v57 = vld [vmem:[%s16365_s4 + $0xf8] sm:$0xff] }
 0x35f   : > { %v10752_v18 = vpop.xlane.xlu0 %1142 }
 0x367   : > { %v10754_v25 = vpop.permute.xlu0 %3910 }
 0x368   : > { %3995 = vrot.lane.b32.xlu0 %v9807_v12, %s9203_s23  ;;  %16802 = vst [vmem:[#allocation140_spill] sm:$0xff] %v10754_v25  ;;  %v1175_v12 = vsub.f32 %v10300_v15, %v10628_v27  ;;  %v567_v15 = vld [vmem:[%s16365_s4 + $0xf0] sm:$0xff]  ;;  %v1221_v27 = vmul.f32 1.442695, %v1174_v44 }
 0x369   : > { %v10777_v52 = vadd.f32 %v1025_v51, %v567_v15 }
 0x36a   : > { %3991 = vrot.lane.b32.xlu1 %v9804_v28, %s9203_s23  ;;  %3914 = vrot.lane.b32.xlu2 %v16799_v53, %s9204_s25  ;;  %v1027_v28 = vpop.f32.mrf.mxu1  ;;  %v1223_v30 = vmul.f32 1.442695, %v1175_v12 }
 0x36b   : > { %v1028_v49 = vadd.f32 %v1027_v28, %v10542_v39  ;;  %v1160_v39 = vsub.f32 %v10404_v32, %v10665_v23  ;;  %v1153_v37 = vsel %vm1062_vm2, %v10777_v52, -inf  ;;  %v1161_v23 = vsub.f32 %v10434_v45, %v10669_v21 }
 0x36c   : > { %8596 = vpow2.f32 %v1223_v30 }
 0x36d   : > { %8598 = vpow2.f32 %v1221_v27  ;;  %v1195_v45 = vmul.f32 1.442695, %v1161_v23 }
 0x36f   : > { %v10760_v53 = vpop.permute.xlu0 %3916 }
 0x370   : > { %4001 = vrot.lane.b32.xlu0 %v16708_v29, %s9203_s23  ;;  %16804 = vst [vmem:[#allocation142_spill] sm:$0xff] %v10760_v53  ;;  %v1167_v29 = vsub.f32 %v10354_v20, %v10645_v33  ;;  %v10775_v20 = vadd.f32 %v1028_v49, %v568_v57  ;;  %v1225_v33 = vmul.f32 1.442695, %v1176_v13 }
 0x372   : > { %v1207_v53 = vmul.f32 1.442695, %v1167_v29  ;;  %16805 = vst [vmem:[#allocation143_spill] sm:$0xff] %v10775_v20  ;;  %v1156_v29 = vsel %vm1062_vm2, %v10775_v20, -inf  ;;  %v10788_v44 = vpop.eup %8596 }
 0x373   : > { %v10790_v30 = vpop.eup %8598  ;;  %v1303_v51 = vsel %vm1062_vm2, %v10788_v44, 0.0 }
 0x374   : > { %8600 = vpow2.f32 %v1207_v53  ;;  %v1169_v53 = vsub.f32 %v10414_v9, %v10649_v46  ;;  %v1077_v9 = vpop.xlane.xlu2 %1076 }
 0x375   : > { %8602 = vpow2.f32 %v1225_v33 }
 0x376   : > { %v1211_v15 = vmul.f32 1.442695, %v1169_v53 }
 0x379   : > { %v1137_v25 = vpop.xlane.xlu1 %1136 }
 0x37a   : > { %v1183_v12 = vsub.f32 %v10626_v1, %v1137_v25  ;;  %v1193_v1 = vmul.f32 1.442695, %v1160_v39  ;;  %v10792_v57 = vpop.eup %8600  ;;  %v1300_v25 = vsel %vm1062_vm2, %v10790_v30, 0.0 }
 0x37b   : > { %v1279_v49 = vsel %vm1062_vm2, %v10792_v57, 0.0  ;;  %v10804_v5 = vpop.eup %8602 }
 0x37c   : > { %v1239_v31 = vmul.f32 1.442695, %v1183_v12  ;;  %v1306_v46 = vsel %vm1062_vm2, %v10804_v5, 0.0  ;;  %v1170_v12 = vsub.f32 %v10449_v43, %v10680_v62 }
 0x37e   : > { %8604 = vpow2.f32 %v1239_v31 }
 0x384   : > { %v10806_v60 = vpop.eup %8604 }
 0x385   : > { %16806 = vst [vmem:[#allocation144_spill] sm:$0xff] %v10806_v60  ;;  %v1327_v33 = vsel %vm1062_vm2, %v10806_v60, 0.0 }
 0x38f   : > { %v10780_v28 = vpop.xlane.xlu0 %1151 }
 0x393   : > { %1157 = vmax.xlane.f32.xlu2 %v1156_v29  ;;  %v1178_v29 = vsub.f32 %v10440_v34, %v10661_v63 }
 0x394   : > { %1154 = vmax.xlane.f32.xlu1 %v1153_v37 }
 0x395   : > { %v1229_v62 = vmul.f32 1.442695, %v1178_v29 }
 0x397   : > { %v1257_v32 = vpop.xlane.xlu0 %1256 }
 0x398   : > { %8606 = vrcp.f32 %v1257_v32  ;;  %v1362_v37 = vand.u32 2147483648, %v1257_v32  ;;  %v1360_v23 = vand.u32 2147483647, %v1257_v32  ;;  %vm1356_vm4 = vweird.f32 %v1257_v32 }
 0x399   : > { %8608 = vpow2.f32 %v1193_v1 }
 0x39a   : > { %1301 = vadd.xlane.f32.xlu0 %v1300_v25  ;;  %8610 = vpow2.f32 %v1195_v45  ;;  %v1213_v25 = vmul.f32 1.442695, %v1170_v12  ;;  %v1363_v53 = vor.u32 1.1754944e-38, %v1362_v37  ;;  %vm1361_vm6 = vcmp.eq.f32.partialorder %v1360_v23, 8.507059e+37  ;;  %v16807_v37 = vld [vmem:[#allocation48_spill] sm:$0xff] }
 0x39b   : > { %1280 = vadd.xlane.f32.xlu2 %v1279_v49  ;;  %8612 = vpow2.f32 %v1211_v15  ;;  %v1179_v45 = vsub.f32 %v10479_v14, %v10690_v10 }
 0x39c   : > { %1304 = vadd.xlane.f32.xlu1 %v1303_v51  ;;  %8614 = vpow2.f32 %v1213_v25 }
 0x39d   : > { %8616 = vpow2.f32 %v1229_v62  ;;  %v1231_v14 = vmul.f32 1.442695, %v1179_v45 }
 0x39e   : > { %v8607_v21 = vpop.eup %8606 }
 0x39f   : > { %v10808_v27 = vpop.eup %8608  ;;  %v1352_v13 = vmul.f32 %v8607_v21, %v1257_v32  ;;  %vm1357_vm3 = vweird.f32 %v8607_v21  ;;  %v1104_v32 = vpop.xlane.xlu2 %1103  ;;  %8618 = vpow2.f32 %v1231_v14 }
 0x3a0   : > { %v1258_v31 = vsel %vm1062_vm2, %v10808_v27, 0.0  ;;  %vm1358_vm5 = vmor %vm1356_vm4, %vm1357_vm3  ;;  %v10820_v49 = vpop.eup %8610 }
 0x3a1   : > { %v1353_v39 = vsub.f32 1.0, %v1352_v13  ;;  %v10822_v34 = vpop.eup %8612  ;;  %v1163_v13 = vsub.f32 %v10503_v47, %v1077_v9  ;;  %v1164_v47 = vsub.f32 %v10507_v35, %v10699_v48  ;;  %v1172_v9 = vsub.f32 %v10535_v54, %v1104_v32 }
 0x3a2   : > { %1328 = vadd.xlane.f32.xlu0 %v1327_v33  ;;  %v1173_v48 = vsub.f32 %v10544_v8, %v10708_v42  ;;  %v16809_v8 = vld [vmem:[#allocation5_spill] sm:$0xff] }
 0x3a3   : > { %v1354_v1 = vmul.f32 %v8607_v21, %v1353_v39  ;;  %1307 = vadd.xlane.f32.xlu2 %v1306_v46  ;;  %v1261_v46 = vsel %vm1062_vm2, %v10820_v49, 0.0  ;;  %v1199_v10 = vmul.f32 1.442695, %v1163_v13  ;;  %v1217_v29 = vmul.f32 1.442695, %v1172_v9 }
 0x3a4   : > { %1259 = vadd.xlane.f32.xlu1 %v1258_v31  ;;  %v1219_v23 = vmul.f32 1.442695, %v1173_v48  ;;  %v16813_v48 = vld [vmem:[#allocation77_spill] sm:$0xff] }
 0x3a5   : > { %v1355_v43 = vadd.f32 %v8607_v21, %v1354_v1  ;;  %8620 = vpow2.f32 %v1199_v10  ;;  %v10908_v10 = vpop.xlane.xlu0 %1283 }
 0x3a6   : > { %vm1491_vm9 = vweird.f32 %v10908_v10 }
 0x3a7   : > { %v1359_v51 = vsel %vm1358_vm5, %v8607_v21, %v1355_v43  ;;  %v1285_v21 = vsel %vm1062_vm2, %v10822_v34, 0.0  ;;  %v1131_v33 = vpop.xlane.xlu2 %1130  ;;  %v1182_v43 = vsub.f32 %v10562_v0, %v10730_v7 }
 0x3a8   : > { %v1364_v63 = vsel %vm1361_vm6, %v1363_v53, %v1359_v51 }
 0x3a9   : > { %v1365_v15 = vmul.f32 %v10667_v50, %v1364_v63  ;;  %v10835_v50 = vpop.eup %8614  ;;  %v1237_v51 = vmul.f32 1.442695, %v1182_v43 }
 0x3aa   : > { %v10837_v12 = vpop.eup %8616 }
 0x3ab   : > { %7838 = vmatmul.msk.f32.vlgmr.msra.gmra.mxu2 %vm1062_vm2, %v1365_v15  ;;  %1262 = vadd.xlane.f32.xlu2 %v1261_v46  ;;  %v1312_v39 = vsel %vm1062_vm2, %v10837_v12, 0.0  ;;  %v10852_v35 = vpop.eup %8618 }
 0x3ac   : > { %7910 = vmatpush.xpose.msk.msra.mxu2 %vm633_vm1, %v10202_v36  ;;  %1286 = vadd.xlane.f32.xlu1 %v1285_v21  ;;  %v1288_v36 = vsel %vm1062_vm2, %v10835_v50, 0.0  ;;  %v10854_v54 = vpop.eup %8620  ;;  %v1315_v31 = vsel %vm1062_vm2, %v10852_v35, 0.0 }
 0x3ad   : > { %v1267_v1 = vsel %vm1062_vm2, %v10854_v54, 0.0 }
 0x3af   : > { %v10867_v25 = vpop.permute.xlu2 %3890 }
 0x3b0   : > { %7911 = vmatpush.xpose.msk.msra.mxu2 %vm633_vm1, %v10188_v59  ;;  %v1201_v59 = vmul.f32 1.442695, %v1164_v47  ;;  %16808 = vst [vmem:[#allocation145_spill] sm:$0xff] %v10867_v25 }
 0x3b2   : > { %8622 = vpow2.f32 %v1201_v59  ;;  %v16812_v59 = vld [vmem:[#allocation72_spill] sm:$0xff] }
 0x3b3   : > { %1289 = vadd.xlane.f32.xlu2 %v1288_v36  ;;  %8624 = vpow2.f32 %v1217_v29 }
 0x3b4   : > { %7912 = vmatpush.xpose.msk.msra.mxu2 %vm633_vm1, %v10109_v4  ;;  %1313 = vadd.xlane.f32.xlu1 %v1312_v39  ;;  %v1181_v4 = vsub.f32 %v10560_v61, %v1131_v33  ;;  %8626 = vpow2.f32 %v1219_v23  ;;  %v10918_v39 = vpop.xlane.xlu0 %1310 }
 0x3b5   : > { %vm1626_vm10 = vweird.f32 %v10918_v39 }
 0x3b6   : > { %4007 = vrot.lane.b32.xlu0 %v16807_v37, %s9204_s25 }
 0x3b8   : > { %7913 = vmatpush.xpose.msk.msra.mxu2 %vm633_vm1, %v10186_v58  ;;  %v1235_v58 = vmul.f32 1.442695, %v1181_v4  ;;  %v10871_v42 = vpop.eup %8622 }
 0x3b9   : > { %v10873_v61 = vpop.eup %8624  ;;  %v1270_v62 = vsel %vm1062_vm2, %v10871_v42, 0.0 }
 0x3ba   : > { %8628 = vpow2.f32 %v1235_v58  ;;  %v1294_v53 = vsel %vm1062_vm2, %v10873_v61, 0.0  ;;  %v10887_v63 = vpop.eup %8626 }
 0x3bb   : > { %1316 = vadd.xlane.f32.xlu2 %v1315_v31  ;;  %8630 = vpow2.f32 %v1237_v51  ;;  %v1297_v0 = vsel %vm1062_vm2, %v10887_v63, 0.0  ;;  %v16814_v31 = vld [vmem:[#allocation26_spill] sm:$0xff] }
 0x3bc   : > { %7914 = vmatpush.xpose.msk.msra.mxu2 %vm633_vm1, %v10172_v40  ;;  %1268 = vadd.xlane.f32.xlu1 %v1267_v1  ;;  %v10879_v40 = vpop.permute.xlu1 %3906  ;;  %v10926_v33 = vpop.xlane.xlu0 %1265 }
 0x3bd   : > { %vm1401_vm14 = vweird.f32 %v10926_v33 }
 0x3be   : > { %4013 = vrot.lane.b32.xlu0 %v16809_v8, %s9204_s25 }
 0x3c0   : > { %7915 = vmatpush.xpose.msk.msra.mxu2 %vm633_vm1, %v10079_v38  ;;  %v1086_v38 = vpop.xlane.xlu2 %1085  ;;  %v10889_v45 = vpop.eup %8628 }
 0x3c1   : > { %v10899_v15 = vpop.eup %8630 }
 0x3c2   : > { %v1324_v32 = vsel %vm1062_vm2, %v10899_v15, 0.0 }
 0x3c3   : > { %1271 = vadd.xlane.f32.xlu2 %v1270_v62 }
 0x3c4   : > { %7916 = vmatpush.xpose.msk.msra.mxu2 %vm633_vm1, %v10170_v55  ;;  %1295 = vadd.xlane.f32.xlu1 %v1294_v53  ;;  %v10895_v7 = vpop.permute.xlu1 %3912  ;;  %v1321_v55 = vsel %vm1062_vm2, %v10889_v45, 0.0  ;;  %v10943_v23 = vpop.xlane.xlu0 %1292 }
 0x3c8   : > { %7917 = vmatpush.xpose.msk.msra.mxu2 %vm633_vm1, %v10153_v17  ;;  %v10901_v13 = vpop.permute.xlu2 %3896 }
 0x3c9   : > { %16810 = vst [vmem:[#allocation146_spill] sm:$0xff] %v10901_v13 }
 0x3cb   : > { %1298 = vadd.xlane.f32.xlu2 %v1297_v0  ;;  %v1166_v0 = vsub.f32 %v10599_v41, %v1086_v38 }
 0x3cc   : > { %1322 = vadd.xlane.f32.xlu1 %v1321_v55  ;;  %v1146_v46 = vpop.xlane.xlu1 %1145 }
 0x3cd   : > { %v1186_v17 = vsub.f32 %v10722_v24, %v1146_v46 }
 0x3cf   : > { %v1245_v14 = vmul.f32 1.442695, %v1186_v17 }
 0x3d0   : > { %v10906_v21 = vpop.xlane.xlu2 %1139 }
 0x3d1   : > { %8632 = vpow2.f32 %v1245_v14  ;;  %v16816_v14 = vld [vmem:[#allocation84_spill] sm:$0xff] }
 0x3d2   : > { %8634 = vrcp.f32 %v10908_v10 }
 0x3d3   : > { %1325 = vadd.xlane.f32.xlu2 %v1324_v32  ;;  %8636 = vrcp.f32 %v10918_v39  ;;  %v1185_v32 = vsub.f32 %v10607_v19, %v10752_v18  ;;  %v1497_v18 = vand.u32 2147483648, %v10908_v10 }
 0x3d4   : > { %8638 = vrcp.f32 %v10926_v33 }
 0x3d5   : > { %8640 = vrcp.f32 %v10943_v23  ;;  %v1243_v41 = vmul.f32 1.442695, %v1185_v32 }
 0x3d7   : > { %v10912_v9 = vpop.eup %8632 }
 0x3d8   : > { %v10910_v47 = vpop.permute.xlu2 %3902  ;;  %16811 = vst [vmem:[#allocation147_spill] sm:$0xff] %v10912_v9  ;;  %v1336_v36 = vsel %vm1062_vm2, %v10912_v9, 0.0  ;;  %v10937_v4 = vpop.eup %8634 }
 0x3d9   : > { %v10941_v1 = vpop.eup %8636  ;;  %v1487_v53 = vmul.f32 %v10937_v4, %v10908_v10  ;;  %vm1492_vm7 = vweird.f32 %v10937_v4 }
 0x3da   : > { %v10949_v62 = vpop.eup %8638  ;;  %v1622_v51 = vmul.f32 %v10941_v1, %v10918_v39  ;;  %vm1627_vm8 = vweird.f32 %v10941_v1  ;;  %vm10998_vm11 = vmor %vm1491_vm9, %vm1492_vm7  ;;  %vm1536_vm7 = vweird.f32 %v10943_v23 }
 0x3db   : > { %v1397_v55 = vmul.f32 %v10949_v62, %v10926_v33  ;;  %v1488_v46 = vsub.f32 1.0, %v1487_v53  ;;  %v16819_v53 = vld [vmem:[#allocation107_spill] sm:$0xff]  ;;  %vm1402_vm12 = vweird.f32 %v10949_v62  ;;  %vm11005_vm13 = vmor %vm1626_vm10, %vm1627_vm8 }
 0x3dc   : > { %v10947_v43 = vpop.permute.xlu1 %3991  ;;  %v1623_v17 = vsub.f32 1.0, %v1622_v51  ;;  %v1498_v51 = vor.u32 1.1754944e-38, %v1497_v18  ;;  %vm11027_vm3 = vmor %vm1401_vm14, %vm1402_vm12 }
 0x3dd   : > { %16815 = vst [vmem:[#allocation148_spill] sm:$0xff] %v10947_v43  ;;  %v1205_v43 = vmul.f32 1.442695, %v1166_v0  ;;  %v1398_v13 = vsub.f32 1.0, %v1397_v55  ;;  %v1489_v38 = vmul.f32 %v10937_v4, %v1488_v46  ;;  %v16820_v55 = vld [vmem:[#allocation112_spill] sm:$0xff]  ;;  %v10980_v46 = vpop.xlane.xlu0 %1319 }
 0x3de   : > { %v1624_v19 = vmul.f32 %v10941_v1, %v1623_v17 }
 0x3df   : > { %8642 = vpow2.f32 %v1205_v43  ;;  %v1399_v32 = vmul.f32 %v10949_v62, %v1398_v13  ;;  %v1490_v17 = vadd.f32 %v10937_v4, %v1489_v38  ;;  %v1632_v13 = vand.u32 2147483648, %v10918_v39 }
 0x3e0   : > { %v10922_v24 = vpop.permute.xlu2 %3908  ;;  %8644 = vpow2.f32 %v1243_v41  ;;  %v1625_v43 = vadd.f32 %v10941_v1, %v1624_v19  ;;  %v1495_v38 = vand.u32 2147483647, %v10908_v10 }
 0x3e1   : > { %8646 = vrcp.f32 %v10980_v46  ;;  %v1400_v19 = vadd.f32 %v10949_v62, %v1399_v32  ;;  %v1494_v10 = vsel %vm10998_vm11, %v10937_v4, %v1490_v17  ;;  %v1405_v32 = vand.u32 2147483647, %v10926_v33 }
 0x3e2   : > { %v1633_v4 = vor.u32 1.1754944e-38, %v1632_v13  ;;  %vm1496_vm15 = vcmp.eq.f32.partialorder %v1495_v38, 8.507059e+37  ;;  %v1540_v13 = vand.u32 2147483647, %v10943_v23  ;;  %v1542_v38 = vand.u32 2147483648, %v10943_v23 }
 0x3e3   : > { %vm1406_vm5 = vcmp.eq.f32.partialorder %v1405_v32, 8.507059e+37 }
 0x3e4   : > { %vm11068_vm8 = vcmp.eq.f32.partialorder %v1540_v13, 8.507059e+37 }
 0x3e5   : > { %3997 = vrot.lane.b32.xlu1 %v9826_v11, %s9203_s23 }
 0x3e8   : > { %1337 = vadd.xlane.f32.xlu0 %v1336_v36  ;;  %v10930_v29 = vpop.xlane.xlu2 %1148  ;;  %v10963_v36 = vpop.eup %8640 }
 0x3e9   : > { %v1532_v0 = vmul.f32 %v10963_v36, %v10943_v23  ;;  %v11014_v9 = vpop.eup %8642  ;;  %vm1537_vm6 = vweird.f32 %v10963_v36 }
 0x3ea   : > { %v11022_v20 = vpop.eup %8644  ;;  %vm11080_vm9 = vmor %vm1536_vm7, %vm1537_vm6 }
 0x3eb   : > { %3993 = vrot.lane.b32.xlu2 %v9789_v26, %s9203_s23  ;;  %v1533_v41 = vsub.f32 1.0, %v1532_v0  ;;  %v11038_v37 = vpop.eup %8646 }
 0x3ed   : > { %4003 = vrot.lane.b32.xlu1 %v16718_v6, %s9203_s23  ;;  %v16818_v6 = vld [vmem:[#allocation105_spill] sm:$0xff]  ;;  %v1534_v17 = vmul.f32 %v10963_v36, %v1533_v41  ;;  %v1276_v41 = vsel %vm1062_vm2, %v11014_v9, 0.0 }
 0x3ee   : > { %16826 = vst [vmem:[#allocation105_spill] sm:$0xff] %v11022_v20 }
 0x3f0   : > { %v10945_v58 = vpop.permute.xlu2 %3914 }
 0x3f3   : > { %3999 = vrot.lane.b32.xlu2 %v16812_v59, %s9203_s23  ;;  %v16821_v59 = vld [vmem:[#allocation131_spill] sm:$0xff] }
 0x3fb   : > { %4005 = vrot.lane.b32.xlu2 %v16813_v48, %s9203_s23 }
 0x3fc   : > { %4019 = vrot.lane.b32.xlu0 %v16814_v31, %s9204_s25  ;;  %v1407_v31 = vand.u32 2147483648, %v10926_v33  ;;  %v1404_v33 = vsel %vm11027_vm3, %v10949_v62, %v1400_v19  ;;  %v1535_v19 = vadd.f32 %v10963_v36, %v1534_v17 }
 0x404   : > { %4098 = vrot.lane.b32.xlu0 %v16816_v14, %s9203_s23  ;;  %v1184_v14 = vsub.f32 %v16821_v59, %v10906_v21  ;;  %v1630_v59 = vand.u32 2147483647, %v10918_v39  ;;  %v1629_v39 = vsel %vm11005_vm13, %v10941_v1, %v1625_v43  ;;  %v1499_v43 = vsel %vm1496_vm15, %v1498_v51, %v1494_v10 }
 0x405   : > { %v1408_v21 = vor.u32 1.1754944e-38, %v1407_v31  ;;  %v11046_v51 = vsel %vm1062_vm2, %v11022_v20, 0.0  ;;  %v11049_v62 = vmul.f32 %v10678_v16, %v1499_v43  ;;  %v1677_v16 = vand.u32 2147483648, %v10980_v46 }
 0x406   : > { %v10967_v48 = vpop.xlane.xlu2 %1157  ;;  %vm1631_vm4 = vcmp.eq.f32.partialorder %v1630_v59, 8.507059e+37  ;;  %v11040_v8 = vmul.f32 1.442695, %v1184_v14  ;;  %v1667_v43 = vmul.f32 %v11038_v37, %v10980_v46 }
 0x407   : > { %v10965_v25 = vpop.xlane.xlu1 %1154  ;;  %16817 = vst [vmem:[#allocation149_spill] sm:$0xff] %v10967_v48  ;;  %v16827_v48 = vld [vmem:[#allocation117_spill] sm:$0xff]  ;;  %v1634_v0 = vsel %vm1631_vm4, %v1633_v4, %v1629_v39  ;;  %v1409_v31 = vsel %vm1406_vm5, %v1408_v21, %v1404_v33  ;;  %v11065_v21 = vpop.xlane.xlu0 %1274 }
 0x408   : > { %v1189_v14 = vsub.f32 %v10777_v52, %v10965_v25  ;;  %v11061_v32 = vmul.f32 %v10687_v3, %v1634_v0  ;;  %v1543_v25 = vor.u32 1.1754944e-38, %v1542_v38  ;;  %v11076_v3 = vmul.f32 %v10694_v2, %v1409_v31 }
 0x409   : > { %v1539_v38 = vsel %vm11080_vm9, %v10963_v36, %v1535_v19 }
 0x40a   : > { %v1544_v23 = vsel %vm11068_vm8, %v1543_v25, %v1539_v38 }
 0x40e   : > { %v10996_v11 = vpop.xlane.xlu2 %1280 }
 0x40f   : > { %v10994_v26 = vpop.xlane.xlu1 %1304  ;;  %v1482_v1 = vand.u32 2147483648, %v10996_v11  ;;  %vm1476_vm14 = vweird.f32 %v10996_v11  ;;  %v11109_v38 = vpop.permute.xlu0 %3995 }
 0x410   : > { %8648 = vrcp.f32 %v10994_v26  ;;  %v1602_v0 = vand.u32 2147483648, %v10994_v26  ;;  %v1600_v2 = vand.u32 2147483647, %v10994_v26  ;;  %vm1596_vm12 = vweird.f32 %v10994_v26  ;;  %16836 = vst [vmem:[#allocation107_spill] sm:$0xff] %v11109_v38 }
 0x411   : > { %8650 = vrcp.f32 %v10996_v11 }
 0x412   : > { %v1603_v36 = vor.u32 1.1754944e-38, %v1602_v0  ;;  %vm1601_vm15 = vcmp.eq.f32.partialorder %v1600_v2, 8.507059e+37 }
 0x416   : > { %v8649_v59 = vpop.eup %8648  ;;  %v11058_v18 = vpop.xlane.xlu2 %1307 }
 0x417   : > { %v8651_v10 = vpop.eup %8650  ;;  %v1592_v39 = vmul.f32 %v8649_v59, %v10994_v26  ;;  %v11056_v4 = vpop.xlane.xlu1 %1259  ;;  %1277 = vadd.xlane.f32.xlu1 %v1276_v41  ;;  %v1251_v41 = vmul.f32 1.442695, %v1189_v14  ;;  %vm1597_vm10 = vweird.f32 %v8649_v59  ;;  %v16837_v26 = vunpack.i.h.bf16 %v16819_v53 }
 0x418   : > { %v1472_v17 = vmul.f32 %v8651_v10, %v10996_v11  ;;  %8652 = vrcp.f32 %v11056_v4  ;;  %vm1477_vm11 = vweird.f32 %v8651_v10  ;;  %vm1598_vm13 = vmor %vm1596_vm12, %vm1597_vm10  ;;  %vm1611_vm6 = vweird.f32 %v11058_v18 }
 0x419   : > { %v1593_v33 = vsub.f32 1.0, %v1592_v39  ;;  %8654 = vrcp.f32 %v11058_v18  ;;  %vm11101_vm3 = vmor %vm1476_vm14, %vm1477_vm11  ;;  %vm1371_vm8 = vweird.f32 %v11056_v4 }
 0x41a   : > { %v1473_v13 = vsub.f32 1.0, %v1472_v17  ;;  %v1480_v17 = vand.u32 2147483647, %v10996_v11  ;;  %8656 = vrcp.f32 %v11065_v21 }
 0x41b   : > { %v1594_v39 = vmul.f32 %v8649_v59, %v1593_v33  ;;  %v1668_v33 = vsub.f32 1.0, %v1667_v43  ;;  %8658 = vpow2.f32 %v1251_v41 }
 0x41c   : > { %v1474_v31 = vmul.f32 %v8651_v10, %v1473_v13  ;;  %vm1481_vm4 = vcmp.eq.f32.partialorder %v1480_v17, 8.507059e+37 }
 0x41d   : > { %v1595_v60 = vadd.f32 %v8649_v59, %v1594_v39  ;;  %v1483_v39 = vor.u32 1.1754944e-38, %v1482_v1 }
 0x41e   : > { %v1475_v19 = vadd.f32 %v8651_v10, %v1474_v31  ;;  %v11098_v14 = vpop.eup %8652  ;;  %v11105_v52 = vpop.xlane.xlu2 %1262  ;;  %v1617_v31 = vand.u32 2147483648, %v11058_v18 }
 0x41f   : > { %v1599_v13 = vsel %vm1598_vm13, %v8649_v59, %v1595_v60  ;;  %v11107_v25 = vpop.eup %8654  ;;  %v1367_v60 = vmul.f32 %v11098_v14, %v11056_v4  ;;  %v11115_v59 = vpop.xlane.xlu1 %1286  ;;  %vm1372_vm5 = vweird.f32 %v11098_v14  ;;  %vm1386_vm13 = vweird.f32 %v11105_v52 }
 0x420   : > { %v1604_v0 = vsel %vm1601_vm15, %v1603_v36, %v1599_v13  ;;  %v1479_v11 = vsel %vm11101_vm3, %v8651_v10, %v1475_v19  ;;  %v1607_v41 = vmul.f32 %v11107_v25, %v11058_v18  ;;  %8660 = vrcp.f32 %v11115_v59  ;;  %v11127_v17 = vpop.eup %8656  ;;  %vm11162_vm9 = vmor %vm1371_vm8, %vm1372_vm5 }
 0x421   : > { %v1605_v43 = vmul.f32 %v10788_v44, %v1604_v0  ;;  %v1368_v2 = vsub.f32 1.0, %v1367_v60  ;;  %8662 = vrcp.f32 %v11105_v52  ;;  %v1484_v10 = vsel %vm1481_vm4, %v1483_v39, %v1479_v11 }
 0x422   : > { %v1608_v1 = vsub.f32 1.0, %v1607_v41  ;;  %v1485_v36 = vmul.f32 %v10792_v57, %v1484_v10  ;;  %v1375_v19 = vand.u32 2147483647, %v11056_v4  ;;  %v1377_v44 = vand.u32 2147483648, %v11056_v4  ;;  %v11136_v57 = vpop.eup %8658  ;;  %v16838_v41 = vld [vmem:[#allocation99_spill] sm:$0xff]  ;;  %v16846_v10 = vld [vmem:[#allocation108_spill] sm:$0xff] }
 0x423   : > { %7854 = vmatmul.msk.f32.vlgmr.msrb.gmra.mxu1 %vm1062_vm2, %v1605_v43  ;;  %v11129_v13 = vor.u32 1.1754944e-38, %v1677_v16  ;;  %v1369_v0 = vmul.f32 %v11098_v14, %v1368_v2  ;;  %v1615_v11 = vand.u32 2147483647, %v11058_v18  ;;  %v11139_v39 = vmul.f32 %v11038_v37, %v1668_v33 }
 0x424   : > { %3561 = vmatpush.msrb.mxu1 %v16837_v26  ;;  %v1609_v60 = vmul.f32 %v11107_v25, %v1608_v1  ;;  %7846 = vmatmul.msk.f32.vlgmr.msra.gmra.mxu3 %vm1062_vm2, %v1485_v36  ;;  %v11145_v16 = vmul.f32 %v10701_v22, %v1544_v23  ;;  %vm1612_vm7 = vweird.f32 %v11107_v25  ;;  %v16839_v33 = vunpack.i.l.bf16 %v16819_v53 }
 0x425   : > { %1334 = vadd.xlane.f32.xlu2 %v11046_v51  ;;  %7926 = vmatpush.xpose.msk.msra.mxu3 %vm633_vm1, %v16838_v41  ;;  %v1370_v2 = vadd.f32 %v11098_v14, %v1369_v0  ;;  %v1618_v22 = vor.u32 1.1754944e-38, %v1617_v31  ;;  %vm11166_vm10 = vcmp.eq.f32.partialorder %v1375_v19, 8.507059e+37  ;;  %v1378_v53 = vor.u32 1.1754944e-38, %v1377_v44  ;;  %vm1613_vm12 = vmor %vm1611_vm6, %vm1612_vm7 }
 0x426   : > { %3562 = vmatpush.msrb.mxu1 %v16839_v33  ;;  %v11156_v51 = vpop.eup %8660  ;;  %v11158_v23 = vpop.xlane.xlu2 %1289  ;;  %v1610_v36 = vadd.f32 %v11107_v25, %v1609_v60  ;;  %v16844_v0 = vunpack.i.h.bf16 %v16820_v55  ;;  %vm1616_vm11 = vcmp.eq.f32.partialorder %v1615_v11, 8.507059e+37  ;;  %v1390_v60 = vand.u32 2147483647, %v11105_v52 }
 0x427   : > { %v11171_v26 = vpop.eup %8662  ;;  %v1502_v4 = vmul.f32 %v11156_v51, %v11115_v59  ;;  %v11175_v31 = vpop.xlane.xlu1 %1313  ;;  %8664 = vrcp.f32 %v11158_v23  ;;  %v1374_v19 = vsel %vm11162_vm9, %v11098_v14, %v1370_v2  ;;  %v1392_v41 = vand.u32 2147483648, %v11105_v52 }
 0x428   : > { %3563 = vmatpush.msrb.mxu1 %v16844_v0  ;;  %v1382_v44 = vmul.f32 %v11171_v26, %v11105_v52  ;;  %8666 = vrcp.f32 %v11175_v31  ;;  %v11192_v33 = vpop.permute.xlu0 %4001  ;;  %v16847_v14 = vunpack.i.l.bf16 %v16820_v55  ;;  %v1379_v18 = vsel %vm11166_vm10, %v1378_v53, %v1374_v19 }
 0x429   : > { %16845 = vst [vmem:[#allocation112_spill] sm:$0xff] %v11192_v33  ;;  %v1503_v0 = vsub.f32 1.0, %v1502_v4  ;;  %7927 = vmatpush.xpose.msk.msra.mxu3 %vm633_vm1, %v16846_v10  ;;  %v1614_v11 = vsel %vm1613_vm12, %v11107_v25, %v1610_v36  ;;  %v1510_v2 = vand.u32 2147483647, %v11115_v59  ;;  %v1380_v20 = vmul.f32 %v10808_v27, %v1379_v18 }
 0x42a   : > { %3564 = vmatpush.msrb.mxu1 %v16847_v14  ;;  %v1383_v43 = vsub.f32 1.0, %v1382_v44  ;;  %v1619_v38 = vsel %vm1616_vm11, %v1618_v22, %v1614_v11  ;;  %v1512_v33 = vand.u32 2147483648, %v11115_v59  ;;  %v11206_v4 = vmul.f32 %v11127_v17, %v11065_v21 }
 0x42b   : > { %v1620_v55 = vmul.f32 %v10804_v5, %v1619_v38  ;;  %v16848_v10 = vunpack.i.h.bf16 %v16827_v48  ;;  %v1345_v25 = vsel %vm1062_vm2, %v11136_v57, 0.0  ;;  %v1504_v1 = vmul.f32 %v11156_v51, %v1503_v0  ;;  %7839 = vmatmul.msk.f32.gmra.mxu2 %vm1062_vm2, %v1380_v20  ;;  %v16849_v38 = vld [vmem:[#allocation106_spill] sm:$0xff] }
 0x42c   : > { %7847 = vmatmul.msk.f32.gmra.mxu3 %vm1062_vm2, %v11049_v62  ;;  %v1384_v27 = vmul.f32 %v11171_v26, %v1383_v43  ;;  %vm1387_vm14 = vweird.f32 %v11171_v26  ;;  %vm1506_vm15 = vweird.f32 %v11115_v59  ;;  %vm11226_vm3 = vcmp.eq.f32.partialorder %v1390_v60, 8.507059e+37 }
 0x42d   : > { %3565 = vmatpush.msrb.mxu1 %v16848_v10  ;;  %v11221_v5 = vpop.eup %8664  ;;  %7928 = vmatpush.xpose.msk.msra.mxu3 %vm633_vm1, %v16849_v38  ;;  %v1393_v62 = vor.u32 1.1754944e-38, %v1392_v41  ;;  %v1505_v43 = vadd.f32 %v11156_v51, %v1504_v1  ;;  %vm1507_vm4 = vweird.f32 %v11156_v51  ;;  %v16852_v36 = vunpack.i.l.bf16 %v16827_v48  ;;  %vm1388_vm7 = vmor %vm1386_vm13, %vm1387_vm14  ;;  %v16857_v1 = vld [vmem:[#allocation52_spill] sm:$0xff] }
 0x42e   : > { %7855 = vmatmul.msk.f32.gmra.mxu1 %vm1062_vm2, %v1620_v55  ;;  %v11232_v22 = vpop.eup %8666  ;;  %v1517_v53 = vmul.f32 %v11221_v5, %v11158_v23  ;;  %1346 = vadd.xlane.f32.xlu0 %v1345_v25  ;;  %v11238_v19 = vpop.xlane.xlu2 %1316  ;;  %v1385_v44 = vadd.f32 %v11171_v26, %v1384_v27  ;;  %vm11241_vm5 = vcmp.eq.f32.partialorder %v1510_v2, 8.507059e+37  ;;  %v1513_v41 = vor.u32 1.1754944e-38, %v1512_v33  ;;  %v16856_v2 = vld [vmem:[#allocation46_spill] sm:$0xff]  ;;  %vm1508_vm8 = vmor %vm1506_vm15, %vm1507_vm4 }
 0x42f   : > { %3566 = vmatpush.msrb.mxu1 %v16852_v36  ;;  %vm1672_vm6 = vweird.f32 %v11038_v37  ;;  %v1637_v0 = vmul.f32 %v11232_v22, %v11175_v31  ;;  %v1647_v14 = vand.u32 2147483648, %v11175_v31  ;;  %v11249_v18 = vpop.xlane.xlu1 %1268  ;;  %8668 = vrcp.f32 %v11238_v19 }
 0x430   : > { %v1525_v48 = vand.u32 2147483647, %v11158_v23  ;;  %v1518_v11 = vsub.f32 1.0, %v1517_v53  ;;  %8670 = vrcp.f32 %v11249_v18  ;;  %v16855_v33 = vunpack.i.h.bf16 %v16818_v6  ;;  %4009 = vrot.lane.b32.xlu1 %v16856_v2, %s9204_s25  ;;  %v11269_v10 = vpop.xlane.xlu0 %1301 }
 0x431   : > { %v1389_v55 = vsel %vm1388_vm7, %v11171_v26, %v1385_v44  ;;  %v1527_v52 = vand.u32 2147483648, %v11158_v23  ;;  %vm1671_vm9 = vweird.f32 %v10980_v46  ;;  %v1638_v25 = vsub.f32 1.0, %v1637_v0  ;;  %7929 = vmatpush.xpose.msk.msra.mxu3 %vm633_vm1, %v16857_v1 }
 0x432   : > { %3567 = vmatpush.msrb.mxu1 %v16855_v33  ;;  %v1394_v27 = vsel %vm11226_vm3, %v1393_v62, %v1389_v55  ;;  %v1509_v26 = vsel %vm1508_vm8, %v11156_v51, %v1505_v43  ;;  %v1645_v38 = vand.u32 2147483647, %v11175_v31  ;;  %v16858_v59 = vunpack.i.l.bf16 %v16818_v6 }
 0x433   : > { %v1395_v53 = vmul.f32 %v10820_v49, %v1394_v27  ;;  %v1514_v36 = vsel %vm11241_vm5, %v1513_v41, %v1509_v26  ;;  %v1519_v44 = vmul.f32 %v11221_v5, %v1518_v11  ;;  %vm1522_vm10 = vweird.f32 %v11221_v5  ;;  %vm11333_vm5 = vmor %vm1671_vm9, %vm1672_vm6 }
 0x434   : > { %3568 = vmatpush.msrb.mxu1 %v16858_v59  ;;  %v1639_v0 = vmul.f32 %v11232_v22, %v1638_v25  ;;  %vm1642_vm11 = vweird.f32 %v11232_v22  ;;  %v1515_v51 = vmul.f32 %v10822_v34, %v1514_v36  ;;  %v11289_v20 = vadd.f32 %v11038_v37, %v11139_v39  ;;  %v16862_v59 = vld [vmem:[#allocation104_spill] sm:$0xff] }
 0x435   : > { %v1443_v6 = vsub.f32 1.0, %v11206_v4  ;;  %8672 = vrcp.f32 %v11269_v10  ;;  %7840 = vmatmul.msk.f32.gmra.mxu2 %vm1062_vm2, %v1395_v53  ;;  %v1520_v49 = vadd.f32 %v11221_v5, %v1519_v44  ;;  %vm1521_vm12 = vweird.f32 %v11158_v23  ;;  %v11296_v62 = vpop.eup %8668 }
 0x436   : > { %vm1641_vm13 = vweird.f32 %v11175_v31  ;;  %v1648_v43 = vor.u32 1.1754944e-38, %v1647_v14  ;;  %7848 = vmatmul.msk.f32.gmra.mxu3 %vm1062_vm2, %v1515_v51  ;;  %7856 = vmatmul.msk.f32.gmra.mxu1 %vm1062_vm2, %v11061_v32  ;;  %vm1523_vm14 = vmor %vm1521_vm12, %vm1522_vm10  ;;  %v1528_v34 = vor.u32 1.1754944e-38, %v1527_v52  ;;  %v1640_v39 = vadd.f32 %v11232_v22, %v1639_v0  ;;  %v11305_v4 = vpop.eup %8670  ;;  %v16859_v31 = vld [vmem:[#allocation89_spill] sm:$0xff]  ;;  %v11313_v60 = vpop.xlane.xlu2 %1271 }
 0x437   : > { %vm1643_vm15 = vmor %vm1641_vm13, %vm1642_vm11  ;;  %v1652_v23 = vmul.f32 %v11296_v62, %v11238_v19  ;;  %7930 = vmatpush.xpose.msk.msra.mxu3 %vm633_vm1, %v16859_v31  ;;  %v1524_v32 = vsel %vm1523_vm14, %v11221_v5, %v1520_v49  ;;  %vm1526_vm3 = vcmp.eq.f32.partialorder %v1525_v48, 8.507059e+37  ;;  %vm1646_vm4 = vcmp.eq.f32.partialorder %v1645_v38, 8.507059e+37  ;;  %v11318_v14 = vpop.xlane.xlu1 %1295 }
 0x438   : > { %v1412_v41 = vmul.f32 %v11305_v4, %v11249_v18  ;;  %8674 = vrcp.f32 %v11313_v60  ;;  %v1529_v11 = vsel %vm1526_vm3, %v1528_v34, %v1524_v32  ;;  %v1644_v33 = vsel %vm1643_vm15, %v11232_v22, %v1640_v39 }
 0x439   : > { %v1653_v55 = vsub.f32 1.0, %v1652_v23  ;;  %8676 = vrcp.f32 %v11318_v14  ;;  %v1649_v52 = vsel %vm1646_vm4, %v1648_v43, %v1644_v33  ;;  %v1444_v25 = vmul.f32 %v11127_v17, %v1443_v6  ;;  %v16866_v6 = vld [vmem:[#allocation59_spill] sm:$0xff]  ;;  %v16869_v23 = vld [vmem:[#allocation41_spill] sm:$0xff] }
 0x43a   : > { %v1413_v1 = vsub.f32 1.0, %v1412_v41  ;;  %v1662_v5 = vand.u32 2147483648, %v11238_v19  ;;  %v1530_v48 = vmul.f32 %v10835_v50, %v1529_v11  ;;  %v1650_v27 = vmul.f32 %v10837_v12, %v1649_v52 }
 0x43b   : > { %v11327_v26 = vpop.eup %8672  ;;  %v1654_v38 = vmul.f32 %v11296_v62, %v1653_v55  ;;  %vm1657_vm7 = vweird.f32 %v11296_v62  ;;  %7931 = vmatpush.xpose.msk.msra.mxu3 %vm633_vm1, %v16862_v59  ;;  %v1422_v50 = vand.u32 2147483648, %v11249_v18  ;;  %v1660_v12 = vand.u32 2147483647, %v11238_v19 }
 0x43c   : > { %v1414_v53 = vmul.f32 %v11305_v4, %v1413_v1  ;;  %vm1417_vm8 = vweird.f32 %v11305_v4  ;;  %v1674_v36 = vsel %vm11333_vm5, %v11038_v37, %v11289_v20  ;;  %v16863_v44 = vand.u32 2147483647, %v10980_v46 }
 0x43d   : > { %vm1446_vm9 = vweird.f32 %v11065_v21  ;;  %v1452_v51 = vand.u32 2147483648, %v11065_v21  ;;  %vm1656_vm10 = vweird.f32 %v11238_v19  ;;  %7841 = vmatmul.msk.f32.gmra.mxu2 %vm1062_vm2, %v11076_v3  ;;  %4011 = vrot.lane.b32.xlu2 %v16866_v6, %s9204_s25  ;;  %v1420_v37 = vand.u32 2147483647, %v11249_v18 }
 0x43e   : > { %vm11351_vm6 = vcmp.eq.f32.partialorder %v16863_v44, 8.507059e+37  ;;  %v1655_v46 = vadd.f32 %v11296_v62, %v1654_v38  ;;  %vm1447_vm11 = vweird.f32 %v11127_v17  ;;  %v11365_v20 = vpop.eup %8674  ;;  %vm11369_vm12 = vmor %vm1656_vm10, %vm1657_vm7  ;;  %v1663_v19 = vor.u32 1.1754944e-38, %v1662_v5  ;;  %7849 = vmatmul.msk.f32.gmra.mxu3 %vm1062_vm2, %v1530_v48  ;;  %7857 = vmatmul.msk.f32.gmra.mxu1 %vm1062_vm2, %v1650_v27  ;;  %v11386_v31 = vpop.xlane.xlu2 %1298  ;;  %v16870_v27 = vld [vmem:[#allocation103_spill] sm:$0xff] }
 0x43f   : > { %v1415_v3 = vadd.f32 %v11305_v4, %v1414_v53  ;;  %vm1416_vm13 = vweird.f32 %v11249_v18  ;;  %v11378_v43 = vadd.f32 %v11127_v17, %v1444_v25  ;;  %v11380_v34 = vpop.eup %8676  ;;  %v1427_v39 = vmul.f32 %v11365_v20, %v11313_v60  ;;  %7932 = vmatpush.xpose.msk.msra.mxu3 %vm633_vm1, %v16869_v23  ;;  %v11395_v11 = vpop.xlane.xlu1 %1322  ;;  %vm11436_vm10 = vmor %vm1446_vm9, %vm1447_vm11  ;;  %v16881_v44 = vld [vmem:[#allocation135_spill] sm:$0xff] }
 0x440   : > { %vm1418_vm14 = vmor %vm1416_vm13, %vm1417_vm8  ;;  %v1423_v32 = vor.u32 1.1754944e-38, %v1422_v50  ;;  %v1659_v18 = vsel %vm11369_vm12, %v11296_v62, %v1655_v46  ;;  %vm1661_vm15 = vcmp.eq.f32.partialorder %v1660_v12, 8.507059e+37  ;;  %v1547_v41 = vmul.f32 %v11380_v34, %v11318_v14 }
 0x441   : > { %8678 = vrcp.f32 %v11386_v31  ;;  %v1419_v33 = vsel %vm1418_vm14, %v11305_v4, %v1415_v3  ;;  %v1664_v55 = vsel %vm1661_vm15, %v1663_v19, %v1659_v18  ;;  %v11401_v52 = vmul.f32 %v11327_v26, %v11269_v10  ;;  %v16871_v4 = vld [vmem:[#allocation87_spill] sm:$0xff] }
 0x442   : > { %v1428_v25 = vsub.f32 1.0, %v1427_v39  ;;  %8680 = vrcp.f32 %v11395_v11  ;;  %vm1421_vm3 = vcmp.eq.f32.partialorder %v1420_v37, 8.507059e+37  ;;  %v1548_v62 = vsub.f32 1.0, %v1547_v41  ;;  %4104 = vrot.lane.b32.xlu0 %v16871_v4, %s9203_s23 }
 0x443   : > { %v1424_v1 = vsel %vm1421_vm3, %v1423_v32, %v1419_v33  ;;  %v1665_v5 = vmul.f32 %v10852_v35, %v1664_v55  ;;  %v1435_v48 = vand.u32 2147483647, %v11313_v60  ;;  %7933 = vmatpush.xpose.msk.msra.mxu3 %vm633_vm1, %v16870_v27  ;;  %vm1432_vm4 = vweird.f32 %v11365_v20 }
 0x444   : > { %v1425_v22 = vmul.f32 %v10854_v54, %v1424_v1  ;;  %v1429_v38 = vmul.f32 %v11365_v20, %v1428_v25  ;;  %v1437_v59 = vand.u32 2147483648, %v11313_v60  ;;  %v1549_v50 = vmul.f32 %v11380_v34, %v1548_v62  ;;  %v16875_v54 = vld [vmem:[#allocation19_spill] sm:$0xff] }
 0x445   : > { %v1555_v35 = vand.u32 2147483647, %v11318_v14  ;;  %v1557_v12 = vand.u32 2147483648, %v11318_v14  ;;  %v16872_v53 = vand.u32 2147483647, %v11065_v21  ;;  %v1453_v37 = vor.u32 1.1754944e-38, %v1452_v51  ;;  %4017 = vrot.lane.b32.xlu2 %v16875_v54, %s9204_s25 }
 0x446   : > { %7842 = vmatmul.msk.f32.gmra.mxu2 %vm1062_vm2, %v1425_v22  ;;  %v1430_v46 = vadd.f32 %v11365_v20, %v1429_v38  ;;  %vm1431_vm7 = vweird.f32 %v11313_v60  ;;  %vm1552_vm8 = vweird.f32 %v11380_v34  ;;  %v1679_v49 = vsel %vm11351_vm6, %v11129_v13, %v1674_v36  ;;  %7850 = vmatmul.msk.f32.gmra.mxu3 %vm1062_vm2, %v11145_v16  ;;  %v11457_v0 = vpop.xlane.xlu2 %1325  ;;  %v16880_v25 = vld [vmem:[#allocation91_spill] sm:$0xff] }
 0x447   : > { %vm11419_vm5 = vcmp.eq.f32.partialorder %v16872_v53, 8.507059e+37  ;;  %v8679_v19 = vpop.eup %8678  ;;  %v1578_v3 = vsub.f32 1.0, %v11401_v52  ;;  %7858 = vmatmul.msk.f32.gmra.mxu1 %vm1062_vm2, %v1665_v5  ;;  %vm11446_vm12 = vmor %vm1431_vm7, %vm1432_vm4  ;;  %v1550_v21 = vadd.f32 %v11380_v34, %v1549_v50  ;;  %vm1551_vm6 = vweird.f32 %v11318_v14 }
 0x448   : > { %v1449_v60 = vsel %vm11436_vm10, %v11127_v17, %v11378_v43  ;;  %v8681_v36 = vpop.eup %8680  ;;  %v1562_v16 = vmul.f32 %v8679_v19, %v11386_v31  ;;  %v1434_v39 = vsel %vm11446_vm12, %v11365_v20, %v1430_v46  ;;  %vm1436_vm9 = vcmp.eq.f32.partialorder %v1435_v48, 8.507059e+37  ;;  %vm1553_vm11 = vmor %vm1551_vm6, %vm1552_vm8 }
 0x449   : > { %v1438_v23 = vor.u32 1.1754944e-38, %v1437_v59  ;;  %v1682_v32 = vmul.f32 %v8681_v36, %v11395_v11  ;;  %8682 = vrcp.f32 %v11457_v0  ;;  %vm1556_vm13 = vcmp.eq.f32.partialorder %v1555_v35, 8.507059e+37 }
 0x44a   : > { %v1558_v17 = vor.u32 1.1754944e-38, %v1557_v12  ;;  %v1692_v14 = vand.u32 2147483648, %v11395_v11  ;;  %v1563_v43 = vsub.f32 1.0, %v1562_v16  ;;  %v1554_v41 = vsel %vm1553_vm11, %v11380_v34, %v1550_v21  ;;  %4110 = vrot.lane.b32.xlu0 %v16880_v25, %s9203_s23 }
 0x44b   : > { %v1439_v18 = vsel %vm1436_vm9, %v1438_v23, %v1434_v39  ;;  %v1683_v33 = vsub.f32 1.0, %v1682_v32  ;;  %v1572_v52 = vand.u32 2147483648, %v11386_v31  ;;  %vm1567_vm14 = vweird.f32 %v8679_v19 }
 0x44c   : > { %v1440_v20 = vmul.f32 %v10871_v42, %v1439_v18  ;;  %v1559_v55 = vsel %vm1556_vm13, %v1558_v17, %v1554_v41  ;;  %v1564_v1 = vmul.f32 %v8679_v19, %v1563_v43  ;;  %v1570_v5 = vand.u32 2147483647, %v11386_v31  ;;  %v16883_v43 = vld [vmem:[#allocation18_spill] sm:$0xff]  ;;  %v16884_v41 = vld [vmem:[#allocation133_spill] sm:$0xff] }
 0x44d   : > { %v1560_v62 = vmul.f32 %v10873_v61, %v1559_v55  ;;  %v1684_v48 = vmul.f32 %v8681_v36, %v1683_v33  ;;  %vm1687_vm15 = vweird.f32 %v8681_v36  ;;  %v1680_v27 = vmul.f32 %v10710_v56, %v1679_v49  ;;  %v16885_v33 = vld [vmem:[#allocation20_spill] sm:$0xff] }
 0x44e   : > { %v1690_v34 = vand.u32 2147483647, %v11395_v11  ;;  %7843 = vmatmul.msk.f32.gmra.mxu2 %vm1062_vm2, %v1440_v20  ;;  %v1454_v42 = vsel %vm11419_vm5, %v1453_v37, %v1449_v60  ;;  %v1565_v22 = vadd.f32 %v8679_v19, %v1564_v1  ;;  %vm1566_vm3 = vweird.f32 %v11386_v31  ;;  %v16886_v20 = vld [vmem:[#allocation13_spill] sm:$0xff]  ;;  %v16892_v1 = vld [vmem:[#allocation142_spill] sm:$0xff] }
 0x44f   : > { %v8683_v38 = vpop.eup %8682  ;;  %vm1686_vm4 = vweird.f32 %v11395_v11  ;;  %7851 = vmatmul.msk.f32.gmra.mxu3 %vm1062_vm2, %v1560_v62  ;;  %7859 = vmatmul.msk.f32.gmra.mxu1 %vm1062_vm2, %v1680_v27  ;;  %vm1568_vm7 = vmor %vm1566_vm3, %vm1567_vm14  ;;  %v1573_v61 = vor.u32 1.1754944e-38, %v1572_v52  ;;  %v1685_v56 = vadd.f32 %v8681_v36, %v1684_v48  ;;  %v1579_v59 = vmul.f32 %v11327_v26, %v1578_v3  ;;  %v16894_v48 = vld [vmem:[#allocation109_spill] sm:$0xff] }
 0x450   : > { %vm1688_vm8 = vmor %vm1686_vm4, %vm1687_vm15  ;;  %v1693_v50 = vor.u32 1.1754944e-38, %v1692_v14  ;;  %v1697_v35 = vmul.f32 %v8683_v38, %v11457_v0  ;;  %v1569_v12 = vsel %vm1568_vm7, %v8679_v19, %v1565_v22  ;;  %vm1571_vm5 = vcmp.eq.f32.partialorder %v1570_v5, 8.507059e+37 }
 0x451   : > { %8684 = vpow2.f32 %v11040_v8  ;;  %v1574_v31 = vsel %vm1571_vm5, %v1573_v61, %v1569_v12  ;;  %v1689_v11 = vsel %vm1688_vm8, %v8681_v36, %v1685_v56  ;;  %vm1691_vm10 = vcmp.eq.f32.partialorder %v1690_v34, 8.507059e+37  ;;  %v16882_v8 = vld [vmem:[#allocation53_spill] sm:$0xff]  ;;  %v16899_v61 = vld [vmem:[#allocation95_spill] sm:$0xff]  ;;  %v16900_v56 = vld [vmem:[#allocation102_spill] sm:$0xff] }
 0x452   : > { %v1698_v53 = vsub.f32 1.0, %v1697_v35  ;;  %v1455_v37 = vmul.f32 %v16881_v44, %v1454_v42  ;;  %v1694_v46 = vsel %vm1691_vm10, %v1693_v50, %v1689_v11  ;;  %vm1582_vm12 = vweird.f32 %v11327_v26  ;;  %4116 = vrot.lane.b32.xlu0 %v16882_v8, %s9204_s25  ;;  %v16896_v42 = vld [vmem:[#allocation49_spill] sm:$0xff]  ;;  %v16903_v35 = vld [vmem:[#allocation111_spill] sm:$0xff]  ;;  %v16909_v44 = vld [vmem:[#allocation54_spill] sm:$0xff] }
 0x453   : > { %v1707_v49 = vand.u32 2147483648, %v11457_v0  ;;  %v1575_v51 = vmul.f32 %v10887_v63, %v1574_v31  ;;  %v1695_v3 = vmul.f32 %v10889_v45, %v1694_v46  ;;  %v1580_v19 = vadd.f32 %v11327_v26, %v1579_v59  ;;  %v16905_v31 = vld [vmem:[#allocation140_spill] sm:$0xff]  ;;  %v16906_v11 = vld [vmem:[#allocation25_spill] sm:$0xff] }
 0x454   : > { %v1699_v13 = vmul.f32 %v8683_v38, %v1698_v53  ;;  %vm1702_vm6 = vweird.f32 %v8683_v38  ;;  %v1587_v21 = vand.u32 2147483648, %v11269_v10  ;;  %v1705_v60 = vand.u32 2147483647, %v11457_v0  ;;  %v16907_v53 = vld [vmem:[#allocation16_spill] sm:$0xff] }
 0x455   : > { %vm1581_vm9 = vweird.f32 %v11269_v10  ;;  %v1585_v36 = vand.u32 2147483647, %v11269_v10  ;;  %vm1701_vm11 = vweird.f32 %v11457_v0  ;;  %v1708_v16 = vor.u32 1.1754944e-38, %v1707_v49  ;;  %v16912_v49 = vld [vmem:[#allocation36_spill] sm:$0xff] }
 0x456   : > { %7844 = vmatmul.msk.f32.gmra.mxu2 %vm1062_vm2, %v1455_v37  ;;  %vm1583_vm13 = vmor %vm1581_vm9, %vm1582_vm12  ;;  %v1700_v63 = vadd.f32 %v8683_v38, %v1699_v13  ;;  %v1588_v23 = vor.u32 1.1754944e-38, %v1587_v21  ;;  %vm1706_vm15 = vcmp.eq.f32.partialorder %v1705_v60, 8.507059e+37  ;;  %v11518_v55 = vpack.i.bf16 %v16886_v20, %v16885_v33  ;;  %v16910_v37 = vld [vmem:[#allocation33_spill] sm:$0xff]  ;;  %v16917_v13 = vld [vmem:[#allocation3_spill] sm:$0xff] }
 0x457   : > { %v11501_v45 = vpop.eup %8684  ;;  %vm1703_vm14 = vmor %vm1701_vm11, %vm1702_vm6  ;;  %7852 = vmatmul.msk.f32.gmra.mxu3 %vm1062_vm2, %v1575_v51  ;;  %7860 = vmatmul.msk.f32.gmra.mxu1 %vm1062_vm2, %v1695_v3  ;;  %v1584_v39 = vsel %vm1583_vm13, %v11327_v26, %v1580_v19  ;;  %vm1586_vm3 = vcmp.eq.f32.partialorder %v1585_v36, 8.507059e+37  ;;  %v1188_v26 = vsub.f32 %v16884_v41, %v10780_v28  ;;  %v16890_v28 = vld [vmem:[#allocation114_spill] sm:$0xff]  ;;  %v16895_v27 = vunpack.i.h.bf16 %v16894_v48  ;;  %v11570_v46 = vpop.permute.xlu1 %3997  ;;  %v16913_v51 = vld [vmem:[#allocation55_spill] sm:$0xff] }
 0x458   : > { %v1704_v32 = vsel %vm1703_vm14, %v8683_v38, %v1700_v63  ;;  %v1589_v0 = vsel %vm1586_vm3, %v1588_v23, %v1584_v39  ;;  %v1330_v17 = vsel %vm1062_vm2, %v11501_v45, 0.0  ;;  %16887 = vst [vmem:[#allocation131_spill] sm:$0xff] %v11518_v55  ;;  %v16891_v62 = vunpack.i.h.bf16 %v16890_v28  ;;  %v16898_v38 = vld [vmem:[#allocation47_spill] sm:$0xff]  ;;  %v16915_v19 = vld [vmem:[#allocation138_spill] sm:$0xff]  ;;  %v16920_v36 = vld [vmem:[#allocation69_spill] sm:$0xff] }
 0x459   : > { %v1709_v10 = vsel %vm1706_vm15, %v1708_v16, %v1704_v32  ;;  %v1590_v18 = vmul.f32 %v10790_v30, %v1589_v0  ;;  %v1249_v52 = vmul.f32 1.442695, %v1188_v26  ;;  %v16889_v30 = vld [vmem:[#allocation93_spill] sm:$0xff]  ;;  %v16893_v5 = vunpack.i.l.bf16 %v16890_v28  ;;  %16911 = vst [vmem:[#allocation117_spill] sm:$0xff] %v11570_v46  ;;  %v16914_v3 = vld [vmem:[#allocation51_spill] sm:$0xff]  ;;  %v16923_v32 = vld [vmem:[#allocation2_spill] sm:$0xff] }
 0x45a   : > { %v1710_v14 = vmul.f32 %v10899_v15, %v1709_v10  ;;  %4122 = vrot.lane.b32.xlu0 %v16883_v43, %s9204_s25  ;;  %1331 = vadd.xlane.f32.xlu1 %v1330_v17  ;;  %v16888_v15 = vld [vmem:[#allocation30_spill] sm:$0xff]  ;;  %v16897_v22 = vunpack.i.l.bf16 %v16894_v48  ;;  %v16901_v59 = vunpack.i.h.bf16 %v16900_v56  ;;  %v16902_v50 = vunpack.i.l.bf16 %v16900_v56  ;;  %v16921_v63 = vld [vmem:[#allocation57_spill] sm:$0xff]  ;;  %v16922_v16 = vld [vmem:[#allocation83_spill] sm:$0xff] }
 0x45b   : > { %8686 = vpow2.f32 %v1249_v52  ;;  %v16904_v12 = vunpack.i.h.bf16 %v16903_v35  ;;  %v16925_v10 = vld [vmem:[#allocation58_spill] sm:$0xff]  ;;  %v16926_v17 = vld [vmem:[#allocation85_spill] sm:$0xff] }
 0x45c   : > { %v16927_v26 = vld [vmem:[#allocation134_spill] sm:$0xff]  ;;  %v16930_v28 = vld [vmem:[#allocation73_spill] sm:$0xff] }
 0x45d   : > { %v16928_v52 = vld [vmem:[#allocation14_spill] sm:$0xff] }
 0x45e   : > { %v16991_v46 = vld [vmem:[#allocation10_spill] sm:$0xff] }
 0x45f   : > { %7853 = vmatmul.msk.f32.gmra.mxu3 %vm1062_vm2, %v1590_v18  ;;  %7861 = vmatmul.msk.f32.gmra.mxu1 %vm1062_vm2, %v1710_v14  ;;  %v11588_v60 = vpop.permute.xlu1 %4003 }
 0x460   : > { %16919 = vst [vmem:[#allocation108_spill] sm:$0xff] %v11588_v60 }
 0x461   : > { %v11536_v34 = vpop.eup %8686 }
 0x462   : > { %8431 = vrot.lane.b32.xlu0 %v11518_v55, %s9205_s13 }
 0x467   : > { %7886 = vmatmul.msk.f32.vlgmr.msrb.gmra.mxu3 %vm633_vm1, %v16888_v15  ;;  %7902 = vmatmul.msk.f32.vlgmr.msra.gmra.mxu1 %vm633_vm1, %v16889_v30  ;;  %v16929_v30 = vld [vmem:[#allocation74_spill] sm:$0xff] }
 0x468   : > { %8230 = vmatpush.msrb.mxu3 %v16891_v62  ;;  %7998 = vmatpush.xpose.msk.msra.mxu1 %vm633_vm1, %v16892_v1 }
 0x46a   : > { %8231 = vmatpush.msrb.mxu3 %v16893_v5  ;;  %5396 = vrot.lane.b32.xlu0 %v16896_v42, %s9206_s14 }
 0x46c   : > { %8232 = vmatpush.msrb.mxu3 %v16895_v27  ;;  %7999 = vmatpush.xpose.msk.msra.mxu1 %vm633_vm1, %v10945_v58  ;;  %v1342_v58 = vsel %vm1062_vm2, %v11536_v34, 0.0 }
 0x46e   : > { %8233 = vmatpush.msrb.mxu3 %v16897_v22  ;;  %1343 = vadd.xlane.f32.xlu2 %v1342_v58  ;;  %v16931_v22 = vld [vmem:[#allocation88_spill] sm:$0xff]  ;;  %v16932_v58 = vld [vmem:[#allocation34_spill] sm:$0xff] }
 0x46f   : > { %7887 = vmatmul.msk.f32.gmra.mxu3 %vm633_vm1, %v16898_v38  ;;  %7903 = vmatmul.msk.f32.gmra.mxu1 %vm633_vm1, %v16899_v61 }
 0x470   : > { %8234 = vmatpush.msrb.mxu3 %v16901_v59  ;;  %8000 = vmatpush.xpose.msk.msra.mxu1 %vm633_vm1, %v10895_v7  ;;  %v16908_v7 = vunpack.i.l.bf16 %v16903_v35 }
 0x472   : > { %8235 = vmatpush.msrb.mxu3 %v16902_v50  ;;  %5390 = vrot.lane.b32.xlu0 %v16906_v11, %s9206_s14 }
 0x473   : > { %4015 = vrot.lane.b32.xlu1 %v16907_v53, %s9204_s25 }
 0x474   : > { %8236 = vmatpush.msrb.mxu3 %v16904_v12  ;;  %8001 = vmatpush.xpose.msk.msra.mxu1 %vm633_vm1, %v16905_v31  ;;  %v16933_v31 = vld [vmem:[#allocation92_spill] sm:$0xff] }
 0x476   : > { %8237 = vmatpush.msrb.mxu3 %v16908_v7  ;;  %v16934_v7 = vld [vmem:[#allocation80_spill] sm:$0xff] }
 0x477   : > { %7888 = vmatmul.msk.f32.gmra.mxu3 %vm633_vm1, %v16909_v44  ;;  %7904 = vmatmul.msk.f32.gmra.mxu1 %vm633_vm1, %v16910_v37 }
 0x478   : > { %8002 = vmatpush.xpose.msk.msra.mxu1 %vm633_vm1, %v10922_v24  ;;  %v16916_v24 = vld [vmem:[#allocation7_spill] sm:$0xff] }
 0x479   : > { %v11586_v21 = vpack.i.bf16 %v16917_v13, %v16916_v24 }
 0x47a   : > { %5388 = vrot.lane.b32.xlu0 %v16885_v33, %s9206_s14  ;;  %v1187_v33 = vsub.f32 %v16927_v26, %v10930_v29  ;;  %v16942_v26 = vld [vmem:[#allocation15_spill] sm:$0xff] }
 0x47b   : > { %4021 = vrot.lane.b32.xlu1 %v16912_v49, %s9204_s25  ;;  %16918 = vst [vmem:[#allocation99_spill] sm:$0xff] %v11586_v21 }
 0x47c   : > { %8003 = vmatpush.xpose.msk.msra.mxu1 %vm633_vm1, %v10879_v40  ;;  %v1329_v40 = vpop.xlane.xlu0 %1328  ;;  %v1247_v27 = vmul.f32 1.442695, %v1187_v33 }
 0x47d   : > { %8688 = vrcp.f32 %v1329_v40  ;;  %v1722_v59 = vand.u32 2147483648, %v1329_v40  ;;  %vm1716_vm12 = vweird.f32 %v1329_v40  ;;  %v1720_v35 = vand.u32 2147483647, %v1329_v40 }
 0x47f   : > { %7889 = vmatmul.msk.f32.gmra.mxu3 %vm633_vm1, %v16913_v51  ;;  %7905 = vmatmul.msk.f32.gmra.mxu1 %vm633_vm1, %v16914_v3  ;;  %v1723_v37 = vor.u32 1.1754944e-38, %v1722_v59  ;;  %v16935_v51 = vld [vmem:[#allocation50_spill] sm:$0xff]  ;;  %vm1721_vm9 = vcmp.eq.f32.partialorder %v1720_v35, 8.507059e+37 }
 0x480   : > { %8004 = vmatpush.xpose.msk.msra.mxu1 %vm633_vm1, %v16915_v19 }
 0x482   : > { %8451 = vrot.lane.b32.xlu0 %v11586_v21, %s9205_s13 }
 0x483   : > { %v8689_v23 = vpop.eup %8688 }
 0x484   : > { %8005 = vmatpush.xpose.msk.msra.mxu1 %vm633_vm1, %v10910_v47  ;;  %v16924_v47 = vld [vmem:[#allocation78_spill] sm:$0xff]  ;;  %v1712_v0 = vmul.f32 %v8689_v23, %v1329_v40  ;;  %vm1717_vm5 = vweird.f32 %v8689_v23 }
 0x485   : > { %vm1718_vm6 = vmor %vm1716_vm12, %vm1717_vm5  ;;  %v16937_v40 = vld [vmem:[#allocation38_spill] sm:$0xff] }
 0x486   : > { %4096 = vrot.lane.b32.xlu2 %v16922_v16, %s9203_s23  ;;  %v1713_v18 = vsub.f32 1.0, %v1712_v0 }
 0x487   : > { %7890 = vmatmul.msk.f32.gmra.mxu3 %vm633_vm1, %v16920_v36  ;;  %7906 = vmatmul.msk.f32.gmra.mxu1 %vm633_vm1, %v16921_v63  ;;  %v16938_v36 = vld [vmem:[#allocation121_spill] sm:$0xff] }
 0x488   : > { %v1714_v1 = vmul.f32 %v8689_v23, %v1713_v18  ;;  %v8419_v63 = vunpack.i.h.bf16 %v16938_v36  ;;  %v8418_v18 = vunpack.i.l.bf16 %v16938_v36  ;;  %v16957_v36 = vld [vmem:[#allocation48_spill] sm:$0xff] }
 0x48a   : > { %v1278_v39 = vpop.xlane.xlu1 %1277  ;;  %5382 = vrot.lane.b32.xlu0 %v16923_v32, %s9206_s14  ;;  %v1715_v61 = vadd.f32 %v8689_v23, %v1714_v1  ;;  %v16947_v1 = vld [vmem:[#allocation5_spill] sm:$0xff] }
 0x48b   : > { %8690 = vrcp.f32 %v1278_v39  ;;  %v1467_v62 = vand.u32 2147483648, %v1278_v39  ;;  %v1465_v48 = vand.u32 2147483647, %v1278_v39  ;;  %vm1461_vm7 = vweird.f32 %v1278_v39 }
 0x48c   : > { %8692 = vpow2.f32 %v1247_v27  ;;  %v1719_v44 = vsel %vm1718_vm6, %v8689_v23, %v1715_v61 }
 0x48d   : > { %v1468_v38 = vor.u32 1.1754944e-38, %v1467_v62  ;;  %vm1466_vm10 = vcmp.eq.f32.partialorder %v1465_v48, 8.507059e+37  ;;  %v11650_v62 = vpop.permute.xlu2 %3993 }
 0x48e   : > { %4102 = vrot.lane.b32.xlu2 %v16926_v17, %s9203_s23  ;;  %16946 = vst [vmem:[#allocation52_spill] sm:$0xff] %v11650_v62 }
 0x48f   : > { %7891 = vmatmul.msk.f32.gmra.mxu3 %vm633_vm1, %v16924_v47  ;;  %7907 = vmatmul.msk.f32.gmra.mxu1 %vm633_vm1, %v16925_v10  ;;  %v16940_v10 = vld [vmem:[#allocation123_spill] sm:$0xff] }
 0x490   : > { %v8399_v0 = vunpack.i.h.bf16 %v16940_v10 }
 0x491   : > { %v8691_v14 = vpop.eup %8690 }
 0x492   : > { %v1457_v41 = vmul.f32 %v8691_v14, %v1278_v39  ;;  %5370 = vrot.lane.b32.xlu0 %v16928_v52, %s9207_s15  ;;  %vm1462_vm4 = vweird.f32 %v8691_v14  ;;  %v11630_v19 = vpop.eup %8692  ;;  %v16939_v39 = vld [vmem:[#allocation144_spill] sm:$0xff]  ;;  %v16944_v52 = vld [vmem:[#allocation125_spill] sm:$0xff] }
 0x493   : > { %vm1463_vm8 = vmor %vm1461_vm7, %vm1462_vm4  ;;  %v1339_v23 = vsel %vm1062_vm2, %v11630_v19, 0.0  ;;  %v8413_v48 = vunpack.i.l.bf16 %v16944_v52 }
 0x494   : > { %v1458_v15 = vsub.f32 1.0, %v1457_v41  ;;  %v8398_v41 = vunpack.i.l.bf16 %v16940_v10 }
 0x495   : > { %v11682_v10 = vpop.permute.xlu2 %3999 }
 0x496   : > { %v1459_v5 = vmul.f32 %v8691_v14, %v1458_v15  ;;  %4108 = vrot.lane.b32.xlu2 %v16931_v22, %s9203_s23  ;;  %v8414_v15 = vunpack.i.h.bf16 %v16944_v52  ;;  %16960 = vst [vmem:[#allocation19_spill] sm:$0xff] %v11682_v10  ;;  %v11696_v52 = vpop.permute.xlu0 %4007 }
 0x497   : > { %7892 = vmatmul.msk.f32.gmra.mxu3 %vm633_vm1, %v16929_v30  ;;  %7908 = vmatmul.msk.f32.gmra.mxu1 %vm633_vm1, %v16930_v28  ;;  %v16945_v30 = vld [vmem:[#allocation110_spill] sm:$0xff] }
 0x498   : > { %v1460_v29 = vadd.f32 %v8691_v14, %v1459_v5  ;;  %v8394_v28 = vunpack.i.h.bf16 %v16945_v30  ;;  %v11654_v5 = vpack.i.bf16 %v16866_v6, %v16947_v1 }
 0x49a   : > { %v1464_v56 = vsel %vm1463_vm8, %v8691_v14, %v1460_v29  ;;  %5501 = vrot.lane.b32.xlu0 %v16932_v58, %s9206_s14  ;;  %v16941_v14 = vld [vmem:[#allocation56_spill] sm:$0xff]  ;;  %16948 = vst [vmem:[#allocation89_spill] sm:$0xff] %v11654_v5  ;;  %v8393_v29 = vunpack.i.l.bf16 %v16945_v30  ;;  %v16966_v30 = vld [vmem:[#allocation63_spill] sm:$0xff] }
 0x49b   : > { %v1469_v50 = vsel %vm1466_vm10, %v1468_v38, %v1464_v56  ;;  %v16950_v38 = vld [vmem:[#allocation113_spill] sm:$0xff]  ;;  %v16951_v56 = vld [vmem:[#allocation115_spill] sm:$0xff] }
 0x49c   : > { %v1470_v12 = vmul.f32 %v11014_v9, %v1469_v50  ;;  %v1724_v9 = vsel %vm1721_vm9, %v1723_v37, %v1719_v44  ;;  %v8409_v61 = vunpack.i.h.bf16 %v16950_v38  ;;  %v8389_v59 = vunpack.i.h.bf16 %v16951_v56  ;;  %v16952_v50 = vld [vmem:[#allocation40_spill] sm:$0xff]  ;;  %v16955_v44 = vld [vmem:[#allocation118_spill] sm:$0xff] }
 0x49d   : > { %v1725_v47 = vmul.f32 %v16939_v39, %v1724_v9  ;;  %v8408_v35 = vunpack.i.l.bf16 %v16950_v38  ;;  %v8404_v37 = vunpack.i.h.bf16 %v16955_v44  ;;  %v16956_v9 = vld [vmem:[#allocation120_spill] sm:$0xff]  ;;  %v8403_v39 = vunpack.i.l.bf16 %v16955_v44  ;;  %v16975_v44 = vld [vmem:[#allocation27_spill] sm:$0xff] }
 0x49e   : > { %7845 = vmatmul.msk.f32.gmra.mxu2 %vm1062_vm2, %v1470_v12  ;;  %4114 = vrot.lane.b32.xlu2 %v16935_v51, %s9204_s25  ;;  %v8388_v12 = vunpack.i.l.bf16 %v16951_v56  ;;  %v16973_v56 = vld [vmem:[#allocation65_spill] sm:$0xff] }
 0x49f   : > { %7893 = vmatmul.msk.f32.gmra.mxu3 %vm633_vm1, %v16933_v31  ;;  %7909 = vmatmul.msk.f32.gmra.mxu1 %vm633_vm1, %v16934_v7  ;;  %v16953_v31 = vld [vmem:[#allocation29_spill] sm:$0xff] }
 0x4a0   : > { %v11628_v3 = vpop.f32.mrf.mxu1 }
 0x4a1   : > { %16936 = vst [vmem:[#allocation106_spill] sm:$0xff] %v11628_v3  ;;  %v16985_v3 = vld [vmem:[#allocation64_spill] sm:$0xff] }
 0x4a2   : > { %5376 = vrot.lane.b32.xlu0 %v16937_v40, %s9207_s15  ;;  %v8384_v40 = vunpack.i.h.bf16 %v16956_v9 }
 0x4a5   : > { %1340 = vadd.xlane.f32.xlu1 %v1339_v23  ;;  %v8383_v23 = vunpack.i.l.bf16 %v16956_v9  ;;  %v16977_v9 = vld [vmem:[#allocation90_spill] sm:$0xff] }
 0x4a6   : > { %7862 = vmatmul.msk.f32.vlgmr.msrb.gmra.mxu2 %vm1062_vm2, %v1725_v47  ;;  %4120 = vrot.lane.b32.xlu2 %v16942_v26, %s9204_s25 }
 0x4a7   : > { %7934 = vmatmul.msk.f32.vlgmr.msra.gmra.mxu3 %vm633_vm1, %v16941_v14  ;;  %v11646_v33 = vpop.f32.mrf.mxu3  ;;  %3650 = vmatpush.msrb.mxu2 %v8399_v0  ;;  %v16961_v0 = vld [vmem:[#allocation21_spill] sm:$0xff] }
 0x4a8   : > { %3739 = vmatpush.msra.mxu3 %v8419_v63  ;;  %16943 = vst [vmem:[#allocation46_spill] sm:$0xff] %v11646_v33  ;;  %v11676_v63 = vpack.i.bf16 %v16957_v36, %v16856_v2  ;;  %v16962_v14 = vld [vmem:[#allocation37_spill] sm:$0xff] }
 0x4a9   : > { %3651 = vmatpush.msrb.mxu2 %v8398_v41 }
 0x4aa   : > { %3740 = vmatpush.msra.mxu3 %v8418_v18  ;;  %8471 = vrot.lane.b32.xlu0 %v11654_v5, %s9205_s13  ;;  %16958 = vst [vmem:[#allocation41_spill] sm:$0xff] %v11676_v63  ;;  %v11690_v18 = vpack.i.bf16 %v16906_v11, %v16962_v14  ;;  %v16969_v11 = vld [vmem:[#allocation86_spill] sm:$0xff] }
 0x4ab   : > { %v11657_v27 = vpop.f32.mrf.mxu1  ;;  %3652 = vmatpush.msrb.mxu2 %v8394_v28  ;;  %v11702_v28 = vpop.permute.xlu2 %4005 }
 0x4ac   : > { %3741 = vmatpush.msra.mxu3 %v8414_v15  ;;  %16949 = vst [vmem:[#allocation104_spill] sm:$0xff] %v11657_v27  ;;  %v16984_v27 = vld [vmem:[#allocation82_spill] sm:$0xff] }
 0x4ad   : > { %3653 = vmatpush.msrb.mxu2 %v8393_v29  ;;  %16963 = vst [vmem:[#allocation135_spill] sm:$0xff] %v11690_v18  ;;  %v16970_v29 = vld [vmem:[#allocation42_spill] sm:$0xff] }
 0x4ae   : > { %3742 = vmatpush.msra.mxu3 %v8413_v48  ;;  %4126 = vrot.lane.b32.xlu2 %v16953_v31, %s9204_s25  ;;  %16967 = vst [vmem:[#allocation20_spill] sm:$0xff] %v11702_v28  ;;  %v16968_v48 = vld [vmem:[#allocation81_spill] sm:$0xff] }
 0x4af   : > { %7935 = vmatmul.msk.f32.gmra.mxu3 %vm633_vm1, %v16952_v50  ;;  %v11670_v7 = vpop.f32.mrf.mxu3  ;;  %3654 = vmatpush.msrb.mxu2 %v8389_v59  ;;  %v11716_v59 = vpop.permute.xlu0 %4013 }
 0x4b0   : > { %3743 = vmatpush.msra.mxu3 %v8409_v61  ;;  %16954 = vst [vmem:[#allocation59_spill] sm:$0xff] %v11670_v7 }
 0x4b1   : > { %3655 = vmatpush.msrb.mxu2 %v8388_v12  ;;  %v16974_v12 = vld [vmem:[#allocation98_spill] sm:$0xff] }
 0x4b2   : > { %3744 = vmatpush.msra.mxu3 %v8408_v35  ;;  %8476 = vrot.lane.b32.xlu0 %v11676_v63, %s9205_s13  ;;  %v11718_v35 = vpop.permute.xlu1 %4009 }
 0x4b3   : > { %v11679_v47 = vpop.f32.mrf.mxu1  ;;  %3656 = vmatpush.msrb.mxu2 %v8384_v40  ;;  %v1335_v50 = vpop.xlane.xlu2 %1334 }
 0x4b4   : > { %3745 = vmatpush.msra.mxu3 %v8404_v37  ;;  %16959 = vst [vmem:[#allocation103_spill] sm:$0xff] %v11679_v47  ;;  %v11724_v37 = vpack.i.bf16 %v16975_v44, %v16932_v58  ;;  %8694 = vrcp.f32 %v1335_v50  ;;  %vm1746_vm4 = vweird.f32 %v1335_v50 }
 0x4b5   : > { %3657 = vmatpush.msrb.mxu2 %v8383_v23 }
 0x4b6   : > { %3746 = vmatpush.msra.mxu3 %v8403_v39  ;;  %8426 = vrot.lane.b32.xlu2 %v11690_v18, %s9205_s13  ;;  %16976 = vst [vmem:[#allocation93_spill] sm:$0xff] %v11724_v37 }
 0x4b7   : > { %7936 = vmatmul.msk.f32.gmra.mxu3 %vm633_vm1, %v16961_v0  ;;  %v11736_v23 = vpop.xlane.xlu0 %1337  ;;  %v16980_v0 = vld [vmem:[#allocation100_spill] sm:$0xff] }
 0x4b8   : > { %vm1761_vm10 = vweird.f32 %v11736_v23 }
 0x4b9   : > { %v11694_v41 = vpop.f32.mrf.mxu3 }
 0x4ba   : > { %16964 = vst [vmem:[#allocation18_spill] sm:$0xff] %v11694_v41  ;;  %5380 = vrot.lane.b32.xlu0 %v16966_v30, %s9207_s15  ;;  %v8695_v30 = vpop.eup %8694 }
 0x4bb   : > { %v11698_v15 = vpop.f32.mrf.mxu1  ;;  %vm1747_vm15 = vweird.f32 %v8695_v30 }
 0x4bc   : > { %16965 = vst [vmem:[#allocation133_spill] sm:$0xff] %v11698_v15  ;;  %vm1748_vm7 = vmor %vm1746_vm4, %vm1747_vm15 }
 0x4be   : > { %4100 = vrot.lane.b32.xlu1 %v16969_v11, %s9203_s23  ;;  %5394 = vrot.lane.b32.xlu2 %v16970_v29, %s9206_s14 }
 0x4bf   : > { %7937 = vmatmul.msk.f32.gmra.mxu3 %vm633_vm1, %v16968_v48  ;;  %v16981_v48 = vld [vmem:[#allocation43_spill] sm:$0xff] }
 0x4c1   : > { %v11710_v38 = vpop.f32.mrf.mxu3 }
 0x4c2   : > { %16971 = vst [vmem:[#allocation13_spill] sm:$0xff] %v11710_v38  ;;  %5471 = vrot.lane.b32.xlu0 %v16973_v56, %s9207_s15  ;;  %v1742_v56 = vmul.f32 %v8695_v30, %v1335_v50 }
 0x4c4   : > { %v11712_v61 = vpop.f32.mrf.mxu1  ;;  %v1743_v15 = vsub.f32 1.0, %v1742_v56 }
 0x4c5   : > { %16972 = vst [vmem:[#allocation30_spill] sm:$0xff] %v11712_v61 }
 0x4c6   : > { %4106 = vrot.lane.b32.xlu1 %v16977_v9, %s9203_s23  ;;  %8441 = vrot.lane.b32.xlu2 %v11724_v37, %s9205_s13  ;;  %v1744_v41 = vmul.f32 %v8695_v30, %v1743_v15  ;;  %v1752_v15 = vand.u32 2147483648, %v1335_v50 }
 0x4c7   : > { %7938 = vmatmul.msk.f32.gmra.mxu3 %vm633_vm1, %v16974_v12 }
 0x4c8   : > { %v1745_v10 = vadd.f32 %v8695_v30, %v1744_v41 }
 0x4c9   : > { %v11730_v40 = vpop.f32.mrf.mxu3 }
 0x4ca   : > { %16978 = vst [vmem:[#allocation114_spill] sm:$0xff] %v11730_v40  ;;  %5606 = vrot.lane.b32.xlu0 %v16912_v49, %s9206_s14  ;;  %v16986_v40 = vld [vmem:[#allocation60_spill] sm:$0xff] }
 0x4cb   : > { %v11755_v38 = vpack.i.bf16 %v16986_v40, %v16985_v3 }
 0x4cc   : > { %v11732_v39 = vpop.f32.mrf.mxu1 }
 0x4cd   : > { %16979 = vst [vmem:[#allocation142_spill] sm:$0xff] %v11732_v39  ;;  %v1332_v58 = vpop.xlane.xlu1 %1331 }
 0x4ce   : > { %8696 = vrcp.f32 %v1332_v58  ;;  %4112 = vrot.lane.b32.xlu1 %v16981_v48, %s9204_s25  ;;  %5386 = vrot.lane.b32.xlu2 %v16886_v20, %s9206_s14  ;;  %16987 = vst [vmem:[#allocation47_spill] sm:$0xff] %v11755_v38  ;;  %v1735_v33 = vand.u32 2147483647, %v1332_v58  ;;  %vm1731_vm13 = vweird.f32 %v1332_v58 }
 0x4cf   : > { %7939 = vmatmul.msk.f32.gmra.mxu3 %vm633_vm1, %v16980_v0  ;;  %8698 = vrcp.f32 %v11736_v23 }
 0x4d0   : > { %vm1736_vm3 = vcmp.eq.f32.partialorder %v1735_v33, 8.507059e+37 }
 0x4d2   : > { %v11745_v12 = vpop.f32.mrf.mxu3  ;;  %5602 = vrot.lane.b32.xlu0 %v16875_v54, %s9206_s14 }
 0x4d3   : > { %16982 = vst [vmem:[#allocation109_spill] sm:$0xff] %v11745_v12  ;;  %v1737_v12 = vand.u32 2147483648, %v1332_v58 }
 0x4d4   : > { %v11747_v39 = vpop.f32.mrf.mxu1  ;;  %v8697_v0 = vpop.eup %8696 }
 0x4d5   : > { %16983 = vst [vmem:[#allocation49_spill] sm:$0xff] %v11747_v39  ;;  %v8699_v61 = vpop.eup %8698  ;;  %v1727_v47 = vmul.f32 %v8697_v0, %v1332_v58  ;;  %vm1732_vm11 = vweird.f32 %v8697_v0  ;;  %v1738_v28 = vor.u32 1.1754944e-38, %v1737_v12  ;;  %v1753_v12 = vor.u32 1.1754944e-38, %v1752_v15 }
 0x4d6   : > { %8456 = vrot.lane.b32.xlu2 %v11755_v38, %s9205_s13  ;;  %v1757_v39 = vmul.f32 %v8699_v61, %v11736_v23  ;;  %vm1733_vm14 = vmor %vm1731_vm13, %vm1732_vm11  ;;  %vm1762_vm5 = vweird.f32 %v8699_v61 }
 0x4d7   : > { %7940 = vmatmul.msk.f32.gmra.mxu3 %vm633_vm1, %v16984_v27  ;;  %v1728_v20 = vsub.f32 1.0, %v1727_v47  ;;  %v16990_v47 = vld [vmem:[#allocation101_spill] sm:$0xff]  ;;  %vm1763_vm12 = vmor %vm1761_vm10, %vm1762_vm5 }
 0x4d8   : > { %v1758_v5 = vsub.f32 1.0, %v1757_v39  ;;  %v1749_v39 = vsel %vm1748_vm7, %v8695_v30, %v1745_v10  ;;  %v16996_v10 = vld [vmem:[#allocation105_spill] sm:$0xff]  ;;  %v1765_v30 = vand.u32 2147483647, %v11736_v23 }
 0x4d9   : > { %v1729_v7 = vmul.f32 %v8697_v0, %v1728_v20 }
 0x4da   : > { %v11762_v63 = vpop.f32.mrf.mxu3  ;;  %vm1766_vm6 = vcmp.eq.f32.partialorder %v1765_v30, 8.507059e+37  ;;  %v16999_v30 = vld [vmem:[#allocation45_spill] sm:$0xff] }
 0x4db   : > { %16989 = vst [vmem:[#allocation102_spill] sm:$0xff] %v11762_v63  ;;  %v1730_v27 = vadd.f32 %v8697_v0, %v1729_v7  ;;  %v1759_v7 = vmul.f32 %v8699_v61, %v1758_v5  ;;  %v16995_v5 = vld [vmem:[#allocation31_spill] sm:$0xff] }
 0x4dc   : > { %v11760_v56 = vpop.f32.mrf.mxu1 }
 0x4dd   : > { %16988 = vst [vmem:[#allocation95_spill] sm:$0xff] %v11760_v56  ;;  %v1734_v60 = vsel %vm1733_vm14, %v8697_v0, %v1730_v27  ;;  %v1750_v56 = vand.u32 2147483647, %v1335_v50  ;;  %v16994_v0 = vld [vmem:[#allocation143_spill] sm:$0xff] }
 0x4de   : > { %v1739_v20 = vsel %vm1736_vm3, %v1738_v28, %v1734_v60  ;;  %5368 = vrot.lane.b32.xlu2 %v16991_v46, %s9207_s15  ;;  %v1760_v60 = vadd.f32 %v8699_v61, %v1759_v7  ;;  %v16993_v28 = vld [vmem:[#allocation149_spill] sm:$0xff]  ;;  %v16997_v7 = vld [vmem:[#allocation147_spill] sm:$0xff] }
 0x4df   : > { %7941 = vmatmul.msk.f32.gmra.mxu3 %vm633_vm1, %v16990_v47  ;;  %v1740_v58 = vmul.f32 %v11501_v45, %v1739_v20  ;;  %vm1751_vm8 = vcmp.eq.f32.partialorder %v1750_v56, 8.507059e+37  ;;  %v1190_v46 = vsub.f32 %v16994_v0, %v16993_v28  ;;  %v1767_v45 = vand.u32 2147483648, %v11736_v23  ;;  %v11793_v23 = vld [vmem:[%s16364_s3 + $0x50] sm:$0xff] }
 0x4e0   : > { %v1754_v33 = vsel %vm1751_vm8, %v1753_v12, %v1749_v39  ;;  %v1764_v56 = vsel %vm1763_vm12, %v8699_v61, %v1760_v60  ;;  %v16998_v60 = vld [vmem:[#allocation23_spill] sm:$0xff]  ;;  %v9094_v28 = vld [vmem:[%s16365_s4 + $0x50] sm:$0xff] }
 0x4e1   : > { %7863 = vmatmul.msk.f32.gmra.mxu2 %vm1062_vm2, %v1740_v58  ;;  %v1755_v50 = vmul.f32 %v16996_v10, %v1754_v33  ;;  %v1253_v27 = vmul.f32 1.442695, %v1190_v46  ;;  %v1768_v47 = vor.u32 1.1754944e-38, %v1767_v45  ;;  %v11811_v45 = vld [vmem:[%s16364_s3 + $0x48] sm:$0xff] }
 0x4e2   : > { %v11772_v41 = vpop.f32.mrf.mxu3 }
 0x4e3   : > { %16992 = vst [vmem:[#allocation111_spill] sm:$0xff] %v11772_v41  ;;  %v1769_v20 = vsel %vm1766_vm6, %v1768_v47, %v1764_v56  ;;  %8700 = vpow2.f32 %v1253_v27  ;;  %v9095_v56 = vld [vmem:[%s16365_s4 + $0x8] sm:$0xff]  ;;  %v17005_v41 = vld [vmem:[#allocation26_spill] sm:$0xff] }
 0x4e4   : > { %v11770_v63 = vpop.f32.mrf.mxu1  ;;  %v1770_v39 = vmul.f32 %v16997_v7, %v1769_v20  ;;  %v11827_v20 = vpop.permute.xlu0 %4019 }
 0x4e5   : > { %v11829_v7 = vpop.permute.xlu1 %4015 }
 0x4e6   : > { %5374 = vrot.lane.b32.xlu2 %v16995_v5, %s9207_s15 }
 0x4e9   : > { %7864 = vmatmul.msk.f32.gmra.mxu2 %vm1062_vm2, %v1755_v50  ;;  %v11796_v12 = vpop.eup %8700  ;;  %v11816_v50 = vpop.permute.xlu2 %4011 }
 0x4ea   : > { %v11785_v58 = vpop.f32.mrf.mxu3 }
 0x4ec   : > { %v11783_v15 = vpop.f32.mrf.mxu1 }
 0x4ee   : > { %5499 = vrot.lane.b32.xlu2 %v16975_v44, %s9206_s14  ;;  %v1348_v44 = vsel %vm1062_vm2, %v11796_v12, 0.0 }
 0x4f1   : > { %7865 = vmatmul.msk.f32.gmra.mxu2 %vm1062_vm2, %v1770_v39  ;;  %v11833_v39 = vpop.permute.xlu2 %4017 }
 0x4f2   : > { %v2280_v46 = vpop.f32.mrf.mxu3 }
 0x4f3   : > { %v2281_v5 = vadd.f32 %v11811_v45, %v2280_v46 }
 0x4f4   : > { %v2388_v61 = vpop.f32.mrf.mxu1 }
 0x4f5   : > { %v2389_v33 = vadd.f32 %v11793_v23, %v2388_v61  ;;  %v11823_v27 = vadd.f32 %v9095_v56, %v2281_v5  ;;  %v11835_v61 = vpop.permute.xlu0 %4098  ;;  %v17002_v5 = vld [vmem:[#allocation6_spill] sm:$0xff] }
 0x4f6   : > { %5497 = vrot.lane.b32.xlu2 %v16998_v60, %s9206_s14  ;;  %17000 = vst [vmem:[#allocation140_spill] sm:$0xff] %v11835_v61 }
 0x4f7   : > { %v11806_v0 = vadd.f32 %v9094_v28, %v2389_v33  ;;  %v2651_v47 = vsel %vm1062_vm2, %v11823_v27, -inf  ;;  %v17001_v28 = vld [vmem:[#allocation8_spill] sm:$0xff] }
 0x4f8   : > { %1349 = vadd.xlane.f32.xlu1 %v1348_v44  ;;  %v11839_v44 = vpop.permute.xlu1 %4021 }
 0x4f9   : > { %v2678_v10 = vsel %vm1062_vm2, %v11806_v0, -inf  ;;  %v1344_v33 = vpop.xlane.xlu2 %1343 }
 0x4fa   : > { %8702 = vrcp.f32 %v1344_v33  ;;  %v1797_v11 = vand.u32 2147483648, %v1344_v33  ;;  %vm1791_vm3 = vweird.f32 %v1344_v33 }
 0x4fc   : > { %2679 = vmax.xlane.f32.xlu0 %v2678_v10  ;;  %v11861_v25 = vpop.f32.mrf.mxu1 }
 0x4fd   : > { %v1347_v46 = vpop.xlane.xlu0 %1346 }
 0x4fe   : > { %5378 = vrot.lane.b32.xlu2 %v16999_v30, %s9207_s15  ;;  %vm1806_vm5 = vweird.f32 %v1347_v46 }
 0x500   : > { %v8703_v56 = vpop.eup %8702 }
 0x501   : > { %vm1792_vm14 = vweird.f32 %v8703_v56 }
 0x502   : > { %vm1793_vm4 = vmor %vm1791_vm3, %vm1792_vm14 }
 0x504   : > { %2652 = vmax.xlane.f32.xlu0 %v2651_v47  ;;  %v11871_v17 = vpop.f32.mrf.mxu1 }
 0x506   : > { %5491 = vrot.lane.b32.xlu2 %v16917_v13, %s9206_s14  ;;  %v17003_v13 = vld [vmem:[#allocation28_spill] sm:$0xff] }
 0x507   : > { %v11847_v10 = vpack.i.bf16 %v17003_v13, %v16953_v31 }
 0x509   : > { %17004 = vst [vmem:[#allocation25_spill] sm:$0xff] %v11847_v10 }
 0x50e   : > { %5487 = vrot.lane.b32.xlu2 %v16986_v40, %s9206_s14  ;;  %v1787_v40 = vmul.f32 %v8703_v56, %v1344_v33 }
 0x510   : > { %v1788_v62 = vsub.f32 1.0, %v1787_v40 }
 0x511   : > { %4118 = vrot.lane.b32.xlu1 %v17001_v28, %s9204_s25 }
 0x512   : > { %v1789_v37 = vmul.f32 %v8703_v56, %v1788_v62 }
 0x516   : > { %5475 = vrot.lane.b32.xlu2 %v17002_v5, %s9207_s15  ;;  %v11857_v5 = vpack.i.bf16 %v16970_v29, %v16896_v42  ;;  %v17007_v29 = vld [vmem:[#allocation9_spill] sm:$0xff] }
 0x517   : > { %v11865_v40 = vpack.i.bf16 %v16923_v32, %v17007_v29 }
 0x518   : > { %v1341_v30 = vpop.xlane.xlu1 %1340  ;;  %8481 = vrot.lane.b32.xlu0 %v11847_v10, %s9205_s13  ;;  %17006 = vst [vmem:[#allocation16_spill] sm:$0xff] %v11857_v5 }
 0x519   : > { %8704 = vrcp.f32 %v1341_v30  ;;  %4124 = vrot.lane.b32.xlu1 %v17003_v13, %s9204_s25  ;;  %v1782_v9 = vand.u32 2147483648, %v1341_v30  ;;  %v1780_v18 = vand.u32 2147483647, %v1341_v30  ;;  %vm1776_vm11 = vweird.f32 %v1341_v30  ;;  %17008 = vst [vmem:[#allocation54_spill] sm:$0xff] %v11865_v40 }
 0x51a   : > { %8706 = vrcp.f32 %v1347_v46 }
 0x51b   : > { %v1783_v42 = vor.u32 1.1754944e-38, %v1782_v9  ;;  %vm1781_vm15 = vcmp.eq.f32.partialorder %v1780_v18, 8.507059e+37 }
 0x51e   : > { %5604 = vrot.lane.b32.xlu2 %v17005_v41, %s9206_s14 }
 0x51f   : > { %v8705_v47 = vpop.eup %8704 }
 0x520   : > { %v8707_v61 = vpop.eup %8706  ;;  %v1772_v38 = vmul.f32 %v8705_v47, %v1341_v30  ;;  %vm1777_vm9 = vweird.f32 %v8705_v47  ;;  %v1798_v30 = vor.u32 1.1754944e-38, %v1797_v11 }
 0x521   : > { %8421 = vrot.lane.b32.xlu1 %v11857_v5, %s9205_s13  ;;  %v1802_v21 = vmul.f32 %v8707_v61, %v1347_v46  ;;  %vm1778_vm13 = vmor %vm1776_vm11, %vm1777_vm9  ;;  %vm1807_vm8 = vweird.f32 %v8707_v61 }
 0x522   : > { %v1773_v10 = vsub.f32 1.0, %v1772_v38  ;;  %v1790_v38 = vadd.f32 %v8703_v56, %v1789_v37  ;;  %v1812_v37 = vand.u32 2147483648, %v1347_v46  ;;  %vm1808_vm10 = vmor %vm1806_vm5, %vm1807_vm8 }
 0x523   : > { %v1803_v4 = vsub.f32 1.0, %v1802_v21  ;;  %v2283_v21 = vpop.f32.mrf.mxu3 }
 0x524   : > { %v1774_v55 = vmul.f32 %v8705_v47, %v1773_v10  ;;  %v1794_v32 = vsel %vm1793_vm4, %v8703_v56, %v1790_v38  ;;  %v1813_v56 = vor.u32 1.1754944e-38, %v1812_v37  ;;  %v11895_v38 = vld [vmem:[%s16364_s3 + $0x40] sm:$0xff] }
 0x525   : > { %v1804_v9 = vmul.f32 %v8707_v61, %v1803_v4 }
 0x526   : > { %v1775_v22 = vadd.f32 %v8705_v47, %v1774_v55  ;;  %v1795_v55 = vand.u32 2147483647, %v1344_v33  ;;  %v1810_v33 = vand.u32 2147483647, %v1347_v46 }
 0x527   : > { %v1805_v18 = vadd.f32 %v8707_v61, %v1804_v9 }
 0x528   : > { %v1779_v5 = vsel %vm1778_vm13, %v8705_v47, %v1775_v22  ;;  %vm1796_vm7 = vcmp.eq.f32.partialorder %v1795_v55, 8.507059e+37  ;;  %vm1811_vm12 = vcmp.eq.f32.partialorder %v1810_v33, 8.507059e+37  ;;  %v11882_v47 = vld [vmem:[%s16364_s3 + $0x68] sm:$0xff]  ;;  %v17011_v33 = vld [vmem:[#allocation4_spill] sm:$0xff] }
 0x529   : > { %8436 = vrot.lane.b32.xlu1 %v11865_v40, %s9205_s13  ;;  %v1784_v62 = vsel %vm1781_vm15, %v1783_v42, %v1779_v5  ;;  %v1799_v22 = vsel %vm1796_vm7, %v1798_v30, %v1794_v32  ;;  %v1809_v4 = vsel %vm1808_vm10, %v8707_v61, %v1805_v18  ;;  %v2397_v5 = vpop.f32.mrf.mxu1  ;;  %v9097_v30 = vld [vmem:[%s16365_s4 + $0x40] sm:$0xff] }
 0x52a   : > { %v1785_v10 = vmul.f32 %v11630_v19, %v1784_v62  ;;  %v1800_v19 = vmul.f32 %v11536_v34, %v1799_v22  ;;  %v1814_v34 = vsel %vm1811_vm12, %v1813_v56, %v1809_v4  ;;  %v2398_v61 = vadd.f32 %v11882_v47, %v2397_v5  ;;  %v11923_v22 = vld [vmem:[%s16364_s3 + $0x58] sm:$0xff] }
 0x52b   : > { %v11877_v11 = vpop.f32.mrf.mxu3  ;;  %v1815_v46 = vmul.f32 %v11136_v57, %v1814_v34  ;;  %v11908_v57 = vld [vmem:[%s16364_s3 + $0x60] sm:$0xff]  ;;  %v2392_v37 = vadd.f32 %v11923_v22, %v11861_v25  ;;  %v9099_v56 = vld [vmem:[%s16365_s4 + $0x58] sm:$0xff]  ;;  %v2284_v34 = vadd.f32 %v11793_v23, %v2283_v21  ;;  %v11959_v21 = vpack.i.bf16 %v17005_v41, %v16912_v49 }
 0x52c   : > { %7866 = vmatmul.msk.f32.gmra.mxu2 %vm1062_vm2, %v1785_v10  ;;  %v2383_v10 = vadd.f32 %v11895_v38, %v11770_v63 }
 0x52d   : > { %v11941_v5 = vadd.f32 %v9099_v56, %v2392_v37  ;;  %17014 = vst [vmem:[#allocation55_spill] sm:$0xff] %v11959_v21 }
 0x52e   : > { %v11918_v63 = vadd.f32 %v9097_v30, %v2383_v10  ;;  %v11973_v30 = vpack.i.bf16 %v16907_v53, %v16875_v54 }
 0x530   : > { %v11944_v25 = vpop.permute.xlu1 %4100  ;;  %17017 = vst [vmem:[#allocation7_spill] sm:$0xff] %v11973_v30 }
 0x531   : > { %5392 = vrot.lane.b32.xlu1 %v16962_v14, %s9206_s14  ;;  %v17009_v14 = vld [vmem:[#allocation11_spill] sm:$0xff]  ;;  %17012 = vst [vmem:[#allocation36_spill] sm:$0xff] %v11944_v25 }
 0x532   : > { %v11886_v42 = vpack.i.bf16 %v17009_v14, %v16998_v60  ;;  %v9096_v60 = vld [vmem:[%s16365_s4 + $0x68] sm:$0xff] }
 0x533   : > { %v11901_v62 = vadd.f32 %v9096_v60, %v2398_v61  ;;  %v2289_v55 = vpop.f32.mrf.mxu3  ;;  %v2681_v61 = vsel %vm1062_vm2, %v11941_v5, -inf  ;;  %v9100_v60 = vld [vmem:[%s16365_s4 + $0x10] sm:$0xff] }
 0x534   : > { %7867 = vmatmul.msk.f32.gmra.mxu2 %vm1062_vm2, %v1800_v19  ;;  %17010 = vst [vmem:[#allocation33_spill] sm:$0xff] %v11886_v42  ;;  %v2290_v9 = vadd.f32 %v11908_v57, %v2289_v55  ;;  %v2672_v19 = vsel %vm1062_vm2, %v11918_v63, -inf  ;;  %v11953_v10 = vadd.f32 %v9100_v60, %v2284_v34 }
 0x535   : > { %v2687_v32 = vsel %vm1062_vm2, %v11901_v62, -inf }
 0x536   : > { %v2654_v55 = vsel %vm1062_vm2, %v11953_v10, -inf }
 0x539   : > { %8446 = vrot.lane.b32.xlu1 %v11886_v42, %s9205_s13 }
 0x53c   : > { %7868 = vmatmul.msk.f32.gmra.mxu2 %vm1062_vm2, %v1815_v46  ;;  %v17013_v46 = vld [vmem:[#allocation22_spill] sm:$0xff] }
 0x541   : > { %5384 = vrot.lane.b32.xlu1 %v17007_v29, %s9206_s14  ;;  %v9098_v29 = vld [vmem:[%s16365_s4 + $0x20] sm:$0xff] }
 0x542   : > { %2688 = vmax.xlane.f32.xlu0 %v2687_v32  ;;  %v11928_v18 = vadd.f32 %v9098_v29, %v2290_v9  ;;  %v11961_v9 = vpop.permute.xlu1 %4106  ;;  %v11967_v32 = vpack.i.bf16 %v16942_v26, %v16883_v43  ;;  %v2292_v29 = vpop.f32.mrf.mxu3 }
 0x543   : > { %17015 = vst [vmem:[#allocation51_spill] sm:$0xff] %v11961_v9 }
 0x544   : > { %v2660_v4 = vsel %vm1062_vm2, %v11928_v18, -inf  ;;  %17016 = vst [vmem:[#allocation138_spill] sm:$0xff] %v11967_v32 }
 0x547   : > { %2673 = vmax.xlane.f32.xlu2 %v2672_v19 }
 0x549   : > { %5366 = vrot.lane.b32.xlu1 %v17011_v33, %s9207_s15  ;;  %v11987_v33 = vpop.f32.mrf.mxu2 }
 0x54a   : > { %2661 = vmax.xlane.f32.xlu0 %v2660_v4  ;;  %v11977_v49 = vpop.permute.xlu1 %4112  ;;  %17018 = vst [vmem:[#allocation3_spill] sm:$0xff] %v11987_v33  ;;  %v11991_v34 = vpop.f32.mrf.mxu3 }
 0x54f   : > { %2682 = vmax.xlane.f32.xlu2 %v2681_v61 }
 0x551   : > { %5372 = vrot.lane.b32.xlu1 %v17013_v46, %s9207_s15  ;;  %v11994_v60 = vpop.f32.mrf.mxu2 }
 0x552   : > { %17019 = vst [vmem:[#allocation69_spill] sm:$0xff] %v11994_v60 }
 0x557   : > { %2655 = vmax.xlane.f32.xlu2 %v2654_v55  ;;  %v17020_v55 = vld [vmem:[#allocation66_spill] sm:$0xff] }
 0x559   : > { %8461 = vrot.lane.b32.xlu1 %v11959_v21, %s9205_s13 }
 0x55e   : > { %8486 = vrot.lane.b32.xlu0 %v11967_v32, %s9205_s13 }
 0x561   : > { %8466 = vrot.lane.b32.xlu1 %v11973_v30, %s9205_s13 }
 0x566   : > { %5594 = vrot.lane.b32.xlu0 %v16856_v2, %s9206_s14 }
 0x569   : > { %5495 = vrot.lane.b32.xlu1 %v17009_v14, %s9206_s14 }
 0x56b   : > { %v1350_v41 = vpop.xlane.xlu1 %1349 }
 0x56c   : > { %8708 = vrcp.f32 %v1350_v41  ;;  %v1827_v4 = vand.u32 2147483648, %v1350_v41  ;;  %v1825_v2 = vand.u32 2147483647, %v1350_v41  ;;  %vm1821_vm9 = vweird.f32 %v1350_v41 }
 0x56e   : > { %vm1826_vm13 = vcmp.eq.f32.partialorder %v1825_v2, 8.507059e+37  ;;  %v12023_v2 = vld [vmem:[%s16364_s3 + $0x70] sm:$0xff] }
 0x56f   : > { %5600 = vrot.lane.b32.xlu2 %v16907_v53, %s9206_s14  ;;  %v1828_v53 = vor.u32 1.1754944e-38, %v1827_v4  ;;  %v9101_v4 = vld [vmem:[%s16365_s4 + $0x38] sm:$0xff] }
 0x571   : > { %5493 = vrot.lane.b32.xlu1 %v16916_v24, %s9206_s14 }
 0x572   : > { %v8709_v54 = vpop.eup %8708 }
 0x573   : > { %v1817_v37 = vmul.f32 %v8709_v54, %v1350_v41  ;;  %vm1822_vm6 = vweird.f32 %v8709_v54  ;;  %v2298_v41 = vpop.f32.mrf.mxu3 }
 0x574   : > { %vm1823_vm11 = vmor %vm1821_vm9, %vm1822_vm6 }
 0x575   : > { %v1818_v19 = vsub.f32 1.0, %v1817_v37  ;;  %v17021_v37 = vld [vmem:[#allocation67_spill] sm:$0xff] }
 0x577   : > { %v1819_v56 = vmul.f32 %v8709_v54, %v1818_v19  ;;  %v17023_v19 = vld [vmem:[#allocation12_spill] sm:$0xff] }
 0x579   : > { %5489 = vrot.lane.b32.xlu1 %v16985_v3, %s9206_s14  ;;  %v1820_v14 = vadd.f32 %v8709_v54, %v1819_v56  ;;  %v12002_v3 = vld [vmem:[%s16364_s3 + $0x78] sm:$0xff] }
 0x57b   : > { %v1824_v61 = vsel %vm1823_vm11, %v8709_v54, %v1820_v14  ;;  %v12006_v54 = vpop.f32.mrf.mxu2  ;;  %v2400_v14 = vpop.f32.mrf.mxu1 }
 0x57c   : > { %v1829_v24 = vsel %vm1826_vm13, %v1828_v53, %v1824_v61  ;;  %17022 = vst [vmem:[#allocation57_spill] sm:$0xff] %v12006_v54  ;;  %v17025_v53 = vld [vmem:[#allocation94_spill] sm:$0xff] }
 0x57d   : > { %v1830_v46 = vmul.f32 %v11796_v12, %v1829_v24  ;;  %v2299_v12 = vadd.f32 %v12002_v3, %v2298_v41  ;;  %v12034_v24 = vpop.permute.xlu2 %4096  ;;  %v17028_v41 = vld [vmem:[#allocation61_spill] sm:$0xff] }
 0x57e   : > { %17027 = vst [vmem:[#allocation58_spill] sm:$0xff] %v12034_v24 }
 0x57f   : > { %7869 = vmatmul.msk.f32.gmra.mxu2 %vm1062_vm2, %v1830_v46  ;;  %v12018_v56 = vadd.f32 %v9101_v4, %v2299_v12  ;;  %v9102_v46 = vld [vmem:[%s16365_s4 + $0x70] sm:$0xff] }
 0x581   : > { %5473 = vrot.lane.b32.xlu1 %v17020_v55, %s9207_s15  ;;  %17024 = vst [vmem:[#allocation2_spill] sm:$0xff] %v12018_v56 }
 0x583   : > { %v12032_v61 = vpop.f32.mrf.mxu2 }
 0x584   : > { %17026 = vst [vmem:[#allocation78_spill] sm:$0xff] %v12032_v61 }
 0x585   : > { %v12059_v4 = vpop.permute.xlu2 %4102 }
 0x586   : > { %17030 = vst [vmem:[#allocation14_spill] sm:$0xff] %v12059_v4 }
 0x587   : > { %7918 = vmatmul.msk.f32.vlgmr.msra.gmra.mxu2 %vm633_vm1, %v17021_v37 }
 0x588   : > { %8014 = vmatpush.xpose.msk.msra.mxu2 %vm633_vm1, %v11839_v44  ;;  %v2401_v44 = vadd.f32 %v12023_v2, %v2400_v14 }
 0x589   : > { %5477 = vrot.lane.b32.xlu1 %v17023_v19, %s9207_s15 }
 0x58a   : > { %v12041_v55 = vadd.f32 %v9102_v46, %v2401_v44  ;;  %v2386_v44 = vadd.f32 %v11811_v45, %v11783_v15 }
 0x58b   : > { %v12050_v12 = vpop.f32.mrf.mxu2 }
 0x58c   : > { %8015 = vmatpush.xpose.msk.msra.mxu2 %vm633_vm1, %v11827_v20  ;;  %v2669_v20 = vsel %vm1062_vm2, %v12018_v56, -inf  ;;  %v2690_v37 = vsel %vm1062_vm2, %v12041_v55, -inf  ;;  %17029 = vst [vmem:[#allocation134_spill] sm:$0xff] %v12050_v12  ;;  %v17048_v12 = vld [vmem:[#allocation17_spill] sm:$0xff] }
 0x58d   : > { %v12071_v14 = vpop.permute.xlu2 %4108 }
 0x58e   : > { %17033 = vst [vmem:[#allocation73_spill] sm:$0xff] %v12071_v14 }
 0x58f   : > { %7919 = vmatmul.msk.f32.gmra.mxu2 %vm633_vm1, %v17025_v53  ;;  %v17034_v53 = vld [vmem:[#allocation96_spill] sm:$0xff] }
 0x590   : > { %8016 = vmatpush.xpose.msk.msra.mxu2 %vm633_vm1, %v11833_v39  ;;  %2670 = vmax.xlane.f32.xlu0 %v2669_v20  ;;  %v2293_v39 = vadd.f32 %v11882_v47, %v2292_v29  ;;  %v17031_v29 = vld [vmem:[#allocation62_spill] sm:$0xff]  ;;  %v12077_v20 = vpop.permute.xlu0 %4104 }
 0x591   : > { %17035 = vst [vmem:[#allocation34_spill] sm:$0xff] %v12077_v20 }
 0x594   : > { %8017 = vmatpush.xpose.msk.msra.mxu2 %vm633_vm1, %v11829_v7  ;;  %v9103_v7 = vld [vmem:[%s16365_s4 + $0x28] sm:$0xff] }
 0x595   : > { %v12057_v19 = vadd.f32 %v9103_v7, %v2293_v39  ;;  %v12088_v39 = vpop.permute.xlu2 %4114  ;;  %v9105_v7 = vld [vmem:[%s16365_s4] sm:$0xff] }
 0x597   : > { %7920 = vmatmul.msk.f32.gmra.mxu2 %vm633_vm1, %v17028_v41  ;;  %v17036_v41 = vld [vmem:[#allocation32_spill] sm:$0xff] }
 0x598   : > { %8018 = vmatpush.xpose.msk.msra.mxu2 %vm633_vm1, %v11716_v59  ;;  %2691 = vmax.xlane.f32.xlu2 %v2690_v37  ;;  %v2663_v59 = vsel %vm1062_vm2, %v12057_v19, -inf  ;;  %v2278_v37 = vadd.f32 %v11895_v38, %v11785_v58  ;;  %v12107_v58 = vpop.permute.xlu1 %4118 }
 0x59c   : > { %8019 = vmatpush.xpose.msk.msra.mxu2 %vm633_vm1, %v11816_v50  ;;  %v12069_v50 = vpop.f32.mrf.mxu2 }
 0x59d   : > { %17032 = vst [vmem:[#allocation74_spill] sm:$0xff] %v12069_v50 }
 0x59f   : > { %7921 = vmatmul.msk.f32.gmra.mxu2 %vm633_vm1, %v17031_v29  ;;  %v12097_v29 = vadd.f32 %v9105_v7, %v2278_v37  ;;  %v17042_v37 = vld [vmem:[#allocation97_spill] sm:$0xff]  ;;  %v12117_v7 = vpack.i.bf16 %v16882_v8, %v17001_v28 }
 0x5a0   : > { %8020 = vmatpush.xpose.msk.msra.mxu2 %vm633_vm1, %v11718_v35  ;;  %2664 = vmax.xlane.f32.xlu2 %v2663_v59  ;;  %v9104_v35 = vld [vmem:[%s16365_s4 + $0x48] sm:$0xff]  ;;  %v12099_v59 = vpop.permute.xlu0 %4110 }
 0x5a1   : > { %v12082_v46 = vadd.f32 %v9104_v35, %v2386_v44  ;;  %17038 = vst [vmem:[#allocation80_spill] sm:$0xff] %v12099_v59  ;;  %v17041_v35 = vld [vmem:[#allocation24_spill] sm:$0xff] }
 0x5a2   : > { %17043 = vst [vmem:[#allocation121_spill] sm:$0xff] %v12117_v7 }
 0x5a3   : > { %v2675_v15 = vsel %vm1062_vm2, %v12082_v46, -inf }
 0x5a4   : > { %8021 = vmatpush.xpose.msk.msra.mxu2 %vm633_vm1, %v11696_v52  ;;  %v12086_v52 = vpop.f32.mrf.mxu2 }
 0x5a5   : > { %17037 = vst [vmem:[#allocation92_spill] sm:$0xff] %v12086_v52 }
 0x5a7   : > { %7922 = vmatmul.msk.f32.gmra.mxu2 %vm633_vm1, %v17034_v53  ;;  %v17039_v53 = vld [vmem:[#allocation44_spill] sm:$0xff] }
 0x5ac   : > { %v12103_v44 = vpop.f32.mrf.mxu2 }
 0x5ad   : > { %17040 = vst [vmem:[#allocation38_spill] sm:$0xff] %v12103_v44  ;;  %v12125_v44 = vpop.permute.xlu1 %4124 }
 0x5af   : > { %7923 = vmatmul.msk.f32.gmra.mxu2 %vm633_vm1, %v17036_v41  ;;  %v2648_v41 = vsel %vm1062_vm2, %v12097_v29, -inf }
 0x5b3   : > { %2676 = vmax.xlane.f32.xlu1 %v2675_v15  ;;  %v12111_v15 = vpop.permute.xlu2 %4120 }
 0x5b5   : > { %v12139_v52 = vpop.permute.xlu1 %8421 }
 0x5b7   : > { %7924 = vmatmul.msk.f32.gmra.mxu2 %vm633_vm1, %v17039_v53  ;;  %v12119_v53 = vpop.permute.xlu0 %4116 }
 0x5b8   : > { %5481 = vrot.lane.b32.xlu2 %v17041_v35, %s9207_s15  ;;  %v12123_v35 = vpop.f32.mrf.mxu2 }
 0x5b9   : > { %17044 = vst [vmem:[#allocation144_spill] sm:$0xff] %v12123_v35 }
 0x5bb   : > { %2649 = vmax.xlane.f32.xlu1 %v2648_v41  ;;  %v12127_v60 = vpop.permute.xlu2 %4126  ;;  %v12131_v41 = vpack.i.bf16 %v16981_v48, %v16935_v51 }
 0x5bd   : > { %17045 = vst [vmem:[#allocation123_spill] sm:$0xff] %v12131_v41  ;;  %v12149_v61 = vpop.permute.xlu1 %8436 }
 0x5bf   : > { %7925 = vmatmul.msk.f32.gmra.mxu2 %vm633_vm1, %v17042_v37  ;;  %v12137_v33 = vpop.permute.xlu0 %4122 }
 0x5c0   : > { %8491 = vrot.lane.b32.xlu2 %v12117_v7, %s9205_s13  ;;  %v12135_v37 = vpop.f32.mrf.mxu2 }
 0x5c1   : > { %17046 = vst [vmem:[#allocation56_spill] sm:$0xff] %v12135_v37 }
 0x5c3   : > { %v12141_v50 = vpop.permute.xlu2 %8426 }
 0x5c5   : > { %v12157_v7 = vpop.permute.xlu1 %5392 }
 0x5c6   : > { %17052 = vst [vmem:[#allocation113_spill] sm:$0xff] %v12157_v7 }
 0x5c7   : > { %v12147_v54 = vpop.permute.xlu0 %8431 }
 0x5c8   : > { %8496 = vrot.lane.b32.xlu2 %v12131_v41, %s9205_s13  ;;  %v12143_v35 = vpop.f32.mrf.mxu2 }
 0x5c9   : > { %17047 = vst [vmem:[#allocation15_spill] sm:$0xff] %v12143_v35 }
 0x5cb   : > { %v12151_v32 = vpop.permute.xlu2 %5394 }
 0x5cc   : > { %17049 = vst [vmem:[#allocation125_spill] sm:$0xff] %v12151_v32 }
 0x5cd   : > { %v12165_v9 = vpop.permute.xlu1 %8446 }
 0x5cf   : > { %v12155_v37 = vpop.permute.xlu0 %5396 }
 0x5d0   : > { %v12153_v41 = vpop.f32.mrf.mxu2  ;;  %17051 = vst [vmem:[#allocation5_spill] sm:$0xff] %v12155_v37 }
 0x5d1   : > { %17050 = vst [vmem:[#allocation110_spill] sm:$0xff] %v12153_v41  ;;  %v2395_v41 = vadd.f32 %v11908_v57, %v11871_v17 }
 0x5d3   : > { %v12159_v59 = vpop.permute.xlu2 %8441 }
 0x5d4   : > { %5479 = vrot.lane.b32.xlu1 %v17048_v12, %s9207_s15 }
 0x5d5   : > { %v12175_v25 = vpop.permute.xlu1 %5384 }
 0x5d6   : > { %17058 = vst [vmem:[#allocation48_spill] sm:$0xff] %v12175_v25  ;;  %v12192_v25 = vpop.f32.mrf.mxu3 }
 0x5d7   : > { %v12163_v35 = vpop.permute.xlu0 %5390 }
 0x5d8   : > { %v12161_v14 = vpop.f32.mrf.mxu2  ;;  %17054 = vst [vmem:[#allocation40_spill] sm:$0xff] %v12163_v35 }
 0x5d9   : > { %17053 = vst [vmem:[#allocation115_spill] sm:$0xff] %v12161_v14  ;;  %v9106_v14 = vld [vmem:[%s16365_s4 + $0x60] sm:$0xff] }
 0x5da   : > { %v12182_v21 = vadd.f32 %v9106_v14, %v2395_v41  ;;  %v9107_v14 = vld [vmem:[%s16365_s4 + $0x18] sm:$0xff] }
 0x5db   : > { %v12167_v12 = vpop.permute.xlu2 %5386 }
 0x5dc   : > { %17055 = vst [vmem:[#allocation29_spill] sm:$0xff] %v12167_v12  ;;  %v2684_v17 = vsel %vm1062_vm2, %v12182_v21, -inf }
 0x5df   : > { %v12171_v4 = vpop.permute.xlu0 %5388 }
 0x5e0   : > { %v12169_v20 = vpop.f32.mrf.mxu2  ;;  %17057 = vst [vmem:[#allocation120_spill] sm:$0xff] %v12171_v4  ;;  %v12194_v4 = vpop.permute.xlu1 %5366 }
 0x5e1   : > { %17056 = vst [vmem:[#allocation118_spill] sm:$0xff] %v12169_v20  ;;  %v2287_v20 = vadd.f32 %v11923_v22, %v11877_v11 }
 0x5e2   : > { %17060 = vst [vmem:[#allocation37_spill] sm:$0xff] %v12194_v4 }
 0x5e3   : > { %v12177_v24 = vpop.permute.xlu2 %8456  ;;  %v12201_v41 = vadd.f32 %v9107_v14, %v2287_v20  ;;  %v9108_v20 = vld [vmem:[%s16365_s4 + $0x80] sm:$0xff] }
 0x5e5   : > { %v2657_v11 = vsel %vm1062_vm2, %v12201_v41, -inf }
 0x5e7   : > { %v12186_v12 = vpop.permute.xlu0 %8451 }
 0x5e8   : > { %v12184_v35 = vpop.f32.mrf.mxu2  ;;  %v12209_v37 = vpop.permute.xlu1 %5372 }
 0x5e9   : > { %17059 = vst [vmem:[#allocation21_spill] sm:$0xff] %v12184_v35 }
 0x5ea   : > { %17064 = vst [vmem:[#allocation65_spill] sm:$0xff] %v12209_v37 }
 0x5eb   : > { %v12196_v7 = vpop.permute.xlu2 %5368 }
 0x5ec   : > { %17061 = vst [vmem:[#allocation63_spill] sm:$0xff] %v12196_v7 }
 0x5ef   : > { %v12207_v32 = vpop.permute.xlu0 %5382 }
 0x5f0   : > { %17063 = vst [vmem:[#allocation42_spill] sm:$0xff] %v12207_v32 }
 0x5f3   : > { %v12211_v30 = vpop.permute.xlu2 %5374 }
 0x5f4   : > { %17065 = vst [vmem:[#allocation98_spill] sm:$0xff] %v12211_v30 }
 0x5f7   : > { %v12222_v32 = vpop.permute.xlu0 %5370 }
 0x5f8   : > { %17067 = vst [vmem:[#allocation100_spill] sm:$0xff] %v12222_v32 }
 0x5fe   : > { %2685 = vmax.xlane.f32.xlu1 %v2684_v17  ;;  %v2595_v17 = vpop.f32.mrf.mxu3 }
 0x602   : > { %v12203_v35 = vpop.f32.mrf.mxu2 }
 0x603   : > { %17062 = vst [vmem:[#allocation81_spill] sm:$0xff] %v12203_v35  ;;  %v2596_v35 = vadd.f32 %v11811_v45, %v2595_v17  ;;  %v9110_v17 = vld [vmem:[%s16365_s4 + $0x88] sm:$0xff] }
 0x606   : > { %2658 = vmax.xlane.f32.xlu1 %v2657_v11  ;;  %v2598_v40 = vpop.f32.mrf.mxu3 }
 0x607   : > { %v2599_v32 = vadd.f32 %v11793_v23, %v2598_v40 }
 0x60a   : > { %v2487_v4 = vpop.f32.mrf.mxu2 }
 0x60b   : > { %v2488_v7 = vadd.f32 %v11895_v38, %v2487_v4  ;;  %v9109_v4 = vld [vmem:[%s16365_s4 + $0xc8] sm:$0xff] }
 0x60c   : > { %v12228_v30 = vadd.f32 %v9109_v4, %v2596_v35  ;;  %v9111_v4 = vld [vmem:[%s16365_s4 + $0xd0] sm:$0xff] }
 0x60d   : > { %v12217_v14 = vadd.f32 %v9108_v20, %v2488_v7  ;;  %v12230_v7 = vpop.permute.xlu1 %8461  ;;  %v12232_v20 = vpop.permute.xlu2 %5499 }
 0x60e   : > { %17068 = vst [vmem:[#allocation82_spill] sm:$0xff] %v12228_v30  ;;  %v2723_v35 = vsel %vm1062_vm2, %v12228_v30, -inf }
 0x60f   : > { %17066 = vst [vmem:[#allocation27_spill] sm:$0xff] %v12217_v14  ;;  %v2696_v11 = vsel %vm1062_vm2, %v12217_v14, -inf }
 0x610   : > { %2697 = vmax.xlane.f32.xlu0 %v2696_v11  ;;  %17069 = vst [vmem:[#allocation64_spill] sm:$0xff] %v12230_v7  ;;  %v12249_v7 = vadd.f32 %v9111_v4, %v2599_v32 }
 0x611   : > { %17070 = vst [vmem:[#allocation60_spill] sm:$0xff] %v12232_v20 }
 0x612   : > { %v2490_v37 = vpop.f32.mrf.mxu2  ;;  %v2726_v40 = vsel %vm1062_vm2, %v12249_v7, -inf }
 0x613   : > { %v2491_v42 = vadd.f32 %v11811_v45, %v2490_v37  ;;  %v12244_v37 = vpop.permute.xlu0 %5501 }
 0x614   : > { %17071 = vst [vmem:[#allocation101_spill] sm:$0xff] %v12244_v37 }
 0x615   : > { %v12237_v11 = vadd.f32 %v9110_v17, %v2491_v42  ;;  %v12251_v42 = vpop.permute.xlu1 %8466  ;;  %v12253_v17 = vpop.permute.xlu2 %5497 }
 0x616   : > { %17072 = vst [vmem:[#allocation10_spill] sm:$0xff] %v12251_v42 }
 0x617   : > { %v2699_v45 = vsel %vm1062_vm2, %v12237_v11, -inf  ;;  %17073 = vst [vmem:[#allocation149_spill] sm:$0xff] %v12253_v17  ;;  %v17080_v17 = vld [vmem:[#allocation39_spill] sm:$0xff] }
 0x618   : > { %2700 = vmax.xlane.f32.xlu2 %v2699_v45  ;;  %2724 = vmax.xlane.f32.xlu0 %v2723_v35 }
 0x61a   : > { %v12271_v42 = vpop.f32.mrf.mxu2 }
 0x61b   : > { %v12259_v45 = vpop.permute.xlu0 %5376 }
 0x61c   : > { %17074 = vst [vmem:[#allocation143_spill] sm:$0xff] %v12259_v45 }
 0x61d   : > { %v12261_v35 = vpop.permute.xlu1 %5495  ;;  %v12263_v20 = vpop.permute.xlu2 %5378 }
 0x61e   : > { %17075 = vst [vmem:[#allocation31_spill] sm:$0xff] %v12261_v35 }
 0x61f   : > { %5598 = vrot.lane.b32.xlu1 %v16947_v1, %s9206_s14  ;;  %17076 = vst [vmem:[#allocation105_spill] sm:$0xff] %v12263_v20  ;;  %v2403_v20 = vpop.f32.mrf.mxu1 }
 0x620   : > { %2727 = vmax.xlane.f32.xlu2 %v2726_v40 }
 0x622   : > { %v2496_v35 = vpop.f32.mrf.mxu2 }
 0x623   : > { %v12267_v32 = vpop.permute.xlu0 %8471 }
 0x624   : > { %17077 = vst [vmem:[#allocation147_spill] sm:$0xff] %v12267_v32  ;;  %v12284_v32 = vpop.f32.mrf.mxu3 }
 0x625   : > { %v12269_v4 = vpop.permute.xlu1 %5493  ;;  %v12273_v1 = vpop.permute.xlu2 %5491 }
 0x626   : > { %17078 = vst [vmem:[#allocation23_spill] sm:$0xff] %v12269_v4 }
 0x627   : > { %17079 = vst [vmem:[#allocation45_spill] sm:$0xff] %v12273_v1  ;;  %v9112_v1 = vld [vmem:[%s16365_s4 + $0x78] sm:$0xff] }
 0x62b   : > { %v12277_v40 = vpop.permute.xlu0 %8476 }
 0x62c   : > { %5592 = vrot.lane.b32.xlu0 %v16957_v36, %s9206_s14  ;;  %17081 = vst [vmem:[#allocation6_spill] sm:$0xff] %v12277_v40  ;;  %v2404_v36 = vadd.f32 %v12002_v3, %v2403_v20  ;;  %v2499_v40 = vpop.f32.mrf.mxu2  ;;  %v2604_v16 = vpop.f32.mrf.mxu3 }
 0x62d   : > { %v12279_v45 = vpop.permute.xlu1 %5489  ;;  %v12281_v37 = vpop.permute.xlu2 %5487  ;;  %v2500_v14 = vadd.f32 %v11908_v57, %v2499_v40 }
 0x62e   : > { %17082 = vst [vmem:[#allocation28_spill] sm:$0xff] %v12279_v45  ;;  %v12291_v28 = vadd.f32 %v9112_v1, %v2404_v36  ;;  %v2497_v36 = vadd.f32 %v11923_v22, %v2496_v35 }
 0x62f   : > { %17083 = vst [vmem:[#allocation26_spill] sm:$0xff] %v12281_v37  ;;  %v2296_v37 = vadd.f32 %v12023_v2, %v11991_v34 }
 0x630   : > { %v2693_v20 = vsel %vm1062_vm2, %v12291_v28, -inf }
 0x633   : > { %v12286_v4 = vpop.permute.xlu0 %5380 }
 0x634   : > { %17084 = vst [vmem:[#allocation9_spill] sm:$0xff] %v12286_v4  ;;  %v9113_v4 = vld [vmem:[%s16365_s4 + $0x30] sm:$0xff] }
 0x635   : > { %v12295_v45 = vpop.permute.xlu2 %5475  ;;  %v12304_v48 = vadd.f32 %v9113_v4, %v2296_v37  ;;  %v2605_v4 = vadd.f32 %v11908_v57, %v2604_v16 }
 0x636   : > { %17086 = vst [vmem:[#allocation4_spill] sm:$0xff] %v12295_v45  ;;  %v12311_v45 = vpop.f32.mrf.mxu2 }
 0x637   : > { %v2666_v34 = vsel %vm1062_vm2, %v12304_v48, -inf }
 0x638   : > { %5485 = vrot.lane.b32.xlu2 %v17080_v17, %s9207_s15  ;;  %v12293_v17 = vpop.permute.xlu1 %5473 }
 0x639   : > { %17085 = vst [vmem:[#allocation11_spill] sm:$0xff] %v12293_v17 }
 0x63b   : > { %v12306_v1 = vpop.permute.xlu0 %5471 }
 0x63c   : > { %17087 = vst [vmem:[#allocation22_spill] sm:$0xff] %v12306_v1 }
 0x63d   : > { %v12315_v30 = vpop.permute.xlu2 %5604 }
 0x63e   : > { %17089 = vst [vmem:[#allocation67_spill] sm:$0xff] %v12315_v30 }
 0x640   : > { %v12309_v17 = vpop.permute.xlu1 %5477 }
 0x641   : > { %17088 = vst [vmem:[#allocation66_spill] sm:$0xff] %v12309_v17  ;;  %v2607_v17 = vpop.f32.mrf.mxu3 }
 0x642   : > { %v2608_v40 = vadd.f32 %v11882_v47, %v2607_v17  ;;  %v9118_v17 = vld [vmem:[%s16365_s4 + $0xe8] sm:$0xff] }
 0x643   : > { %v12325_v1 = vpop.permute.xlu0 %5606 }
 0x644   : > { %17091 = vst [vmem:[#allocation94_spill] sm:$0xff] %v12325_v1 }
 0x645   : > { %v2674_v30 = vpop.xlane.xlu2 %2673 }
 0x646   : > { %v2752_v16 = vsub.f32 %v11918_v63, %v2674_v30 }
 0x648   : > { %v2677_v8 = vpop.xlane.xlu1 %2676 }
 0x649   : > { %2694 = vmax.xlane.f32.xlu1 %v2693_v20  ;;  %v9114_v20 = vld [vmem:[%s16365_s4 + $0x98] sm:$0xff] }
 0x64a   : > { %v12320_v37 = vadd.f32 %v9114_v20, %v2497_v36  ;;  %v2505_v36 = vpop.f32.mrf.mxu2  ;;  %v9116_v20 = vld [vmem:[%s16365_s4 + $0xa0] sm:$0xff] }
 0x64b   : > { %v2506_v1 = vadd.f32 %v12023_v2, %v2505_v36  ;;  %v12347_v30 = vpop.permute.xlu0 %5602 }
 0x64c   : > { %17090 = vst [vmem:[#allocation12_spill] sm:$0xff] %v12320_v37  ;;  %v2705_v35 = vsel %vm1062_vm2, %v12320_v37, -inf  ;;  %v12343_v37 = vpop.f32.mrf.mxu3 }
 0x64d   : > { %17093 = vst [vmem:[#allocation62_spill] sm:$0xff] %v12347_v30 }
 0x650   : > { %v2650_v36 = vpop.xlane.xlu1 %2649 }
 0x651   : > { %2667 = vmax.xlane.f32.xlu1 %v2666_v34  ;;  %v9115_v34 = vld [vmem:[%s16365_s4 + $0xe0] sm:$0xff] }
 0x652   : > { %v12331_v56 = vadd.f32 %v9115_v34, %v2605_v4  ;;  %v2792_v4 = vmul.f32 1.442695, %v2752_v16  ;;  %v2508_v16 = vpop.f32.mrf.mxu2 }
 0x653   : > { %v2509_v30 = vadd.f32 %v12002_v3, %v2508_v16 }
 0x654   : > { %17092 = vst [vmem:[#allocation61_spill] sm:$0xff] %v12331_v56  ;;  %v2732_v57 = vsel %vm1062_vm2, %v12331_v56, -inf  ;;  %8710 = vpow2.f32 %v2792_v4  ;;  %v2613_v56 = vpop.f32.mrf.mxu3 }
 0x655   : > { %v2614_v16 = vadd.f32 %v12002_v3, %v2613_v56 }
 0x656   : > { %2706 = vmax.xlane.f32.xlu0 %v2705_v35  ;;  %v12337_v35 = vadd.f32 %v9116_v20, %v2500_v14  ;;  %v9117_v14 = vld [vmem:[%s16365_s4 + $0xb0] sm:$0xff]  ;;  %v12357_v20 = vadd.f32 %v9118_v17, %v2608_v40 }
 0x657   : > { %v12352_v34 = vadd.f32 %v9117_v14, %v2506_v1  ;;  %v12365_v14 = vpop.xlane.xlu0 %2679 }
 0x658   : > { %v2708_v63 = vsel %vm1062_vm2, %v12337_v35, -inf  ;;  %17095 = vst [vmem:[#allocation32_spill] sm:$0xff] %v12357_v20  ;;  %v2735_v1 = vsel %vm1062_vm2, %v12357_v20, -inf  ;;  %v12369_v40 = vpop.permute.xlu1 %5479 }
 0x659   : > { %17094 = vst [vmem:[#allocation96_spill] sm:$0xff] %v12352_v34 }
 0x65a   : > { %v12367_v4 = vpop.eup %8710  ;;  %17096 = vst [vmem:[#allocation44_spill] sm:$0xff] %v12369_v40  ;;  %v2744_v40 = vsub.f32 %v12097_v29, %v2650_v36 }
 0x65c   : > { %v2776_v3 = vmul.f32 1.442695, %v2744_v40 }
 0x65e   : > { %2733 = vmax.xlane.f32.xlu0 %v2732_v57  ;;  %v2714_v57 = vsel %vm1062_vm2, %v12352_v34, -inf }
 0x661   : > { %2709 = vmax.xlane.f32.xlu2 %v2708_v63  ;;  %v2753_v63 = vsub.f32 %v12082_v46, %v2677_v8  ;;  %v9119_v8 = vld [vmem:[%s16365_s4 + $0xb8] sm:$0xff] }
 0x662   : > { %v12376_v46 = vadd.f32 %v9119_v8, %v2509_v30  ;;  %v12389_v8 = vpop.xlane.xlu0 %2652 }
 0x663   : > { %v2794_v17 = vmul.f32 1.442695, %v2753_v63  ;;  %v9120_v63 = vld [vmem:[%s16365_s4 + $0xf8] sm:$0xff] }
 0x664   : > { %17097 = vst [vmem:[#allocation24_spill] sm:$0xff] %v12376_v46  ;;  %v12387_v34 = vadd.f32 %v9120_v63, %v2614_v16 }
 0x665   : > { %8712 = vpow2.f32 %v2794_v17 }
 0x666   : > { %2715 = vmax.xlane.f32.xlu0 %v2714_v57  ;;  %v2683_v57 = vpop.xlane.xlu2 %2682  ;;  %17098 = vst [vmem:[#allocation97_spill] sm:$0xff] %v12387_v34  ;;  %v2741_v17 = vsel %vm1062_vm2, %v12387_v34, -inf  ;;  %8714 = vpow2.f32 %v2776_v3 }
 0x667   : > { %v2755_v34 = vsub.f32 %v11941_v5, %v2683_v57 }
 0x669   : > { %2736 = vmax.xlane.f32.xlu2 %v2735_v1  ;;  %v2864_v1 = vsel %vm1062_vm2, %v12367_v4, 0.0 }
 0x66a   : > { %5596 = vrot.lane.b32.xlu1 %v16866_v6, %s9206_s14  ;;  %v2717_v6 = vsel %vm1062_vm2, %v12376_v46, -inf  ;;  %v12398_v16 = vpop.permute.xlu0 %8481 }
 0x66b   : > { %v12391_v56 = vpop.eup %8712  ;;  %17099 = vst [vmem:[#allocation17_spill] sm:$0xff] %v12398_v16 }
 0x66c   : > { %v12400_v46 = vpop.eup %8714 }
 0x66d   : > { %v2840_v3 = vsel %vm1062_vm2, %v12400_v46, 0.0 }
 0x66e   : > { %2865 = vadd.xlane.f32.xlu0 %v2864_v1  ;;  %v2656_v29 = vpop.xlane.xlu2 %2655  ;;  %v2867_v1 = vsel %vm1062_vm2, %v12391_v56, 0.0 }
 0x671   : > { %2718 = vmax.xlane.f32.xlu2 %v2717_v6  ;;  %v2686_v30 = vpop.xlane.xlu1 %2685 }
 0x672   : > { %v2756_v36 = vsub.f32 %v12182_v21, %v2686_v30  ;;  %v12407_v21 = vpop.xlane.xlu0 %2688 }
 0x674   : > { %v2800_v6 = vmul.f32 1.442695, %v2756_v36 }
 0x676   : > { %2742 = vmax.xlane.f32.xlu0 %v2741_v17  ;;  %8716 = vpow2.f32 %v2800_v6  ;;  %v12403_v51 = vpop.permute.xlu2 %5600  ;;  %v2593_v6 = vadd.f32 %v11895_v38, %v12192_v25 }
 0x677   : > { %17100 = vst [vmem:[#allocation39_spill] sm:$0xff] %v12403_v51 }
 0x679   : > { %2868 = vadd.xlane.f32.xlu2 %v2867_v1  ;;  %v2659_v63 = vpop.xlane.xlu1 %2658 }
 0x67a   : > { %v2747_v40 = vsub.f32 %v12201_v41, %v2659_v63  ;;  %v17102_v41 = vld [vmem:[#allocation68_spill] sm:$0xff] }
 0x67c   : > { %v2782_v30 = vmul.f32 1.442695, %v2747_v40  ;;  %v12409_v17 = vpop.eup %8716  ;;  %v9121_v40 = vld [vmem:[%s16365_s4 + $0xc0] sm:$0xff] }
 0x67d   : > { %17101 = vst [vmem:[#allocation150_spill] sm:$0xff] %v12409_v17  ;;  %v2876_v36 = vsel %vm1062_vm2, %v12409_v17, 0.0 }
 0x67e   : > { %8718 = vpow2.f32 %v2782_v30  ;;  %v12411_v1 = vpop.xlane.xlu2 %2691  ;;  %v12426_v30 = vadd.f32 %v9121_v40, %v2593_v6  ;;  %v2798_v6 = vmul.f32 1.442695, %v2755_v34 }
 0x680   : > { %8720 = vpow2.f32 %v2798_v6 }
 0x681   : > { %2841 = vadd.xlane.f32.xlu2 %v2840_v3  ;;  %v12421_v3 = vpop.xlane.xlu0 %2661 }
 0x684   : > { %v12419_v63 = vpop.eup %8718 }
 0x685   : > { %17103 = vst [vmem:[#allocation68_spill] sm:$0xff] %v12419_v63  ;;  %v2849_v51 = vsel %vm1062_vm2, %v12419_v63, 0.0  ;;  %v17109_v63 = vld [vmem:[#allocation35_spill] sm:$0xff] }
 0x689   : > { %2877 = vadd.xlane.f32.xlu2 %v2876_v36  ;;  %v12430_v36 = vpop.xlane.xlu2 %2664  ;;  %v12434_v38 = vpop.permute.xlu0 %8486 }
 0x68a   : > { %5578 = vrot.lane.b32.xlu0 %v17102_v41, %s9207_s15  ;;  %v2720_v41 = vsel %vm1062_vm2, %v12426_v30, -inf  ;;  %17104 = vst [vmem:[#allocation151_spill] sm:$0xff] %v12434_v38  ;;  %v12450_v38 = vpop.eup %8720 }
 0x68b   : > { %17111 = vst [vmem:[#allocation156_spill] sm:$0xff] %v12450_v38  ;;  %v2873_v5 = vsel %vm1062_vm2, %v12450_v38, 0.0 }
 0x691   : > { %2850 = vadd.xlane.f32.xlu2 %v2849_v51  ;;  %v12436_v25 = vpop.permute.xlu2 %5481  ;;  %v12438_v16 = vpop.permute.xlu0 %5594  ;;  %v2746_v51 = vsub.f32 %v11953_v10, %v2656_v29 }
 0x692   : > { %17105 = vst [vmem:[#allocation152_spill] sm:$0xff] %v12436_v25  ;;  %v12456_v34 = vpop.permute.xlu1 %5598 }
 0x693   : > { %17106 = vst [vmem:[#allocation153_spill] sm:$0xff] %v12438_v16 }
 0x694   : > { %2721 = vmax.xlane.f32.xlu1 %v2720_v41  ;;  %v2780_v41 = vmul.f32 1.442695, %v2746_v51  ;;  %17113 = vst [vmem:[#allocation158_spill] sm:$0xff] %v12456_v34 }
 0x696   : > { %8722 = vpow2.f32 %v2780_v41 }
 0x699   : > { %v12441_v40 = vpop.permute.xlu2 %8491  ;;  %v12443_v17 = vpop.xlane.xlu0 %2670 }
 0x69a   : > { %17107 = vst [vmem:[#allocation154_spill] sm:$0xff] %v12441_v40 }
 0x69b   : > { %17108 = vst [vmem:[#allocation155_spill] sm:$0xff] %v12443_v17 }
 0x69c   : > { %v12458_v57 = vpop.eup %8722 }
 0x69d   : > { %17114 = vst [vmem:[#allocation159_spill] sm:$0xff] %v12458_v57 }
 0x6a1   : > { %v12448_v20 = vpop.xlane.xlu0 %2697  ;;  %v12452_v25 = vpop.permute.xlu2 %8496 }
 0x6a2   : > { %17110 = vst [vmem:[#allocation35_spill] sm:$0xff] %v12448_v20 }
 0x6a3   : > { %17112 = vst [vmem:[#allocation157_spill] sm:$0xff] %v12452_v25 }
 0x6a9   : > { %v12460_v10 = vpop.xlane.xlu2 %2700  ;;  %v12462_v29 = vpop.xlane.xlu0 %2724 }
 0x6aa   : > { %17115 = vst [vmem:[#allocation160_spill] sm:$0xff] %v12462_v29 }
 0x6ad   : > { %5483 = vrot.lane.b32.xlu1 %v17109_v63, %s9207_s15  ;;  %v2846_v63 = vsel %vm1062_vm2, %v12458_v57, 0.0 }
 0x6b1   : > { %v12467_v16 = vpop.permute.xlu0 %5592  ;;  %v12469_v25 = vpop.xlane.xlu2 %2727 }
 0x6b2   : > { %17116 = vst [vmem:[#allocation161_spill] sm:$0xff] %v12467_v16 }
 0x6b4   : > { %2874 = vadd.xlane.f32.xlu0 %v2873_v5 }
 0x6bc   : > { %v2695_v6 = vpop.xlane.xlu1 %2694  ;;  %2847 = vadd.xlane.f32.xlu0 %v2846_v63 }
 0x6bd   : > { %v2759_v51 = vsub.f32 %v12291_v28, %v2695_v6  ;;  %v12478_v28 = vpop.permute.xlu2 %5485  ;;  %v2494_v6 = vadd.f32 %v11793_v23, %v12271_v42  ;;  %v2602_v23 = vadd.f32 %v11923_v22, %v12284_v32 }
 0x6be   : > { %17119 = vst [vmem:[#allocation164_spill] sm:$0xff] %v12478_v28 }
 0x6bf   : > { %v2806_v41 = vmul.f32 1.442695, %v2759_v51 }
 0x6c1   : > { %8724 = vpow2.f32 %v2806_v41  ;;  %v17120_v41 = vld [vmem:[#allocation75_spill] sm:$0xff] }
 0x6c4   : > { %v2668_v5 = vpop.xlane.xlu1 %2667 }
 0x6c5   : > { %v2750_v34 = vsub.f32 %v12304_v48, %v2668_v5 }
 0x6c7   : > { %v12472_v40 = vpop.eup %8724  ;;  %v2788_v38 = vmul.f32 1.442695, %v2750_v34 }
 0x6c8   : > { %17117 = vst [vmem:[#allocation162_spill] sm:$0xff] %v12472_v40  ;;  %v2885_v29 = vsel %vm1062_vm2, %v12472_v40, 0.0 }
 0x6c9   : > { %8726 = vpow2.f32 %v2788_v38  ;;  %2886 = vadd.xlane.f32.xlu2 %v2885_v29  ;;  %v12476_v63 = vpop.xlane.xlu0 %2706  ;;  %v9122_v38 = vld [vmem:[%s16365_s4 + $0x90] sm:$0xff] }
 0x6ca   : > { %17118 = vst [vmem:[#allocation163_spill] sm:$0xff] %v12476_v63  ;;  %v12493_v29 = vadd.f32 %v9122_v38, %v2494_v6 }
 0x6cc   : > { %v2702_v42 = vsel %vm1062_vm2, %v12493_v29, -inf }
 0x6cf   : > { %v12482_v51 = vpop.eup %8726 }
 0x6d0   : > { %5582 = vrot.lane.b32.xlu0 %v17120_v41, %s9207_s15  ;;  %v2858_v48 = vsel %vm1062_vm2, %v12482_v51, 0.0 }
 0x6d1   : > { %2859 = vadd.xlane.f32.xlu2 %v2858_v48  ;;  %v12488_v34 = vpop.xlane.xlu0 %2733  ;;  %v9123_v48 = vld [vmem:[%s16365_s4 + $0xd8] sm:$0xff] }
 0x6d2   : > { %17121 = vst [vmem:[#allocation75_spill] sm:$0xff] %v12488_v34  ;;  %v12506_v28 = vadd.f32 %v9123_v48, %v2602_v23 }
 0x6d4   : > { %v12495_v5 = vpop.xlane.xlu2 %2709  ;;  %v2729_v6 = vsel %vm1062_vm2, %v12506_v28, -inf }
 0x6d7   : > { %2703 = vmax.xlane.f32.xlu1 %v2702_v42  ;;  %v2758_v42 = vsub.f32 %v12041_v55, %v12411_v1 }
 0x6d9   : > { %v12501_v41 = vpop.xlane.xlu0 %2715  ;;  %v2804_v48 = vmul.f32 1.442695, %v2758_v42  ;;  %v8443_v42 = vunpack.i.l.bf16 %v12159_v59 }
 0x6da   : > { %17122 = vst [vmem:[#allocation165_spill] sm:$0xff] %v12501_v41 }
 0x6dc   : > { %v12508_v16 = vpop.xlane.xlu2 %2736 }
 0x6dd   : > { %17123 = vst [vmem:[#allocation166_spill] sm:$0xff] %v12508_v16 }
 0x6df   : > { %2730 = vmax.xlane.f32.xlu1 %v2729_v6 }
 0x6e1   : > { %v2866_v38 = vpop.xlane.xlu0 %2865 }
 0x6e2   : > { %8728 = vrcp.f32 %v2866_v38  ;;  %v3067_v41 = vand.u32 2147483648, %v2866_v38  ;;  %v3065_v57 = vand.u32 2147483647, %v2866_v38  ;;  %vm3061_vm15 = vweird.f32 %v2866_v38 }
 0x6e4   : > { %v12512_v22 = vpop.xlane.xlu2 %2718  ;;  %v3068_v55 = vor.u32 1.1754944e-38, %v3067_v41  ;;  %vm3066_vm4 = vcmp.eq.f32.partialorder %v3065_v57, 8.507059e+37  ;;  %v8448_v57 = vunpack.i.l.bf16 %v12165_v9 }
 0x6e5   : > { %17124 = vst [vmem:[#allocation167_spill] sm:$0xff] %v12512_v22  ;;  %v2749_v22 = vsub.f32 %v12057_v19, %v12430_v36  ;;  %v8444_v19 = vunpack.i.h.bf16 %v12159_v59 }
 0x6e8   : > { %v8729_v32 = vpop.eup %8728 }
 0x6e9   : > { %v3057_v40 = vmul.f32 %v8729_v32, %v2866_v38  ;;  %5709 = vrot.lane.b32.xlu2 %v17003_v13, %s9206_s14  ;;  %vm3062_vm14 = vweird.f32 %v8729_v32 }
 0x6ea   : > { %vm3063_vm3 = vmor %vm3061_vm15, %vm3062_vm14 }
 0x6eb   : > { %v3058_v23 = vsub.f32 1.0, %v3057_v40 }
 0x6ec   : > { %v2869_v34 = vpop.xlane.xlu2 %2868 }
 0x6ed   : > { %v3059_v63 = vmul.f32 %v8729_v32, %v3058_v23  ;;  %8730 = vrcp.f32 %v2869_v34  ;;  %v2786_v23 = vmul.f32 1.442695, %v2749_v22  ;;  %v3082_v41 = vand.u32 2147483648, %v2869_v34 }
 0x6ee   : > { %8732 = vpow2.f32 %v2804_v48  ;;  %vm3076_vm8 = vweird.f32 %v2869_v34 }
 0x6ef   : > { %v3060_v6 = vadd.f32 %v8729_v32, %v3059_v63  ;;  %v3083_v48 = vor.u32 1.1754944e-38, %v3082_v41 }
 0x6f1   : > { %v3064_v1 = vsel %vm3063_vm3, %v8729_v32, %v3060_v6  ;;  %v8449_v32 = vunpack.i.h.bf16 %v12165_v9  ;;  %v8453_v6 = vunpack.i.l.bf16 %v12186_v12 }
 0x6f2   : > { %v3069_v20 = vsel %vm3066_vm4, %v3068_v55, %v3064_v1 }
 0x6f3   : > { %v8731_v13 = vpop.eup %8730  ;;  %v3070_v40 = vmul.f32 %v12367_v4, %v3069_v20  ;;  %v17125_v20 = vld [vmem:[#allocation70_spill] sm:$0xff]  ;;  %v3080_v4 = vand.u32 2147483647, %v2869_v34 }
 0x6f4   : > { %v3072_v17 = vmul.f32 %v8731_v13, %v2869_v34  ;;  %v2842_v16 = vpop.xlane.xlu2 %2841  ;;  %v12523_v63 = vpop.eup %8732  ;;  %vm3077_vm7 = vweird.f32 %v8731_v13 }
 0x6f5   : > { %8734 = vrcp.f32 %v2842_v16  ;;  %7950 = vmatmul.msk.f32.vlgmr.msrb.gmra.mxu1 %vm1062_vm2, %v3070_v40  ;;  %v2882_v22 = vsel %vm1062_vm2, %v12523_v63, 0.0  ;;  %vm3078_vm5 = vmor %vm3076_vm8, %vm3077_vm7  ;;  %vm3081_vm10 = vcmp.eq.f32.partialorder %v3080_v4, 8.507059e+37  ;;  %v12537_v34 = vpop.permute.xlu1 %5596  ;;  %vm2941_vm6 = vweird.f32 %v2842_v16 }
 0x6f6   : > { %v3073_v36 = vsub.f32 1.0, %v3072_v17  ;;  %5146 = vmatpush.msrb.mxu1 %v8443_v42  ;;  %8736 = vpow2.f32 %v2786_v23  ;;  %v8454_v23 = vunpack.i.h.bf16 %v12186_v12  ;;  %v8459_v12 = vunpack.i.h.bf16 %v12177_v24 }
 0x6f8   : > { %v3074_v38 = vmul.f32 %v8731_v13, %v3073_v36  ;;  %5147 = vmatpush.msrb.mxu1 %v8444_v19  ;;  %5576 = vrot.lane.b32.xlu1 %v17125_v20, %s9207_s15  ;;  %v2947_v36 = vand.u32 2147483648, %v2842_v16 }
 0x6fa   : > { %5148 = vmatpush.msrb.mxu1 %v8448_v57  ;;  %2883 = vadd.xlane.f32.xlu0 %v2882_v22  ;;  %v3075_v59 = vadd.f32 %v8731_v13, %v3074_v38  ;;  %v8458_v57 = vunpack.i.l.bf16 %v12177_v24  ;;  %v2945_v38 = vand.u32 2147483647, %v2842_v16  ;;  %v2948_v20 = vor.u32 1.1754944e-38, %v2947_v36 }
 0x6fb   : > { %v8735_v17 = vpop.eup %8734  ;;  %v8424_v24 = vunpack.i.h.bf16 %v12139_v52 }
 0x6fc   : > { %v2937_v55 = vmul.f32 %v8735_v17, %v2842_v16  ;;  %5149 = vmatpush.msrb.mxu1 %v8449_v32  ;;  %v3079_v1 = vsel %vm3078_vm5, %v8731_v13, %v3075_v59  ;;  %v12533_v42 = vpop.eup %8736  ;;  %vm2942_vm12 = vweird.f32 %v8735_v17  ;;  %vm2946_vm11 = vcmp.eq.f32.partialorder %v2945_v38, 8.507059e+37 }
 0x6fd   : > { %v3084_v40 = vsel %vm3081_vm10, %v3083_v48, %v3079_v1  ;;  %v2855_v13 = vsel %vm1062_vm2, %v12533_v42, 0.0  ;;  %vm2943_vm9 = vmor %vm2941_vm6, %vm2942_vm12  ;;  %v8423_v59 = vunpack.i.l.bf16 %v12139_v52  ;;  %v8434_v1 = vunpack.i.h.bf16 %v12147_v54 }
 0x6fe   : > { %v2938_v19 = vsub.f32 1.0, %v2937_v55  ;;  %5150 = vmatpush.msrb.mxu1 %v8453_v6  ;;  %v3085_v9 = vmul.f32 %v12391_v56, %v3084_v40  ;;  %v8428_v55 = vunpack.i.l.bf16 %v12141_v50  ;;  %v8438_v40 = vunpack.i.l.bf16 %v12149_v61 }
 0x700   : > { %v2939_v41 = vmul.f32 %v8735_v17, %v2938_v19  ;;  %5151 = vmatpush.msrb.mxu1 %v8454_v23  ;;  %v8439_v23 = vunpack.i.h.bf16 %v12149_v61  ;;  %v9124_v19 = vld [vmem:[%s16365_s4 + $0xa8] sm:$0xff]  ;;  %v2611_v61 = vadd.f32 %v12023_v2, %v12343_v37  ;;  %v2761_v2 = vsub.f32 %v12237_v11, %v12460_v10 }
 0x701   : > { %7951 = vmatmul.msk.f32.gmra.mxu1 %vm1062_vm2, %v3085_v9 }
 0x702   : > { %5152 = vmatpush.msrb.mxu1 %v8458_v57  ;;  %2856 = vadd.xlane.f32.xlu0 %v2855_v13  ;;  %v2940_v56 = vadd.f32 %v8735_v17, %v2939_v41  ;;  %v12581_v41 = vpop.xlane.xlu2 %2877  ;;  %v2810_v37 = vmul.f32 1.442695, %v2761_v2  ;;  %v2770_v13 = vsub.f32 %v12249_v7, %v12469_v25 }
 0x704   : > { %5153 = vmatpush.msrb.mxu1 %v8459_v12  ;;  %v2944_v4 = vsel %vm2943_vm9, %v8735_v17, %v2940_v56  ;;  %v8429_v17 = vunpack.i.h.bf16 %v12141_v50  ;;  %v17126_v50 = vld [vmem:[#allocation72_spill] sm:$0xff]  ;;  %v2828_v12 = vmul.f32 1.442695, %v2770_v13  ;;  %vm3121_vm9 = vweird.f32 %v12581_v41 }
 0x705   : > { %v2949_v22 = vsel %vm2946_vm11, %v2948_v20, %v2944_v4  ;;  %v17128_v20 = vld [vmem:[#allocation71_spill] sm:$0xff] }
 0x706   : > { %v2950_v32 = vmul.f32 %v12400_v46, %v2949_v22  ;;  %v8433_v46 = vunpack.i.l.bf16 %v12147_v54  ;;  %v2503_v54 = vadd.f32 %v11882_v47, %v12311_v45  ;;  %v9125_v47 = vld [vmem:[%s16365_s4 + $0xf0] sm:$0xff] }
 0x707   : > { %v2722_v48 = vpop.xlane.xlu1 %2721  ;;  %v12577_v45 = vadd.f32 %v9125_v47, %v2611_v61  ;;  %v17131_v47 = vld [vmem:[#allocation32_spill] sm:$0xff] }
 0x708   : > { %v2768_v6 = vsub.f32 %v12426_v30, %v2722_v48  ;;  %7942 = vmatmul.msk.f32.vlgmr.msrb.gmra.mxu0 %vm1062_vm2, %v2950_v32  ;;  %v12566_v9 = vadd.f32 %v9124_v19, %v2503_v54 }
 0x709   : > { %5057 = vmatpush.msrb.mxu0 %v8423_v59  ;;  %v2738_v57 = vsel %vm1062_vm2, %v12577_v45, -inf }
 0x70a   : > { %v2824_v16 = vmul.f32 1.442695, %v2768_v6  ;;  %v2711_v36 = vsel %vm1062_vm2, %v12566_v9, -inf }
 0x70b   : > { %5058 = vmatpush.msrb.mxu0 %v8424_v24 }
 0x70c   : > { %8738 = vpow2.f32 %v2824_v16 }
 0x70d   : > { %5059 = vmatpush.msrb.mxu0 %v8428_v55  ;;  %8740 = vpow2.f32 %v2810_v37 }
 0x70f   : > { %5060 = vmatpush.msrb.mxu0 %v8429_v17 }
 0x711   : > { %5061 = vmatpush.msrb.mxu0 %v8433_v46 }
 0x712   : > { %v12553_v30 = vpop.eup %8738 }
 0x713   : > { %5062 = vmatpush.msrb.mxu0 %v8434_v1  ;;  %v2912_v52 = vsel %vm1062_vm2, %v12553_v30, 0.0  ;;  %v12597_v4 = vpop.eup %8740 }
 0x714   : > { %2913 = vadd.xlane.f32.xlu2 %v2912_v52  ;;  %v2891_v11 = vsel %vm1062_vm2, %v12597_v4, 0.0 }
 0x715   : > { %5063 = vmatpush.msrb.mxu0 %v8438_v40 }
 0x716   : > { %5584 = vrot.lane.b32.xlu0 %v17126_v50, %s9207_s15 }
 0x717   : > { %5064 = vmatpush.msrb.mxu0 %v8439_v23 }
 0x71e   : > { %5711 = vrot.lane.b32.xlu0 %v16953_v31, %s9206_s14  ;;  %v12585_v31 = vpop.xlane.xlu2 %2850 }
 0x71f   : > { %v12593_v56 = vpop.permute.xlu1 %5483 }
 0x720   : > { %17127 = vst [vmem:[#allocation70_spill] sm:$0xff] %v12593_v56 }
 0x722   : > { %2712 = vmax.xlane.f32.xlu1 %v2711_v36 }
 0x72a   : > { %2739 = vmax.xlane.f32.xlu1 %v2738_v57 }
 0x72c   : > { %5707 = vrot.lane.b32.xlu2 %v16883_v43, %s9206_s14 }
 0x73c   : > { %v12589_v38 = vpop.xlane.xlu2 %2886 }
 0x743   : > { %5580 = vrot.lane.b32.xlu1 %v17128_v20, %s9207_s15 }
 0x744   : > { %v2860_v43 = vpop.xlane.xlu2 %2859 }
 0x745   : > { %8742 = vrcp.f32 %v2860_v43  ;;  %v3037_v6 = vand.u32 2147483648, %v2860_v43  ;;  %v3035_v55 = vand.u32 2147483647, %v2860_v43  ;;  %vm3031_vm14 = vweird.f32 %v2860_v43 }
 0x746   : > { %8744 = vpow2.f32 %v2828_v12 }
 0x747   : > { %v3038_v1 = vor.u32 1.1754944e-38, %v3037_v6  ;;  %vm3036_vm3 = vcmp.eq.f32.partialorder %v3035_v55, 8.507059e+37  ;;  %v17136_v55 = vld [vmem:[#allocation2_spill] sm:$0xff] }
 0x748   : > { %2892 = vadd.xlane.f32.xlu0 %v2891_v11 }
 0x74a   : > { %v2704_v10 = vpop.xlane.xlu1 %2703 }
 0x74b   : > { %v8743_v22 = vpop.eup %8742  ;;  %v2762_v32 = vsub.f32 %v12493_v29, %v2704_v10 }
 0x74c   : > { %v12602_v7 = vpop.eup %8744  ;;  %v3027_v25 = vmul.f32 %v8743_v22, %v2860_v43  ;;  %vm3032_vm13 = vweird.f32 %v8743_v22 }
 0x74d   : > { %v2812_v59 = vmul.f32 1.442695, %v2762_v32  ;;  %v2918_v24 = vsel %vm1062_vm2, %v12602_v7, 0.0  ;;  %vm3033_vm15 = vmor %vm3031_vm14, %vm3032_vm13 }
 0x74e   : > { %v3028_v48 = vsub.f32 1.0, %v3027_v25  ;;  %v17133_v25 = vld [vmem:[#allocation76_spill] sm:$0xff] }
 0x74f   : > { %8746 = vpow2.f32 %v2812_v59 }
 0x750   : > { %v3029_v16 = vmul.f32 %v8743_v22, %v3028_v48  ;;  %2919 = vadd.xlane.f32.xlu0 %v2918_v24 }
 0x752   : > { %v3030_v17 = vadd.f32 %v8743_v22, %v3029_v16  ;;  %v2731_v46 = vpop.xlane.xlu1 %2730  ;;  %v17134_v16 = vld [vmem:[#allocation50_spill] sm:$0xff] }
 0x753   : > { %v2771_v29 = vsub.f32 %v12506_v28, %v2731_v46  ;;  %v2754_v28 = vsub.f32 %v11806_v0, %v12365_v14 }
 0x754   : > { %v3034_v40 = vsel %vm3033_vm15, %v8743_v22, %v3030_v17 }
 0x755   : > { %v12607_v52 = vpop.eup %8746  ;;  %v3039_v23 = vsel %vm3036_vm3, %v3038_v1, %v3034_v40  ;;  %v2830_v50 = vmul.f32 1.442695, %v2771_v29  ;;  %v2796_v36 = vmul.f32 1.442695, %v2754_v28  ;;  %v17137_v1 = vld [vmem:[#allocation35_spill] sm:$0xff]  ;;  %v17141_v28 = vld [vmem:[#allocation53_spill] sm:$0xff] }
 0x756   : > { %v3040_v54 = vmul.f32 %v12482_v51, %v3039_v23  ;;  %v2894_v19 = vsel %vm1062_vm2, %v12607_v52, 0.0  ;;  %v17138_v29 = vld [vmem:[#allocation27_spill] sm:$0xff] }
 0x757   : > { %8748 = vpow2.f32 %v2830_v50  ;;  %2895 = vadd.xlane.f32.xlu2 %v2894_v19  ;;  %v2760_v40 = vsub.f32 %v17138_v29, %v17137_v1  ;;  %v17139_v50 = vld [vmem:[#allocation167_spill] sm:$0xff] }
 0x758   : > { %7948 = vmatmul.msk.f32.vlgmr.msrb.gmra.mxu3 %vm1062_vm2, %v3040_v54  ;;  %8750 = vpow2.f32 %v2796_v36  ;;  %v17140_v54 = vld [vmem:[#allocation24_spill] sm:$0xff]  ;;  %v12699_v36 = vpop.xlane.xlu0 %2742  ;;  %v17152_v29 = vld [vmem:[#allocation87_spill] sm:$0xff] }
 0x759   : > { %8030 = vmatpush.xpose.msk.msrb.mxu3 %vm633_vm1, %v12127_v60  ;;  %v2745_v60 = vsub.f32 %v11823_v27, %v12389_v8  ;;  %v2808_v23 = vmul.f32 1.442695, %v2760_v40  ;;  %v2767_v19 = vsub.f32 %v17140_v54, %v17139_v50 }
 0x75b   : > { %v2778_v0 = vmul.f32 1.442695, %v2745_v60  ;;  %v17142_v60 = vld [vmem:[#allocation160_spill] sm:$0xff] }
 0x75d   : > { %v12617_v61 = vpop.eup %8748  ;;  %8031 = vmatpush.xpose.msk.msrb.mxu3 %vm633_vm1, %v12125_v44  ;;  %8752 = vpow2.f32 %v2778_v0  ;;  %v17143_v0 = vld [vmem:[#allocation82_spill] sm:$0xff] }
 0x75e   : > { %v2921_v51 = vsel %vm1062_vm2, %v12617_v61, 0.0  ;;  %v12631_v44 = vpop.eup %8750 }
 0x75f   : > { %2922 = vadd.xlane.f32.xlu2 %v2921_v51  ;;  %v2870_v14 = vsel %vm1062_vm2, %v12631_v44, 0.0 }
 0x761   : > { %8032 = vmatpush.xpose.msk.msrb.mxu3 %vm633_vm1, %v12137_v33  ;;  %v2757_v33 = vsub.f32 %v11901_v62, %v12407_v21 }
 0x763   : > { %v12641_v27 = vpop.eup %8752 }
 0x764   : > { %5705 = vrot.lane.b32.xlu0 %v16942_v26, %s9206_s14  ;;  %v2802_v26 = vmul.f32 1.442695, %v2757_v33  ;;  %v2843_v62 = vsel %vm1062_vm2, %v12641_v27, 0.0  ;;  %v2769_v33 = vsub.f32 %v17143_v0, %v17142_v60 }
 0x765   : > { %8033 = vmatpush.xpose.msk.msrb.mxu3 %vm633_vm1, %v12111_v15 }
 0x766   : > { %8754 = vpow2.f32 %v2802_v26 }
 0x769   : > { %8034 = vmatpush.xpose.msk.msrb.mxu3 %vm633_vm1, %v12107_v58  ;;  %v2748_v58 = vsub.f32 %v11928_v18, %v12421_v3 }
 0x76b   : > { %v2784_v15 = vmul.f32 1.442695, %v2748_v58  ;;  %v2826_v58 = vmul.f32 1.442695, %v2769_v33 }
 0x76c   : > { %v12653_v8 = vpop.eup %8754 }
 0x76d   : > { %8035 = vmatpush.xpose.msk.msrb.mxu3 %vm633_vm1, %v12119_v53  ;;  %2871 = vadd.xlane.f32.xlu1 %v2870_v14  ;;  %v17129_v53 = vld [vmem:[#allocation79_spill] sm:$0xff]  ;;  %8756 = vpow2.f32 %v2784_v15  ;;  %v2879_v18 = vsel %vm1062_vm2, %v12653_v8, 0.0  ;;  %v2822_v14 = vmul.f32 1.442695, %v2767_v19 }
 0x771   : > { %8036 = vmatpush.xpose.msk.msrb.mxu3 %vm633_vm1, %v12088_v39  ;;  %v2764_v39 = vsub.f32 %v12337_v35, %v12495_v5  ;;  %v12667_v35 = vpop.permute.xlu1 %5576 }
 0x772   : > { %17132 = vst [vmem:[#allocation72_spill] sm:$0xff] %v12667_v35 }
 0x773   : > { %v2816_v21 = vmul.f32 1.442695, %v2764_v39  ;;  %v12659_v3 = vpop.eup %8756 }
 0x774   : > { %v2852_v2 = vsel %vm1062_vm2, %v12659_v3, 0.0 }
 0x775   : > { %8037 = vmatpush.xpose.msk.msrb.mxu3 %vm633_vm1, %v11977_v49  ;;  %2844 = vadd.xlane.f32.xlu1 %v2843_v62  ;;  %8758 = vpow2.f32 %v2816_v21  ;;  %v17130_v49 = vld [vmem:[#allocation166_spill] sm:$0xff]  ;;  %v17144_v62 = vld [vmem:[#allocation77_spill] sm:$0xff]  ;;  %v17146_v21 = vld [vmem:[#allocation43_spill] sm:$0xff] }
 0x776   : > { %v2773_v57 = vsub.f32 %v17131_v47, %v17130_v49 }
 0x777   : > { %5588 = vrot.lane.b32.xlu2 %v17129_v53, %s9207_s15  ;;  %v12709_v53 = vpop.permute.xlu0 %5578 }
 0x778   : > { %v2834_v37 = vmul.f32 1.442695, %v2773_v57  ;;  %17145 = vst [vmem:[#allocation71_spill] sm:$0xff] %v12709_v53 }
 0x77a   : > { %8760 = vpow2.f32 %v2834_v37 }
 0x77b   : > { %v12665_v13 = vpop.eup %8758 }
 0x77c   : > { %v2900_v5 = vsel %vm1062_vm2, %v12665_v13, 0.0 }
 0x77d   : > { %2880 = vadd.xlane.f32.xlu1 %v2879_v18 }
 0x77f   : > { %v12721_v57 = vpop.xlane.xlu0 %2874 }
 0x780   : > { %v12671_v12 = vpop.eup %8760  ;;  %vm3106_vm12 = vweird.f32 %v12721_v57 }
 0x781   : > { %v2927_v43 = vsel %vm1062_vm2, %v12671_v12, 0.0 }
 0x785   : > { %2853 = vadd.xlane.f32.xlu1 %v2852_v2 }
 0x78e   : > { %2901 = vadd.xlane.f32.xlu0 %v2900_v5  ;;  %v17148_v5 = vld [vmem:[#allocation83_spill] sm:$0xff] }
 0x795   : > { %v2713_v20 = vpop.xlane.xlu1 %2712 }
 0x796   : > { %v2765_v11 = vsub.f32 %v12566_v9, %v2713_v20  ;;  %2928 = vadd.xlane.f32.xlu0 %v2927_v43  ;;  %v12731_v20 = vpop.xlane.xlu0 %2847 }
 0x798   : > { %v2818_v10 = vmul.f32 1.442695, %v2765_v11 }
 0x79a   : > { %8762 = vpow2.f32 %v2818_v10  ;;  %v17149_v10 = vld [vmem:[#allocation85_spill] sm:$0xff] }
 0x79d   : > { %v2740_v22 = vpop.xlane.xlu1 %2739 }
 0x79e   : > { %v2774_v32 = vsub.f32 %v12577_v45, %v2740_v22  ;;  %5586 = vrot.lane.b32.xlu1 %v17133_v25, %s9207_s15  ;;  %v17135_v45 = vld [vmem:[#allocation155_spill] sm:$0xff] }
 0x79f   : > { %v2751_v17 = vsub.f32 %v17136_v55, %v17135_v45  ;;  %v17151_v55 = vld [vmem:[#allocation86_spill] sm:$0xff] }
 0x7a0   : > { %v12679_v59 = vpop.eup %8762  ;;  %v2836_v48 = vmul.f32 1.442695, %v2774_v32 }
 0x7a1   : > { %v2903_v6 = vsel %vm1062_vm2, %v12679_v59, 0.0  ;;  %v2790_v46 = vmul.f32 1.442695, %v2751_v17 }
 0x7a2   : > { %8764 = vpow2.f32 %v2836_v48  ;;  %2904 = vadd.xlane.f32.xlu2 %v2903_v6  ;;  %v12745_v48 = vpop.permute.xlu0 %5582 }
 0x7a3   : > { %8766 = vpow2.f32 %v2790_v46  ;;  %17150 = vst [vmem:[#allocation166_spill] sm:$0xff] %v12745_v48 }
 0x7a4   : > { %8768 = vpow2.f32 %v2808_v23 }
 0x7a5   : > { %8770 = vpow2.f32 %v2822_v14 }
 0x7a6   : > { %8772 = vpow2.f32 %v2826_v58 }
 0x7a7   : > { %8774 = vrcp.f32 %v12721_v57 }
 0x7a8   : > { %v12683_v24 = vpop.eup %8764  ;;  %8776 = vrcp.f32 %v12581_v41 }
 0x7a9   : > { %v2930_v9 = vsel %vm1062_vm2, %v12683_v24, 0.0  ;;  %v12697_v51 = vpop.eup %8766 }
 0x7aa   : > { %2931 = vadd.xlane.f32.xlu2 %v2930_v9  ;;  %5699 = vrot.lane.b32.xlu0 %v17134_v16, %s9206_s14  ;;  %v2861_v26 = vsel %vm1062_vm2, %v12697_v51, 0.0  ;;  %v12707_v15 = vpop.eup %8768  ;;  %v12762_v0 = vpop.xlane.xlu0 %2883 }
 0x7ab   : > { %v2888_v39 = vsel %vm1062_vm2, %v12707_v15, 0.0  ;;  %v12713_v18 = vpop.eup %8770 }
 0x7ac   : > { %v2909_v49 = vsel %vm1062_vm2, %v12713_v18, 0.0  ;;  %v12719_v47 = vpop.eup %8772 }
 0x7ad   : > { %v2915_v2 = vsel %vm1062_vm2, %v12719_v47, 0.0  ;;  %v12733_v43 = vpop.eup %8774 }
 0x7ae   : > { %v12737_v22 = vpop.eup %8776  ;;  %v3102_v32 = vmul.f32 %v12733_v43, %v12721_v57  ;;  %vm3107_vm8 = vweird.f32 %v12733_v43 }
 0x7af   : > { %v3117_v25 = vmul.f32 %v12737_v22, %v12581_v41  ;;  %vm12782_vm6 = vmor %vm3106_vm12, %vm3107_vm8  ;;  %vm3122_vm13 = vweird.f32 %v12737_v22 }
 0x7b0   : > { %v3103_v9 = vsub.f32 1.0, %v3102_v32 }
 0x7b1   : > { %v3118_v46 = vsub.f32 1.0, %v3117_v25 }
 0x7b2   : > { %v3104_v40 = vmul.f32 %v12733_v43, %v3103_v9  ;;  %v17157_v9 = vld [vmem:[#allocation88_spill] sm:$0xff] }
 0x7b3   : > { %v3119_v60 = vmul.f32 %v12737_v22, %v3118_v46  ;;  %v3127_v46 = vand.u32 2147483648, %v12581_v41 }
 0x7b5   : > { %v12725_v37 = vpop.permute.xlu1 %5580 }
 0x7b6   : > { %17147 = vst [vmem:[#allocation79_spill] sm:$0xff] %v12725_v37 }
 0x7c2   : > { %5701 = vrot.lane.b32.xlu2 %v17141_v28, %s9206_s14 }
 0x7c8   : > { %2862 = vadd.xlane.f32.xlu1 %v2861_v26 }
 0x7ca   : > { %5590 = vrot.lane.b32.xlu2 %v17144_v62, %s9207_s15  ;;  %v3105_v62 = vadd.f32 %v12733_v43, %v3104_v40 }
 0x7d0   : > { %2889 = vadd.xlane.f32.xlu1 %v2888_v39 }
 0x7d2   : > { %5697 = vrot.lane.b32.xlu2 %v17146_v21, %s9206_s14 }
 0x7d4   : > { %2910 = vadd.xlane.f32.xlu0 %v2909_v49 }
 0x7d8   : > { %2916 = vadd.xlane.f32.xlu1 %v2915_v2  ;;  %v17153_v2 = vld [vmem:[#allocation16_spill] sm:$0xff] }
 0x7da   : > { %5681 = vrot.lane.b32.xlu2 %v17148_v5, %s9207_s15 }
 0x7e0   : > { %v2872_v11 = vpop.xlane.xlu1 %2871 }
 0x7e1   : > { %8778 = vrcp.f32 %v2872_v11  ;;  %v3097_v23 = vand.u32 2147483648, %v2872_v11  ;;  %v3095_v28 = vand.u32 2147483647, %v2872_v11  ;;  %vm3091_vm7 = vweird.f32 %v2872_v11 }
 0x7e2   : > { %5687 = vrot.lane.b32.xlu2 %v17149_v10, %s9207_s15  ;;  %8780 = vrcp.f32 %v12731_v20  ;;  %v17154_v10 = vld [vmem:[#allocation8_spill] sm:$0xff] }
 0x7e3   : > { %8782 = vrcp.f32 %v12585_v31  ;;  %v3098_v58 = vor.u32 1.1754944e-38, %v3097_v23  ;;  %vm3096_vm10 = vcmp.eq.f32.partialorder %v3095_v28, 8.507059e+37 }
 0x7e7   : > { %v8779_v6 = vpop.eup %8778 }
 0x7e8   : > { %v3087_v16 = vmul.f32 %v8779_v6, %v2872_v11  ;;  %v12747_v45 = vpop.xlane.xlu1 %2844  ;;  %5685 = vrot.lane.b32.xlu0 %v17151_v55, %s9207_s15  ;;  %v12751_v17 = vpop.eup %8780  ;;  %vm3092_vm4 = vweird.f32 %v8779_v6  ;;  %v3112_v11 = vand.u32 2147483648, %v12721_v57  ;;  %v3110_v55 = vand.u32 2147483647, %v12721_v57 }
 0x7e9   : > { %8784 = vrcp.f32 %v12747_v45  ;;  %v12757_v50 = vpop.eup %8782  ;;  %v2967_v54 = vmul.f32 %v12751_v17, %v12731_v20  ;;  %vm3093_vm5 = vmor %vm3091_vm7, %vm3092_vm4  ;;  %v2960_v23 = vand.u32 2147483647, %v12747_v45  ;;  %vm2956_vm14 = vweird.f32 %v12747_v45 }
 0x7ea   : > { %v3088_v1 = vsub.f32 1.0, %v3087_v16  ;;  %5689 = vrot.lane.b32.xlu2 %v17152_v29, %s9207_s15  ;;  %v12766_v26 = vmul.f32 %v12757_v50, %v12585_v31  ;;  %v3109_v29 = vsel %vm12782_vm6, %v12733_v43, %v3105_v62  ;;  %v3113_v57 = vor.u32 1.1754944e-38, %v3112_v11 }
 0x7eb   : > { %v2968_v39 = vsub.f32 1.0, %v2967_v54  ;;  %v3120_v54 = vadd.f32 %v12737_v22, %v3119_v60  ;;  %vm3111_vm15 = vcmp.eq.f32.partialorder %v3110_v55, 8.507059e+37  ;;  %vm2971_vm4 = vweird.f32 %v12731_v20  ;;  %v12811_v60 = vpop.xlane.xlu0 %2856 }
 0x7ec   : > { %v3089_v19 = vmul.f32 %v8779_v6, %v3088_v1  ;;  %v2962_v1 = vand.u32 2147483648, %v12747_v45  ;;  %v2983_v28 = vsub.f32 1.0, %v12766_v26  ;;  %v3114_v62 = vsel %vm3111_vm15, %v3113_v57, %v3109_v29 }
 0x7ed   : > { %vm2972_vm7 = vweird.f32 %v12751_v17  ;;  %vm2961_vm8 = vcmp.eq.f32.partialorder %v2960_v23, 8.507059e+37 }
 0x7ee   : > { %v3090_v33 = vadd.f32 %v8779_v6, %v3089_v19  ;;  %v3125_v19 = vand.u32 2147483647, %v12581_v41  ;;  %v2984_v29 = vmul.f32 %v12757_v50, %v2983_v28 }
 0x7ef   : > { %v8785_v14 = vpop.eup %8784 }
 0x7f0   : > { %v2952_v21 = vmul.f32 %v8785_v14, %v12747_v45  ;;  %v12771_v49 = vpop.xlane.xlu1 %2880  ;;  %8501 = vrot.lane.b32.xlu0 %v17153_v2, %s9208_s26  ;;  %v3094_v5 = vsel %vm3093_vm5, %v8779_v6, %v3090_v33  ;;  %vm2957_vm11 = vweird.f32 %v8785_v14  ;;  %v17158_v45 = vld [vmem:[#allocation54_spill] sm:$0xff]  ;;  %vm12827_vm5 = vmor %vm3121_vm9, %vm3122_vm13  ;;  %vm3126_vm12 = vcmp.eq.f32.partialorder %v3125_v19, 8.507059e+37 }
 0x7f1   : > { %8786 = vrcp.f32 %v12771_v49  ;;  %5703 = vrot.lane.b32.xlu1 %v17154_v10, %s9206_s14  ;;  %v3099_v32 = vsel %vm3096_vm10, %v3098_v58, %v3094_v5  ;;  %vm2958_vm3 = vmor %vm2956_vm14, %vm2957_vm11  ;;  %v2963_v58 = vor.u32 1.1754944e-38, %v2962_v1  ;;  %v2975_v10 = vand.u32 2147483647, %v12731_v20 }
 0x7f2   : > { %8788 = vrcp.f32 %v12762_v0  ;;  %v2953_v6 = vsub.f32 1.0, %v2952_v21  ;;  %5693 = vrot.lane.b32.xlu2 %v17157_v9, %s9207_s15  ;;  %v3100_v16 = vmul.f32 %v12631_v44, %v3099_v32  ;;  %v2969_v44 = vmul.f32 %v12751_v17, %v2968_v39  ;;  %vm2973_vm10 = vmor %vm2971_vm4, %vm2972_vm7 }
 0x7f3   : > { %v2977_v32 = vand.u32 2147483648, %v12731_v20  ;;  %v3124_v41 = vsel %vm12827_vm5, %v12737_v22, %v3120_v54  ;;  %vm2976_vm6 = vcmp.eq.f32.partialorder %v2975_v10, 8.507059e+37  ;;  %v2985_v22 = vadd.f32 %v12757_v50, %v2984_v29  ;;  %v17165_v10 = vld [vmem:[#allocation131_spill] sm:$0xff] }
 0x7f4   : > { %7952 = vmatmul.msk.f32.gmra.mxu1 %vm1062_vm2, %v3100_v16  ;;  %v2954_v40 = vmul.f32 %v8785_v14, %v2953_v6  ;;  %v2970_v5 = vadd.f32 %v12751_v17, %v2969_v44  ;;  %v17161_v6 = vld [vmem:[#allocation135_spill] sm:$0xff]  ;;  %v17162_v16 = vld [vmem:[#allocation156_spill] sm:$0xff]  ;;  %vm2987_vm9 = vweird.f32 %v12757_v50  ;;  %v2992_v19 = vand.u32 2147483648, %v12585_v31 }
 0x7f5   : > { %v3115_v55 = vmul.f32 %v17162_v16, %v3114_v62  ;;  %v2978_v44 = vor.u32 1.1754944e-38, %v2977_v32  ;;  %vm2986_vm13 = vweird.f32 %v12585_v31  ;;  %vm3136_vm14 = vweird.f32 %v12771_v49  ;;  %v17166_v32 = vld [vmem:[#allocation159_spill] sm:$0xff] }
 0x7f6   : > { %v2955_v33 = vadd.f32 %v8785_v14, %v2954_v40  ;;  %v3128_v40 = vor.u32 1.1754944e-38, %v3127_v46  ;;  %v2974_v23 = vsel %vm2973_vm10, %v12751_v17, %v2970_v5  ;;  %v17163_v17 = vld [vmem:[#allocation33_spill] sm:$0xff]  ;;  %v2990_v5 = vand.u32 2147483647, %v12585_v31  ;;  %vm2988_vm15 = vmor %vm2986_vm13, %vm2987_vm9 }
 0x7f7   : > { %v12805_v43 = vpop.eup %8786  ;;  %v2989_v16 = vsel %vm2988_vm15, %v12757_v50, %v2985_v22  ;;  %v17170_v50 = vld [vmem:[#allocation12_spill] sm:$0xff]  ;;  %vm3151_vm10 = vweird.f32 %v12762_v0  ;;  %v3157_v22 = vand.u32 2147483648, %v12762_v0  ;;  %v17176_v31 = vld [vmem:[#allocation61_spill] sm:$0xff] }
 0x7f8   : > { %v12809_v39 = vpop.eup %8788  ;;  %v3132_v26 = vmul.f32 %v12805_v43, %v12771_v49  ;;  %v12815_v21 = vpop.xlane.xlu1 %2853  ;;  %8516 = vrot.lane.b32.xlu0 %v17158_v45, %s9208_s26  ;;  %v2959_v2 = vsel %vm2958_vm3, %v8785_v14, %v2955_v33  ;;  %v3129_v20 = vsel %vm3126_vm12, %v3128_v40, %v3124_v41  ;;  %vm3137_vm11 = vweird.f32 %v12805_v43  ;;  %v17164_v45 = vld [vmem:[#allocation150_spill] sm:$0xff] }
 0x7f9   : > { %8790 = vrcp.f32 %v12815_v21  ;;  %v2964_v11 = vsel %vm2961_vm8, %v2963_v58, %v2959_v2  ;;  %v3147_v1 = vmul.f32 %v12809_v39, %v12762_v0  ;;  %v2979_v58 = vsel %vm2976_vm6, %v2978_v44, %v2974_v23  ;;  %vm12882_vm3 = vmor %vm3136_vm14, %vm3137_vm11 }
 0x7fa   : > { %8792 = vrcp.f32 %v12589_v38  ;;  %v3133_v14 = vsub.f32 1.0, %v3132_v26  ;;  %8506 = vrot.lane.b32.xlu2 %v17161_v6, %s9208_s26  ;;  %v2965_v9 = vmul.f32 %v12641_v27, %v2964_v11  ;;  %v3142_v26 = vand.u32 2147483648, %v12771_v49 }
 0x7fb   : > { %8794 = vrcp.f32 %v12811_v60  ;;  %v3148_v33 = vsub.f32 1.0, %v3147_v1  ;;  %v3130_v2 = vmul.f32 %v17164_v45, %v3129_v20  ;;  %v2980_v25 = vmul.f32 %v17166_v32, %v2979_v58 }
 0x7fc   : > { %v3134_v27 = vmul.f32 %v12805_v43, %v3133_v14  ;;  %7943 = vmatmul.msk.f32.gmra.mxu0 %vm1062_vm2, %v2965_v9  ;;  %7953 = vmatmul.msk.f32.gmra.mxu1 %vm1062_vm2, %v3115_v55  ;;  %v3140_v14 = vand.u32 2147483647, %v12771_v49  ;;  %v2993_v49 = vor.u32 1.1754944e-38, %v2992_v19  ;;  %v3143_v29 = vor.u32 1.1754944e-38, %v3142_v26  ;;  %v17174_v26 = vld [vmem:[#allocation93_spill] sm:$0xff] }
 0x7fd   : > { %v3149_v9 = vmul.f32 %v12809_v39, %v3148_v33  ;;  %vm2991_vm4 = vcmp.eq.f32.partialorder %v2990_v5, 8.507059e+37  ;;  %vm3152_vm8 = vweird.f32 %v12809_v39  ;;  %v3007_v19 = vand.u32 2147483648, %v12815_v21 }
 0x7fe   : > { %v3135_v28 = vadd.f32 %v12805_v43, %v3134_v27  ;;  %v2994_v40 = vsel %vm2991_vm4, %v2993_v49, %v2989_v16  ;;  %vm3141_vm7 = vcmp.eq.f32.partialorder %v3140_v14, 8.507059e+37  ;;  %v17169_v27 = vld [vmem:[#allocation163_spill] sm:$0xff]  ;;  %vm12905_vm12 = vmor %vm3151_vm10, %vm3152_vm8  ;;  %vm3001_vm6 = vweird.f32 %v12815_v21 }
 0x7ff   : > { %v12851_v57 = vpop.eup %8790  ;;  %v2763_v23 = vsub.f32 %v17170_v50, %v17169_v27  ;;  %v3155_v5 = vand.u32 2147483647, %v12762_v0  ;;  %v3158_v14 = vor.u32 1.1754944e-38, %v3157_v22  ;;  %v3022_v49 = vand.u32 2147483648, %v12811_v60 }
 0x800   : > { %v12855_v46 = vpop.eup %8792  ;;  %v2997_v54 = vmul.f32 %v12851_v57, %v12815_v21  ;;  %8526 = vrot.lane.b32.xlu0 %v17163_v17, %s9208_s26  ;;  %v3139_v1 = vsel %vm12882_vm3, %v12805_v43, %v3135_v28  ;;  %vm3002_vm5 = vweird.f32 %v12851_v57  ;;  %v3150_v43 = vadd.f32 %v12809_v39, %v3149_v9  ;;  %v17175_v9 = vld [vmem:[#allocation75_spill] sm:$0xff] }
 0x801   : > { %v12864_v62 = vpop.eup %8794  ;;  %v3162_v6 = vmul.f32 %v12855_v46, %v12589_v38  ;;  %v3144_v20 = vsel %vm3141_vm7, %v3143_v29, %v3139_v1  ;;  %vm3003_vm9 = vmor %vm3001_vm6, %vm3002_vm5  ;;  %vm3156_vm13 = vcmp.eq.f32.partialorder %v3155_v5, 8.507059e+37  ;;  %vm3167_vm14 = vweird.f32 %v12855_v46  ;;  %v17179_v29 = vld [vmem:[#allocation7_spill] sm:$0xff]  ;;  %v17184_v5 = vld [vmem:[#allocation116_spill] sm:$0xff] }
 0x802   : > { %v2998_v11 = vsub.f32 1.0, %v2997_v54  ;;  %8511 = vrot.lane.b32.xlu2 %v17165_v10, %s9208_s26  ;;  %v3012_v55 = vmul.f32 %v12864_v62, %v12811_v60  ;;  %v17171_v54 = vld [vmem:[#allocation68_spill] sm:$0xff]  ;;  %v3145_v45 = vmul.f32 %v12653_v8, %v3144_v20  ;;  %v3154_v8 = vsel %vm12905_vm12, %v12809_v39, %v3150_v43 }
 0x803   : > { %v3163_v44 = vsub.f32 1.0, %v3162_v6  ;;  %v2995_v17 = vmul.f32 %v17171_v54, %v2994_v40  ;;  %v3159_v6 = vsel %vm3156_vm13, %v3158_v14, %v3154_v8  ;;  %v2772_v16 = vsub.f32 %v17176_v31, %v17175_v9  ;;  %v17181_v43 = vld [vmem:[#allocation96_spill] sm:$0xff]  ;;  %v12973_v8 = vpop.permute.xlu0 %5584  ;;  %v17189_v14 = vld [vmem:[#allocation125_spill] sm:$0xff] }
 0x804   : > { %7944 = vmatmul.msk.f32.gmra.mxu0 %vm1062_vm2, %v2980_v25  ;;  %7954 = vmatmul.msk.f32.gmra.mxu1 %vm1062_vm2, %v3130_v2  ;;  %v2999_v41 = vmul.f32 %v12851_v57, %v2998_v11  ;;  %v3013_v33 = vsub.f32 1.0, %v3012_v55  ;;  %v3005_v2 = vand.u32 2147483647, %v12815_v21  ;;  %v2814_v11 = vmul.f32 1.442695, %v2763_v23  ;;  %17188 = vst [vmem:[#allocation32_spill] sm:$0xff] %v12973_v8 }
 0x805   : > { %v3164_v10 = vmul.f32 %v12855_v46, %v3163_v44  ;;  %v3008_v21 = vor.u32 1.1754944e-38, %v3007_v19  ;;  %vm3017_vm15 = vweird.f32 %v12864_v62  ;;  %vm3166_vm3 = vweird.f32 %v12589_v38  ;;  %v17192_v9 = vld [vmem:[#allocation132_spill] sm:$0xff]  ;;  %v17193_v31 = vld [vmem:[#allocation113_spill] sm:$0xff] }
 0x806   : > { %v3000_v58 = vadd.f32 %v12851_v57, %v2999_v41  ;;  %v3014_v25 = vmul.f32 %v12864_v62, %v3013_v33  ;;  %vm3006_vm11 = vcmp.eq.f32.partialorder %v3005_v2, 8.507059e+37  ;;  %8796 = vpow2.f32 %v2814_v11  ;;  %vm12933_vm4 = vmor %vm3166_vm3, %vm3167_vm14 }
 0x807   : > { %v3165_v39 = vadd.f32 %v12855_v46, %v3164_v10  ;;  %v3172_v55 = vand.u32 2147483648, %v12589_v38  ;;  %v3170_v1 = vand.u32 2147483647, %v12589_v38  ;;  %v3160_v27 = vmul.f32 %v12523_v63, %v3159_v6  ;;  %v17186_v10 = vld [vmem:[#allocation5_spill] sm:$0xff]  ;;  %v17191_v6 = vld [vmem:[#allocation127_spill] sm:$0xff] }
 0x808   : > { %v3004_v32 = vsel %vm3003_vm9, %v12851_v57, %v3000_v58  ;;  %v3015_v57 = vadd.f32 %v12864_v62, %v3014_v25  ;;  %vm3016_vm7 = vweird.f32 %v12811_v60  ;;  %v3020_v50 = vand.u32 2147483647, %v12811_v60  ;;  %v17180_v58 = vld [vmem:[#allocation165_spill] sm:$0xff]  ;;  %v12977_v25 = vpop.permute.xlu2 %5709 }
 0x809   : > { %v3009_v0 = vsel %vm3006_vm11, %v3008_v21, %v3004_v32  ;;  %vm3018_vm8 = vmor %vm3016_vm7, %vm3017_vm15  ;;  %v3169_v23 = vsel %vm12933_vm4, %v12855_v46, %v3165_v39  ;;  %v3173_v20 = vor.u32 1.1754944e-38, %v3172_v55  ;;  %v3023_v63 = vor.u32 1.1754944e-38, %v3022_v49  ;;  %v17187_v32 = vld [vmem:[#allocation101_spill] sm:$0xff]  ;;  %v17190_v21 = vld [vmem:[#allocation60_spill] sm:$0xff] }
 0x80a   : > { %8521 = vrot.lane.b32.xlu2 %v17174_v26, %s9208_s26  ;;  %v3010_v40 = vmul.f32 %v12659_v3, %v3009_v0  ;;  %v3019_v38 = vsel %vm3018_vm8, %v12864_v62, %v3015_v57  ;;  %v2832_v3 = vmul.f32 1.442695, %v2772_v16  ;;  %vm3021_vm5 = vcmp.eq.f32.partialorder %v3020_v50, 8.507059e+37  ;;  %v17183_v26 = vld [vmem:[#allocation97_spill] sm:$0xff]  ;;  %v17195_v49 = vld [vmem:[#allocation40_spill] sm:$0xff] }
 0x80b   : > { %vm3171_vm10 = vcmp.eq.f32.partialorder %v3170_v1, 8.507059e+37  ;;  %v3024_v33 = vsel %vm3021_vm5, %v3023_v63, %v3019_v38  ;;  %v2766_v22 = vsub.f32 %v17181_v43, %v17180_v58  ;;  %v17194_v16 = vld [vmem:[#allocation149_spill] sm:$0xff]  ;;  %v12997_v55 = vpop.permute.xlu0 %5711  ;;  %v17196_v1 = vld [vmem:[#allocation31_spill] sm:$0xff]  ;;  %v17200_v50 = vld [vmem:[#allocation120_spill] sm:$0xff] }
 0x80c   : > { %7945 = vmatmul.msk.f32.gmra.mxu0 %vm1062_vm2, %v2995_v17  ;;  %7955 = vmatmul.msk.f32.gmra.mxu1 %vm1062_vm2, %v3145_v45  ;;  %v12949_v44 = vpop.eup %8796  ;;  %v3174_v60 = vsel %vm3171_vm10, %v3173_v20, %v3169_v23  ;;  %8798 = vpow2.f32 %v2832_v3  ;;  %v3025_v54 = vmul.f32 %v12533_v42, %v3024_v33  ;;  %v17182_v17 = vld [vmem:[#allocation162_spill] sm:$0xff]  ;;  %v2775_v45 = vsub.f32 %v17183_v26, %v12699_v36  ;;  %v17201_v38 = vld [vmem:[#allocation23_spill] sm:$0xff]  ;;  %v17202_v20 = vld [vmem:[#allocation29_spill] sm:$0xff] }
 0x80d   : > { %v2897_v62 = vsel %vm1062_vm2, %v12949_v44, 0.0  ;;  %v3175_v46 = vmul.f32 %v17182_v17, %v3174_v60  ;;  %v2820_v19 = vmul.f32 1.442695, %v2766_v22  ;;  %v17185_v42 = vld [vmem:[#allocation130_spill] sm:$0xff]  ;;  %v17203_v63 = vld [vmem:[#allocation45_spill] sm:$0xff]  ;;  %v17204_v58 = vld [vmem:[#allocation119_spill] sm:$0xff] }
 0x80e   : > { %v2838_v11 = vmul.f32 1.442695, %v2775_v45  ;;  %v17205_v43 = vld [vmem:[#allocation136_spill] sm:$0xff]  ;;  %v17209_v26 = vld [vmem:[#allocation26_spill] sm:$0xff] }
 0x80f   : > { %8800 = vpow2.f32 %v2820_v19  ;;  %v17208_v19 = vld [vmem:[#allocation42_spill] sm:$0xff] }
 0x810   : > { %8802 = vpow2.f32 %v2838_v11  ;;  %v12995_v39 = vpop.xlane.xlu2 %2913 }
 0x811   : > { %8804 = vrcp.f32 %v12995_v39  ;;  %vm3301_vm11 = vweird.f32 %v12995_v39 }
 0x812   : > { %8546 = vrot.lane.b32.xlu2 %v17179_v29, %s9208_s26  ;;  %v12959_v28 = vpop.eup %8798  ;;  %v13005_v29 = vpop.permute.xlu1 %5586 }
 0x813   : > { %v2924_v2 = vsel %vm1062_vm2, %v12959_v28, 0.0  ;;  %17197 = vst [vmem:[#allocation76_spill] sm:$0xff] %v13005_v29  ;;  %v13016_v23 = vpop.xlane.xlu0 %2892 }
 0x814   : > { %7946 = vmatmul.msk.f32.gmra.mxu0 %vm1062_vm2, %v3010_v40  ;;  %7956 = vmatmul.msk.f32.gmra.mxu1 %vm1062_vm2, %v3160_v27  ;;  %v17198_v40 = vld [vmem:[#allocation124_spill] sm:$0xff]  ;;  %v17199_v27 = vld [vmem:[#allocation145_spill] sm:$0xff] }
 0x815   : > { %v12975_v36 = vpop.eup %8800 }
 0x816   : > { %v2906_v0 = vsel %vm1062_vm2, %v12975_v36, 0.0  ;;  %v12993_v57 = vpop.eup %8802 }
 0x817   : > { %v2933_v41 = vsel %vm1062_vm2, %v12993_v57, 0.0  ;;  %v13024_v33 = vpop.eup %8804 }
 0x818   : > { %v13018_v3 = vpop.permute.xlu2 %5707  ;;  %v3297_v22 = vmul.f32 %v13024_v33, %v12995_v39  ;;  %vm3302_vm6 = vweird.f32 %v13024_v33 }
 0x819   : > { %vm13072_vm15 = vmor %vm3301_vm11, %vm3302_vm6 }
 0x81a   : > { %v3298_v17 = vsub.f32 1.0, %v3297_v22  ;;  %v17214_v22 = vld [vmem:[#allocation84_spill] sm:$0xff] }
 0x81b   : > { %2898 = vadd.xlane.f32.xlu1 %v2897_v62  ;;  %v17206_v62 = vld [vmem:[#allocation48_spill] sm:$0xff] }
 0x81c   : > { %7947 = vmatmul.msk.f32.gmra.mxu0 %vm1062_vm2, %v3025_v54  ;;  %7957 = vmatmul.msk.f32.gmra.mxu1 %vm1062_vm2, %v3175_v46  ;;  %v17207_v54 = vld [vmem:[#allocation28_spill] sm:$0xff] }
 0x820   : > { %v13037_v46 = vpop.xlane.xlu2 %2895 }
 0x823   : > { %2925 = vadd.xlane.f32.xlu1 %v2924_v2  ;;  %v13043_v2 = vpop.xlane.xlu0 %2919 }
 0x824   : > { %7990 = vmatmul.msk.f32.vlgmr.msra.gmra.mxu0 %vm633_vm1, %v17184_v5  ;;  %8006 = vmatmul.msk.f32.vlgmr.msra.gmra.mxu1 %vm633_vm1, %v17185_v42 }
 0x825   : > { %8086 = vmatpush.xpose.msk.msra.mxu0 %vm633_vm1, %v17186_v10  ;;  %8102 = vmatpush.xpose.msk.msra.mxu1 %vm633_vm1, %v17187_v32  ;;  %v17210_v10 = vld [vmem:[#allocation128_spill] sm:$0xff]  ;;  %v17211_v32 = vld [vmem:[#allocation139_spill] sm:$0xff] }
 0x829   : > { %8087 = vmatpush.xpose.msk.msra.mxu0 %vm633_vm1, %v17189_v14  ;;  %8103 = vmatpush.xpose.msk.msra.mxu1 %vm633_vm1, %v17190_v21  ;;  %v3299_v14 = vmul.f32 %v13024_v33, %v3298_v17 }
 0x82b   : > { %2907 = vadd.xlane.f32.xlu1 %v2906_v0 }
 0x82c   : > { %7991 = vmatmul.msk.f32.gmra.mxu0 %vm633_vm1, %v17191_v6  ;;  %8007 = vmatmul.msk.f32.gmra.mxu1 %vm633_vm1, %v17192_v9 }
 0x82d   : > { %8088 = vmatpush.xpose.msk.msra.mxu0 %vm633_vm1, %v17193_v31  ;;  %8104 = vmatpush.xpose.msk.msra.mxu1 %vm633_vm1, %v17194_v16  ;;  %v3300_v16 = vadd.f32 %v13024_v33, %v3299_v14 }
 0x831   : > { %8089 = vmatpush.xpose.msk.msra.mxu0 %vm633_vm1, %v17195_v49  ;;  %8105 = vmatpush.xpose.msk.msra.mxu1 %vm633_vm1, %v17196_v1 }
 0x833   : > { %2934 = vadd.xlane.f32.xlu1 %v2933_v41 }
 0x834   : > { %7992 = vmatmul.msk.f32.gmra.mxu0 %vm633_vm1, %v17198_v40  ;;  %8008 = vmatmul.msk.f32.gmra.mxu1 %vm633_vm1, %v17199_v27 }
 0x835   : > { %8090 = vmatpush.xpose.msk.msra.mxu0 %vm633_vm1, %v17200_v50  ;;  %8106 = vmatpush.xpose.msk.msra.mxu1 %vm633_vm1, %v17201_v38  ;;  %v3307_v50 = vand.u32 2147483648, %v12995_v39  ;;  %v13065_v38 = vpop.xlane.xlu2 %2922 }
 0x837   : > { %v3308_v14 = vor.u32 1.1754944e-38, %v3307_v50 }
 0x839   : > { %8091 = vmatpush.xpose.msk.msra.mxu0 %vm633_vm1, %v17202_v20  ;;  %8107 = vmatpush.xpose.msk.msra.mxu1 %vm633_vm1, %v17203_v63 }
 0x83b   : > { %v2863_v60 = vpop.xlane.xlu1 %2862 }
 0x83c   : > { %8806 = vrcp.f32 %v2863_v60  ;;  %7993 = vmatmul.msk.f32.gmra.mxu0 %vm633_vm1, %v17204_v58  ;;  %8009 = vmatmul.msk.f32.gmra.mxu1 %vm633_vm1, %v17205_v43  ;;  %v3052_v6 = vand.u32 2147483648, %v2863_v60  ;;  %v3050_v31 = vand.u32 2147483647, %v2863_v60  ;;  %vm3046_vm9 = vweird.f32 %v2863_v60 }
 0x83d   : > { %8808 = vrcp.f32 %v13016_v23  ;;  %8092 = vmatpush.xpose.msk.msra.mxu0 %vm633_vm1, %v17206_v62  ;;  %8108 = vmatpush.xpose.msk.msra.mxu1 %vm633_vm1, %v17207_v54  ;;  %v3305_v43 = vand.u32 2147483647, %v12995_v39  ;;  %v17215_v62 = vld [vmem:[#allocation126_spill] sm:$0xff] }
 0x83e   : > { %v3053_v40 = vor.u32 1.1754944e-38, %v3052_v6  ;;  %vm3051_vm14 = vcmp.eq.f32.partialorder %v3050_v31, 8.507059e+37 }
 0x83f   : > { %vm3306_vm4 = vcmp.eq.f32.partialorder %v3305_v43, 8.507059e+37 }
 0x841   : > { %8093 = vmatpush.xpose.msk.msra.mxu0 %vm633_vm1, %v17208_v19  ;;  %8109 = vmatpush.xpose.msk.msra.mxu1 %vm633_vm1, %v17209_v26  ;;  %v3304_v19 = vsel %vm13072_vm15, %v13024_v33, %v3300_v16 }
 0x842   : > { %v8807_v45 = vpop.eup %8806  ;;  %v3309_v31 = vsel %vm3306_vm4, %v3308_v14, %v3304_v19  ;;  %v17219_v19 = vld [vmem:[#allocation90_spill] sm:$0xff] }
 0x843   : > { %v13045_v5 = vpop.eup %8808  ;;  %v3042_v42 = vmul.f32 %v8807_v45, %v2863_v60  ;;  %v13047_v11 = vpop.xlane.xlu1 %2889  ;;  %vm3047_vm12 = vweird.f32 %v8807_v45 }
 0x844   : > { %8810 = vrcp.f32 %v13047_v11  ;;  %7994 = vmatmul.msk.f32.gmra.mxu0 %vm633_vm1, %v17210_v10  ;;  %8010 = vmatmul.msk.f32.gmra.mxu1 %vm633_vm1, %v17211_v32  ;;  %v3192_v0 = vmul.f32 %v13045_v5, %v13016_v23  ;;  %vm3048_vm13 = vmor %vm3046_vm9, %vm3047_vm12  ;;  %v3187_v32 = vand.u32 2147483648, %v13047_v11  ;;  %v3185_v33 = vand.u32 2147483647, %v13047_v11 }
 0x845   : > { %8812 = vrcp.f32 %v13043_v2  ;;  %v3043_v21 = vsub.f32 1.0, %v3042_v42  ;;  %vm3181_vm7 = vweird.f32 %v13047_v11  ;;  %vm3197_vm8 = vweird.f32 %v13045_v5 }
 0x846   : > { %8814 = vrcp.f32 %v13037_v46  ;;  %v3193_v41 = vsub.f32 1.0, %v3192_v0  ;;  %v17217_v0 = vld [vmem:[#allocation17_spill] sm:$0xff]  ;;  %vm3186_vm10 = vcmp.eq.f32.partialorder %v3185_v33, 8.507059e+37  ;;  %vm3196_vm12 = vweird.f32 %v13016_v23 }
 0x847   : > { %v3044_v9 = vmul.f32 %v8807_v45, %v3043_v21  ;;  %v8484_v6 = vunpack.i.h.bf16 %v17217_v0  ;;  %vm13117_vm6 = vmor %vm3196_vm12, %vm3197_vm8 }
 0x848   : > { %v3194_v42 = vmul.f32 %v13045_v5, %v3193_v41 }
 0x849   : > { %v3045_v49 = vadd.f32 %v8807_v45, %v3044_v9  ;;  %v8483_v9 = vunpack.i.l.bf16 %v17217_v0 }
 0x84a   : > { %v8811_v1 = vpop.eup %8810  ;;  %v3195_v50 = vadd.f32 %v13045_v5, %v3194_v42 }
 0x84b   : > { %v13062_v27 = vpop.eup %8812  ;;  %v3177_v20 = vmul.f32 %v8811_v1, %v13047_v11  ;;  %v13068_v63 = vpop.xlane.xlu1 %2916  ;;  %v3049_v58 = vsel %vm3048_vm13, %v8807_v45, %v3045_v49  ;;  %v17216_v45 = vld [vmem:[#allocation146_spill] sm:$0xff]  ;;  %vm3182_vm3 = vweird.f32 %v8811_v1  ;;  %v3202_v11 = vand.u32 2147483648, %v13016_v23 }
 0x84c   : > { %8816 = vrcp.f32 %v13068_v63  ;;  %5683 = vrot.lane.b32.xlu1 %v17214_v22, %s9207_s15  ;;  %7995 = vmatmul.msk.f32.gmra.mxu0 %vm633_vm1, %v17215_v62  ;;  %v3054_v54 = vsel %vm3051_vm14, %v3053_v40, %v3049_v58  ;;  %v13082_v17 = vpop.eup %8814  ;;  %v3327_v10 = vmul.f32 %v13062_v27, %v13043_v2  ;;  %vm3183_vm5 = vmor %vm3181_vm7, %vm3182_vm3  ;;  %v3188_v40 = vor.u32 1.1754944e-38, %v3187_v32 }
 0x84d   : > { %v3178_v26 = vsub.f32 1.0, %v3177_v20  ;;  %8011 = vmatmul.msk.f32.gmra.mxu1 %vm633_vm1, %v17216_v45  ;;  %v3055_v39 = vmul.f32 %v12697_v51, %v3054_v54  ;;  %8818 = vrcp.f32 %v13065_v38  ;;  %v3207_v51 = vmul.f32 %v13082_v17, %v13037_v46  ;;  %v17218_v20 = vld [vmem:[#allocation64_spill] sm:$0xff] }
 0x84e   : > { %v3328_v41 = vsub.f32 1.0, %v3327_v10  ;;  %v8464_v58 = vunpack.i.h.bf16 %v17218_v20  ;;  %v3310_v45 = vmul.f32 %v12553_v30, %v3309_v31  ;;  %v17223_v10 = vld [vmem:[#allocation137_spill] sm:$0xff]  ;;  %v3200_v32 = vand.u32 2147483647, %v13016_v23 }
 0x84f   : > { %v3179_v21 = vmul.f32 %v8811_v1, %v3178_v26  ;;  %7949 = vmatmul.msk.f32.gmra.mxu3 %vm1062_vm2, %v3055_v39  ;;  %v3208_v62 = vsub.f32 1.0, %v3207_v51  ;;  %v17220_v26 = vld [vmem:[#allocation122_spill] sm:$0xff]  ;;  %v8463_v14 = vunpack.i.l.bf16 %v17218_v20  ;;  %v3322_v30 = vand.u32 2147483648, %v13068_v63  ;;  %v17224_v51 = vld [vmem:[#allocation151_spill] sm:$0xff] }
 0x850   : > { %v3199_v33 = vsel %vm13117_vm6, %v13045_v5, %v3195_v50  ;;  %v3320_v23 = vand.u32 2147483647, %v13068_v63  ;;  %v8489_v31 = vunpack.i.h.bf16 %v17224_v51  ;;  %v17225_v5 = vld [vmem:[#allocation10_spill] sm:$0xff]  ;;  %vm3316_vm11 = vweird.f32 %v13068_v63 }
 0x851   : > { %v3180_v16 = vadd.f32 %v8811_v1, %v3179_v21  ;;  %v3329_v21 = vmul.f32 %v13062_v27, %v3328_v41  ;;  %v3203_v41 = vor.u32 1.1754944e-38, %v3202_v11  ;;  %v8469_v50 = vunpack.i.h.bf16 %v17225_v5 }
 0x852   : > { %v8817_v49 = vpop.eup %8816  ;;  %vm3201_vm13 = vcmp.eq.f32.partialorder %v3200_v32, 8.507059e+37  ;;  %vm3332_vm14 = vweird.f32 %v13062_v27  ;;  %vm3321_vm3 = vcmp.eq.f32.partialorder %v3320_v23, 8.507059e+37  ;;  %vm3212_vm4 = vweird.f32 %v13082_v17  ;;  %v17231_v32 = vld [vmem:[#allocation141_spill] sm:$0xff] }
 0x853   : > { %v3184_v60 = vsel %vm3183_vm5, %v8811_v1, %v3180_v16  ;;  %v3312_v43 = vmul.f32 %v8817_v49, %v13068_v63  ;;  %v13106_v22 = vpop.eup %8818  ;;  %vm3317_vm9 = vweird.f32 %v8817_v49  ;;  %v8488_v16 = vunpack.i.l.bf16 %v17224_v51  ;;  %v13186_v51 = vpop.f32.mrf.mxu1 }
 0x854   : > { %v3189_v54 = vsel %vm3186_vm10, %v3188_v40, %v3184_v60  ;;  %5691 = vrot.lane.b32.xlu1 %v17219_v19, %s9207_s15  ;;  %7996 = vmatmul.msk.f32.gmra.mxu0 %vm633_vm1, %v17220_v26  ;;  %v3342_v0 = vmul.f32 %v13106_v22, %v13065_v38  ;;  %v3209_v40 = vmul.f32 %v13082_v17, %v3208_v62  ;;  %v8468_v60 = vunpack.i.l.bf16 %v17225_v5  ;;  %vm3318_vm15 = vmor %vm3316_vm11, %vm3317_vm9 }
 0x855   : > { %v3190_v39 = vmul.f32 %v12707_v15, %v3189_v54  ;;  %v3313_v42 = vsub.f32 1.0, %v3312_v43  ;;  %8012 = vmatmul.msk.f32.gmra.mxu1 %vm633_vm1, %v17223_v10  ;;  %v3323_v43 = vor.u32 1.1754944e-38, %v3322_v30  ;;  %v3204_v11 = vsel %vm3201_vm13, %v3203_v41, %v3199_v33  ;;  %17235 = vst [vmem:[#allocation50_spill] sm:$0xff] %v13186_v51  ;;  %v9128_v51 = vld [vmem:[%s16365_s4 + $0x8] sm:$0xff] }
 0x856   : > { %v3343_v54 = vsub.f32 1.0, %v3342_v0  ;;  %v3337_v19 = vand.u32 2147483648, %v13043_v2  ;;  %v3210_v26 = vadd.f32 %v13082_v17, %v3209_v40  ;;  %vm3331_vm7 = vweird.f32 %v13043_v2  ;;  %v17237_v40 = vld [vmem:[#allocation6_spill] sm:$0xff] }
 0x857   : > { %v3314_v15 = vmul.f32 %v8817_v49, %v3313_v42  ;;  %7958 = vmatmul.msk.f32.vlgmr.msrb.gmra.mxu2 %vm1062_vm2, %v3190_v39  ;;  %7966 = vmatmul.msk.f32.vlgmr.msra.gmra.mxu3 %vm1062_vm2, %v3310_v45  ;;  %v3335_v1 = vand.u32 2147483647, %v13043_v2  ;;  %v17228_v39 = vld [vmem:[#allocation154_spill] sm:$0xff]  ;;  %vm13159_vm8 = vmor %vm3331_vm7, %vm3332_vm14  ;;  %vm3211_vm5 = vweird.f32 %v13037_v46  ;;  %v8478_v5 = vunpack.i.l.bf16 %v17237_v40 }
 0x858   : > { %5235 = vmatpush.msrb.mxu2 %v8463_v14  ;;  %5324 = vmatpush.msra.mxu3 %v8483_v9  ;;  %v3330_v9 = vadd.f32 %v13062_v27, %v3329_v21  ;;  %v8493_v42 = vunpack.i.l.bf16 %v17228_v39  ;;  %v3205_v14 = vmul.f32 %v12597_v4, %v3204_v11  ;;  %v17232_v21 = vld [vmem:[#allocation147_spill] sm:$0xff]  ;;  %vm13171_vm10 = vmor %vm3211_vm5, %vm3212_vm4  ;;  %v3344_v33 = vmul.f32 %v13106_v22, %v3343_v54 }
 0x859   : > { %v3315_v20 = vadd.f32 %v8817_v49, %v3314_v15  ;;  %v8473_v2 = vunpack.i.l.bf16 %v17232_v21  ;;  %v8494_v4 = vunpack.i.h.bf16 %v17228_v39  ;;  %v3214_v15 = vsel %vm13171_vm10, %v13082_v17, %v3210_v26  ;;  %v17238_v11 = vld [vmem:[#allocation99_spill] sm:$0xff] }
 0x85a   : > { %5236 = vmatpush.msrb.mxu2 %v8464_v58  ;;  %5325 = vmatpush.msra.mxu3 %v8484_v6  ;;  %v3217_v58 = vand.u32 2147483648, %v13037_v46  ;;  %v17226_v6 = vld [vmem:[#allocation91_spill] sm:$0xff]  ;;  %v3334_v0 = vsel %vm13159_vm8, %v13062_v27, %v3330_v9  ;;  %v8474_v23 = vunpack.i.h.bf16 %v17232_v21  ;;  %vm3336_vm12 = vcmp.eq.f32.partialorder %v3335_v1, 8.507059e+37 }
 0x85b   : > { %v3319_v62 = vsel %vm3318_vm15, %v8817_v49, %v3315_v20  ;;  %v17227_v49 = vld [vmem:[#allocation129_spill] sm:$0xff]  ;;  %vm3347_vm9 = vweird.f32 %v13106_v22  ;;  %v3345_v17 = vadd.f32 %v13106_v22, %v3344_v33  ;;  %vm3346_vm11 = vweird.f32 %v13065_v38  ;;  %v13204_v26 = vpop.f32.mrf.mxu1 }
 0x85c   : > { %5237 = vmatpush.msrb.mxu2 %v8468_v60  ;;  %5326 = vmatpush.msra.mxu3 %v8488_v16  ;;  %v3324_v63 = vsel %vm3321_vm3, %v3323_v43, %v3319_v62  ;;  %v17236_v16 = vld [vmem:[#allocation157_spill] sm:$0xff]  ;;  %v3352_v60 = vand.u32 2147483648, %v13065_v38  ;;  %v8479_v43 = vunpack.i.h.bf16 %v17237_v40  ;;  %v3350_v62 = vand.u32 2147483647, %v13065_v38  ;;  %vm3348_vm13 = vmor %vm3346_vm11, %vm3347_vm9  ;;  %17239 = vst [vmem:[#allocation155_spill] sm:$0xff] %v13204_v26 }
 0x85d   : > { %5695 = vrot.lane.b32.xlu1 %v17226_v6, %s9207_s15  ;;  %7997 = vmatmul.msk.f32.gmra.mxu0 %vm633_vm1, %v17227_v49  ;;  %v3325_v45 = vmul.f32 %v12719_v47, %v3324_v63  ;;  %v3215_v47 = vand.u32 2147483647, %v13037_v46  ;;  %v3338_v46 = vor.u32 1.1754944e-38, %v3337_v19  ;;  %v8498_v41 = vunpack.i.l.bf16 %v17236_v16  ;;  %v13216_v49 = vpop.permute.xlu0 %5705 }
 0x85e   : > { %8013 = vmatmul.msk.f32.gmra.mxu1 %vm633_vm1, %v17231_v32  ;;  %5327 = vmatpush.msra.mxu3 %v8489_v31  ;;  %v3218_v31 = vor.u32 1.1754944e-38, %v3217_v58  ;;  %v8499_v20 = vunpack.i.h.bf16 %v17236_v16  ;;  %v3349_v19 = vsel %vm3348_vm13, %v13106_v22, %v3345_v17  ;;  %v3353_v63 = vor.u32 1.1754944e-38, %v3352_v60  ;;  %v17242_v22 = vld [vmem:[#allocation55_spill] sm:$0xff] }
 0x85f   : > { %5238 = vmatpush.msrb.mxu2 %v8469_v50  ;;  %7967 = vmatmul.msk.f32.gmra.mxu3 %vm1062_vm2, %v3325_v45  ;;  %vm3216_vm6 = vcmp.eq.f32.partialorder %v3215_v47, 8.507059e+37  ;;  %v3339_v27 = vsel %vm3336_vm12, %v3338_v46, %v3334_v0  ;;  %vm3351_vm14 = vcmp.eq.f32.partialorder %v3350_v62, 8.507059e+37 }
 0x860   : > { %7959 = vmatmul.msk.f32.gmra.mxu2 %vm1062_vm2, %v3205_v14  ;;  %5328 = vmatpush.msra.mxu3 %v8493_v42  ;;  %v3219_v50 = vsel %vm3216_vm6, %v3218_v31, %v3214_v15  ;;  %v3340_v54 = vmul.f32 %v12602_v7, %v3339_v27  ;;  %v3354_v58 = vsel %vm3351_vm14, %v3353_v63, %v3349_v19  ;;  %v17240_v7 = vld [vmem:[#allocation47_spill] sm:$0xff] }
 0x861   : > { %5239 = vmatpush.msrb.mxu2 %v8473_v2  ;;  %v3220_v9 = vmul.f32 %v12607_v52, %v3219_v50  ;;  %v3355_v38 = vmul.f32 %v12617_v61, %v3354_v58  ;;  %v13210_v52 = vpop.f32.mrf.mxu0  ;;  %v13226_v61 = vpop.permute.xlu2 %5588 }
 0x862   : > { %5329 = vmatpush.msra.mxu3 %v8494_v4  ;;  %17246 = vst [vmem:[#allocation24_spill] sm:$0xff] %v13226_v61 }
 0x863   : > { %5240 = vmatpush.msrb.mxu2 %v8474_v23  ;;  %v13228_v32 = vpop.permute.xlu1 %5703 }
 0x864   : > { %5330 = vmatpush.msra.mxu3 %v8498_v41 }
 0x865   : > { %5241 = vmatpush.msrb.mxu2 %v8478_v5  ;;  %8531 = vrot.lane.b32.xlu1 %v17238_v11, %s9208_s26  ;;  %v2902_v39 = vpop.xlane.xlu0 %2901 }
 0x866   : > { %5331 = vmatpush.msra.mxu3 %v8499_v20  ;;  %8820 = vrcp.f32 %v2902_v39  ;;  %v3247_v60 = vand.u32 2147483648, %v2902_v39  ;;  %v3245_v63 = vand.u32 2147483647, %v2902_v39  ;;  %vm3241_vm4 = vweird.f32 %v2902_v39 }
 0x867   : > { %5242 = vmatpush.msrb.mxu2 %v8479_v43  ;;  %7968 = vmatmul.msk.f32.gmra.mxu3 %vm1062_vm2, %v3340_v54 }
 0x868   : > { %7960 = vmatmul.msk.f32.gmra.mxu2 %vm1062_vm2, %v3220_v9  ;;  %vm13285_vm12 = vcmp.eq.f32.partialorder %v3245_v63, 8.507059e+37 }
 0x869   : > { %v13236_v2 = vpop.xlane.xlu2 %2904 }
 0x86c   : > { %v13238_v30 = vpop.eup %8820 }
 0x86d   : > { %8536 = vrot.lane.b32.xlu1 %v17240_v7, %s9208_s26  ;;  %v13234_v21 = vpop.xlane.xlu0 %2928  ;;  %v3237_v0 = vmul.f32 %v13238_v30, %v2902_v39  ;;  %vm3242_vm3 = vweird.f32 %v13238_v30 }
 0x86e   : > { %8822 = vrcp.f32 %v13234_v21  ;;  %vm13277_vm5 = vmor %vm3241_vm4, %vm3242_vm3  ;;  %vm3376_vm6 = vweird.f32 %v13234_v21 }
 0x86f   : > { %7969 = vmatmul.msk.f32.gmra.mxu3 %vm1062_vm2, %v3355_v38  ;;  %v3238_v15 = vsub.f32 1.0, %v3237_v0  ;;  %v3248_v0 = vor.u32 1.1754944e-38, %v3247_v60  ;;  %v13294_v60 = vld [vmem:[%s16364_s3 + $0x80] sm:$0xff] }
 0x871   : > { %v13212_v6 = vpop.f32.mrf.mxu1  ;;  %v13251_v41 = vpop.xlane.xlu2 %2931  ;;  %v3239_v50 = vmul.f32 %v13238_v30, %v3238_v15  ;;  %v3382_v15 = vand.u32 2147483648, %v13234_v21 }
 0x872   : > { %17241 = vst [vmem:[#allocation2_spill] sm:$0xff] %v13212_v6 }
 0x873   : > { %v3240_v58 = vadd.f32 %v13238_v30, %v3239_v50 }
 0x874   : > { %v13247_v23 = vpop.eup %8822 }
 0x875   : > { %8541 = vrot.lane.b32.xlu1 %v17242_v22, %s9208_s26  ;;  %v13249_v16 = vpop.permute.xlu0 %5699  ;;  %v3372_v17 = vmul.f32 %v13247_v23, %v13234_v21  ;;  %vm3377_vm9 = vweird.f32 %v13247_v23 }
 0x876   : > { %vm13366_vm4 = vmor %vm3376_vm6, %vm3377_vm9  ;;  %vm3391_vm9 = vweird.f32 %v13251_v41 }
 0x877   : > { %v3373_v7 = vsub.f32 1.0, %v3372_v17 }
 0x879   : > { %v13218_v45 = vpop.f32.mrf.mxu0  ;;  %v13220_v1 = vpop.f32.mrf.mxu1 }
 0x87a   : > { %17243 = vst [vmem:[#allocation35_spill] sm:$0xff] %v13220_v1 }
 0x87d   : > { %v13273_v1 = vpop.xlane.xlu0 %2910 }
 0x881   : > { %v13222_v42 = vpop.f32.mrf.mxu0  ;;  %v13224_v10 = vpop.f32.mrf.mxu1 }
 0x882   : > { %17244 = vst [vmem:[#allocation27_spill] sm:$0xff] %v13222_v42 }
 0x883   : > { %17245 = vst [vmem:[#allocation167_spill] sm:$0xff] %v13224_v10 }
 0x889   : > { %v13230_v14 = vpop.f32.mrf.mxu0  ;;  %v13232_v47 = vpop.f32.mrf.mxu1 }
 0x88a   : > { %17247 = vst [vmem:[#allocation53_spill] sm:$0xff] %v13230_v14 }
 0x88b   : > { %17248 = vst [vmem:[#allocation160_spill] sm:$0xff] %v13232_v47 }
 0x88e   : > { %v2899_v33 = vpop.xlane.xlu1 %2898 }
 0x88f   : > { %8824 = vrcp.f32 %v2899_v33  ;;  %v3232_v11 = vand.u32 2147483648, %v2899_v33  ;;  %v3230_v19 = vand.u32 2147483647, %v2899_v33  ;;  %vm3226_vm7 = vweird.f32 %v2899_v33 }
 0x890   : > { %8826 = vrcp.f32 %v13236_v2 }
 0x891   : > { %v13243_v4 = vpop.f32.mrf.mxu0  ;;  %v13245_v46 = vpop.f32.mrf.mxu1  ;;  %vm3231_vm10 = vcmp.eq.f32.partialorder %v3230_v19, 8.507059e+37 }
 0x892   : > { %17249 = vst [vmem:[#allocation82_spill] sm:$0xff] %v13243_v4 }
 0x893   : > { %17250 = vst [vmem:[#allocation77_spill] sm:$0xff] %v13245_v46 }
 0x895   : > { %v8825_v31 = vpop.eup %8824 }
 0x896   : > { %v13253_v27 = vpop.eup %8826  ;;  %v3222_v40 = vmul.f32 %v8825_v31, %v2899_v33  ;;  %v13255_v5 = vpop.xlane.xlu1 %2925  ;;  %vm3227_vm15 = vweird.f32 %v8825_v31 }
 0x897   : > { %8828 = vrcp.f32 %v13255_v5  ;;  %v3252_v43 = vmul.f32 %v13253_v27, %v13236_v2  ;;  %vm3228_vm8 = vmor %vm3226_vm7, %vm3227_vm15  ;;  %vm3257_vm13 = vweird.f32 %v13253_v27  ;;  %vm3361_vm14 = vweird.f32 %v13255_v5 }
 0x898   : > { %8830 = vrcp.f32 %v13251_v41  ;;  %v3223_v20 = vsub.f32 1.0, %v3222_v40  ;;  %vm3256_vm7 = vweird.f32 %v13236_v2 }
 0x899   : > { %v13264_v54 = vpop.f32.mrf.mxu0  ;;  %v13266_v62 = vpop.f32.mrf.mxu1  ;;  %v3253_v40 = vsub.f32 1.0, %v3252_v43 }
 0x89a   : > { %17251 = vst [vmem:[#allocation43_spill] sm:$0xff] %v13264_v54  ;;  %v3224_v9 = vmul.f32 %v8825_v31, %v3223_v20  ;;  %v3233_v20 = vor.u32 1.1754944e-38, %v3232_v11  ;;  %v3244_v11 = vsel %vm13277_vm5, %v13238_v30, %v3240_v58 }
 0x89b   : > { %17252 = vst [vmem:[#allocation83_spill] sm:$0xff] %v13266_v62  ;;  %v3254_v62 = vmul.f32 %v13253_v27, %v3253_v40  ;;  %v3365_v40 = vand.u32 2147483647, %v13255_v5 }
 0x89c   : > { %v3225_v38 = vadd.f32 %v8825_v31, %v3224_v9  ;;  %v3374_v9 = vmul.f32 %v13247_v23, %v3373_v7  ;;  %v3367_v7 = vand.u32 2147483648, %v13255_v5 }
 0x89d   : > { %v13270_v22 = vpop.eup %8828  ;;  %vm3366_vm3 = vcmp.eq.f32.partialorder %v3365_v40, 8.507059e+37 }
 0x89e   : > { %v13275_v6 = vpop.eup %8830  ;;  %v3357_v39 = vmul.f32 %v13270_v22, %v13255_v5  ;;  %v13283_v33 = vpop.xlane.xlu1 %2907  ;;  %v3229_v50 = vsel %vm3228_vm8, %v8825_v31, %v3225_v38  ;;  %v13304_v38 = vor.u32 1.1754944e-38, %v3382_v15  ;;  %vm3362_vm11 = vweird.f32 %v13270_v22  ;;  %vm13374_vm8 = vmor %vm3256_vm7, %vm3257_vm13 }
 0x89f   : > { %8832 = vrcp.f32 %v13283_v33  ;;  %v3234_v43 = vsel %vm3231_vm10, %v3233_v20, %v3229_v50  ;;  %v3387_v20 = vmul.f32 %v13275_v6, %v13251_v41  ;;  %v3249_v15 = vsel %vm13285_vm12, %v3248_v0, %v3244_v11  ;;  %vm13340_vm15 = vmor %vm3361_vm14, %vm3362_vm11 }
 0x8a0   : > { %8834 = vrcp.f32 %v13273_v1  ;;  %v3358_v19 = vsub.f32 1.0, %v3357_v39  ;;  %v3235_v63 = vmul.f32 %v12949_v44, %v3234_v43  ;;  %v3262_v44 = vand.u32 2147483648, %v13236_v2  ;;  %v9126_v43 = vld [vmem:[%s16365_s4 + $0x40] sm:$0xff] }
 0x8a1   : > { %v3862_v26 = vpop.f32.mrf.mxu0  ;;  %v3967_v30 = vpop.f32.mrf.mxu1  ;;  %v3375_v31 = vadd.f32 %v13247_v23, %v3374_v9  ;;  %v3388_v0 = vsub.f32 1.0, %v3387_v20  ;;  %v3255_v11 = vadd.f32 %v13253_v27, %v3254_v62  ;;  %v13356_v62 = vld [vmem:[%s16364_s3 + $0x88] sm:$0xff]  ;;  %vm3392_vm12 = vweird.f32 %v13275_v6 }
 0x8a2   : > { %v3359_v58 = vmul.f32 %v13270_v22, %v3358_v19  ;;  %v3863_v50 = vadd.f32 %v13294_v60, %v3862_v26  ;;  %v3968_v39 = vadd.f32 %v13294_v60, %v3967_v30  ;;  %7961 = vmatmul.msk.f32.gmra.mxu2 %vm1062_vm2, %v3235_v63  ;;  %v9127_v26 = vld [vmem:[%s16365_s4] sm:$0xff]  ;;  %vm13429_vm11 = vmor %vm3391_vm9, %vm3392_vm12  ;;  %vm3271_vm13 = vweird.f32 %v13283_v33 }
 0x8a3   : > { %v3389_v40 = vmul.f32 %v13275_v6, %v3388_v0  ;;  %v3259_v0 = vsel %vm13374_vm8, %v13253_v27, %v3255_v11  ;;  %vm3286_vm8 = vweird.f32 %v13273_v1 }
 0x8a4   : > { %v13322_v19 = vadd.f32 %v9126_v43, %v3968_v39  ;;  %v13327_v63 = vadd.f32 %v9127_v26, %v3863_v50  ;;  %v3360_v30 = vadd.f32 %v13270_v22, %v3359_v58  ;;  %v3368_v58 = vor.u32 1.1754944e-38, %v3367_v7 }
 0x8a5   : > { %v13331_v17 = vpop.eup %8832  ;;  %v3260_v26 = vand.u32 2147483647, %v13236_v2 }
 0x8a6   : > { %v13336_v39 = vpop.eup %8834  ;;  %v3267_v9 = vmul.f32 %v13331_v17, %v13283_v33  ;;  %v13346_v43 = vpop.xlane.xlu1 %2934  ;;  %v4257_v20 = vsel %vm1062_vm2, %v13322_v19, -inf  ;;  %v4233_v5 = vsel %vm1062_vm2, %v13327_v63, -inf  ;;  %v3364_v7 = vsel %vm13340_vm15, %v13270_v22, %v3360_v30  ;;  %v13424_v22 = vld [vmem:[%s16364_s3 + $0x90] sm:$0xff] }
 0x8a7   : > { %8836 = vrcp.f32 %v13346_v43  ;;  %4258 = vmax.xlane.f32.xlu2 %v4257_v20  ;;  %4234 = vmax.xlane.f32.xlu0 %v4233_v5  ;;  %v3250_v5 = vmul.f32 %v12665_v13, %v3249_v15  ;;  %v3369_v46 = vsel %vm3366_vm3, %v3368_v58, %v3364_v7  ;;  %v3282_v30 = vmul.f32 %v13336_v39, %v13273_v1 }
 0x8a8   : > { %v3268_v20 = vsub.f32 1.0, %v3267_v9  ;;  %v3370_v10 = vmul.f32 %v12959_v28, %v3369_v46  ;;  %v3379_v13 = vsel %vm13366_vm4, %v13247_v23, %v3375_v31  ;;  %v3263_v9 = vor.u32 1.1754944e-38, %v3262_v44  ;;  %v9129_v46 = vld [vmem:[%s16365_s4 + $0x48] sm:$0xff] }
 0x8a9   : > { %v3865_v50 = vpop.f32.mrf.mxu0  ;;  %v3970_v47 = vpop.f32.mrf.mxu1  ;;  %vm3261_vm5 = vcmp.eq.f32.partialorder %v3260_v26, 8.507059e+37  ;;  %v17263_v28 = vand.u32 2147483647, %v13234_v21  ;;  %v3283_v21 = vsub.f32 1.0, %v3282_v30  ;;  %vm3272_vm6 = vweird.f32 %v13331_v17 }
 0x8aa   : > { %v3269_v2 = vmul.f32 %v13331_v17, %v3268_v20  ;;  %v3866_v15 = vadd.f32 %v13356_v62, %v3865_v50  ;;  %v3971_v58 = vadd.f32 %v13356_v62, %v3970_v47  ;;  %7962 = vmatmul.msk.f32.gmra.mxu2 %vm1062_vm2, %v3250_v5  ;;  %7970 = vmatmul.msk.f32.gmra.mxu3 %vm1062_vm2, %v3370_v10  ;;  %v3277_v5 = vand.u32 2147483648, %v13283_v33  ;;  %vm13438_vm14 = vmor %vm3271_vm13, %vm3272_vm6 }
 0x8ab   : > { %vm3381_vm10 = vcmp.eq.f32.partialorder %v17263_v28, 8.507059e+37  ;;  %v3264_v31 = vsel %vm3261_vm5, %v3263_v9, %v3259_v0  ;;  %v3390_v44 = vadd.f32 %v13275_v6, %v3389_v40  ;;  %v3395_v40 = vand.u32 2147483647, %v13251_v41 }
 0x8ac   : > { %v13399_v47 = vadd.f32 %v9128_v51, %v3866_v15  ;;  %v13404_v23 = vadd.f32 %v9129_v46, %v3971_v58  ;;  %v3384_v10 = vsel %vm3381_vm10, %v13304_v38, %v3379_v13  ;;  %v3270_v20 = vadd.f32 %v13331_v17, %v3269_v2 }
 0x8ad   : > { %v13407_v27 = vpop.eup %8836  ;;  %v3397_v38 = vand.u32 2147483648, %v13251_v41  ;;  %v3265_v13 = vmul.f32 %v12679_v59, %v3264_v31  ;;  %v3275_v2 = vand.u32 2147483647, %v13283_v33  ;;  %v3385_v0 = vmul.f32 %v12671_v12, %v3384_v10 }
 0x8ae   : > { %v3402_v11 = vmul.f32 %v13407_v27, %v13346_v43  ;;  %v4236_v7 = vsel %vm1062_vm2, %v13399_v47, -inf  ;;  %v4260_v26 = vsel %vm1062_vm2, %v13404_v23, -inf  ;;  %v3394_v9 = vsel %vm13429_vm11, %v13275_v6, %v3390_v44  ;;  %v9130_v6 = vld [vmem:[%s16365_s4 + $0x10] sm:$0xff] }
 0x8af   : > { %4237 = vmax.xlane.f32.xlu1 %v4236_v7  ;;  %4261 = vmax.xlane.f32.xlu0 %v4260_v26  ;;  %v3284_v28 = vmul.f32 %v13336_v39, %v3283_v21  ;;  %v3274_v51 = vsel %vm13438_vm14, %v13331_v17, %v3270_v20  ;;  %v3398_v46 = vor.u32 1.1754944e-38, %v3397_v38  ;;  %v3278_v31 = vor.u32 1.1754944e-38, %v3277_v5  ;;  %v9131_v21 = vld [vmem:[%s16365_s4 + $0x50] sm:$0xff]  ;;  %v13476_v5 = vld [vmem:[%s16364_s3 + $0x98] sm:$0xff] }
 0x8b0   : > { %v3403_v50 = vsub.f32 1.0, %v3402_v11  ;;  %vm3276_vm15 = vcmp.eq.f32.partialorder %v3275_v2, 8.507059e+37  ;;  %vm3396_vm3 = vcmp.eq.f32.partialorder %v3395_v40, 8.507059e+37  ;;  %vm3287_vm4 = vweird.f32 %v13336_v39  ;;  %v13548_v2 = vld [vmem:[%s16364_s3 + $0xa8] sm:$0xff] }
 0x8b1   : > { %v3868_v41 = vpop.f32.mrf.mxu0  ;;  %v3973_v58 = vpop.f32.mrf.mxu1  ;;  %v3279_v17 = vsel %vm3276_vm15, %v3278_v31, %v3274_v51  ;;  %v3399_v11 = vsel %vm3396_vm3, %v3398_v46, %v3394_v9  ;;  %v3285_v20 = vadd.f32 %v13336_v39, %v3284_v28  ;;  %v3292_v38 = vand.u32 2147483648, %v13273_v1  ;;  %vm13483_vm5 = vmor %vm3286_vm8, %vm3287_vm4  ;;  %v9133_v46 = vld [vmem:[%s16365_s4 + $0x18] sm:$0xff] }
 0x8b2   : > { %v3869_v59 = vadd.f32 %v13424_v22, %v3868_v41  ;;  %v3974_v33 = vadd.f32 %v13424_v22, %v3973_v58  ;;  %7963 = vmatmul.msk.f32.gmra.mxu2 %vm1062_vm2, %v3265_v13  ;;  %v3404_v12 = vmul.f32 %v13407_v27, %v3403_v50  ;;  %7971 = vmatmul.msk.f32.gmra.mxu3 %vm1062_vm2, %v3385_v0  ;;  %vm3407_vm7 = vweird.f32 %v13407_v27 }
 0x8b3   : > { %v3412_v30 = vand.u32 2147483648, %v13346_v43  ;;  %v3280_v50 = vmul.f32 %v12975_v36, %v3279_v17  ;;  %v3290_v13 = vand.u32 2147483647, %v13273_v1  ;;  %vm3406_vm10 = vweird.f32 %v13346_v43 }
 0x8b4   : > { %v13458_v10 = vadd.f32 %v9130_v6, %v3869_v59  ;;  %v13463_v44 = vadd.f32 %v9131_v21, %v3974_v33  ;;  %v3405_v40 = vadd.f32 %v13407_v27, %v3404_v12  ;;  %v3400_v58 = vmul.f32 %v12683_v24, %v3399_v11  ;;  %vm13492_vm12 = vmor %vm3406_vm10, %vm3407_vm7  ;;  %v9132_v33 = vld [vmem:[%s16365_s4 + $0x58] sm:$0xff]  ;;  %v13523_v21 = vld [vmem:[%s16364_s3 + $0xa0] sm:$0xff] }
 0x8b5   : > { %v3410_v0 = vand.u32 2147483647, %v13346_v43  ;;  %v3289_v28 = vsel %vm13483_vm5, %v13336_v39, %v3285_v20  ;;  %v3293_v59 = vor.u32 1.1754944e-38, %v3292_v38  ;;  %v3413_v43 = vor.u32 1.1754944e-38, %v3412_v30 }
 0x8b6   : > { %v4239_v7 = vsel %vm1062_vm2, %v13458_v10, -inf  ;;  %v4263_v26 = vsel %vm1062_vm2, %v13463_v44, -inf  ;;  %v3409_v24 = vsel %vm13492_vm12, %v13407_v27, %v3405_v40  ;;  %vm3291_vm6 = vcmp.eq.f32.partialorder %v3290_v13, 8.507059e+37  ;;  %v9134_v40 = vld [vmem:[%s16365_s4 + $0x20] sm:$0xff] }
 0x8b7   : > { %4240 = vmax.xlane.f32.xlu2 %v4239_v7  ;;  %4264 = vmax.xlane.f32.xlu1 %v4263_v26  ;;  %v3294_v39 = vsel %vm3291_vm6, %v3293_v59, %v3289_v28  ;;  %vm3411_vm9 = vcmp.eq.f32.partialorder %v3410_v0, 8.507059e+37  ;;  %v17272_v0 = vld [vmem:[#allocation148_spill] sm:$0xff]  ;;  %v9136_v28 = vld [vmem:[%s16365_s4 + $0x28] sm:$0xff] }
 0x8b8   : > { %v3414_v6 = vsel %vm3411_vm9, %v3413_v43, %v3409_v24  ;;  %v3295_v17 = vmul.f32 %v12713_v18, %v3294_v39  ;;  %v9135_v18 = vld [vmem:[%s16365_s4 + $0x60] sm:$0xff]  ;;  %v9137_v24 = vld [vmem:[%s16365_s4 + $0x68] sm:$0xff]  ;;  %v13579_v39 = vld [vmem:[%s16364_s3 + $0xb0] sm:$0xff] }
 0x8b9   : > { %v3871_v15 = vpop.f32.mrf.mxu0  ;;  %v3976_v41 = vpop.f32.mrf.mxu1  ;;  %v3415_v26 = vmul.f32 %v12993_v57, %v3414_v6 }
 0x8ba   : > { %v3872_v36 = vadd.f32 %v13476_v5, %v3871_v15  ;;  %v3977_v1 = vadd.f32 %v13476_v5, %v3976_v41  ;;  %7964 = vmatmul.msk.f32.gmra.mxu2 %vm1062_vm2, %v3280_v50  ;;  %7972 = vmatmul.msk.f32.gmra.mxu3 %vm1062_vm2, %v3400_v58 }
 0x8bc   : > { %v13509_v51 = vadd.f32 %v9132_v33, %v3977_v1  ;;  %v13514_v31 = vadd.f32 %v9133_v46, %v3872_v36  ;;  %v17273_v36 = vld [vmem:[#allocation58_spill] sm:$0xff]  ;;  %v17275_v46 = vld [vmem:[#allocation67_spill] sm:$0xff] }
 0x8bd   : > { %v17274_v1 = vld [vmem:[#allocation94_spill] sm:$0xff] }
 0x8be   : > { %v4266_v12 = vsel %vm1062_vm2, %v13509_v51, -inf  ;;  %v4242_v27 = vsel %vm1062_vm2, %v13514_v31, -inf }
 0x8bf   : > { %4267 = vmax.xlane.f32.xlu2 %v4266_v12  ;;  %4243 = vmax.xlane.f32.xlu0 %v4242_v27 }
 0x8c1   : > { %v3874_v11 = vpop.f32.mrf.mxu0  ;;  %v3979_v7 = vpop.f32.mrf.mxu1 }
 0x8c2   : > { %v3875_v20 = vadd.f32 %v13523_v21, %v3874_v11  ;;  %v3980_v38 = vadd.f32 %v13523_v21, %v3979_v7  ;;  %7965 = vmatmul.msk.f32.gmra.mxu2 %vm1062_vm2, %v3295_v17  ;;  %7973 = vmatmul.msk.f32.gmra.mxu3 %vm1062_vm2, %v3415_v26  ;;  %v17276_v17 = vld [vmem:[#allocation52_spill] sm:$0xff]  ;;  %v5702_v11 = vpop.permute.xlu2 %5701 }
 0x8c3   : > { %v17277_v26 = vld [vmem:[#allocation140_spill] sm:$0xff] }
 0x8c4   : > { %v13534_v30 = vadd.f32 %v9134_v40, %v3875_v20  ;;  %v13539_v50 = vadd.f32 %v9135_v18, %v3980_v38  ;;  %v17278_v20 = vld [vmem:[#allocation62_spill] sm:$0xff]  ;;  %v9139_v40 = vld [vmem:[%s16365_s4 + $0x70] sm:$0xff] }
 0x8c6   : > { %v4245_v57 = vsel %vm1062_vm2, %v13534_v30, -inf  ;;  %v4269_v13 = vsel %vm1062_vm2, %v13539_v50, -inf }
 0x8c7   : > { %4246 = vmax.xlane.f32.xlu1 %v4245_v57  ;;  %4270 = vmax.xlane.f32.xlu0 %v4269_v13  ;;  %v17279_v13 = vld [vmem:[#allocation39_spill] sm:$0xff] }
 0x8c9   : > { %v3877_v15 = vpop.f32.mrf.mxu0 }
 0x8ca   : > { %v3878_v41 = vadd.f32 %v13548_v2, %v3877_v15  ;;  %v3982_v58 = vpop.f32.mrf.mxu1  ;;  %8022 = vmatmul.msk.f32.vlgmr.msra.gmra.mxu2 %vm633_vm1, %v17272_v0  ;;  %8038 = vmatmul.msk.f32.vlgmr.msrb.gmra.mxu3 %vm633_vm1, %v17273_v36  ;;  %v13614_v15 = vld [vmem:[%s16364_s3 + $0xb8] sm:$0xff]  ;;  %v17281_v36 = vld [vmem:[#allocation36_spill] sm:$0xff] }
 0x8cb   : > { %v3983_v9 = vadd.f32 %v13548_v2, %v3982_v58  ;;  %8118 = vmatpush.xpose.msk.msra.mxu2 %vm633_vm1, %v17274_v1  ;;  %8134 = vmatpush.xpose.msk.msrb.mxu3 %vm633_vm1, %v12997_v55  ;;  %v17280_v58 = vld [vmem:[#allocation107_spill] sm:$0xff]  ;;  %v17282_v1 = vld [vmem:[#allocation158_spill] sm:$0xff] }
 0x8cc   : > { %v13563_v59 = vadd.f32 %v9136_v28, %v3878_v41  ;;  %v13626_v28 = vpop.permute.xlu2 %5590 }
 0x8cd   : > { %v13568_v43 = vadd.f32 %v9137_v24, %v3983_v9  ;;  %17283 = vst [vmem:[#allocation85_spill] sm:$0xff] %v13626_v28  ;;  %v9140_v24 = vld [vmem:[%s16365_s4 + $0x38] sm:$0xff] }
 0x8ce   : > { %v4248_v33 = vsel %vm1062_vm2, %v13563_v59, -inf }
 0x8cf   : > { %8119 = vmatpush.xpose.msk.msra.mxu2 %vm633_vm1, %v17275_v46  ;;  %4249 = vmax.xlane.f32.xlu2 %v4248_v33  ;;  %v4272_v55 = vsel %vm1062_vm2, %v13568_v43, -inf  ;;  %v9141_v46 = vld [vmem:[%s16365_s4 + $0x78] sm:$0xff] }
 0x8d0   : > { %8135 = vmatpush.xpose.msk.msrb.mxu3 %vm633_vm1, %v12977_v25  ;;  %4273 = vmax.xlane.f32.xlu1 %v4272_v55  ;;  %v9138_v25 = vld [vmem:[%s16365_s4 + $0x30] sm:$0xff] }
 0x8d1   : > { %v3880_v12 = vpop.f32.mrf.mxu0 }
 0x8d2   : > { %v3881_v27 = vadd.f32 %v13579_v39, %v3880_v12  ;;  %v3985_v6 = vpop.f32.mrf.mxu1  ;;  %8023 = vmatmul.msk.f32.gmra.mxu2 %vm633_vm1, %v17276_v17  ;;  %8039 = vmatmul.msk.f32.gmra.mxu3 %vm633_vm1, %v17277_v26  ;;  %v17286_v17 = vld [vmem:[#allocation153_spill] sm:$0xff]  ;;  %v17289_v26 = vld [vmem:[#allocation34_spill] sm:$0xff] }
 0x8d3   : > { %v3986_v7 = vadd.f32 %v13579_v39, %v3985_v6  ;;  %8120 = vmatpush.xpose.msk.msra.mxu2 %vm633_vm1, %v17278_v20  ;;  %v17285_v6 = vld [vmem:[#allocation14_spill] sm:$0xff]  ;;  %v17290_v20 = vld [vmem:[#allocation112_spill] sm:$0xff] }
 0x8d4   : > { %8136 = vmatpush.xpose.msk.msrb.mxu3 %vm633_vm1, %v13018_v3  ;;  %v13596_v38 = vadd.f32 %v9138_v25, %v3881_v27  ;;  %v17284_v27 = vld [vmem:[#allocation117_spill] sm:$0xff]  ;;  %v17291_v25 = vld [vmem:[#allocation51_spill] sm:$0xff] }
 0x8d5   : > { %v13601_v18 = vadd.f32 %v9139_v40, %v3986_v7  ;;  %v17287_v7 = vld [vmem:[#allocation161_spill] sm:$0xff]  ;;  %v13664_v40 = vpop.f32.mrf.mxu3 }
 0x8d6   : > { %v4251_v57 = vsel %vm1062_vm2, %v13596_v38, -inf  ;;  %17292 = vst [vmem:[#allocation86_spill] sm:$0xff] %v13664_v40 }
 0x8d7   : > { %8121 = vmatpush.xpose.msk.msra.mxu2 %vm633_vm1, %v17279_v13  ;;  %v4275_v3 = vsel %vm1062_vm2, %v13601_v18, -inf  ;;  %4252 = vmax.xlane.f32.xlu0 %v4251_v57  ;;  %v17294_v57 = vld [vmem:[#allocation73_spill] sm:$0xff] }
 0x8d8   : > { %8137 = vmatpush.xpose.msk.msrb.mxu3 %vm633_vm1, %v13216_v49  ;;  %4276 = vmax.xlane.f32.xlu2 %v4275_v3  ;;  %v17296_v3 = vld [vmem:[#allocation20_spill] sm:$0xff] }
 0x8da   : > { %v3883_v41 = vpop.f32.mrf.mxu0  ;;  %8024 = vmatmul.msk.f32.gmra.mxu2 %vm633_vm1, %v17280_v58  ;;  %8040 = vmatmul.msk.f32.gmra.mxu3 %vm633_vm1, %v17281_v36 }
 0x8db   : > { %v3884_v0 = vadd.f32 %v13614_v15, %v3883_v41  ;;  %v3988_v9 = vpop.f32.mrf.mxu1  ;;  %8122 = vmatpush.xpose.msk.msra.mxu2 %vm633_vm1, %v17282_v1  ;;  %v17297_v41 = vld [vmem:[#allocation80_spill] sm:$0xff] }
 0x8dc   : > { %v3989_v49 = vadd.f32 %v13614_v15, %v3988_v9  ;;  %8138 = vmatpush.xpose.msk.msrb.mxu3 %vm633_vm1, %v13228_v32 }
 0x8dd   : > { %v13631_v33 = vadd.f32 %v9140_v24, %v3884_v0  ;;  %v13670_v13 = vpop.f32.mrf.mxu3  ;;  %v13678_v0 = vpop.f32.mrf.mxu2 }
 0x8de   : > { %v13636_v55 = vadd.f32 %v9141_v46, %v3989_v49  ;;  %17295 = vst [vmem:[#allocation87_spill] sm:$0xff] %v13670_v13 }
 0x8df   : > { %8123 = vmatpush.xpose.msk.msra.mxu2 %vm633_vm1, %v12537_v34  ;;  %v4254_v32 = vsel %vm1062_vm2, %v13631_v33, -inf  ;;  %v5698_v34 = vpop.permute.xlu2 %5697  ;;  %17299 = vst [vmem:[#allocation8_spill] sm:$0xff] %v13678_v0 }
 0x8e0   : > { %8139 = vmatpush.xpose.msk.msrb.mxu3 %vm633_vm1, %v5702_v11  ;;  %4255 = vmax.xlane.f32.xlu1 %v4254_v32  ;;  %v4278_v12 = vsel %vm1062_vm2, %v13636_v55, -inf  ;;  %v17288_v11 = vld [vmem:[#allocation19_spill] sm:$0xff] }
 0x8e1   : > { %4279 = vmax.xlane.f32.xlu0 %v4278_v12 }
 0x8e2   : > { %8025 = vmatmul.msk.f32.gmra.mxu2 %vm633_vm1, %v17284_v27  ;;  %8041 = vmatmul.msk.f32.gmra.mxu3 %vm633_vm1, %v17285_v6 }
 0x8e3   : > { %8124 = vmatpush.xpose.msk.msra.mxu2 %vm633_vm1, %v17286_v17 }
 0x8e4   : > { %8140 = vmatpush.xpose.msk.msrb.mxu3 %vm633_vm1, %v13249_v16  ;;  %v17293_v16 = vld [vmem:[#allocation108_spill] sm:$0xff] }
 0x8e5   : > { %v13676_v58 = vpop.f32.mrf.mxu3  ;;  %v13682_v36 = vpop.f32.mrf.mxu2 }
 0x8e6   : > { %17298 = vst [vmem:[#allocation16_spill] sm:$0xff] %v13676_v58 }
 0x8e7   : > { %8125 = vmatpush.xpose.msk.msra.mxu2 %vm633_vm1, %v17287_v7  ;;  %17301 = vst [vmem:[#allocation54_spill] sm:$0xff] %v13682_v36  ;;  %v13684_v1 = vpop.permute.xlu2 %5681 }
 0x8e8   : > { %8141 = vmatpush.xpose.msk.msrb.mxu3 %vm633_vm1, %v5698_v34  ;;  %17302 = vst [vmem:[#allocation135_spill] sm:$0xff] %v13684_v1 }
 0x8ea   : > { %8026 = vmatmul.msk.f32.gmra.mxu2 %vm633_vm1, %v17288_v11  ;;  %8042 = vmatmul.msk.f32.gmra.mxu3 %vm633_vm1, %v17289_v26  ;;  %v13708_v26 = vpop.permute.xlu1 %5683 }
 0x8eb   : > { %17314 = vst [vmem:[#allocation7_spill] sm:$0xff] %v13708_v26 }
 0x8ed   : > { %v13680_v9 = vpop.f32.mrf.mxu3  ;;  %v13688_v24 = vpop.f32.mrf.mxu2 }
 0x8ee   : > { %17300 = vst [vmem:[#allocation88_spill] sm:$0xff] %v13680_v9 }
 0x8ef   : > { %17304 = vst [vmem:[#allocation33_spill] sm:$0xff] %v13688_v24  ;;  %v13690_v46 = vpop.permute.xlu2 %5687 }
 0x8f0   : > { %17305 = vst [vmem:[#allocation150_spill] sm:$0xff] %v13690_v46 }
 0x8f2   : > { %8027 = vmatmul.msk.f32.gmra.mxu2 %vm633_vm1, %v17290_v20  ;;  %8043 = vmatmul.msk.f32.gmra.mxu3 %vm633_vm1, %v17291_v25 }
 0x8f5   : > { %v13686_v49 = vpop.f32.mrf.mxu3 }
 0x8f6   : > { %17303 = vst [vmem:[#allocation156_spill] sm:$0xff] %v13686_v49 }
 0x8f7   : > { %v13696_v27 = vpop.permute.xlu2 %5689 }
 0x8f8   : > { %17308 = vst [vmem:[#allocation163_spill] sm:$0xff] %v13696_v27 }
 0x8fa   : > { %8028 = vmatmul.msk.f32.gmra.mxu2 %vm633_vm1, %v17293_v16  ;;  %8044 = vmatmul.msk.f32.gmra.mxu3 %vm633_vm1, %v17294_v57  ;;  %v13716_v57 = vpop.permute.xlu1 %5691 }
 0x8fb   : > { %17317 = vst [vmem:[#allocation162_spill] sm:$0xff] %v13716_v57 }
 0x8fd   : > { %v13694_v12 = vpop.f32.mrf.mxu3 }
 0x8fe   : > { %17307 = vst [vmem:[#allocation159_spill] sm:$0xff] %v13694_v12 }
 0x8ff   : > { %v13706_v11 = vpop.permute.xlu2 %5693 }
 0x900   : > { %17313 = vst [vmem:[#allocation61_spill] sm:$0xff] %v13706_v11 }
 0x902   : > { %8029 = vmatmul.msk.f32.gmra.mxu2 %vm633_vm1, %v17296_v3  ;;  %8045 = vmatmul.msk.f32.gmra.mxu3 %vm633_vm1, %v17297_v41 }
 0x907   : > { %v13714_v16 = vpop.permute.xlu2 %8506 }
 0x90f   : > { %v13724_v12 = vpop.permute.xlu2 %8511 }
 0x925   : > { %v13692_v32 = vpop.f32.mrf.mxu2 }
 0x926   : > { %17306 = vst [vmem:[#allocation131_spill] sm:$0xff] %v13692_v32 }
 0x92d   : > { %v13698_v6 = vpop.f32.mrf.mxu2  ;;  %v13700_v17 = vpop.f32.mrf.mxu3 }
 0x92e   : > { %17309 = vst [vmem:[#allocation12_spill] sm:$0xff] %v13698_v6 }
 0x92f   : > { %17310 = vst [vmem:[#allocation68_spill] sm:$0xff] %v13700_v17  ;;  %v13722_v17 = vpop.permute.xlu0 %5685 }
 0x930   : > { %17320 = vst [vmem:[#allocation130_spill] sm:$0xff] %v13722_v17  ;;  %v9157_v17 = vld [vmem:[%s16365_s4 + $0xb8] sm:$0xff] }
 0x935   : > { %v13702_v34 = vpop.f32.mrf.mxu2  ;;  %v13704_v7 = vpop.f32.mrf.mxu3 }
 0x936   : > { %17311 = vst [vmem:[#allocation93_spill] sm:$0xff] %v13702_v34 }
 0x937   : > { %17312 = vst [vmem:[#allocation75_spill] sm:$0xff] %v13704_v7  ;;  %v13726_v7 = vpop.permute.xlu1 %5695  ;;  %v13740_v6 = vpop.permute.xlu0 %8501 }
 0x938   : > { %17321 = vst [vmem:[#allocation5_spill] sm:$0xff] %v13726_v7 }
 0x93d   : > { %v13710_v20 = vpop.f32.mrf.mxu2  ;;  %v13712_v25 = vpop.f32.mrf.mxu3 }
 0x93e   : > { %17315 = vst [vmem:[#allocation165_spill] sm:$0xff] %v13710_v20  ;;  %v9142_v20 = vld [vmem:[%s16365_s4 + $0x80] sm:$0xff] }
 0x93f   : > { %17316 = vst [vmem:[#allocation96_spill] sm:$0xff] %v13712_v25  ;;  %v13749_v24 = vpop.permute.xlu1 %8531 }
 0x945   : > { %v13718_v3 = vpop.f32.mrf.mxu2  ;;  %v13720_v41 = vpop.f32.mrf.mxu3 }
 0x946   : > { %17318 = vst [vmem:[#allocation97_spill] sm:$0xff] %v13718_v3 }
 0x947   : > { %17319 = vst [vmem:[#allocation116_spill] sm:$0xff] %v13720_v41  ;;  %v9143_v41 = vld [vmem:[%s16365_s4 + $0xc0] sm:$0xff] }
 0x94d   : > { %v4072_v49 = vpop.f32.mrf.mxu2  ;;  %v4177_v58 = vpop.f32.mrf.mxu3 }
 0x94e   : > { %v4073_v9 = vadd.f32 %v13294_v60, %v4072_v49  ;;  %v4178_v25 = vadd.f32 %v13294_v60, %v4177_v58  ;;  %v13746_v58 = vpop.permute.xlu2 %8521 }
 0x950   : > { %v13733_v34 = vadd.f32 %v9142_v20, %v4073_v9  ;;  %v13738_v3 = vadd.f32 %v9143_v41, %v4178_v25  ;;  %v9144_v41 = vld [vmem:[%s16365_s4 + $0x88] sm:$0xff] }
 0x952   : > { %v4281_v49 = vsel %vm1062_vm2, %v13733_v34, -inf  ;;  %v4305_v60 = vsel %vm1062_vm2, %v13738_v3, -inf }
 0x953   : > { %4282 = vmax.xlane.f32.xlu1 %v4281_v49  ;;  %4306 = vmax.xlane.f32.xlu0 %v4305_v60  ;;  %v9145_v49 = vld [vmem:[%s16365_s4 + $0xc8] sm:$0xff] }
 0x955   : > { %v4075_v9 = vpop.f32.mrf.mxu2  ;;  %v4180_v32 = vpop.f32.mrf.mxu3 }
 0x956   : > { %v4076_v20 = vadd.f32 %v13356_v62, %v4075_v9  ;;  %v4181_v25 = vadd.f32 %v13356_v62, %v4180_v32  ;;  %v13766_v62 = vpop.permute.xlu0 %8516  ;;  %v13769_v13 = vpop.permute.xlu2 %8546 }
 0x958   : > { %v13755_v36 = vadd.f32 %v9144_v41, %v4076_v20  ;;  %v13760_v60 = vadd.f32 %v9145_v49, %v4181_v25  ;;  %v9146_v25 = vld [vmem:[%s16365_s4 + $0x90] sm:$0xff] }
 0x95a   : > { %v4284_v9 = vsel %vm1062_vm2, %v13755_v36, -inf  ;;  %v4308_v0 = vsel %vm1062_vm2, %v13760_v60, -inf }
 0x95b   : > { %4285 = vmax.xlane.f32.xlu2 %v4284_v9  ;;  %4309 = vmax.xlane.f32.xlu1 %v4308_v0  ;;  %v13777_v9 = vpop.permute.xlu1 %8536  ;;  %v9147_v0 = vld [vmem:[%s16365_s4 + $0xd0] sm:$0xff] }
 0x95d   : > { %v4078_v32 = vpop.f32.mrf.mxu2  ;;  %v4183_v41 = vpop.f32.mrf.mxu3 }
 0x95e   : > { %v4079_v20 = vadd.f32 %v13424_v22, %v4078_v32  ;;  %v4184_v40 = vadd.f32 %v13424_v22, %v4183_v41  ;;  %v13788_v4 = vpop.permute.xlu0 %8526  ;;  %v4259_v42 = vpop.xlane.xlu2 %4258 }
 0x95f   : > { %v4337_v7 = vsub.f32 %v13322_v19, %v4259_v42  ;;  %v9150_v42 = vld [vmem:[%s16365_s4 + $0xa0] sm:$0xff] }
 0x960   : > { %v13775_v49 = vadd.f32 %v9146_v25, %v4079_v20  ;;  %v13782_v54 = vadd.f32 %v9147_v0, %v4184_v40  ;;  %v9148_v40 = vld [vmem:[%s16365_s4 + $0x98] sm:$0xff] }
 0x962   : > { %v4287_v32 = vsel %vm1062_vm2, %v13775_v49, -inf  ;;  %v4311_v22 = vsel %vm1062_vm2, %v13782_v54, -inf }
 0x963   : > { %4288 = vmax.xlane.f32.xlu0 %v4287_v32  ;;  %4312 = vmax.xlane.f32.xlu2 %v4311_v22  ;;  %v9149_v32 = vld [vmem:[%s16365_s4 + $0xd8] sm:$0xff]  ;;  %v13805_v11 = vpop.permute.xlu1 %8541 }
 0x965   : > { %v4081_v41 = vpop.f32.mrf.mxu2  ;;  %v4186_v25 = vpop.f32.mrf.mxu3 }
 0x966   : > { %v4082_v20 = vadd.f32 %v13476_v5, %v4081_v41  ;;  %v4187_v14 = vadd.f32 %v13476_v5, %v4186_v25  ;;  %v4377_v25 = vmul.f32 1.442695, %v4337_v7 }
 0x968   : > { %v13795_v0 = vadd.f32 %v9148_v40, %v4082_v20  ;;  %v13800_v22 = vadd.f32 %v9149_v32, %v4187_v14  ;;  %v4235_v40 = vpop.xlane.xlu0 %4234  ;;  %v9151_v32 = vld [vmem:[%s16365_s4 + $0xe0] sm:$0xff]  ;;  %8838 = vpow2.f32 %v4377_v25 }
 0x96a   : > { %v4290_v41 = vsel %vm1062_vm2, %v13795_v0, -inf  ;;  %v4314_v5 = vsel %vm1062_vm2, %v13800_v22, -inf }
 0x96b   : > { %4291 = vmax.xlane.f32.xlu1 %v4290_v41  ;;  %4315 = vmax.xlane.f32.xlu0 %v4314_v5  ;;  %v4329_v5 = vsub.f32 %v13327_v63, %v4235_v40  ;;  %v9152_v63 = vld [vmem:[%s16365_s4 + $0xa8] sm:$0xff] }
 0x96d   : > { %v4084_v20 = vpop.f32.mrf.mxu2  ;;  %v4189_v28 = vpop.f32.mrf.mxu3  ;;  %v4361_v27 = vmul.f32 1.442695, %v4329_v5 }
 0x96e   : > { %v4085_v57 = vadd.f32 %v13523_v21, %v4084_v20  ;;  %v4190_v14 = vadd.f32 %v13523_v21, %v4189_v28  ;;  %v4238_v20 = vpop.xlane.xlu1 %4237  ;;  %v4241_v5 = vpop.xlane.xlu2 %4240 }
 0x96f   : > { %8840 = vpow2.f32 %v4361_v27 }
 0x970   : > { %v13814_v19 = vadd.f32 %v9150_v42, %v4085_v57  ;;  %v13819_v41 = vadd.f32 %v9151_v32, %v4190_v14  ;;  %v13828_v32 = vpop.eup %8838  ;;  %v4262_v25 = vpop.xlane.xlu0 %4261 }
 0x972   : > { %v4293_v7 = vsel %vm1062_vm2, %v13814_v19, -inf  ;;  %v4317_v21 = vsel %vm1062_vm2, %v13819_v41, -inf }
 0x973   : > { %4294 = vmax.xlane.f32.xlu2 %v4293_v7  ;;  %4318 = vmax.xlane.f32.xlu1 %v4317_v21  ;;  %v9153_v7 = vld [vmem:[%s16365_s4 + $0xe8] sm:$0xff] }
 0x975   : > { %v4087_v28 = vpop.f32.mrf.mxu2  ;;  %v4192_v42 = vpop.f32.mrf.mxu3 }
 0x976   : > { %v4088_v57 = vadd.f32 %v13548_v2, %v4087_v28  ;;  %v4193_v14 = vadd.f32 %v13548_v2, %v4192_v42  ;;  %v4330_v28 = vsub.f32 %v13399_v47, %v4238_v20  ;;  %v4338_v42 = vsub.f32 %v13404_v23, %v4262_v25  ;;  %v9154_v23 = vld [vmem:[%s16365_s4 + $0xb0] sm:$0xff] }
 0x978   : > { %v13833_v40 = vadd.f32 %v9152_v63, %v4088_v57  ;;  %v13838_v21 = vadd.f32 %v9153_v7, %v4193_v14  ;;  %v4449_v63 = vsel %vm1062_vm2, %v13828_v32, 0.0  ;;  %v4265_v14 = vpop.xlane.xlu1 %4264  ;;  %v4363_v61 = vmul.f32 1.442695, %v4330_v28  ;;  %v9155_v28 = vld [vmem:[%s16365_s4 + $0xf0] sm:$0xff] }
 0x979   : > { %v4379_v46 = vmul.f32 1.442695, %v4338_v42  ;;  %v4339_v42 = vsub.f32 %v13463_v44, %v4265_v14 }
 0x97a   : > { %v4296_v2 = vsel %vm1062_vm2, %v13833_v40, -inf  ;;  %v4320_v57 = vsel %vm1062_vm2, %v13838_v21, -inf  ;;  %8842 = vpow2.f32 %v4363_v61  ;;  %v4244_v61 = vpop.xlane.xlu0 %4243 }
 0x97b   : > { %4297 = vmax.xlane.f32.xlu0 %v4296_v2  ;;  %4321 = vmax.xlane.f32.xlu2 %v4320_v57  ;;  %v13855_v2 = vpop.eup %8840  ;;  %v4331_v57 = vsub.f32 %v13458_v10, %v4241_v5  ;;  %8844 = vpow2.f32 %v4379_v46 }
 0x97c   : > { %4450 = vadd.xlane.f32.xlu1 %v4449_v63  ;;  %v4425_v10 = vsel %vm1062_vm2, %v13855_v2, 0.0 }
 0x97d   : > { %v4090_v7 = vpop.f32.mrf.mxu2  ;;  %v4195_v20 = vpop.f32.mrf.mxu3  ;;  %v4365_v5 = vmul.f32 1.442695, %v4331_v57 }
 0x97e   : > { %v4091_v47 = vadd.f32 %v13579_v39, %v4090_v7  ;;  %v4196_v27 = vadd.f32 %v13579_v39, %v4195_v20 }
 0x97f   : > { %8846 = vpow2.f32 %v4365_v5 }
 0x980   : > { %v13853_v25 = vadd.f32 %v9154_v23, %v4091_v47  ;;  %v13861_v63 = vadd.f32 %v9155_v28, %v4196_v27  ;;  %v4268_v47 = vpop.xlane.xlu2 %4267  ;;  %v4247_v20 = vpop.xlane.xlu1 %4246  ;;  %v4381_v27 = vmul.f32 1.442695, %v4339_v42 }
 0x981   : > { %v13871_v14 = vpop.eup %8842  ;;  %v4340_v28 = vsub.f32 %v13509_v51, %v4268_v47  ;;  %v4333_v42 = vsub.f32 %v13534_v30, %v4247_v20 }
 0x982   : > { %v4299_v39 = vsel %vm1062_vm2, %v13853_v25, -inf  ;;  %v4323_v7 = vsel %vm1062_vm2, %v13861_v63, -inf  ;;  %v13873_v46 = vpop.eup %8844  ;;  %8848 = vpow2.f32 %v4381_v27 }
 0x983   : > { %4324 = vmax.xlane.f32.xlu0 %v4323_v7  ;;  %4426 = vadd.xlane.f32.xlu2 %v4425_v10  ;;  %v4332_v10 = vsub.f32 %v13514_v31, %v4244_v61  ;;  %v4452_v47 = vsel %vm1062_vm2, %v13873_v46, 0.0  ;;  %v4369_v27 = vmul.f32 1.442695, %v4333_v42 }
 0x984   : > { %4300 = vmax.xlane.f32.xlu1 %v4299_v39  ;;  %v9156_v39 = vld [vmem:[%s16365_s4 + $0xf8] sm:$0xff] }
 0x985   : > { %v4198_v23 = vpop.f32.mrf.mxu3  ;;  %v4093_v7 = vpop.f32.mrf.mxu2  ;;  %v4367_v31 = vmul.f32 1.442695, %v4332_v10 }
 0x986   : > { %v4199_v44 = vadd.f32 %v13614_v15, %v4198_v23  ;;  %v4428_v23 = vsel %vm1062_vm2, %v13871_v14, 0.0  ;;  %v4094_v51 = vadd.f32 %v13614_v15, %v4093_v7  ;;  %v13890_v30 = vpop.eup %8846 }
 0x988   : > { %v13879_v57 = vadd.f32 %v9156_v39, %v4199_v44  ;;  %v4250_v29 = vpop.xlane.xlu2 %4249  ;;  %v4383_v44 = vmul.f32 1.442695, %v4340_v28  ;;  %v4274_v20 = vpop.xlane.xlu1 %4273  ;;  %v13897_v15 = vadd.f32 %v9157_v17, %v4094_v51 }
 0x989   : > { %v13892_v61 = vpop.eup %8848  ;;  %v4271_v39 = vpop.xlane.xlu0 %4270  ;;  %v4334_v7 = vsub.f32 %v13563_v59, %v4250_v29  ;;  %v4342_v28 = vsub.f32 %v13568_v43, %v4274_v20 }
 0x98a   : > { %v4326_v5 = vsel %vm1062_vm2, %v13879_v57, -inf  ;;  %8850 = vpow2.f32 %v4383_v44  ;;  %v4341_v42 = vsub.f32 %v13539_v50, %v4271_v39  ;;  %v4455_v10 = vsel %vm1062_vm2, %v13892_v61, 0.0 }
 0x98b   : > { %4429 = vadd.xlane.f32.xlu0 %v4428_v23  ;;  %4453 = vadd.xlane.f32.xlu2 %v4452_v47  ;;  %8852 = vpow2.f32 %v4369_v27  ;;  %v4431_v23 = vsel %vm1062_vm2, %v13890_v30, 0.0  ;;  %v4302_v17 = vsel %vm1062_vm2, %v13897_v15, -inf  ;;  %v4387_v29 = vmul.f32 1.442695, %v4342_v28 }
 0x98c   : > { %4327 = vmax.xlane.f32.xlu1 %v4326_v5  ;;  %8854 = vpow2.f32 %v4367_v31  ;;  %v4371_v5 = vmul.f32 1.442695, %v4334_v7  ;;  %v4385_v43 = vmul.f32 1.442695, %v4341_v42 }
 0x98e   : > { %8856 = vpow2.f32 %v4371_v5 }
 0x98f   : > { %8858 = vpow2.f32 %v4387_v29 }
 0x990   : > { %v4277_v59 = vpop.xlane.xlu2 %4276  ;;  %v13908_v51 = vpop.eup %8850  ;;  %8860 = vpow2.f32 %v4385_v43 }
 0x991   : > { %v4256_v47 = vpop.xlane.xlu1 %4255  ;;  %v13910_v50 = vpop.eup %8852  ;;  %v4343_v31 = vsub.f32 %v13601_v18, %v4277_v59  ;;  %v4458_v28 = vsel %vm1062_vm2, %v13908_v51, 0.0 }
 0x992   : > { %v4253_v44 = vpop.xlane.xlu0 %4252  ;;  %v13912_v27 = vpop.eup %8854  ;;  %v4336_v20 = vsub.f32 %v13631_v33, %v4256_v47  ;;  %v4437_v7 = vsel %vm1062_vm2, %v13910_v50, 0.0 }
 0x993   : > { %4456 = vadd.xlane.f32.xlu0 %v4455_v10  ;;  %4303 = vmax.xlane.f32.xlu2 %v4302_v17  ;;  %v4335_v39 = vsub.f32 %v13596_v38, %v4253_v44  ;;  %v4434_v42 = vsel %vm1062_vm2, %v13912_v27, 0.0  ;;  %v4389_v10 = vmul.f32 1.442695, %v4343_v31 }
 0x994   : > { %4432 = vadd.xlane.f32.xlu1 %v4431_v23  ;;  %v4375_v18 = vmul.f32 1.442695, %v4336_v20  ;;  %v13923_v23 = vpop.eup %8856 }
 0x995   : > { %v4373_v33 = vmul.f32 1.442695, %v4335_v39  ;;  %v13925_v17 = vpop.eup %8858  ;;  %8862 = vpow2.f32 %v4389_v10  ;;  %v4440_v29 = vsel %vm1062_vm2, %v13923_v23, 0.0 }
 0x996   : > { %v13927_v38 = vpop.eup %8860  ;;  %8864 = vpow2.f32 %v4375_v18  ;;  %v4464_v5 = vsel %vm1062_vm2, %v13925_v17, 0.0 }
 0x997   : > { %8866 = vpow2.f32 %v4373_v33  ;;  %v4461_v59 = vsel %vm1062_vm2, %v13927_v38, 0.0 }
 0x99b   : > { %4438 = vadd.xlane.f32.xlu0 %v4437_v7  ;;  %4435 = vadd.xlane.f32.xlu2 %v4434_v42  ;;  %v13935_v43 = vpop.eup %8862  ;;  %v17322_v7 = vld [vmem:[#allocation89_spill] sm:$0xff]  ;;  %v4280_v42 = vpop.xlane.xlu0 %4279 }
 0x99c   : > { %4459 = vadd.xlane.f32.xlu1 %v4458_v28  ;;  %v13937_v47 = vpop.eup %8864  ;;  %v4467_v20 = vsel %vm1062_vm2, %v13935_v43, 0.0  ;;  %v17323_v28 = vld [vmem:[#allocation41_spill] sm:$0xff] }
 0x99d   : > { %v13939_v44 = vpop.eup %8866  ;;  %v4446_v31 = vsel %vm1062_vm2, %v13937_v47, 0.0 }
 0x99e   : > { %v4443_v39 = vsel %vm1062_vm2, %v13939_v44, 0.0 }
 0x9a3   : > { %4465 = vadd.xlane.f32.xlu0 %v4464_v5  ;;  %4462 = vadd.xlane.f32.xlu2 %v4461_v59 }
 0x9a4   : > { %4441 = vadd.xlane.f32.xlu1 %v4440_v29 }
 0x9ab   : > { %4447 = vadd.xlane.f32.xlu0 %v4446_v31  ;;  %4444 = vadd.xlane.f32.xlu2 %v4443_v39 }
 0x9ac   : > { %4468 = vadd.xlane.f32.xlu1 %v4467_v20 }
 0x9bf   : > { %8551 = vrot.lane.b32.xlu0 %v17322_v7, %s9208_s26  ;;  %v4344_v7 = vsub.f32 %v13636_v55, %v4280_v42 }
 0x9c1   : > { %v4391_v1 = vmul.f32 1.442695, %v4344_v7 }
 0x9c3   : > { %8556 = vrot.lane.b32.xlu2 %v17323_v28, %s9208_s26 }
 0x9c6   : > { %v4283_v10 = vpop.xlane.xlu1 %4282  ;;  %v4307_v29 = vpop.xlane.xlu0 %4306 }
 0x9c7   : > { %v4345_v31 = vsub.f32 %v13733_v34, %v4283_v10 }
 0x9c9   : > { %v4393_v28 = vmul.f32 1.442695, %v4345_v31 }
 0x9ce   : > { %v4286_v18 = vpop.xlane.xlu2 %4285  ;;  %v4310_v59 = vpop.xlane.xlu1 %4309 }
 0x9cf   : > { %v4346_v33 = vsub.f32 %v13755_v36, %v4286_v18  ;;  %v4354_v36 = vsub.f32 %v13760_v60, %v4310_v59  ;;  %v4353_v18 = vsub.f32 %v13738_v3, %v4307_v29 }
 0x9d1   : > { %v4395_v5 = vmul.f32 1.442695, %v4346_v33  ;;  %v4411_v34 = vmul.f32 1.442695, %v4354_v36  ;;  %v4409_v37 = vmul.f32 1.442695, %v4353_v18 }
 0x9d3   : > { %8868 = vpow2.f32 %v4395_v5 }
 0x9d4   : > { %8870 = vpow2.f32 %v4393_v28 }
 0x9d5   : > { %8872 = vpow2.f32 %v4391_v1 }
 0x9d6   : > { %v4289_v8 = vpop.xlane.xlu0 %4288  ;;  %v4313_v26 = vpop.xlane.xlu2 %4312  ;;  %8874 = vpow2.f32 %v4411_v34 }
 0x9d7   : > { %8876 = vpow2.f32 %v4409_v37  ;;  %v4347_v29 = vsub.f32 %v13775_v49, %v4289_v8 }
 0x9d9   : > { %v13953_v20 = vpop.eup %8868  ;;  %v4397_v36 = vmul.f32 1.442695, %v4347_v29 }
 0x9da   : > { %v4476_v39 = vsel %vm1062_vm2, %v13953_v20, 0.0  ;;  %v13960_v10 = vpop.eup %8870 }
 0x9db   : > { %4477 = vadd.xlane.f32.xlu1 %v4476_v39  ;;  %v4355_v39 = vsub.f32 %v13782_v54, %v4313_v26  ;;  %v4473_v31 = vsel %vm1062_vm2, %v13960_v10, 0.0  ;;  %v13966_v7 = vpop.eup %8872 }
 0x9dc   : > { %v4470_v54 = vsel %vm1062_vm2, %v13966_v7, 0.0  ;;  %v13972_v26 = vpop.eup %8874 }
 0x9dd   : > { %v4413_v60 = vmul.f32 1.442695, %v4355_v39  ;;  %v13979_v18 = vpop.eup %8876  ;;  %v4500_v8 = vsel %vm1062_vm2, %v13972_v26, 0.0 }
 0x9de   : > { %v4292_v48 = vpop.xlane.xlu1 %4291  ;;  %v4316_v33 = vpop.xlane.xlu0 %4315 }
 0x9df   : > { %v4348_v37 = vsub.f32 %v13795_v0, %v4292_v48  ;;  %v4356_v39 = vsub.f32 %v13800_v22, %v4316_v33  ;;  %v4497_v48 = vsel %vm1062_vm2, %v13979_v18, 0.0 }
 0x9e6   : > { %v4295_v5 = vpop.xlane.xlu2 %4294  ;;  %v4319_v55 = vpop.xlane.xlu1 %4318 }
 0x9e7   : > { %v4357_v42 = vsub.f32 %v13819_v41, %v4319_v55  ;;  %v4349_v3 = vsub.f32 %v13814_v19, %v4295_v5  ;;  %v4399_v5 = vmul.f32 1.442695, %v4348_v37 }
 0x9e9   : > { %v4417_v1 = vmul.f32 1.442695, %v4357_v42  ;;  %4474 = vadd.xlane.f32.xlu0 %v4473_v31  ;;  %v4401_v41 = vmul.f32 1.442695, %v4349_v3 }
 0x9eb   : > { %8878 = vpow2.f32 %v4417_v1 }
 0x9ec   : > { %4471 = vadd.xlane.f32.xlu2 %v4470_v54  ;;  %8880 = vpow2.f32 %v4413_v60  ;;  %v4415_v60 = vmul.f32 1.442695, %v4356_v39 }
 0x9ee   : > { %v13974_v59 = vpop.xlane.xlu0 %4297  ;;  %v13976_v28 = vpop.xlane.xlu2 %4321 }
 0x9ef   : > { %v4451_v19 = vpop.xlane.xlu1 %4450 }
 0x9f0   : > { %8882 = vrcp.f32 %v4451_v19  ;;  %vm4646_vm13 = vweird.f32 %v4451_v19 }
 0x9f1   : > { %v13983_v49 = vpop.eup %8878  ;;  %8884 = vpow2.f32 %v4401_v41  ;;  %4501 = vadd.xlane.f32.xlu0 %v4500_v8 }
 0x9f2   : > { %17324 = vst [vmem:[#allocation101_spill] sm:$0xff] %v13983_v49  ;;  %v4509_v34 = vsel %vm1062_vm2, %v13983_v49, 0.0  ;;  %8886 = vpow2.f32 %v4397_v36  ;;  %v13988_v55 = vpop.eup %8880  ;;  %v4652_v36 = vand.u32 2147483648, %v4451_v19 }
 0x9f3   : > { %4510 = vadd.xlane.f32.xlu1 %v4509_v34  ;;  %17325 = vst [vmem:[#allocation125_spill] sm:$0xff] %v13988_v55  ;;  %8888 = vpow2.f32 %v4399_v5  ;;  %v4503_v54 = vsel %vm1062_vm2, %v13988_v55, 0.0  ;;  %v4650_v34 = vand.u32 2147483647, %v4451_v19 }
 0x9f4   : > { %4498 = vadd.xlane.f32.xlu2 %v4497_v48 }
 0x9f5   : > { %vm4651_vm15 = vcmp.eq.f32.partialorder %v4650_v34, 8.507059e+37 }
 0x9f6   : > { %v8883_v0 = vpop.eup %8882  ;;  %v4325_v3 = vpop.xlane.xlu0 %4324 }
 0x9f7   : > { %v4642_v42 = vmul.f32 %v8883_v0, %v4451_v19  ;;  %v13992_v31 = vpop.xlane.xlu1 %4300  ;;  %v13994_v1 = vpop.eup %8884  ;;  %v4359_v22 = vsub.f32 %v13861_v63, %v4325_v3  ;;  %vm4647_vm11 = vweird.f32 %v8883_v0 }
 0x9f8   : > { %17326 = vst [vmem:[#allocation60_spill] sm:$0xff] %v13994_v1  ;;  %v13996_v29 = vpop.xlane.xlu2 %4426  ;;  %v14002_v41 = vpop.eup %8886  ;;  %v4485_v5 = vsel %vm1062_vm2, %v13994_v1, 0.0  ;;  %vm4648_vm14 = vmor %vm4646_vm13, %vm4647_vm11 }
 0x9f9   : > { %v4643_v33 = vsub.f32 1.0, %v4642_v42  ;;  %8890 = vrcp.f32 %v13996_v29  ;;  %v4421_v37 = vmul.f32 1.442695, %v4359_v22  ;;  %4504 = vadd.xlane.f32.xlu0 %v4503_v54  ;;  %v4479_v39 = vsel %vm1062_vm2, %v14002_v41, 0.0  ;;  %v14008_v48 = vpop.eup %8888 }
 0x9fa   : > { %8892 = vpow2.f32 %v4415_v60  ;;  %17327 = vst [vmem:[#allocation127_spill] sm:$0xff] %v14008_v48  ;;  %v4653_v42 = vor.u32 1.1754944e-38, %v4652_v36  ;;  %v4482_v36 = vsel %vm1062_vm2, %v14008_v48, 0.0  ;;  %vm4526_vm4 = vweird.f32 %v13996_v29 }
 0x9fb   : > { %v4644_v8 = vmul.f32 %v8883_v0, %v4643_v33  ;;  %4486 = vadd.xlane.f32.xlu1 %v4485_v5  ;;  %8894 = vpow2.f32 %v4421_v37 }
 0x9fc   : > { %4480 = vadd.xlane.f32.xlu2 %v4479_v39  ;;  %v8524_v39 = vunpack.i.h.bf16 %v13746_v58 }
 0x9fd   : > { %v4645_v63 = vadd.f32 %v8883_v0, %v4644_v8 }
 0x9fe   : > { %v14012_v54 = vpop.xlane.xlu0 %4429 }
 0x9ff   : > { %v8891_v3 = vpop.eup %8890  ;;  %v4649_v22 = vsel %vm4648_vm14, %v8883_v0, %v4645_v63  ;;  %v14010_v33 = vpop.xlane.xlu1 %4327  ;;  %v8523_v0 = vunpack.i.l.bf16 %v13746_v58  ;;  %vm4541_vm12 = vweird.f32 %v14012_v54 }
 0xa00   : > { %v4654_v60 = vsel %vm4651_vm15, %v4653_v42, %v4649_v22  ;;  %v4522_v8 = vmul.f32 %v8891_v3, %v13996_v29  ;;  %v14015_v19 = vpop.xlane.xlu2 %4453  ;;  %v14021_v5 = vpop.eup %8892  ;;  %v4532_v42 = vand.u32 2147483648, %v13996_v29  ;;  %vm4527_vm3 = vweird.f32 %v8891_v3 }
 0xa01   : > { %v4655_v37 = vmul.f32 %v13828_v32, %v4654_v60  ;;  %8896 = vrcp.f32 %v14015_v19  ;;  %17328 = vst [vmem:[#allocation132_spill] sm:$0xff] %v14021_v5  ;;  %4483 = vadd.xlane.f32.xlu0 %v4482_v36  ;;  %v14025_v63 = vpop.eup %8894  ;;  %v4530_v22 = vand.u32 2147483647, %v13996_v29  ;;  %v8528_v36 = vunpack.i.l.bf16 %v13788_v4  ;;  %vm4528_vm7 = vmor %vm4526_vm4, %vm4527_vm3 }
 0xa02   : > { %v4523_v34 = vsub.f32 1.0, %v4522_v8  ;;  %8898 = vrcp.f32 %v14012_v54  ;;  %17329 = vst [vmem:[#allocation113_spill] sm:$0xff] %v14025_v63  ;;  %v4515_v60 = vsel %vm1062_vm2, %v14025_v63, 0.0  ;;  %v4506_v8 = vsel %vm1062_vm2, %v14021_v5, 0.0 }
 0xa03   : > { %8054 = vmatmul.msk.f32.vlgmr.msrb.gmra.mxu1 %vm1062_vm2, %v4655_v37  ;;  %4516 = vadd.xlane.f32.xlu1 %v4515_v60  ;;  %v8529_v37 = vunpack.i.h.bf16 %v13788_v4  ;;  %vm4531_vm8 = vcmp.eq.f32.partialorder %v4530_v22, 8.507059e+37  ;;  %v8534_v22 = vunpack.i.h.bf16 %v13749_v24  ;;  %vm4661_vm6 = vweird.f32 %v14015_v19 }
 0xa04   : > { %v4524_v32 = vmul.f32 %v8891_v3, %v4523_v34  ;;  %6731 = vmatpush.msrb.mxu1 %v8523_v0  ;;  %4507 = vadd.xlane.f32.xlu2 %v4506_v8  ;;  %v4533_v0 = vor.u32 1.1754944e-38, %v4532_v42  ;;  %v8533_v42 = vunpack.i.l.bf16 %v13749_v24  ;;  %v8538_v24 = vunpack.i.l.bf16 %v13777_v9 }
 0xa06   : > { %v4525_v53 = vadd.f32 %v8891_v3, %v4524_v32  ;;  %6732 = vmatpush.msrb.mxu1 %v8524_v39  ;;  %v14042_v35 = vpop.xlane.xlu0 %4456 }
 0xa07   : > { %v14037_v58 = vpop.eup %8896  ;;  %v14040_v34 = vpop.xlane.xlu1 %4432 }
 0xa08   : > { %v14044_v60 = vpop.eup %8898  ;;  %v4529_v63 = vsel %vm4528_vm7, %v8891_v3, %v4525_v53  ;;  %v4657_v32 = vmul.f32 %v14037_v58, %v14015_v19  ;;  %8900 = vrcp.f32 %v14040_v34  ;;  %v14049_v29 = vpop.xlane.xlu2 %4303  ;;  %6733 = vmatpush.msrb.mxu1 %v8528_v36  ;;  %v8503_v53 = vunpack.i.l.bf16 %v13740_v6 }
 0xa09   : > { %v4534_v39 = vsel %vm4531_vm8, %v4533_v0, %v4529_v63  ;;  %v4537_v4 = vmul.f32 %v14044_v60, %v14012_v54  ;;  %8902 = vrcp.f32 %v14042_v35  ;;  %v8509_v63 = vunpack.i.h.bf16 %v13714_v16 }
 0xa0a   : > { %v4535_v8 = vmul.f32 %v13855_v2, %v4534_v39  ;;  %v4658_v56 = vsub.f32 1.0, %v4657_v32  ;;  %6734 = vmatpush.msrb.mxu1 %v8529_v37  ;;  %v8508_v36 = vunpack.i.l.bf16 %v13714_v16  ;;  %v8504_v2 = vunpack.i.h.bf16 %v13740_v6 }
 0xa0b   : > { %v4538_v3 = vsub.f32 1.0, %v4537_v4  ;;  %v8539_v32 = vunpack.i.h.bf16 %v13777_v9  ;;  %v4547_v39 = vand.u32 2147483648, %v14012_v54  ;;  %vm4542_vm5 = vweird.f32 %v14044_v60 }
 0xa0c   : > { %v4659_v49 = vmul.f32 %v14037_v58, %v4658_v56  ;;  %8046 = vmatmul.msk.f32.vlgmr.msrb.gmra.mxu0 %vm1062_vm2, %v4535_v8  ;;  %6735 = vmatpush.msrb.mxu1 %v8533_v42  ;;  %v4667_v56 = vand.u32 2147483648, %v14015_v19  ;;  %v4545_v8 = vand.u32 2147483647, %v14012_v54  ;;  %vm4662_vm10 = vweird.f32 %v14037_v58  ;;  %vm4543_vm9 = vmor %vm4541_vm12, %vm4542_vm5 }
 0xa0d   : > { %v4539_v37 = vmul.f32 %v14044_v60, %v4538_v3  ;;  %6642 = vmatpush.msrb.mxu0 %v8503_v53  ;;  %v4665_v3 = vand.u32 2147483647, %v14015_v19  ;;  %vm4663_vm11 = vmor %vm4661_vm6, %vm4662_vm10  ;;  %vm4556_vm3 = vweird.f32 %v14040_v34  ;;  %vm4676_vm8 = vweird.f32 %v14042_v35 }
 0xa0e   : > { %v14064_v0 = vpop.eup %8900  ;;  %6736 = vmatpush.msrb.mxu1 %v8534_v22  ;;  %v14075_v4 = vpop.xlane.xlu0 %4438  ;;  %v4660_v53 = vadd.f32 %v14037_v58, %v4659_v49  ;;  %v4668_v54 = vor.u32 1.1754944e-38, %v4667_v56  ;;  %vm4546_vm13 = vcmp.eq.f32.partialorder %v4545_v8, 8.507059e+37 }
 0xa0f   : > { %v4552_v16 = vmul.f32 %v14064_v0, %v14040_v34  ;;  %6643 = vmatpush.msrb.mxu0 %v8504_v2  ;;  %v14073_v6 = vpop.xlane.xlu1 %4459  ;;  %v4540_v42 = vadd.f32 %v14044_v60, %v4539_v37  ;;  %v14085_v22 = vpop.eup %8902  ;;  %v8513_v2 = vunpack.i.l.bf16 %v13724_v12  ;;  %vm4666_vm14 = vcmp.eq.f32.partialorder %v4665_v3, 8.507059e+37 }
 0xa10   : > { %8904 = vrcp.f32 %v14073_v6  ;;  %v14081_v9 = vpop.xlane.xlu2 %4435  ;;  %6737 = vmatpush.msrb.mxu1 %v8538_v24  ;;  %v4548_v24 = vor.u32 1.1754944e-38, %v4547_v39  ;;  %v4672_v49 = vmul.f32 %v14085_v22, %v14042_v35  ;;  %v4664_v5 = vsel %vm4663_vm11, %v14037_v58, %v4660_v53 }
 0xa11   : > { %v4553_v37 = vsub.f32 1.0, %v4552_v16  ;;  %8906 = vrcp.f32 %v14081_v9  ;;  %6644 = vmatpush.msrb.mxu0 %v8508_v36  ;;  %v4544_v36 = vsel %vm4543_vm9, %v14044_v60, %v4540_v42  ;;  %v8514_v39 = vunpack.i.h.bf16 %v13724_v12 }
 0xa12   : > { %8908 = vrcp.f32 %v14075_v4  ;;  %6738 = vmatpush.msrb.mxu1 %v8539_v32  ;;  %v4549_v19 = vsel %vm4546_vm13, %v4548_v24, %v4544_v36  ;;  %v4673_v1 = vsub.f32 1.0, %v4672_v49  ;;  %v4669_v32 = vsel %vm4666_vm14, %v4668_v54, %v4664_v5 }
 0xa13   : > { %v4554_v16 = vmul.f32 %v14064_v0, %v4553_v37  ;;  %6645 = vmatpush.msrb.mxu0 %v8509_v63  ;;  %v4550_v55 = vmul.f32 %v13871_v14, %v4549_v19  ;;  %vm4557_vm15 = vweird.f32 %v14064_v0  ;;  %v4562_v63 = vand.u32 2147483648, %v14040_v34 }
 0xa14   : > { %v4670_v60 = vmul.f32 %v13873_v46, %v4669_v32  ;;  %v8518_v14 = vunpack.i.l.bf16 %v13766_v62  ;;  %v4682_v42 = vand.u32 2147483648, %v14042_v35  ;;  %v8519_v3 = vunpack.i.h.bf16 %v13766_v62  ;;  %vm14135_vm4 = vmor %vm4556_vm3, %vm4557_vm15 }
 0xa15   : > { %6646 = vmatpush.msrb.mxu0 %v8513_v2  ;;  %6974 = vrot.lane.b32.xlu0 %v13210_v52, %s9209_s29  ;;  %v4555_v58 = vadd.f32 %v14064_v0, %v4554_v16  ;;  %v4674_v37 = vmul.f32 %v14085_v22, %v4673_v1  ;;  %v4680_v49 = vand.u32 2147483647, %v14042_v35  ;;  %v4563_v54 = vor.u32 1.1754944e-38, %v4562_v63 }
 0xa16   : > { %v14103_v48 = vpop.eup %8904  ;;  %8047 = vmatmul.msk.f32.gmra.mxu0 %vm1062_vm2, %v4550_v55  ;;  %8055 = vmatmul.msk.f32.gmra.mxu1 %vm1062_vm2, %v4670_v60  ;;  %v14129_v53 = vpop.xlane.xlu0 %4465  ;;  %v4560_v55 = vand.u32 2147483647, %v14040_v34  ;;  %vm4677_vm7 = vweird.f32 %v14085_v22  ;;  %v4683_v1 = vor.u32 1.1754944e-38, %v4682_v42  ;;  %vm4691_vm10 = vweird.f32 %v14073_v6 }
 0xa17   : > { %v14111_v12 = vpop.eup %8906  ;;  %v4687_v5 = vmul.f32 %v14103_v48, %v14073_v6  ;;  %v14118_v56 = vpop.xlane.xlu1 %4441  ;;  %6647 = vmatpush.msrb.mxu0 %v8514_v39  ;;  %v4559_v62 = vsel %vm14135_vm4, %v14064_v0, %v4555_v58  ;;  %v4675_v0 = vadd.f32 %v14085_v22, %v4674_v37  ;;  %vm14154_vm12 = vcmp.eq.f32.partialorder %v4680_v49, 8.507059e+37  ;;  %vm14160_vm6 = vmor %vm4676_vm8, %vm4677_vm7 }
 0xa18   : > { %v14120_v46 = vpop.eup %8908  ;;  %v4567_v52 = vmul.f32 %v14111_v12, %v14081_v9  ;;  %8910 = vrcp.f32 %v14118_v56  ;;  %v14127_v8 = vpop.xlane.xlu2 %4462  ;;  %vm4561_vm5 = vcmp.eq.f32.partialorder %v4560_v55, 8.507059e+37  ;;  %vm4692_vm9 = vweird.f32 %v14103_v48 }
 0xa19   : > { %v4688_v24 = vsub.f32 1.0, %v4687_v5  ;;  %8912 = vrcp.f32 %v14127_v8  ;;  %6648 = vmatpush.msrb.mxu0 %v8518_v14  ;;  %v4582_v36 = vmul.f32 %v14120_v46, %v14075_v4  ;;  %v4564_v39 = vsel %vm4561_vm5, %v4563_v54, %v4559_v62  ;;  %v17336_v14 = vld [vmem:[#allocation25_spill] sm:$0xff]  ;;  %vm14196_vm14 = vmor %vm4691_vm10, %vm4692_vm9 }
 0xa1a   : > { %v4568_v16 = vsub.f32 1.0, %v4567_v52  ;;  %8914 = vrcp.f32 %v14129_v53  ;;  %v4697_v35 = vand.u32 2147483648, %v14073_v6  ;;  %v4565_v58 = vmul.f32 %v13890_v30, %v4564_v39  ;;  %v17337_v5 = vld [vmem:[#allocation121_spill] sm:$0xff] }
 0xa1b   : > { %v4689_v34 = vmul.f32 %v14103_v48, %v4688_v24  ;;  %6649 = vmatpush.msrb.mxu0 %v8519_v3  ;;  %v4577_v52 = vand.u32 2147483648, %v14081_v9  ;;  %v4583_v55 = vsub.f32 1.0, %v4582_v36  ;;  %vm4586_vm11 = vweird.f32 %v14075_v4 }
 0xa1c   : > { %v4569_v19 = vmul.f32 %v14111_v12, %v4568_v16  ;;  %8561 = vrot.lane.b32.xlu2 %v17336_v14, %s9208_s26  ;;  %8571 = vrot.lane.b32.xlu1 %v17337_v5, %s9208_s26  ;;  %v4679_v3 = vsel %vm14160_vm6, %v14085_v22, %v4675_v0  ;;  %v4575_v30 = vand.u32 2147483647, %v14081_v9  ;;  %vm4572_vm13 = vweird.f32 %v14111_v12 }
 0xa1d   : > { %v4690_v42 = vadd.f32 %v14103_v48, %v4689_v34  ;;  %v4684_v24 = vsel %vm14154_vm12, %v4683_v1, %v4679_v3  ;;  %v4695_v16 = vand.u32 2147483647, %v14073_v6  ;;  %vm4571_vm15 = vweird.f32 %v14081_v9 }
 0xa1e   : > { %v14158_v63 = vpop.eup %8910  ;;  %8048 = vmatmul.msk.f32.gmra.mxu0 %vm1062_vm2, %v4565_v58  ;;  %v4570_v54 = vadd.f32 %v14111_v12, %v4569_v19  ;;  %v4685_v1 = vmul.f32 %v13892_v61, %v4684_v24  ;;  %v4698_v19 = vor.u32 1.1754944e-38, %v4697_v35  ;;  %v4578_v39 = vor.u32 1.1754944e-38, %v4577_v52  ;;  %vm4573_vm3 = vmor %vm4571_vm15, %vm4572_vm13  ;;  %v14220_v35 = vpop.xlane.xlu0 %4447 }
 0xa1f   : > { %v14177_v2 = vpop.xlane.xlu1 %4468  ;;  %v14180_v37 = vpop.eup %8912  ;;  %v4597_v34 = vmul.f32 %v14158_v63, %v14118_v56  ;;  %v4694_v6 = vsel %vm14196_vm14, %v14103_v48, %v4690_v42  ;;  %v4584_v0 = vmul.f32 %v14120_v46, %v4583_v55  ;;  %vm4587_vm4 = vweird.f32 %v14120_v46 }
 0xa20   : > { %v14186_v49 = vpop.xlane.xlu2 %4444  ;;  %v14190_v22 = vpop.eup %8914  ;;  %v4702_v36 = vmul.f32 %v14180_v37, %v14127_v8  ;;  %8916 = vrcp.f32 %v14177_v2  ;;  %8056 = vmatmul.msk.f32.gmra.mxu1 %vm1062_vm2, %v4685_v1  ;;  %v4592_v61 = vand.u32 2147483648, %v14075_v4  ;;  %vm4576_vm7 = vcmp.eq.f32.partialorder %v4575_v30, 8.507059e+37  ;;  %vm14239_vm10 = vmor %vm4586_vm11, %vm4587_vm4 }
 0xa21   : > { %8918 = vrcp.f32 %v14186_v49  ;;  %v4717_v60 = vmul.f32 %v14190_v22, %v14129_v53  ;;  %vm4696_vm8 = vcmp.eq.f32.partialorder %v4695_v16, 8.507059e+37  ;;  %v4598_v9 = vsub.f32 1.0, %v4597_v34 }
 0xa22   : > { %v4703_v32 = vsub.f32 1.0, %v4702_v36  ;;  %v4574_v58 = vsel %vm4573_vm3, %v14111_v12, %v4570_v54  ;;  %v4699_v14 = vsel %vm4696_vm8, %v4698_v19, %v4694_v6  ;;  %vm4707_vm5 = vweird.f32 %v14180_v37 }
 0xa23   : > { %v4712_v5 = vand.u32 2147483648, %v14127_v8  ;;  %v4579_v42 = vsel %vm4576_vm7, %v4578_v39, %v4574_v58  ;;  %v4590_v52 = vand.u32 2147483647, %v14075_v4  ;;  %v4718_v3 = vsub.f32 1.0, %v4717_v60 }
 0xa24   : > { %v4704_v48 = vmul.f32 %v14180_v37, %v4703_v32  ;;  %6976 = vrot.lane.b32.xlu2 %v13218_v45, %s9209_s29  ;;  %v4580_v30 = vmul.f32 %v13912_v27, %v4579_v42  ;;  %v4700_v24 = vmul.f32 %v13908_v51, %v4699_v14  ;;  %v4585_v12 = vadd.f32 %v14120_v46, %v4584_v0 }
 0xa25   : > { %vm4706_vm12 = vweird.f32 %v14127_v8  ;;  %8920 = vrcp.f32 %v14220_v35  ;;  %v4710_v51 = vand.u32 2147483647, %v14127_v8  ;;  %v4593_v27 = vor.u32 1.1754944e-38, %v4592_v61 }
 0xa26   : > { %v14228_v55 = vpop.eup %8916  ;;  %v4705_v45 = vadd.f32 %v14180_v37, %v4704_v48  ;;  %v4599_v62 = vmul.f32 %v14158_v63, %v4598_v9  ;;  %vm4708_vm6 = vmor %vm4706_vm12, %vm4707_vm5  ;;  %8049 = vmatmul.msk.f32.gmra.mxu0 %vm1062_vm2, %v4580_v30  ;;  %v4713_v34 = vor.u32 1.1754944e-38, %v4712_v5  ;;  %v4589_v1 = vsel %vm14239_vm10, %v14120_v46, %v4585_v12 }
 0xa27   : > { %v14233_v54 = vpop.eup %8918  ;;  %v4732_v36 = vmul.f32 %v14228_v55, %v14177_v2  ;;  %v4719_v19 = vmul.f32 %v14190_v22, %v4718_v3  ;;  %vm4591_vm9 = vcmp.eq.f32.partialorder %v4590_v52, 8.507059e+37  ;;  %vm4711_vm11 = vcmp.eq.f32.partialorder %v4710_v51, 8.507059e+37 }
 0xa28   : > { %v4612_v4 = vmul.f32 %v14233_v54, %v14186_v49  ;;  %v4709_v8 = vsel %vm4708_vm6, %v14180_v37, %v4705_v45  ;;  %8057 = vmatmul.msk.f32.gmra.mxu1 %vm1062_vm2, %v4700_v24  ;;  %v4351_v6 = vsub.f32 %v13853_v25, %v13992_v31  ;;  %v4594_v39 = vsel %vm4591_vm9, %v4593_v27, %v4589_v1 }
 0xa29   : > { %v4714_v0 = vsel %vm4711_vm11, %v4713_v34, %v4709_v8  ;;  %vm4602_vm13 = vweird.f32 %v14158_v63  ;;  %v4600_v60 = vadd.f32 %v14158_v63, %v4599_v62  ;;  %vm4601_vm14 = vweird.f32 %v14118_v56 }
 0xa2a   : > { %v4613_v32 = vsub.f32 1.0, %v4612_v4  ;;  %v4607_v46 = vand.u32 2147483648, %v14118_v56  ;;  %vm4722_vm15 = vweird.f32 %v14190_v22  ;;  %v4733_v37 = vsub.f32 1.0, %v4732_v36  ;;  %vm14274_vm3 = vmor %vm4601_vm14, %vm4602_vm13 }
 0xa2b   : > { %v14265_v61 = vpop.eup %8920  ;;  %v4595_v9 = vmul.f32 %v13910_v50, %v4594_v39  ;;  %v4715_v25 = vmul.f32 %v13927_v38, %v4714_v0  ;;  %v4605_v31 = vand.u32 2147483647, %v14118_v56  ;;  %v4720_v48 = vadd.f32 %v14190_v22, %v4719_v19 }
 0xa2c   : > { %v4405_v58 = vmul.f32 1.442695, %v4351_v6  ;;  %vm4721_vm4 = vweird.f32 %v14129_v53  ;;  %v4727_v5 = vand.u32 2147483648, %v14129_v53  ;;  %v4614_v42 = vmul.f32 %v14233_v54, %v4613_v32 }
 0xa2d   : > { %v4627_v50 = vmul.f32 %v14265_v61, %v14220_v35  ;;  %v4604_v38 = vsel %vm14274_vm3, %v14158_v63, %v4600_v60  ;;  %v4725_v56 = vand.u32 2147483647, %v14129_v53  ;;  %v4608_v52 = vor.u32 1.1754944e-38, %v4607_v46  ;;  %vm14290_vm7 = vmor %vm4721_vm4, %vm4722_vm15 }
 0xa2e   : > { %8050 = vmatmul.msk.f32.gmra.mxu0 %vm1062_vm2, %v4595_v9  ;;  %v4734_v30 = vmul.f32 %v14228_v55, %v4733_v37  ;;  %vm4606_vm8 = vcmp.eq.f32.partialorder %v4605_v31, 8.507059e+37  ;;  %v4724_v24 = vsel %vm14290_vm7, %v14190_v22, %v4720_v48  ;;  %8922 = vpow2.f32 %v4405_v58  ;;  %v17346_v58 = vld [vmem:[#allocation37_spill] sm:$0xff] }
 0xa2f   : > { %v4728_v63 = vor.u32 1.1754944e-38, %v4727_v5  ;;  %v4609_v12 = vsel %vm4606_vm8, %v4608_v52, %v4604_v38  ;;  %vm4617_vm5 = vweird.f32 %v14233_v54  ;;  %v4628_v53 = vsub.f32 1.0, %v4627_v50  ;;  %v17348_v50 = vld [vmem:[#allocation63_spill] sm:$0xff] }
 0xa30   : > { %8058 = vmatmul.msk.f32.gmra.mxu1 %vm1062_vm2, %v4715_v25  ;;  %vm4726_vm10 = vcmp.eq.f32.partialorder %v4725_v56, 8.507059e+37  ;;  %v4615_v16 = vadd.f32 %v14233_v54, %v4614_v42  ;;  %v4352_v45 = vsub.f32 %v13897_v15, %v14049_v29  ;;  %vm4616_vm12 = vweird.f32 %v14186_v49  ;;  %v14359_v42 = vpop.permute.xlu2 %8556 }
 0xa31   : > { %v4622_v51 = vand.u32 2147483648, %v14186_v49  ;;  %v4729_v27 = vsel %vm4726_vm10, %v4728_v63, %v4724_v24  ;;  %vm4737_vm6 = vweird.f32 %v14228_v55  ;;  %v4610_v22 = vmul.f32 %v13923_v23, %v4609_v12  ;;  %vm4618_vm11 = vmor %vm4616_vm12, %vm4617_vm5  ;;  %v14354_v14 = vpop.permute.xlu0 %8551  ;;  %v17349_v24 = vld [vmem:[#allocation100_spill] sm:$0xff] }
 0xa32   : > { %v4620_v62 = vand.u32 2147483647, %v14186_v49  ;;  %v4735_v4 = vadd.f32 %v14228_v55, %v4734_v30  ;;  %vm4736_vm9 = vweird.f32 %v14177_v2  ;;  %v4742_v34 = vand.u32 2147483648, %v14177_v2 }
 0xa33   : > { %v4629_v15 = vmul.f32 %v14265_v61, %v4628_v53  ;;  %v4730_v29 = vmul.f32 %v13925_v17, %v4729_v27  ;;  %v4619_v36 = vsel %vm4618_vm11, %v14233_v54, %v4615_v16  ;;  %v4740_v1 = vand.u32 2147483647, %v14177_v2  ;;  %vm4738_vm13 = vmor %vm4736_vm9, %vm4737_vm6 }
 0xa34   : > { %v14316_v23 = vpop.eup %8922  ;;  %v4407_v49 = vmul.f32 1.442695, %v4352_v45  ;;  %v4623_v8 = vor.u32 1.1754944e-38, %v4622_v51  ;;  %vm4621_vm14 = vcmp.eq.f32.partialorder %v4620_v62, 8.507059e+37  ;;  %v4739_v19 = vsel %vm4738_vm13, %v14228_v55, %v4735_v4 }
 0xa35   : > { %v4743_v6 = vor.u32 1.1754944e-38, %v4742_v34  ;;  %v4358_v0 = vsub.f32 %v13838_v21, %v13976_v28  ;;  %vm4632_vm15 = vweird.f32 %v14265_v61  ;;  %vm4741_vm3 = vcmp.eq.f32.partialorder %v4740_v1, 8.507059e+37 }
 0xa36   : > { %8051 = vmatmul.msk.f32.gmra.mxu0 %vm1062_vm2, %v4610_v22  ;;  %v4624_v39 = vsel %vm4621_vm14, %v4623_v8, %v4619_v36  ;;  %v4630_v17 = vadd.f32 %v14265_v61, %v4629_v15  ;;  %8924 = vpow2.f32 %v4407_v49  ;;  %v4637_v2 = vand.u32 2147483648, %v14220_v35  ;;  %v17350_v15 = vld [vmem:[#allocation65_spill] sm:$0xff] }
 0xa37   : > { %v4744_v54 = vsel %vm4741_vm3, %v4743_v6, %v4739_v19  ;;  %vm4631_vm4 = vweird.f32 %v14220_v35  ;;  %v4625_v32 = vmul.f32 %v13939_v44, %v4624_v39  ;;  %v4491_v55 = vsel %vm1062_vm2, %v14316_v23, 0.0 }
 0xa38   : > { %8059 = vmatmul.msk.f32.gmra.mxu1 %vm1062_vm2, %v4730_v29  ;;  %v4635_v60 = vand.u32 2147483647, %v14220_v35  ;;  %vm4633_vm7 = vmor %vm4631_vm4, %vm4632_vm15  ;;  %v4419_v21 = vmul.f32 1.442695, %v4358_v0  ;;  %v4745_v28 = vmul.f32 %v13935_v43, %v4744_v54  ;;  %v4638_v37 = vor.u32 1.1754944e-38, %v4637_v2 }
 0xa39   : > { %v4634_v46 = vsel %vm4633_vm7, %v14265_v61, %v4630_v17  ;;  %v4350_v35 = vsub.f32 %v13833_v40, %v13974_v59  ;;  %v17347_v59 = vld [vmem:[#allocation138_spill] sm:$0xff]  ;;  %v4360_v56 = vsub.f32 %v13879_v57, %v14010_v33  ;;  %v8549_v36 = vunpack.i.h.bf16 %v13769_v13 }
 0xa3a   : > { %vm4636_vm8 = vcmp.eq.f32.partialorder %v4635_v60, 8.507059e+37  ;;  %8926 = vpow2.f32 %v4419_v21  ;;  %v8548_v49 = vunpack.i.l.bf16 %v13769_v13  ;;  %v8544_v39 = vunpack.i.h.bf16 %v13805_v11 }
 0xa3b   : > { %v4639_v44 = vsel %vm4636_vm8, %v4638_v37, %v4634_v46  ;;  %v4403_v43 = vmul.f32 1.442695, %v4350_v35  ;;  %v4423_v30 = vmul.f32 1.442695, %v4360_v56  ;;  %v8543_v60 = vunpack.i.l.bf16 %v13805_v11 }
 0xa3c   : > { %v14334_v9 = vpop.eup %8924  ;;  %v4640_v25 = vmul.f32 %v13937_v47, %v4639_v44  ;;  %v8558_v11 = vunpack.i.l.bf16 %v14359_v42 }
 0xa3d   : > { %v4494_v31 = vsel %vm1062_vm2, %v14334_v9, 0.0  ;;  %8928 = vpow2.f32 %v4403_v43 }
 0xa3e   : > { %8052 = vmatmul.msk.f32.gmra.mxu0 %vm1062_vm2, %v4625_v32 }
 0xa3f   : > { %4492 = vadd.xlane.f32.xlu0 %v4491_v55 }
 0xa40   : > { %8060 = vmatmul.msk.f32.gmra.mxu1 %vm1062_vm2, %v4745_v28  ;;  %v14342_v61 = vpop.eup %8926 }
 0xa41   : > { %v4512_v48 = vsel %vm1062_vm2, %v14342_v61, 0.0 }
 0xa43   : > { %v14348_v40 = vpop.eup %8928 }
 0xa44   : > { %v4488_v5 = vsel %vm1062_vm2, %v14348_v40, 0.0 }
 0xa46   : > { %4495 = vadd.xlane.f32.xlu1 %v4494_v31  ;;  %8053 = vmatmul.msk.f32.gmra.mxu0 %vm1062_vm2, %v4640_v25  ;;  %v8559_v25 = vunpack.i.h.bf16 %v14359_v42  ;;  %v8554_v31 = vunpack.i.h.bf16 %v14354_v14 }
 0xa4d   : > { %4513 = vadd.xlane.f32.xlu2 %v4512_v48 }
 0xa4e   : > { %8094 = vmatmul.msk.f32.vlgmr.msra.gmra.mxu0 %vm633_vm1, %v17346_v58  ;;  %v14350_v47 = vpop.xlane.xlu1 %4477 }
 0xa4f   : > { %8930 = vrcp.f32 %v14350_v47  ;;  %v4787_v0 = vand.u32 2147483648, %v14350_v47  ;;  %vm4781_vm11 = vweird.f32 %v14350_v47  ;;  %v4785_v44 = vand.u32 2147483647, %v14350_v47 }
 0xa51   : > { %vm4786_vm15 = vcmp.eq.f32.partialorder %v4785_v44, 8.507059e+37 }
 0xa53   : > { %8566 = vrot.lane.b32.xlu0 %v17347_v59, %s9208_s26  ;;  %v4788_v59 = vor.u32 1.1754944e-38, %v4787_v0 }
 0xa55   : > { %4489 = vadd.xlane.f32.xlu2 %v4488_v5  ;;  %v14363_v38 = vpop.eup %8930  ;;  %v17353_v5 = vld [vmem:[#allocation98_spill] sm:$0xff] }
 0xa56   : > { %8095 = vmatmul.msk.f32.gmra.mxu0 %vm633_vm1, %v17348_v50  ;;  %v4777_v3 = vmul.f32 %v14363_v38, %v14350_v47  ;;  %vm4782_vm12 = vweird.f32 %v14363_v38 }
 0xa57   : > { %vm14419_vm13 = vmor %vm4781_vm11, %vm4782_vm12 }
 0xa58   : > { %v4778_v53 = vsub.f32 1.0, %v4777_v3 }
 0xa5a   : > { %v4779_v27 = vmul.f32 %v14363_v38, %v4778_v53 }
 0xa5c   : > { %v4475_v52 = vpop.xlane.xlu0 %4474  ;;  %v4780_v55 = vadd.f32 %v14363_v38, %v4779_v27 }
 0xa5d   : > { %8932 = vrcp.f32 %v4475_v52  ;;  %v4772_v22 = vand.u32 2147483648, %v4475_v52  ;;  %v4770_v4 = vand.u32 2147483647, %v4475_v52  ;;  %vm4766_vm10 = vweird.f32 %v4475_v52 }
 0xa5e   : > { %8096 = vmatmul.msk.f32.gmra.mxu0 %vm633_vm1, %v17349_v24  ;;  %v4784_v56 = vsel %vm14419_vm13, %v14363_v38, %v4780_v55 }
 0xa5f   : > { %v14371_v63 = vpop.xlane.xlu2 %4471  ;;  %v4773_v17 = vor.u32 1.1754944e-38, %v4772_v22  ;;  %vm4771_vm9 = vcmp.eq.f32.partialorder %v4770_v4, 8.507059e+37 }
 0xa60   : > { %8934 = vrcp.f32 %v14371_v63  ;;  %v4755_v3 = vand.u32 2147483647, %v14371_v63  ;;  %vm4751_vm3 = vweird.f32 %v14371_v63 }
 0xa61   : > { %8936 = vpow2.f32 %v4423_v30 }
 0xa62   : > { %vm4756_vm8 = vcmp.eq.f32.partialorder %v4755_v3, 8.507059e+37  ;;  %v17361_v3 = vld [vmem:[#allocation105_spill] sm:$0xff] }
 0xa63   : > { %v8933_v12 = vpop.eup %8932 }
 0xa64   : > { %v4762_v16 = vmul.f32 %v8933_v12, %v4475_v52  ;;  %v14374_v45 = vpop.xlane.xlu0 %4501  ;;  %vm4767_vm5 = vweird.f32 %v8933_v12  ;;  %v4757_v52 = vand.u32 2147483648, %v14371_v63 }
 0xa65   : > { %8938 = vrcp.f32 %v14374_v45  ;;  %vm4768_vm6 = vmor %vm4766_vm10, %vm4767_vm5  ;;  %vm4901_vm5 = vweird.f32 %v14374_v45  ;;  %v4907_v13 = vand.u32 2147483648, %v14374_v45 }
 0xa66   : > { %v4763_v57 = vsub.f32 1.0, %v4762_v16  ;;  %v14377_v33 = vpop.xlane.xlu1 %4510  ;;  %v14379_v51 = vpop.eup %8934  ;;  %8097 = vmatmul.msk.f32.gmra.mxu0 %vm633_vm1, %v17350_v15  ;;  %v4789_v16 = vsel %vm4786_vm15, %v4788_v59, %v4784_v56  ;;  %v4758_v4 = vor.u32 1.1754944e-38, %v4757_v52 }
 0xa67   : > { %v4747_v34 = vmul.f32 %v14379_v51, %v14371_v63  ;;  %v14386_v29 = vpop.xlane.xlu2 %4498  ;;  %v14390_v1 = vpop.eup %8936  ;;  %vm4752_vm14 = vweird.f32 %v14379_v51  ;;  %v4908_v59 = vor.u32 1.1754944e-38, %v4907_v13 }
 0xa68   : > { %v4764_v62 = vmul.f32 %v8933_v12, %v4763_v57  ;;  %8940 = vrcp.f32 %v14386_v29  ;;  %v14408_v28 = vsel %vm1062_vm2, %v14390_v1, 0.0  ;;  %v4892_v53 = vand.u32 2147483648, %v14386_v29  ;;  %vm14448_vm4 = vmor %vm4751_vm3, %vm4752_vm14 }
 0xa69   : > { %v4748_v19 = vsub.f32 1.0, %v4747_v34  ;;  %v4890_v22 = vand.u32 2147483647, %v14386_v29  ;;  %vm4886_vm10 = vweird.f32 %v14386_v29 }
 0xa6a   : > { %v4765_v8 = vadd.f32 %v8933_v12, %v4764_v62 }
 0xa6b   : > { %v14393_v6 = vpop.eup %8938  ;;  %v4749_v37 = vmul.f32 %v14379_v51, %v4748_v19 }
 0xa6c   : > { %v4769_v2 = vsel %vm4768_vm6, %v8933_v12, %v4765_v8  ;;  %v4897_v54 = vmul.f32 %v14393_v6, %v14374_v45  ;;  %v14401_v32 = vpop.xlane.xlu0 %4504  ;;  %v4790_v8 = vmul.f32 %v13953_v20, %v4789_v16  ;;  %vm4902_vm12 = vweird.f32 %v14393_v6 }
 0xa6d   : > { %v4774_v21 = vsel %vm4771_vm9, %v4773_v17, %v4769_v2  ;;  %8942 = vrcp.f32 %v14401_v32  ;;  %v4750_v24 = vadd.f32 %v14379_v51, %v4749_v37  ;;  %vm4891_vm9 = vcmp.eq.f32.partialorder %v4890_v22, 8.507059e+37  ;;  %v17356_v2 = vld [vmem:[#allocation143_spill] sm:$0xff]  ;;  %vm14487_vm11 = vmor %vm4901_vm5, %vm4902_vm12 }
 0xa6e   : > { %v4775_v46 = vmul.f32 %v13960_v10, %v4774_v21  ;;  %v8941_v35 = vpop.eup %8940  ;;  %v4898_v48 = vsub.f32 1.0, %v4897_v54  ;;  %v14423_v58 = vpop.xlane.xlu1 %4486  ;;  %v8553_v10 = vunpack.i.l.bf16 %v14354_v14  ;;  %8098 = vmatmul.msk.f32.gmra.mxu0 %vm633_vm1, %v17353_v5  ;;  %vm4916_vm14 = vweird.f32 %v14401_v32  ;;  %v17366_v21 = vld [vmem:[#allocation127_spill] sm:$0xff] }
 0xa6f   : > { %v4882_v47 = vmul.f32 %v8941_v35, %v14386_v29  ;;  %v14429_v50 = vpop.xlane.xlu2 %4480  ;;  %vm4887_vm7 = vweird.f32 %v8941_v35  ;;  %v4754_v34 = vsel %vm14448_vm4, %v14379_v51, %v4750_v24  ;;  %v4922_v14 = vand.u32 2147483648, %v14401_v32 }
 0xa70   : > { %8062 = vmatmul.msk.f32.vlgmr.msrb.gmra.mxu2 %vm1062_vm2, %v4775_v46  ;;  %8944 = vrcp.f32 %v14429_v50  ;;  %v4899_v38 = vmul.f32 %v14393_v6, %v4898_v48  ;;  %vm4888_vm6 = vmor %vm4886_vm10, %vm4887_vm7  ;;  %v4759_v0 = vsel %vm4756_vm8, %v4758_v4, %v4754_v34  ;;  %v4802_v44 = vand.u32 2147483648, %v14429_v50  ;;  %v17364_v34 = vld [vmem:[#allocation22_spill] sm:$0xff] }
 0xa71   : > { %6820 = vmatpush.msrb.mxu2 %v8543_v60  ;;  %v4883_v30 = vsub.f32 1.0, %v4882_v47  ;;  %8946 = vrcp.f32 %v14423_v58  ;;  %v4760_v55 = vmul.f32 %v13966_v7, %v4759_v0  ;;  %v4905_v60 = vand.u32 2147483647, %v14374_v45 }
 0xa72   : > { %v4900_v51 = vadd.f32 %v14393_v6, %v4899_v38  ;;  %v4800_v45 = vand.u32 2147483647, %v14429_v50  ;;  %vm4796_vm3 = vweird.f32 %v14429_v50  ;;  %v4920_v47 = vand.u32 2147483647, %v14401_v32 }
 0xa73   : > { %v14441_v12 = vpop.eup %8942  ;;  %6821 = vmatpush.msrb.mxu2 %v8544_v39  ;;  %v4884_v27 = vmul.f32 %v8941_v35, %v4883_v30  ;;  %v4893_v39 = vor.u32 1.1754944e-38, %v4892_v53  ;;  %8061 = vmatmul.msk.f32.gmra.mxu1 %vm1062_vm2, %v4760_v55  ;;  %vm4906_vm15 = vcmp.eq.f32.partialorder %v4905_v60, 8.507059e+37  ;;  %v4803_v56 = vor.u32 1.1754944e-38, %v4802_v44 }
 0xa74   : > { %v4912_v62 = vmul.f32 %v14441_v12, %v14401_v32  ;;  %v14455_v63 = vpop.xlane.xlu0 %4483  ;;  %vm4917_vm4 = vweird.f32 %v14441_v12  ;;  %vm4801_vm8 = vcmp.eq.f32.partialorder %v4800_v45, 8.507059e+37 }
 0xa75   : > { %6822 = vmatpush.msrb.mxu2 %v8548_v49  ;;  %8948 = vrcp.f32 %v14455_v63  ;;  %v4885_v15 = vadd.f32 %v8941_v35, %v4884_v27  ;;  %v4817_v42 = vand.u32 2147483648, %v14455_v63  ;;  %vm14549_vm10 = vmor %vm4916_vm14, %vm4917_vm4  ;;  %vm4811_vm12 = vweird.f32 %v14455_v63 }
 0xa76   : > { %v14464_v19 = vpop.eup %8944  ;;  %v4913_v29 = vsub.f32 1.0, %v4912_v62  ;;  %8099 = vmatmul.msk.f32.gmra.mxu0 %vm633_vm1, %v17356_v2  ;;  %8950 = vrcp.f32 %v14377_v33  ;;  %v4815_v62 = vand.u32 2147483647, %v14455_v63  ;;  %v14628_v4 = vpop.xlane.xlu1 %4516 }
 0xa77   : > { %6823 = vmatpush.msrb.mxu2 %v8549_v36  ;;  %v14471_v49 = vpop.eup %8946  ;;  %v4889_v17 = vsel %vm4888_vm6, %v8941_v35, %v4885_v15  ;;  %v4792_v20 = vmul.f32 %v14464_v19, %v14429_v50  ;;  %v14477_v54 = vpop.xlane.xlu2 %4507  ;;  %vm4797_vm13 = vweird.f32 %v14464_v19 }
 0xa78   : > { %8063 = vmatmul.msk.f32.gmra.mxu2 %vm1062_vm2, %v4790_v8  ;;  %v4894_v36 = vsel %vm4891_vm9, %v4893_v39, %v4889_v17  ;;  %v4822_v7 = vmul.f32 %v14471_v49, %v14423_v58  ;;  %8952 = vrcp.f32 %v14477_v54  ;;  %v4914_v43 = vmul.f32 %v14441_v12, %v4913_v29  ;;  %vm14521_vm7 = vmor %vm4796_vm3, %vm4797_vm13 }
 0xa79   : > { %6824 = vmatpush.msrb.mxu2 %v8553_v10  ;;  %v4895_v46 = vmul.f32 %v13979_v18, %v4894_v36  ;;  %v4793_v37 = vsub.f32 1.0, %v4792_v20  ;;  %v4904_v18 = vsel %vm14487_vm11, %v14393_v6, %v4900_v51  ;;  %v4818_v39 = vor.u32 1.1754944e-38, %v4817_v42  ;;  %v17365_v20 = vld [vmem:[#allocation9_spill] sm:$0xff] }
 0xa7a   : > { %v4823_v50 = vsub.f32 1.0, %v4822_v7  ;;  %v4915_v38 = vadd.f32 %v14441_v12, %v4914_v43  ;;  %vm4816_vm9 = vcmp.eq.f32.partialorder %v4815_v62, 8.507059e+37  ;;  %vm4921_vm11 = vcmp.eq.f32.partialorder %v4920_v47, 8.507059e+37  ;;  %v17368_v7 = vld [vmem:[#allocation11_spill] sm:$0xff] }
 0xa7b   : > { %v14494_v35 = vpop.eup %8948  ;;  %6825 = vmatpush.msrb.mxu2 %v8554_v31  ;;  %v4794_v48 = vmul.f32 %v14464_v19, %v4793_v37  ;;  %8070 = vmatmul.msk.f32.vlgmr.msra.gmra.mxu3 %vm1062_vm2, %v4895_v46  ;;  %vm4826_vm13 = vweird.f32 %v14423_v58  ;;  %vm4827_vm14 = vweird.f32 %v14471_v49  ;;  %v4832_v36 = vand.u32 2147483648, %v14423_v58  ;;  %v17367_v37 = vld [vmem:[#allocation125_spill] sm:$0xff] }
 0xa7c   : > { %v4807_v10 = vmul.f32 %v14494_v35, %v14455_v63  ;;  %vm4812_vm5 = vweird.f32 %v14494_v35  ;;  %8110 = vmatmul.msk.f32.vlgmr.msra.gmra.mxu1 %vm633_vm1, %v17364_v34  ;;  %v4919_v32 = vsel %vm14549_vm10, %v14441_v12, %v4915_v38  ;;  %v4937_v60 = vand.u32 2147483648, %v14477_v54  ;;  %vm4828_vm3 = vmor %vm4826_vm13, %vm4827_vm14  ;;  %v17373_v38 = vld [vmem:[#allocation101_spill] sm:$0xff] }
 0xa7d   : > { %6826 = vmatpush.msrb.mxu2 %v8558_v11  ;;  %4519 = vadd.xlane.f32.xlu0 %v14408_v28  ;;  %v4795_v31 = vadd.f32 %v14464_v19, %v4794_v48  ;;  %v4909_v28 = vsel %vm4906_vm15, %v4908_v59, %v4904_v18  ;;  %v14527_v11 = vpop.eup %8950  ;;  %vm4813_vm6 = vmor %vm4811_vm12, %vm4812_vm5  ;;  %vm4931_vm4 = vweird.f32 %v14477_v54  ;;  %v4935_v45 = vand.u32 2147483647, %v14477_v54 }
 0xa7e   : > { %v4808_v6 = vsub.f32 1.0, %v4807_v10  ;;  %8100 = vmatmul.msk.f32.gmra.mxu0 %vm633_vm1, %v17361_v3  ;;  %v14536_v53 = vpop.eup %8952  ;;  %v4910_v22 = vmul.f32 %v13972_v26, %v4909_v28  ;;  %v4824_v26 = vmul.f32 %v14471_v49, %v4823_v50  ;;  %v4942_v63 = vmul.f32 %v14527_v11, %v14377_v33 }
 0xa7f   : > { %6827 = vmatpush.msrb.mxu2 %v8559_v25  ;;  %v8562_v30 = vpop.permute.xlu2 %8561  ;;  %v4799_v24 = vsel %vm14521_vm7, %v14464_v19, %v4795_v31  ;;  %v4927_v57 = vmul.f32 %v14536_v53, %v14477_v54  ;;  %v4923_v19 = vor.u32 1.1754944e-38, %v4922_v14  ;;  %vm4932_vm15 = vweird.f32 %v14536_v53  ;;  %v17369_v31 = vld [vmem:[#allocation60_spill] sm:$0xff] }
 0xa80   : > { %v4809_v52 = vmul.f32 %v14494_v35, %v4808_v6  ;;  %v8563_v25 = vunpack.i.l.bf16 %v8562_v30  ;;  %v4804_v16 = vsel %vm4801_vm8, %v4803_v56, %v4799_v24  ;;  %v8564_v15 = vunpack.i.h.bf16 %v8562_v30  ;;  %vm4933_vm7 = vmor %vm4931_vm4, %vm4932_vm15  ;;  %v17371_v56 = vld [vmem:[#allocation132_spill] sm:$0xff]  ;;  %v17372_v24 = vld [vmem:[#allocation66_spill] sm:$0xff]  ;;  %v14626_v62 = vpop.f32.mrf.mxu1 }
 0xa81   : > { %v4805_v27 = vmul.f32 %v14002_v41, %v4804_v16  ;;  %v4928_v8 = vsub.f32 1.0, %v4927_v57  ;;  %v4924_v29 = vsel %vm4921_vm11, %v4923_v19, %v4919_v32  ;;  %v4825_v2 = vadd.f32 %v14471_v49, %v4824_v26  ;;  %v17375_v16 = vld [vmem:[#allocation152_spill] sm:$0xff]  ;;  %v17376_v57 = vld [vmem:[#allocation70_spill] sm:$0xff]  ;;  %17378 = vst [vmem:[#allocation40_spill] sm:$0xff] %v14626_v62 }
 0xa82   : > { %6909 = vmatpush.msra.mxu3 %v8563_v25  ;;  %v4810_v41 = vadd.f32 %v14494_v35, %v4809_v52  ;;  %v4943_v13 = vsub.f32 1.0, %v4942_v63  ;;  %v4925_v44 = vmul.f32 %v17367_v37, %v4924_v29  ;;  %v4833_v48 = vor.u32 1.1754944e-38, %v4832_v36 }
 0xa83   : > { %8064 = vmatmul.msk.f32.gmra.mxu2 %vm1062_vm2, %v4805_v27  ;;  %8071 = vmatmul.msk.f32.gmra.mxu3 %vm1062_vm2, %v4910_v22  ;;  %v4929_v51 = vmul.f32 %v14536_v53, %v4928_v8  ;;  %v4829_v18 = vsel %vm4828_vm3, %v14471_v49, %v4825_v2  ;;  %v4938_v10 = vor.u32 1.1754944e-38, %v4937_v60  ;;  %vm4936_vm5 = vcmp.eq.f32.partialorder %v4935_v45, 8.507059e+37  ;;  %v17370_v49 = vld [vmem:[#allocation4_spill] sm:$0xff] }
 0xa84   : > { %6910 = vmatpush.msra.mxu3 %v8564_v15  ;;  %v4814_v0 = vsel %vm4813_vm6, %v14494_v35, %v4810_v41  ;;  %v4830_v35 = vand.u32 2147483647, %v14423_v58  ;;  %8111 = vmatmul.msk.f32.gmra.mxu1 %vm633_vm1, %v17368_v7  ;;  %v4944_v43 = vmul.f32 %v14527_v11, %v4943_v13  ;;  %vm4947_vm10 = vweird.f32 %v14527_v11  ;;  %v17380_v15 = vld [vmem:[#allocation164_spill] sm:$0xff] }
 0xa85   : > { %v4819_v17 = vsel %vm4816_vm9, %v4818_v39, %v4814_v0  ;;  %v4930_v55 = vadd.f32 %v14536_v53, %v4929_v51  ;;  %v4952_v6 = vand.u32 2147483648, %v14377_v33  ;;  %vm4946_vm12 = vweird.f32 %v14377_v33 }
 0xa86   : > { %8101 = vmatmul.msk.f32.gmra.mxu0 %vm633_vm1, %v17365_v20  ;;  %v4820_v46 = vmul.f32 %v17366_v21, %v4819_v17  ;;  %vm4831_vm8 = vcmp.eq.f32.partialorder %v4830_v35, 8.507059e+37  ;;  %v4945_v54 = vadd.f32 %v14527_v11, %v4944_v43  ;;  %v4950_v50 = vand.u32 2147483647, %v14377_v33  ;;  %vm4948_vm6 = vmor %vm4946_vm12, %vm4947_vm10  ;;  %v17374_v33 = vld [vmem:[#allocation44_spill] sm:$0xff] }
 0xa87   : > { %v4934_v58 = vsel %vm4933_vm7, %v14536_v53, %v4930_v55  ;;  %v4834_v59 = vsel %vm4831_vm8, %v4833_v48, %v4829_v18  ;;  %v4953_v3 = vor.u32 1.1754944e-38, %v4952_v6  ;;  %v14622_v27 = vpop.permute.xlu0 %6974  ;;  %v14630_v34 = vpop.permute.xlu2 %6976  ;;  %8954 = vrcp.f32 %v14628_v4  ;;  %v9158_v6 = vld [vmem:[%s16365_s4] sm:$0xff] }
 0xa88   : > { %v4939_v14 = vsel %vm4936_vm5, %v4938_v10, %v4934_v58  ;;  %v4835_v47 = vmul.f32 %v17369_v31, %v4834_v59  ;;  %v4949_v52 = vsel %vm4948_vm6, %v14527_v11, %v4945_v54  ;;  %vm4951_vm9 = vcmp.eq.f32.partialorder %v4950_v50, 8.507059e+37  ;;  %17377 = vst [vmem:[#allocation149_spill] sm:$0xff] %v14622_v27 }
 0xa89   : > { %v5066_v12 = vpop.f32.mrf.mxu0  ;;  %v4940_v28 = vmul.f32 %v17371_v56, %v4939_v14  ;;  %v4954_v30 = vsel %vm4951_vm9, %v4953_v3, %v4949_v52  ;;  %17379 = vst [vmem:[#allocation31_spill] sm:$0xff] %v14630_v34  ;;  %vm4976_vm4 = vweird.f32 %v14628_v4 }
 0xa8a   : > { %7102 = vrot.lane.b32.xlu1 %v5066_v12, %s9210_s8  ;;  %v4955_v53 = vmul.f32 %v17373_v38, %v4954_v30  ;;  %v14692_v38 = vld [vmem:[%s16364_s3 + $0xc8] sm:$0xff] }
 0xa8b   : > { %8065 = vmatmul.msk.f32.gmra.mxu2 %vm1062_vm2, %v4820_v46  ;;  %8072 = vmatmul.msk.f32.gmra.mxu3 %vm1062_vm2, %v4925_v44  ;;  %v14661_v44 = vld [vmem:[%s16364_s3 + $0xc0] sm:$0xff] }
 0xa8c   : > { %8112 = vmatmul.msk.f32.gmra.mxu1 %vm633_vm1, %v17370_v49 }
 0xa8d   : > { %v14641_v32 = vpop.eup %8954 }
 0xa8e   : > { %v8572_v63 = vpop.permute.xlu1 %8571  ;;  %v4972_v39 = vmul.f32 %v14641_v32, %v14628_v4  ;;  %vm4977_vm13 = vweird.f32 %v14641_v32 }
 0xa8f   : > { %v8573_v21 = vunpack.i.l.bf16 %v8572_v63  ;;  %v8574_v35 = vunpack.i.h.bf16 %v8572_v63  ;;  %vm14685_vm7 = vmor %vm4976_vm4, %vm4977_vm13 }
 0xa90   : > { %v4973_v29 = vsub.f32 1.0, %v4972_v39 }
 0xa92   : > { %v4974_v46 = vmul.f32 %v14641_v32, %v4973_v29  ;;  %v9159_v29 = vld [vmem:[%s16365_s4 + $0x8] sm:$0xff] }
 0xa93   : > { %v5069_v5 = vpop.f32.mrf.mxu0  ;;  %8066 = vmatmul.msk.f32.gmra.mxu2 %vm1062_vm2, %v4835_v47  ;;  %8073 = vmatmul.msk.f32.gmra.mxu3 %vm1062_vm2, %v4940_v28  ;;  %v14639_v8 = vpop.f32.mrf.mxu1  ;;  %v4982_v28 = vand.u32 2147483648, %v14628_v4 }
 0xa94   : > { %7104 = vrot.lane.b32.xlu2 %v5069_v5, %s9210_s8  ;;  %8113 = vmatmul.msk.f32.gmra.mxu1 %vm633_vm1, %v17372_v24  ;;  %17381 = vst [vmem:[#allocation124_spill] sm:$0xff] %v14639_v8  ;;  %v4975_v47 = vadd.f32 %v14641_v32, %v4974_v46 }
 0xa9b   : > { %v14609_v42 = vpop.f32.mrf.mxu0  ;;  %8074 = vmatmul.msk.f32.gmra.mxu3 %vm1062_vm2, %v4955_v53 }
 0xa9c   : > { %8114 = vmatmul.msk.f32.gmra.mxu1 %vm633_vm1, %v17374_v33  ;;  %v4980_v33 = vand.u32 2147483647, %v14628_v4 }
 0xa9d   : > { %v14648_v12 = vpop.f32.mrf.mxu1 }
 0xa9e   : > { %17382 = vst [vmem:[#allocation145_spill] sm:$0xff] %v14648_v12  ;;  %vm4981_vm10 = vcmp.eq.f32.partialorder %v4980_v33, 8.507059e+37 }
 0xaa3   : > { %v14614_v25 = vpop.f32.mrf.mxu0 }
 0xaa4   : > { %8115 = vmatmul.msk.f32.gmra.mxu1 %vm633_vm1, %v17375_v16 }
 0xaa5   : > { %v14679_v50 = vpop.f32.mrf.mxu1 }
 0xaa6   : > { %17383 = vst [vmem:[#allocation120_spill] sm:$0xff] %v14679_v50 }
 0xaab   : > { %v14618_v11 = vpop.f32.mrf.mxu0 }
 0xaac   : > { %8116 = vmatmul.msk.f32.gmra.mxu1 %vm633_vm1, %v17376_v57 }
 0xab2   : > { %v14635_v41 = vpop.xlane.xlu0 %4492 }
 0xab3   : > { %v14624_v22 = vpop.f32.mrf.mxu0 }
 0xab4   : > { %8117 = vmatmul.msk.f32.gmra.mxu1 %vm633_vm1, %v17380_v15  ;;  %v4979_v15 = vsel %vm14685_vm7, %v14641_v32, %v4975_v47 }
 0xab9   : > { %v14652_v36 = vpop.xlane.xlu1 %4495 }
 0xabb   : > { %v14637_v26 = vpop.f32.mrf.mxu0 }
 0xac0   : > { %v4514_v19 = vpop.xlane.xlu2 %4513 }
 0xac1   : > { %8956 = vrcp.f32 %v4514_v19  ;;  %v4967_v45 = vand.u32 2147483648, %v4514_v19  ;;  %v4965_v48 = vand.u32 2147483647, %v4514_v19  ;;  %vm4961_vm14 = vweird.f32 %v4514_v19 }
 0xac2   : > { %8958 = vrcp.f32 %v14635_v41 }
 0xac3   : > { %v14646_v0 = vpop.f32.mrf.mxu0  ;;  %v4968_v54 = vor.u32 1.1754944e-38, %v4967_v45  ;;  %vm4966_vm3 = vcmp.eq.f32.partialorder %v4965_v48, 8.507059e+37  ;;  %v4860_v48 = vand.u32 2147483647, %v14635_v41 }
 0xac5   : > { %v8567_v51 = vpop.permute.xlu0 %8566 }
 0xac6   : > { %v8568_v17 = vunpack.i.l.bf16 %v8567_v51  ;;  %v8569_v2 = vunpack.i.h.bf16 %v8567_v51  ;;  %v4983_v51 = vor.u32 1.1754944e-38, %v4982_v28  ;;  %v14749_v28 = vld [vmem:[%s16364_s3 + $0xd8] sm:$0xff] }
 0xac7   : > { %v8957_v20 = vpop.eup %8956 }
 0xac8   : > { %6911 = vmatpush.msra.mxu3 %v8568_v17  ;;  %v14650_v13 = vpop.eup %8958  ;;  %v4957_v55 = vmul.f32 %v8957_v20, %v4514_v19  ;;  %v14654_v60 = vpop.xlane.xlu2 %4489  ;;  %vm4962_vm11 = vweird.f32 %v8957_v20 }
 0xac9   : > { %8960 = vrcp.f32 %v14654_v60  ;;  %v4852_v7 = vmul.f32 %v14650_v13, %v14635_v41  ;;  %vm4963_vm15 = vmor %vm4961_vm14, %vm4962_vm11  ;;  %v4847_v57 = vand.u32 2147483648, %v14654_v60  ;;  %vm4841_vm5 = vweird.f32 %v14654_v60 }
 0xaca   : > { %6912 = vmatpush.msra.mxu3 %v8569_v2  ;;  %v4958_v37 = vsub.f32 1.0, %v4957_v55  ;;  %8962 = vrcp.f32 %v14652_v36  ;;  %vm4857_vm12 = vweird.f32 %v14650_v13  ;;  %v4984_v2 = vsel %vm4981_vm10, %v4983_v51, %v4979_v15 }
 0xacb   : > { %v5447_v43 = vpop.f32.mrf.mxu0  ;;  %v4853_v14 = vsub.f32 1.0, %v4852_v7  ;;  %v4848_v32 = vor.u32 1.1754944e-38, %v4847_v57  ;;  %vm4856_vm11 = vweird.f32 %v14635_v41  ;;  %v14721_v7 = vld [vmem:[%s16364_s3 + $0xd0] sm:$0xff]  ;;  %vm4861_vm14 = vcmp.eq.f32.partialorder %v4860_v48, 8.507059e+37  ;;  %v9161_v57 = vld [vmem:[%s16365_s4 + $0x18] sm:$0xff] }
 0xacc   : > { %6913 = vmatpush.msra.mxu3 %v8573_v21  ;;  %v4959_v18 = vmul.f32 %v8957_v20, %v4958_v37  ;;  %v5448_v58 = vadd.f32 %v14661_v44, %v5447_v43  ;;  %vm4858_vm13 = vmor %vm4856_vm11, %vm4857_vm12 }
 0xacd   : > { %v4854_v16 = vmul.f32 %v14650_v13, %v4853_v14 }
 0xace   : > { %6914 = vmatpush.msra.mxu3 %v8574_v35  ;;  %v4960_v10 = vadd.f32 %v8957_v20, %v4959_v18  ;;  %v14671_v31 = vadd.f32 %v9158_v6, %v5448_v58  ;;  %v17386_v18 = vld [vmem:[#allocation113_spill] sm:$0xff]  ;;  %v14726_v58 = vpop.f32.mrf.mxu1 }
 0xacf   : > { %v8961_v59 = vpop.eup %8960  ;;  %v4855_v46 = vadd.f32 %v14650_v13, %v4854_v16  ;;  %v4985_v43 = vmul.f32 %v17386_v18, %v4984_v2  ;;  %17387 = vst [vmem:[#allocation23_spill] sm:$0xff] %v14726_v58  ;;  %v9162_v2 = vld [vmem:[%s16365_s4 + $0x28] sm:$0xff] }
 0xad0   : > { %v4837_v49 = vmul.f32 %v8961_v59, %v14654_v60  ;;  %v4964_v5 = vsel %vm4963_vm15, %v8957_v20, %v4960_v10  ;;  %v14675_v56 = vpop.eup %8962  ;;  %v5818_v52 = vsel %vm1062_vm2, %v14671_v31, -inf  ;;  %vm4842_vm8 = vweird.f32 %v8961_v59 }
 0xad1   : > { %v4969_v3 = vsel %vm4966_vm3, %v4968_v54, %v4964_v5  ;;  %5819 = vmax.xlane.f32.xlu1 %v5818_v52  ;;  %v4867_v63 = vmul.f32 %v14675_v56, %v14652_v36  ;;  %vm4843_vm6 = vmor %vm4841_vm5, %vm4842_vm8  ;;  %v4859_v14 = vsel %vm4858_vm13, %v14650_v13, %v4855_v46  ;;  %vm4872_vm15 = vweird.f32 %v14675_v56 }
 0xad2   : > { %v4838_v24 = vsub.f32 1.0, %v4837_v49  ;;  %v4970_v53 = vmul.f32 %v14342_v61, %v4969_v3  ;;  %v4845_v61 = vand.u32 2147483647, %v14654_v60  ;;  %v4862_v60 = vand.u32 2147483648, %v14635_v41  ;;  %v9160_v41 = vld [vmem:[%s16365_s4 + $0x10] sm:$0xff] }
 0xad3   : > { %v5450_v39 = vpop.f32.mrf.mxu0  ;;  %v4868_v55 = vsub.f32 1.0, %v4867_v63  ;;  %v4877_v5 = vand.u32 2147483648, %v14652_v36  ;;  %vm4871_vm3 = vweird.f32 %v14652_v36  ;;  %v4875_v3 = vand.u32 2147483647, %v14652_v36 }
 0xad4   : > { %v4839_v19 = vmul.f32 %v8961_v59, %v4838_v24  ;;  %8075 = vmatmul.msk.f32.gmra.mxu3 %vm1062_vm2, %v4970_v53  ;;  %v5451_v4 = vadd.f32 %v14692_v38, %v5450_v39  ;;  %vm4846_vm9 = vcmp.eq.f32.partialorder %v4845_v61, 8.507059e+37  ;;  %v4863_v54 = vor.u32 1.1754944e-38, %v4862_v60  ;;  %vm4873_vm4 = vmor %vm4871_vm3, %vm4872_vm15  ;;  %v14772_v61 = vld [vmem:[%s16364_s3 + $0xe8] sm:$0xff] }
 0xad5   : > { %v4869_v10 = vmul.f32 %v14675_v56, %v4868_v55  ;;  %v4878_v33 = vor.u32 1.1754944e-38, %v4877_v5  ;;  %vm4876_vm7 = vcmp.eq.f32.partialorder %v4875_v3, 8.507059e+37 }
 0xad6   : > { %v4840_v17 = vadd.f32 %v8961_v59, %v4839_v19  ;;  %v14711_v20 = vadd.f32 %v9159_v29, %v5451_v4  ;;  %v4864_v47 = vsel %vm4861_vm14, %v4863_v54, %v4859_v14  ;;  %v14755_v53 = vpop.f32.mrf.mxu1  ;;  %v17390_v4 = vld [vmem:[#allocation72_spill] sm:$0xff] }
 0xad7   : > { %v4870_v49 = vadd.f32 %v14675_v56, %v4869_v10  ;;  %v4865_v52 = vmul.f32 %v14316_v23, %v4864_v47  ;;  %17388 = vst [vmem:[#allocation29_spill] sm:$0xff] %v14755_v53 }
 0xad8   : > { %v4844_v21 = vsel %vm4843_vm6, %v8961_v59, %v4840_v17  ;;  %v5821_v37 = vsel %vm1062_vm2, %v14711_v20, -inf }
 0xad9   : > { %v4849_v35 = vsel %vm4846_vm9, %v4848_v32, %v4844_v21  ;;  %5822 = vmax.xlane.f32.xlu0 %v5821_v37  ;;  %v4874_v24 = vsel %vm4873_vm4, %v14675_v56, %v4870_v49  ;;  %v17393_v49 = vld [vmem:[#allocation79_spill] sm:$0xff] }
 0xada   : > { %v4850_v45 = vmul.f32 %v14348_v40, %v4849_v35  ;;  %v4879_v23 = vsel %vm4876_vm7, %v4878_v33, %v4874_v24 }
 0xadb   : > { %v5453_v59 = vpop.f32.mrf.mxu0  ;;  %v4880_v63 = vmul.f32 %v14334_v9, %v4879_v23 }
 0xadc   : > { %8067 = vmatmul.msk.f32.gmra.mxu2 %vm1062_vm2, %v4850_v45  ;;  %8076 = vmatmul.msk.f32.gmra.mxu3 %vm1062_vm2, %v4985_v43  ;;  %v5454_v40 = vadd.f32 %v14721_v7, %v5453_v59  ;;  %v17392_v45 = vld [vmem:[#allocation71_spill] sm:$0xff] }
 0xade   : > { %v14738_v6 = vadd.f32 %v9160_v41, %v5454_v40  ;;  %v14767_v19 = vpop.f32.mrf.mxu1  ;;  %v9163_v40 = vld [vmem:[%s16365_s4 + $0x40] sm:$0xff] }
 0xadf   : > { %17389 = vst [vmem:[#allocation45_spill] sm:$0xff] %v14767_v19 }
 0xae0   : > { %v5824_v13 = vsel %vm1062_vm2, %v14738_v6, -inf }
 0xae1   : > { %5825 = vmax.xlane.f32.xlu2 %v5824_v13 }
 0xae3   : > { %v5456_v30 = vpop.f32.mrf.mxu0 }
 0xae4   : > { %8068 = vmatmul.msk.f32.gmra.mxu2 %vm1062_vm2, %v4865_v52  ;;  %v5457_v16 = vadd.f32 %v14749_v28, %v5456_v30  ;;  %v9164_v52 = vld [vmem:[%s16365_s4 + $0x48] sm:$0xff] }
 0xae5   : > { %v17394_v30 = vld [vmem:[#allocation135_spill] sm:$0xff] }
 0xae6   : > { %v14761_v15 = vadd.f32 %v9161_v57, %v5457_v16  ;;  %v17395_v16 = vld [vmem:[#allocation166_spill] sm:$0xff] }
 0xae8   : > { %v5827_v36 = vsel %vm1062_vm2, %v14761_v15, -inf }
 0xae9   : > { %5828 = vmax.xlane.f32.xlu0 %v5827_v36  ;;  %v9165_v36 = vld [vmem:[%s16365_s4 + $0x20] sm:$0xff] }
 0xaeb   : > { %v5459_v56 = vpop.f32.mrf.mxu0 }
 0xaec   : > { %8069 = vmatmul.msk.f32.gmra.mxu2 %vm1062_vm2, %v4880_v63 }
 0xaf0   : > { %v4520_v39 = vpop.xlane.xlu0 %4519  ;;  %v14777_v9 = vpop.f32.mrf.mxu1 }
 0xaf1   : > { %8964 = vrcp.f32 %v4520_v39  ;;  %17391 = vst [vmem:[#allocation119_spill] sm:$0xff] %v14777_v9  ;;  %v4997_v60 = vand.u32 2147483648, %v4520_v39  ;;  %v4995_v35 = vand.u32 2147483647, %v4520_v39  ;;  %vm4991_vm5 = vweird.f32 %v4520_v39 }
 0xaf3   : > { %v5462_v51 = vpop.f32.mrf.mxu0  ;;  %v4998_v43 = vor.u32 1.1754944e-38, %v4997_v60  ;;  %vm4996_vm12 = vcmp.eq.f32.partialorder %v4995_v35, 8.507059e+37  ;;  %v9167_v60 = vld [vmem:[%s16365_s4 + $0x58] sm:$0xff]  ;;  %v17398_v35 = vld [vmem:[#allocation130_spill] sm:$0xff] }
 0xaf4   : > { %8126 = vmatmul.msk.f32.vlgmr.msra.gmra.mxu2 %vm633_vm1, %v17390_v4  ;;  %v5463_v17 = vadd.f32 %v14772_v61, %v5462_v51  ;;  %v17396_v51 = vld [vmem:[#allocation7_spill] sm:$0xff] }
 0xaf6   : > { %v14782_v55 = vadd.f32 %v9162_v2, %v5463_v17 }
 0xaf7   : > { %v8965_v32 = vpop.eup %8964 }
 0xaf8   : > { %v4987_v29 = vmul.f32 %v8965_v32, %v4520_v39  ;;  %v5833_v46 = vsel %vm1062_vm2, %v14782_v55, -inf  ;;  %vm4992_vm8 = vweird.f32 %v8965_v32 }
 0xaf9   : > { %5834 = vmax.xlane.f32.xlu0 %v5833_v46  ;;  %vm4993_vm10 = vmor %vm4991_vm5, %vm4992_vm8  ;;  %v5552_v48 = vpop.f32.mrf.mxu1  ;;  %v14841_v46 = vld [vmem:[%s16364_s3 + $0xf0] sm:$0xff] }
 0xafa   : > { %v4988_v21 = vsub.f32 1.0, %v4987_v29  ;;  %v5553_v59 = vadd.f32 %v14661_v44, %v5552_v48 }
 0xafb   : > { %v5465_v29 = vpop.f32.mrf.mxu0 }
 0xafc   : > { %v4989_v37 = vmul.f32 %v8965_v32, %v4988_v21  ;;  %8127 = vmatmul.msk.f32.gmra.mxu2 %vm633_vm1, %v17392_v45  ;;  %v14793_v41 = vadd.f32 %v9163_v40, %v5553_v59  ;;  %v5466_v45 = vadd.f32 %v14841_v46, %v5465_v29  ;;  %v9168_v59 = vld [vmem:[%s16365_s4 + $0x30] sm:$0xff] }
 0xafe   : > { %v4990_v18 = vadd.f32 %v8965_v32, %v4989_v37  ;;  %v5842_v47 = vsel %vm1062_vm2, %v14793_v41, -inf }
 0xaff   : > { %5843 = vmax.xlane.f32.xlu1 %v5842_v47  ;;  %v9169_v47 = vld [vmem:[%s16365_s4 + $0x60] sm:$0xff] }
 0xb00   : > { %v4994_v10 = vsel %vm4993_vm10, %v8965_v32, %v4990_v18  ;;  %v17397_v32 = vld [vmem:[#allocation32_spill] sm:$0xff] }
 0xb01   : > { %v4999_v14 = vsel %vm4996_vm12, %v4998_v43, %v4994_v10  ;;  %v5555_v5 = vpop.f32.mrf.mxu1  ;;  %v17399_v43 = vld [vmem:[#allocation76_spill] sm:$0xff] }
 0xb02   : > { %v5000_v54 = vmul.f32 %v14390_v1, %v4999_v14  ;;  %v5556_v13 = vadd.f32 %v14692_v38, %v5555_v5  ;;  %v14804_v1 = vld [vmem:[%s16364_s3 + $0xe0] sm:$0xff]  ;;  %v14859_v14 = vadd.f32 %v9168_v59, %v5466_v45 }
 0xb03   : > { %v5460_v24 = vadd.f32 %v14804_v1, %v5459_v56  ;;  %v9166_v56 = vld [vmem:[%s16365_s4 + $0x50] sm:$0xff]  ;;  %v5468_v40 = vpop.f32.mrf.mxu0  ;;  %v17400_v5 = vld [vmem:[#allocation150_spill] sm:$0xff] }
 0xb04   : > { %8077 = vmatmul.msk.f32.gmra.mxu3 %vm1062_vm2, %v5000_v54  ;;  %8128 = vmatmul.msk.f32.gmra.mxu2 %vm633_vm1, %v17393_v49  ;;  %v14809_v3 = vadd.f32 %v9164_v52, %v5556_v13  ;;  %v14864_v54 = vld [vmem:[%s16364_s3 + $0xf8] sm:$0xff]  ;;  %v5836_v52 = vsel %vm1062_vm2, %v14859_v14, -inf  ;;  %v17405_v45 = vld [vmem:[#allocation162_spill] sm:$0xff] }
 0xb05   : > { %v14822_v63 = vadd.f32 %v9165_v36, %v5460_v24  ;;  %v5469_v13 = vadd.f32 %v14864_v54, %v5468_v40  ;;  %v17401_v24 = vld [vmem:[#allocation24_spill] sm:$0xff]  ;;  %v9171_v36 = vld [vmem:[%s16365_s4 + $0x68] sm:$0xff] }
 0xb06   : > { %v5845_v33 = vsel %vm1062_vm2, %v14809_v3, -inf }
 0xb07   : > { %5846 = vmax.xlane.f32.xlu1 %v5845_v33  ;;  %v5830_v17 = vsel %vm1062_vm2, %v14822_v63, -inf }
 0xb09   : > { %v5558_v57 = vpop.f32.mrf.mxu1 }
 0xb0a   : > { %v5559_v23 = vadd.f32 %v14721_v7, %v5558_v57  ;;  %v9170_v57 = vld [vmem:[%s16365_s4 + $0x38] sm:$0xff] }
 0xb0c   : > { %8142 = vmatmul.msk.f32.vlgmr.msrb.gmra.mxu3 %vm633_vm1, %v17394_v30  ;;  %8129 = vmatmul.msk.f32.gmra.mxu2 %vm633_vm1, %v17395_v16  ;;  %v14827_v39 = vadd.f32 %v9166_v56, %v5559_v23  ;;  %v14884_v23 = vadd.f32 %v9170_v57, %v5469_v13 }
 0xb0e   : > { %v5848_v4 = vsel %vm1062_vm2, %v14827_v39, -inf }
 0xb0f   : > { %5849 = vmax.xlane.f32.xlu2 %v5848_v4  ;;  %5831 = vmax.xlane.f32.xlu1 %v5830_v17  ;;  %v5839_v17 = vsel %vm1062_vm2, %v14884_v23, -inf }
 0xb11   : > { %v5561_v2 = vpop.f32.mrf.mxu1 }
 0xb12   : > { %v5562_v21 = vadd.f32 %v14749_v28, %v5561_v2 }
 0xb14   : > { %8143 = vmatmul.msk.f32.gmra.mxu3 %vm633_vm1, %v17396_v51  ;;  %8130 = vmatmul.msk.f32.gmra.mxu2 %vm633_vm1, %v17397_v32  ;;  %v14846_v37 = vadd.f32 %v9167_v60, %v5562_v21  ;;  %v17402_v51 = vld [vmem:[#allocation163_spill] sm:$0xff]  ;;  %v17403_v32 = vld [vmem:[#allocation85_spill] sm:$0xff]  ;;  %v14900_v21 = vpop.f32.mrf.mxu2  ;;  %v9172_v60 = vld [vmem:[%s16365_s4 + $0x70] sm:$0xff] }
 0xb15   : > { %17404 = vst [vmem:[#allocation136_spill] sm:$0xff] %v14900_v21 }
 0xb16   : > { %v5851_v18 = vsel %vm1062_vm2, %v14846_v37, -inf }
 0xb17   : > { %5852 = vmax.xlane.f32.xlu2 %v5851_v18 }
 0xb19   : > { %v5564_v48 = vpop.f32.mrf.mxu1 }
 0xb1a   : > { %v5565_v10 = vadd.f32 %v14804_v1, %v5564_v48 }
 0xb1c   : > { %8144 = vmatmul.msk.f32.gmra.mxu3 %vm633_vm1, %v17398_v35  ;;  %8131 = vmatmul.msk.f32.gmra.mxu2 %vm633_vm1, %v17399_v43  ;;  %v14869_v49 = vadd.f32 %v9169_v47, %v5565_v10  ;;  %v9173_v10 = vld [vmem:[%s16365_s4 + $0x78] sm:$0xff]  ;;  %v14917_v40 = vpop.f32.mrf.mxu2 }
 0xb1d   : > { %17406 = vst [vmem:[#allocation48_spill] sm:$0xff] %v14917_v40  ;;  %v17407_v47 = vld [vmem:[#allocation61_spill] sm:$0xff] }
 0xb1e   : > { %v5854_v30 = vsel %vm1062_vm2, %v14869_v49, -inf }
 0xb1f   : > { %5837 = vmax.xlane.f32.xlu2 %v5836_v52  ;;  %5855 = vmax.xlane.f32.xlu1 %v5854_v30  ;;  %v17409_v52 = vld [vmem:[#allocation5_spill] sm:$0xff]  ;;  %v14927_v30 = vpop.f32.mrf.mxu3 }
 0xb20   : > { %17410 = vst [vmem:[#allocation42_spill] sm:$0xff] %v14927_v30 }
 0xb21   : > { %v5567_v33 = vpop.f32.mrf.mxu1 }
 0xb22   : > { %v5568_v16 = vadd.f32 %v14772_v61, %v5567_v33 }
 0xb24   : > { %8145 = vmatmul.msk.f32.gmra.mxu3 %vm633_vm1, %v17400_v5  ;;  %8132 = vmatmul.msk.f32.gmra.mxu2 %vm633_vm1, %v17401_v24  ;;  %v14889_v56 = vadd.f32 %v9171_v36, %v5568_v16  ;;  %v14923_v13 = vpop.f32.mrf.mxu2 }
 0xb25   : > { %17408 = vst [vmem:[#allocation28_spill] sm:$0xff] %v14923_v13 }
 0xb26   : > { %v5857_v4 = vsel %vm1062_vm2, %v14889_v56, -inf }
 0xb27   : > { %5858 = vmax.xlane.f32.xlu0 %v5857_v4  ;;  %5840 = vmax.xlane.f32.xlu1 %v5839_v17  ;;  %v14931_v33 = vpop.f32.mrf.mxu3 }
 0xb28   : > { %17412 = vst [vmem:[#allocation128_spill] sm:$0xff] %v14931_v33  ;;  %v9177_v33 = vld [vmem:[%s16365_s4 + $0x88] sm:$0xff] }
 0xb29   : > { %v5570_v29 = vpop.f32.mrf.mxu1 }
 0xb2a   : > { %v5571_v2 = vadd.f32 %v14841_v46, %v5570_v29 }
 0xb2c   : > { %8146 = vmatmul.msk.f32.gmra.mxu3 %vm633_vm1, %v17402_v51  ;;  %8133 = vmatmul.msk.f32.gmra.mxu2 %vm633_vm1, %v17403_v32  ;;  %v14905_v35 = vadd.f32 %v9172_v60, %v5571_v2  ;;  %v14929_v24 = vpop.f32.mrf.mxu2 }
 0xb2d   : > { %17411 = vst [vmem:[#allocation26_spill] sm:$0xff] %v14929_v24 }
 0xb2e   : > { %v5860_v18 = vsel %vm1062_vm2, %v14905_v35, -inf }
 0xb2f   : > { %5861 = vmax.xlane.f32.xlu2 %v5860_v18  ;;  %v14935_v57 = vpop.f32.mrf.mxu3 }
 0xb30   : > { %17414 = vst [vmem:[#allocation84_spill] sm:$0xff] %v14935_v57 }
 0xb31   : > { %v5573_v43 = vpop.f32.mrf.mxu1 }
 0xb32   : > { %v5574_v48 = vadd.f32 %v14864_v54, %v5573_v43 }
 0xb34   : > { %8147 = vmatmul.msk.f32.gmra.mxu3 %vm633_vm1, %v17405_v45  ;;  %v14915_v59 = vadd.f32 %v9173_v10, %v5574_v48  ;;  %v14933_v16 = vpop.f32.mrf.mxu2 }
 0xb35   : > { %17413 = vst [vmem:[#allocation139_spill] sm:$0xff] %v14933_v16 }
 0xb36   : > { %v5863_v5 = vsel %vm1062_vm2, %v14915_v59, -inf }
 0xb37   : > { %5864 = vmax.xlane.f32.xlu1 %v5863_v5  ;;  %v14939_v51 = vpop.f32.mrf.mxu3 }
 0xb38   : > { %17416 = vst [vmem:[#allocation146_spill] sm:$0xff] %v14939_v51 }
 0xb3c   : > { %8148 = vmatmul.msk.f32.gmra.mxu3 %vm633_vm1, %v17407_v47  ;;  %v9174_v47 = vld [vmem:[%s16365_s4 + $0xc0] sm:$0xff] }
 0xb3f   : > { %v14943_v17 = vpop.f32.mrf.mxu3 }
 0xb40   : > { %17418 = vst [vmem:[#allocation64_spill] sm:$0xff] %v14943_v17 }
 0xb44   : > { %8149 = vmatmul.msk.f32.gmra.mxu3 %vm633_vm1, %v17409_v52 }
 0xb4c   : > { %v5823_v16 = vpop.xlane.xlu0 %5822 }
 0xb57   : > { %v14947_v29 = vpop.f32.mrf.mxu3 }
 0xb58   : > { %17420 = vst [vmem:[#allocation122_spill] sm:$0xff] %v14947_v29 }
 0xb5f   : > { %v14937_v36 = vpop.f32.mrf.mxu2  ;;  %v14949_v60 = vpop.f32.mrf.mxu3 }
 0xb60   : > { %17415 = vst [vmem:[#allocation126_spill] sm:$0xff] %v14937_v36 }
 0xb61   : > { %17421 = vst [vmem:[#allocation137_spill] sm:$0xff] %v14949_v60  ;;  %v14962_v60 = vpop.permute.xlu1 %7102 }
 0xb62   : > { %17423 = vst [vmem:[#allocation10_spill] sm:$0xff] %v14962_v60 }
 0xb67   : > { %v14941_v4 = vpop.f32.mrf.mxu2 }
 0xb68   : > { %17417 = vst [vmem:[#allocation17_spill] sm:$0xff] %v14941_v4 }
 0xb6f   : > { %v14945_v32 = vpop.f32.mrf.mxu2 }
 0xb70   : > { %17419 = vst [vmem:[#allocation90_spill] sm:$0xff] %v14945_v32 }
 0xb77   : > { %v5657_v2 = vpop.f32.mrf.mxu2 }
 0xb78   : > { %v5658_v52 = vadd.f32 %v14661_v44, %v5657_v2 }
 0xb7f   : > { %v5660_v45 = vpop.f32.mrf.mxu2 }
 0xb87   : > { %v14951_v18 = vpop.f32.mrf.mxu3  ;;  %v5663_v43 = vpop.f32.mrf.mxu2 }
 0xb88   : > { %17422 = vst [vmem:[#allocation151_spill] sm:$0xff] %v14951_v18  ;;  %v9175_v18 = vld [vmem:[%s16365_s4 + $0x80] sm:$0xff] }
 0xb8f   : > { %v5762_v48 = vpop.f32.mrf.mxu3  ;;  %v5666_v51 = vpop.f32.mrf.mxu2 }
 0xb90   : > { %v5763_v10 = vadd.f32 %v14661_v44, %v5762_v48  ;;  %v14967_v48 = vadd.f32 %v9175_v18, %v5658_v52  ;;  %v9176_v44 = vld [vmem:[%s16365_s4 + $0xc8] sm:$0xff]  ;;  %v5667_v18 = vadd.f32 %v14749_v28, %v5666_v51  ;;  %v5820_v52 = vpop.xlane.xlu1 %5819  ;;  %v9179_v51 = vld [vmem:[%s16365_s4 + $0xd0] sm:$0xff] }
 0xb92   : > { %v14957_v5 = vadd.f32 %v9174_v47, %v5763_v10  ;;  %v5866_v47 = vsel %vm1062_vm2, %v14967_v48, -inf }
 0xb94   : > { %v5890_v29 = vsel %vm1062_vm2, %v14957_v5, -inf }
 0xb95   : > { %5891 = vmax.xlane.f32.xlu0 %v5890_v29  ;;  %v5661_v29 = vadd.f32 %v14692_v38, %v5660_v45  ;;  %v9178_v45 = vld [vmem:[%s16365_s4 + $0x98] sm:$0xff] }
 0xb97   : > { %v5765_v17 = vpop.f32.mrf.mxu3  ;;  %v5669_v30 = vpop.f32.mrf.mxu2 }
 0xb98   : > { %v5766_v57 = vadd.f32 %v14692_v38, %v5765_v17  ;;  %v5844_v32 = vpop.xlane.xlu1 %5843 }
 0xb9a   : > { %v14973_v2 = vadd.f32 %v9176_v44, %v5766_v57  ;;  %v14984_v57 = vadd.f32 %v9177_v33, %v5661_v29  ;;  %v14990_v44 = vadd.f32 %v9178_v45, %v5667_v18  ;;  %v5664_v33 = vadd.f32 %v14721_v7, %v5663_v43 }
 0xb9b   : > { %v5670_v18 = vadd.f32 %v14804_v1, %v5669_v30  ;;  %v9181_v30 = vld [vmem:[%s16365_s4 + $0xa0] sm:$0xff] }
 0xb9c   : > { %v5893_v10 = vsel %vm1062_vm2, %v14973_v2, -inf  ;;  %v5875_v45 = vsel %vm1062_vm2, %v14990_v44, -inf }
 0xb9d   : > { %5894 = vmax.xlane.f32.xlu2 %v5893_v10  ;;  %5867 = vmax.xlane.f32.xlu0 %v5866_v47  ;;  %v5914_v47 = vsub.f32 %v14671_v31, %v5820_v52  ;;  %v9180_v31 = vld [vmem:[%s16365_s4 + $0x90] sm:$0xff]  ;;  %v15015_v52 = vadd.f32 %v9181_v30, %v5670_v18  ;;  %v9183_v30 = vld [vmem:[%s16365_s4 + $0xe0] sm:$0xff] }
 0xb9f   : > { %v5768_v17 = vpop.f32.mrf.mxu3 }
 0xba0   : > { %v5769_v38 = vadd.f32 %v14721_v7, %v5768_v17  ;;  %v5869_v17 = vsel %vm1062_vm2, %v14984_v57, -inf  ;;  %v15009_v7 = vadd.f32 %v9180_v31, %v5664_v33  ;;  %v15029_v31 = vpop.permute.xlu2 %7104 }
 0xba1   : > { %17424 = vst [vmem:[#allocation91_spill] sm:$0xff] %v15029_v31 }
 0xba2   : > { %v14995_v10 = vadd.f32 %v9179_v51, %v5769_v38  ;;  %v5946_v51 = vmul.f32 1.442695, %v5914_v47  ;;  %v5872_v47 = vsel %vm1062_vm2, %v15009_v7, -inf }
 0xba4   : > { %v5896_v29 = vsel %vm1062_vm2, %v14995_v10, -inf  ;;  %8966 = vpow2.f32 %v5946_v51 }
 0xba5   : > { %5897 = vmax.xlane.f32.xlu1 %v5896_v29  ;;  %5870 = vmax.xlane.f32.xlu2 %v5869_v17  ;;  %v9182_v29 = vld [vmem:[%s16365_s4 + $0xd8] sm:$0xff] }
 0xba6   : > { %5876 = vmax.xlane.f32.xlu0 %v5875_v45  ;;  %v5847_v45 = vpop.xlane.xlu1 %5846 }
 0xba7   : > { %v5771_v38 = vpop.f32.mrf.mxu3 }
 0xba8   : > { %v5772_v43 = vadd.f32 %v14749_v28, %v5771_v38  ;;  %v5878_v28 = vsel %vm1062_vm2, %v15015_v52, -inf }
 0xbaa   : > { %v15020_v17 = vadd.f32 %v9182_v29, %v5772_v43  ;;  %v5672_v43 = vpop.f32.mrf.mxu2  ;;  %v15031_v51 = vpop.eup %8966 }
 0xbac   : > { %v5899_v33 = vsel %vm1062_vm2, %v15020_v17, -inf }
 0xbad   : > { %5873 = vmax.xlane.f32.xlu1 %v5872_v47  ;;  %5900 = vmax.xlane.f32.xlu2 %v5899_v33  ;;  %v5923_v47 = vsub.f32 %v14809_v3, %v5847_v45  ;;  %v5922_v33 = vsub.f32 %v14793_v41, %v5844_v32  ;;  %v9184_v3 = vld [vmem:[%s16365_s4 + $0xa8] sm:$0xff]  ;;  %v5826_v32 = vpop.xlane.xlu2 %5825 }
 0xbae   : > { %5879 = vmax.xlane.f32.xlu0 %v5878_v28  ;;  %v5673_v28 = vadd.f32 %v14772_v61, %v5672_v43 }
 0xbaf   : > { %v5774_v18 = vpop.f32.mrf.mxu3  ;;  %v5964_v4 = vmul.f32 1.442695, %v5923_v47  ;;  %v5962_v24 = vmul.f32 1.442695, %v5922_v33 }
 0xbb0   : > { %v5775_v38 = vadd.f32 %v14804_v1, %v5774_v18  ;;  %v6010_v18 = vsel %vm1062_vm2, %v15031_v51, 0.0  ;;  %v15048_v45 = vadd.f32 %v9184_v3, %v5673_v28 }
 0xbb1   : > { %8968 = vpow2.f32 %v5964_v4 }
 0xbb2   : > { %v15036_v29 = vadd.f32 %v9183_v30, %v5775_v38  ;;  %v9185_v38 = vld [vmem:[%s16365_s4 + $0xe8] sm:$0xff]  ;;  %v5915_v30 = vsub.f32 %v14711_v20, %v5823_v16  ;;  %8970 = vpow2.f32 %v5962_v24  ;;  %v5881_v47 = vsel %vm1062_vm2, %v15048_v45, -inf  ;;  %v5675_v3 = vpop.f32.mrf.mxu2  ;;  %v9186_v20 = vld [vmem:[%s16365_s4 + $0xf0] sm:$0xff] }
 0xbb3   : > { %v5916_v16 = vsub.f32 %v14738_v6, %v5826_v32  ;;  %v9187_v6 = vld [vmem:[%s16365_s4 + $0xb0] sm:$0xff] }
 0xbb4   : > { %v5902_v1 = vsel %vm1062_vm2, %v15036_v29, -inf }
 0xbb5   : > { %5903 = vmax.xlane.f32.xlu1 %v5902_v1 }
 0xbb6   : > { %6011 = vadd.xlane.f32.xlu0 %v6010_v18  ;;  %v5850_v18 = vpop.xlane.xlu2 %5849 }
 0xbb7   : > { %v5777_v36 = vpop.f32.mrf.mxu3  ;;  %v15062_v1 = vpop.eup %8968  ;;  %v5924_v4 = vsub.f32 %v14827_v39, %v5850_v18 }
 0xbb8   : > { %v5778_v41 = vadd.f32 %v14772_v61, %v5777_v36  ;;  %v5948_v61 = vmul.f32 1.442695, %v5915_v30  ;;  %v6037_v30 = vsel %vm1062_vm2, %v15062_v1, 0.0  ;;  %v5829_v18 = vpop.xlane.xlu0 %5828 }
 0xbba   : > { %v15054_v43 = vadd.f32 %v9185_v38, %v5778_v41  ;;  %v15064_v41 = vpop.eup %8970  ;;  %8972 = vpow2.f32 %v5948_v61  ;;  %v5676_v38 = vadd.f32 %v14841_v46, %v5675_v3  ;;  %v9188_v3 = vld [vmem:[%s16365_s4 + $0xf8] sm:$0xff] }
 0xbbc   : > { %v5905_v33 = vsel %vm1062_vm2, %v15054_v43, -inf  ;;  %v15083_v39 = vadd.f32 %v9187_v6, %v5676_v38 }
 0xbbd   : > { %5882 = vmax.xlane.f32.xlu1 %v5881_v47 }
 0xbbe   : > { %5906 = vmax.xlane.f32.xlu0 %v5905_v33  ;;  %v6034_v33 = vsel %vm1062_vm2, %v15064_v41, 0.0  ;;  %v5884_v38 = vsel %vm1062_vm2, %v15083_v39, -inf }
 0xbbf   : > { %v5780_v36 = vpop.f32.mrf.mxu3 }
 0xbc0   : > { %v5781_v28 = vadd.f32 %v14841_v46, %v5780_v36  ;;  %v5950_v36 = vmul.f32 1.442695, %v5916_v16  ;;  %v15086_v32 = vpop.eup %8972  ;;  %v5917_v16 = vsub.f32 %v14761_v15, %v5829_v18 }
 0xbc2   : > { %v15069_v24 = vadd.f32 %v9186_v20, %v5781_v28  ;;  %v5966_v28 = vmul.f32 1.442695, %v5924_v4  ;;  %8974 = vpow2.f32 %v5950_v36 }
 0xbc4   : > { %17425 = vst [vmem:[#allocation129_spill] sm:$0xff] %v15069_v24  ;;  %v5908_v47 = vsel %vm1062_vm2, %v15069_v24, -inf  ;;  %8976 = vpow2.f32 %v5966_v28 }
 0xbc5   : > { %6038 = vadd.xlane.f32.xlu1 %v6037_v30  ;;  %5909 = vmax.xlane.f32.xlu2 %v5908_v47  ;;  %v6013_v30 = vsel %vm1062_vm2, %v15086_v32, 0.0  ;;  %v5952_v47 = vmul.f32 1.442695, %v5917_v16 }
 0xbc6   : > { %6035 = vadd.xlane.f32.xlu0 %v6034_v33 }
 0xbc7   : > { %v5783_v61 = vpop.f32.mrf.mxu3  ;;  %8978 = vpow2.f32 %v5952_v47  ;;  %v5832_v47 = vpop.xlane.xlu1 %5831 }
 0xbc8   : > { %v5784_v46 = vadd.f32 %v14864_v54, %v5783_v61  ;;  %v15100_v33 = vpop.eup %8974  ;;  %v5678_v61 = vpop.f32.mrf.mxu2 }
 0xbc9   : > { %v5679_v15 = vadd.f32 %v14864_v54, %v5678_v61  ;;  %v6016_v28 = vsel %vm1062_vm2, %v15100_v33, 0.0  ;;  %v17430_v61 = vld [vmem:[#allocation82_spill] sm:$0xff] }
 0xbca   : > { %v15091_v20 = vadd.f32 %v9188_v3, %v5784_v46  ;;  %v15102_v36 = vpop.eup %8976  ;;  %v9189_v46 = vld [vmem:[%s16365_s4 + $0xb8] sm:$0xff] }
 0xbcb   : > { %v6040_v6 = vsel %vm1062_vm2, %v15102_v36, 0.0  ;;  %v15112_v18 = vadd.f32 %v9189_v46, %v5679_v15  ;;  %v15130_v15 = vpop.xlane.xlu0 %5834  ;;  %v17431_v46 = vld [vmem:[#allocation43_spill] sm:$0xff] }
 0xbcc   : > { %17426 = vst [vmem:[#allocation154_spill] sm:$0xff] %v15091_v20  ;;  %v5911_v4 = vsel %vm1062_vm2, %v15091_v20, -inf }
 0xbcd   : > { %5912 = vmax.xlane.f32.xlu1 %v5911_v4  ;;  %5885 = vmax.xlane.f32.xlu2 %v5884_v38  ;;  %v15114_v3 = vpop.eup %8978  ;;  %v5887_v16 = vsel %vm1062_vm2, %v15112_v18, -inf  ;;  %v17427_v4 = vld [vmem:[#allocation53_spill] sm:$0xff]  ;;  %v17428_v38 = vld [vmem:[#allocation27_spill] sm:$0xff] }
 0xbce   : > { %6014 = vadd.xlane.f32.xlu0 %v6013_v30  ;;  %v6019_v54 = vsel %vm1062_vm2, %v15114_v3, 0.0  ;;  %v17429_v30 = vld [vmem:[#allocation123_spill] sm:$0xff] }
 0xbd5   : > { %6017 = vadd.xlane.f32.xlu2 %v6016_v28  ;;  %v5856_v28 = vpop.xlane.xlu1 %5855 }
 0xbd6   : > { %6041 = vadd.xlane.f32.xlu0 %v6040_v6  ;;  %v5853_v6 = vpop.xlane.xlu2 %5852 }
 0xbdd   : > { %5888 = vmax.xlane.f32.xlu2 %v5887_v16  ;;  %v5841_v16 = vpop.xlane.xlu1 %5840 }
 0xbde   : > { %6020 = vadd.xlane.f32.xlu0 %v6019_v54 }
 0xbe6   : > { %6980 = vrot.lane.b32.xlu1 %v17427_v4, %s9209_s29  ;;  %v15142_v4 = vpop.xlane.xlu2 %5837 }
 0xbee   : > { %7108 = vrot.lane.b32.xlu1 %v14614_v25, %s9210_s8  ;;  %v15138_v25 = vpop.xlane.xlu0 %5858 }
 0xbf2   : > { %6978 = vrot.lane.b32.xlu0 %v17428_v38, %s9209_s29  ;;  %v5865_v38 = vpop.xlane.xlu1 %5864 }
 0xbf5   : > { %8576 = vrot.lane.b32.xlu2 %v17429_v30, %s9208_s26  ;;  %s9211_s26 = smov 24  }
 0xbf6   : > { %6982 = vrot.lane.b32.xlu1 %v17430_v61, %s9209_s29  ;;  %v5862_v61 = vpop.xlane.xlu2 %5861 }
 0xbf7   : > { %v5928_v9 = vsub.f32 %v14905_v35, %v5862_v61 }
 0xbf9   : > { %v5974_v19 = vmul.f32 1.442695, %v5928_v9 }
 0xbfa   : > { %7106 = vrot.lane.b32.xlu0 %v14609_v42, %s9210_s8  ;;  %v5925_v42 = vsub.f32 %v14846_v37, %v5853_v6  ;;  %v5929_v37 = vsub.f32 %v14915_v59, %v5865_v38 }
 0xbfc   : > { %v5968_v13 = vmul.f32 1.442695, %v5925_v42 }
 0xbfd   : > { %7112 = vrot.lane.b32.xlu2 %v14624_v22, %s9210_s8  ;;  %v5921_v22 = vsub.f32 %v14884_v23, %v5841_v16 }
 0xbfe   : > { %7110 = vrot.lane.b32.xlu1 %v14618_v11, %s9210_s8  ;;  %8980 = vpow2.f32 %v5968_v13 }
 0xbff   : > { %v5960_v21 = vmul.f32 1.442695, %v5921_v22  ;;  %v5976_v22 = vmul.f32 1.442695, %v5929_v37 }
 0xc01   : > { %8982 = vpow2.f32 %v5960_v21 }
 0xc02   : > { %6984 = vrot.lane.b32.xlu0 %v17431_v46, %s9209_s29  ;;  %v5918_v46 = vsub.f32 %v14822_v63, %v5832_v47  ;;  %8984 = vpow2.f32 %v5974_v19  ;;  %v5926_v63 = vsub.f32 %v14869_v49, %v5856_v28 }
 0xc04   : > { %v5954_v6 = vmul.f32 1.442695, %v5918_v46  ;;  %v15158_v42 = vpop.eup %8980  ;;  %v5970_v19 = vmul.f32 1.442695, %v5926_v63  ;;  %v5919_v46 = vsub.f32 %v14782_v55, %v15130_v15 }
 0xc05   : > { %v6043_v9 = vsel %vm1062_vm2, %v15158_v42, 0.0 }
 0xc06   : > { %8986 = vpow2.f32 %v5954_v6  ;;  %v5956_v63 = vmul.f32 1.442695, %v5919_v46 }
 0xc07   : > { %v15160_v35 = vpop.eup %8982  ;;  %8988 = vpow2.f32 %v5976_v22 }
 0xc08   : > { %v5892_v54 = vpop.xlane.xlu0 %5891  ;;  %v15168_v47 = vpop.eup %8984 }
 0xc09   : > { %v5938_v23 = vsub.f32 %v14957_v5, %v5892_v54  ;;  %v6031_v5 = vsel %vm1062_vm2, %v15160_v35, 0.0 }
 0xc0b   : > { %v5994_v13 = vmul.f32 1.442695, %v5938_v23 }
 0xc0c   : > { %v15170_v49 = vpop.eup %8986 }
 0xc0d   : > { %8990 = vpow2.f32 %v5994_v13  ;;  %v6022_v37 = vsel %vm1062_vm2, %v15170_v49, 0.0 }
 0xc10   : > { %v5868_v30 = vpop.xlane.xlu0 %5867  ;;  %v15152_v12 = vpop.xlane.xlu2 %5894 }
 0xc11   : > { %v5930_v28 = vsub.f32 %v14967_v48, %v5868_v30 }
 0xc13   : > { %v5978_v6 = vmul.f32 1.442695, %v5930_v28 }
 0xc18   : > { %v15146_v40 = vpop.xlane.xlu1 %5897  ;;  %v5871_v21 = vpop.xlane.xlu2 %5870 }
 0xc19   : > { %v15148_v11 = vpop.xlane.xlu0 %5876  ;;  %v5931_v13 = vsub.f32 %v14984_v57, %v5871_v21 }
 0xc1b   : > { %v5980_v21 = vmul.f32 1.442695, %v5931_v13 }
 0xc20   : > { %v5874_v53 = vpop.xlane.xlu1 %5873  ;;  %v15187_v55 = vpop.xlane.xlu2 %5900 }
 0xc21   : > { %v15156_v16 = vpop.xlane.xlu0 %5879  ;;  %v5932_v59 = vsub.f32 %v15009_v7, %v5874_v53  ;;  %v6052_v53 = vsel %vm1062_vm2, %v15168_v47, 0.0  ;;  %v15175_v7 = vpop.eup %8988 }
 0xc22   : > { %v15182_v48 = vpop.eup %8990  ;;  %v6055_v30 = vsel %vm1062_vm2, %v15175_v7, 0.0 }
 0xc23   : > { %v5982_v61 = vmul.f32 1.442695, %v5932_v59  ;;  %v6082_v28 = vsel %vm1062_vm2, %v15182_v48, 0.0 }
 0xc26   : > { %6044 = vadd.xlane.f32.xlu2 %v6043_v9 }
 0xc28   : > { %6032 = vadd.xlane.f32.xlu1 %v6031_v5  ;;  %v5904_v54 = vpop.xlane.xlu1 %5903 }
 0xc29   : > { %v6012_v38 = vpop.xlane.xlu0 %6011  ;;  %v5942_v23 = vsub.f32 %v15036_v29, %v5904_v54 }
 0xc2a   : > { %8992 = vrcp.f32 %v6012_v38  ;;  %v6115_v46 = vand.u32 2147483647, %v6012_v38  ;;  %vm6111_vm9 = vweird.f32 %v6012_v38 }
 0xc2b   : > { %8994 = vpow2.f32 %v5970_v19  ;;  %v6002_v29 = vmul.f32 1.442695, %v5942_v23  ;;  %v5927_v19 = vsub.f32 %v14889_v56, %v15138_v25 }
 0xc2c   : > { %6053 = vadd.xlane.f32.xlu0 %v6052_v53  ;;  %8996 = vpow2.f32 %v5982_v61  ;;  %v6117_v61 = vand.u32 2147483648, %v6012_v38  ;;  %vm6116_vm13 = vcmp.eq.f32.partialorder %v6115_v46, 8.507059e+37 }
 0xc2d   : > { %8998 = vpow2.f32 %v5978_v6  ;;  %v5934_v6 = vsub.f32 %v15015_v52, %v15156_v16  ;;  %v5972_v56 = vmul.f32 1.442695, %v5927_v19  ;;  %v5940_v52 = vsub.f32 %v14995_v10, %v15146_v40 }
 0xc2e   : > { %6023 = vadd.xlane.f32.xlu2 %v6022_v37  ;;  %9000 = vpow2.f32 %v5956_v63  ;;  %v6118_v63 = vor.u32 1.1754944e-38, %v6117_v61  ;;  %v5939_v10 = vsub.f32 %v14973_v2, %v15152_v12 }
 0xc2f   : > { %9002 = vpow2.f32 %v6002_v29  ;;  %v5986_v19 = vmul.f32 1.442695, %v5934_v6 }
 0xc30   : > { %v8993_v22 = vpop.eup %8992  ;;  %6056 = vadd.xlane.f32.xlu1 %v6055_v30  ;;  %v15189_v15 = vpop.xlane.xlu1 %5882  ;;  %9004 = vpow2.f32 %v5980_v21 }
 0xc31   : > { %v6107_v9 = vmul.f32 %v8993_v22, %v6012_v38  ;;  %v15191_v59 = vpop.xlane.xlu0 %5906  ;;  %v15193_v5 = vpop.eup %8994  ;;  %vm6112_vm6 = vweird.f32 %v8993_v22 }
 0xc32   : > { %v15199_v57 = vpop.eup %8996  ;;  %v6046_v37 = vsel %vm1062_vm2, %v15193_v5, 0.0  ;;  %vm6113_vm11 = vmor %vm6111_vm9, %vm6112_vm6 }
 0xc33   : > { %v6108_v54 = vsub.f32 1.0, %v6107_v9  ;;  %v6064_v23 = vsel %vm1062_vm2, %v15199_v57, 0.0  ;;  %v15207_v30 = vpop.eup %8998 }
 0xc34   : > { %6083 = vadd.xlane.f32.xlu0 %v6082_v28  ;;  %v15216_v29 = vpop.eup %9000  ;;  %v5920_v28 = vsub.f32 %v14859_v14, %v15142_v4  ;;  %v6058_v61 = vsel %vm1062_vm2, %v15207_v30, 0.0  ;;  %v5933_v14 = vsub.f32 %v14990_v44, %v15148_v11 }
 0xc35   : > { %v6109_v53 = vmul.f32 %v8993_v22, %v6108_v54  ;;  %v15223_v40 = vpop.eup %9002 }
 0xc36   : > { %6047 = vadd.xlane.f32.xlu2 %v6046_v37  ;;  %v15230_v46 = vpop.eup %9004  ;;  %v5958_v4 = vmul.f32 1.442695, %v5920_v28  ;;  %v6094_v37 = vsel %vm1062_vm2, %v15223_v40, 0.0 }
 0xc37   : > { %v6110_v25 = vadd.f32 %v8993_v22, %v6109_v53  ;;  %v6025_v53 = vsel %vm1062_vm2, %v15216_v29, 0.0 }
 0xc38   : > { %6065 = vadd.xlane.f32.xlu1 %v6064_v23  ;;  %v15209_v13 = vpop.xlane.xlu1 %6038  ;;  %v15211_v9 = vpop.xlane.xlu2 %5909  ;;  %v5984_v23 = vmul.f32 1.442695, %v5933_v14 }
 0xc39   : > { %17432 = vst [vmem:[#allocation141_spill] sm:$0xff] %v15211_v9  ;;  %v6114_v16 = vsel %vm6113_vm11, %v8993_v22, %v6110_v25  ;;  %9006 = vrcp.f32 %v15209_v13  ;;  %v6036_v38 = vpop.xlane.xlu0 %6035  ;;  %v5998_v22 = vmul.f32 1.442695, %v5940_v52  ;;  %v5996_v25 = vmul.f32 1.442695, %v5939_v10 }
 0xc3a   : > { %v6119_v54 = vsel %vm6116_vm13, %v6118_v63, %v6114_v16  ;;  %9008 = vrcp.f32 %v6036_v38  ;;  %v6061_v16 = vsel %vm1062_vm2, %v15230_v46, 0.0  ;;  %v6237_v28 = vand.u32 2147483648, %v6036_v38 }
 0xc3b   : > { %9010 = vpow2.f32 %v5972_v56  ;;  %v6120_v21 = vmul.f32 %v15031_v51, %v6119_v54  ;;  %v6235_v54 = vand.u32 2147483647, %v6036_v38  ;;  %vm6231_vm15 = vweird.f32 %v6036_v38 }
 0xc3c   : > { %6059 = vadd.xlane.f32.xlu0 %v6058_v61  ;;  %9012 = vpow2.f32 %v5986_v19  ;;  %vm6246_vm8 = vweird.f32 %v15209_v13 }
 0xc3d   : > { %8150 = vmatmul.msk.f32.vlgmr.msrb.gmra.mxu0 %vm1062_vm2, %v6120_v21  ;;  %9014 = vpow2.f32 %v5998_v22  ;;  %vm6236_vm7 = vcmp.eq.f32.partialorder %v6235_v54, 8.507059e+37  ;;  %v6250_v54 = vand.u32 2147483647, %v15209_v13 }
 0xc3e   : > { %6026 = vadd.xlane.f32.xlu2 %v6025_v53  ;;  %v5941_v53 = vsub.f32 %v15020_v17, %v15187_v55 }
 0xc3f   : > { %v15234_v51 = vpop.eup %9006  ;;  %vm6251_vm12 = vcmp.eq.f32.partialorder %v6250_v54, 8.507059e+37 }
 0xc40   : > { %v9009_v12 = vpop.eup %9008  ;;  %v6242_v2 = vmul.f32 %v15234_v51, %v15209_v13  ;;  %6095 = vadd.xlane.f32.xlu1 %v6094_v37  ;;  %v15240_v6 = vpop.xlane.xlu2 %5885  ;;  %vm6247_vm3 = vweird.f32 %v15234_v51 }
 0xc41   : > { %v15242_v56 = vpop.eup %9010  ;;  %v6227_v44 = vmul.f32 %v9009_v12, %v6036_v38  ;;  %v15244_v11 = vpop.xlane.xlu0 %6014  ;;  %vm6232_vm14 = vweird.f32 %v9009_v12  ;;  %vm15288_vm5 = vmor %vm6246_vm8, %vm6247_vm3 }
 0xc42   : > { %v6243_v63 = vsub.f32 1.0, %v6242_v2  ;;  %9016 = vrcp.f32 %v15244_v11  ;;  %v15249_v19 = vpop.eup %9012  ;;  %v6049_v21 = vsel %vm1062_vm2, %v15242_v56, 0.0  ;;  %v5935_v2 = vsub.f32 %v15048_v45, %v15189_v15  ;;  %vm6233_vm4 = vmor %vm6231_vm15, %vm6232_vm14 }
 0xc43   : > { %9018 = vpow2.f32 %v5958_v4  ;;  %v6228_v52 = vsub.f32 1.0, %v6227_v44  ;;  %v15254_v22 = vpop.eup %9014  ;;  %v6070_v4 = vsel %vm1062_vm2, %v15249_v19, 0.0  ;;  %v6252_v45 = vand.u32 2147483648, %v15209_v13 }
 0xc44   : > { %6062 = vadd.xlane.f32.xlu0 %v6061_v16  ;;  %9020 = vpow2.f32 %v5996_v25  ;;  %v6244_v61 = vmul.f32 %v15234_v51, %v6243_v63  ;;  %v6238_v25 = vor.u32 1.1754944e-38, %v6237_v28  ;;  %vm6126_vm6 = vweird.f32 %v15244_v11 }
 0xc45   : > { %v6229_v10 = vmul.f32 %v9009_v12, %v6228_v52  ;;  %9022 = vpow2.f32 %v5984_v23  ;;  %v6088_v52 = vsel %vm1062_vm2, %v15254_v22, 0.0 }
 0xc46   : > { %6050 = vadd.xlane.f32.xlu2 %v6049_v21  ;;  %v6245_v17 = vadd.f32 %v15234_v51, %v6244_v61  ;;  %v6000_v61 = vmul.f32 1.442695, %v5941_v53  ;;  %v5943_v53 = vsub.f32 %v15054_v43, %v15191_v59 }
 0xc47   : > { %v6230_v14 = vadd.f32 %v9009_v12, %v6229_v10 }
 0xc48   : > { %v15260_v37 = vpop.eup %9016  ;;  %v15265_v44 = vpop.xlane.xlu2 %6017  ;;  %6071 = vadd.xlane.f32.xlu1 %v6070_v4  ;;  %v5988_v4 = vmul.f32 1.442695, %v5935_v2 }
 0xc49   : > { %v15267_v23 = vpop.eup %9018  ;;  %v6234_v55 = vsel %vm6233_vm4, %v9009_v12, %v6230_v14  ;;  %v6122_v38 = vmul.f32 %v15260_v37, %v15244_v11  ;;  %9024 = vrcp.f32 %v15265_v44  ;;  %v15273_v63 = vpop.xlane.xlu0 %6041  ;;  %vm6127_vm10 = vweird.f32 %v15260_v37 }
 0xc4a   : > { %v6239_v15 = vsel %vm6236_vm7, %v6238_v25, %v6234_v55  ;;  %v15279_v16 = vpop.eup %9020  ;;  %9026 = vrcp.f32 %v15273_v63  ;;  %v6028_v14 = vsel %vm1062_vm2, %v15267_v23, 0.0  ;;  %v6253_v25 = vor.u32 1.1754944e-38, %v6252_v45  ;;  %vm15308_vm9 = vmor %vm6126_vm6, %vm6127_vm10 }
 0xc4b   : > { %v6240_v12 = vmul.f32 %v15064_v41, %v6239_v15  ;;  %v6123_v28 = vsub.f32 1.0, %v6122_v38  ;;  %v15284_v21 = vpop.eup %9022  ;;  %v6249_v41 = vsel %vm15288_vm5, %v15234_v51, %v6245_v17  ;;  %v6132_v55 = vand.u32 2147483648, %v15244_v11 }
 0xc4c   : > { %6089 = vadd.xlane.f32.xlu0 %v6088_v52  ;;  %v6130_v15 = vand.u32 2147483647, %v15244_v11  ;;  %9028 = vpow2.f32 %v6000_v61  ;;  %v15306_v52 = vpop.xlane.xlu1 %5912  ;;  %v6254_v17 = vsel %vm6251_vm12, %v6253_v25, %v6249_v41  ;;  %vm6141_vm14 = vweird.f32 %v15265_v44 }
 0xc4d   : > { %v6124_v13 = vmul.f32 %v15260_v37, %v6123_v28  ;;  %8158 = vmatmul.msk.f32.vlgmr.msrb.gmra.mxu1 %vm1062_vm2, %v6240_v12  ;;  %17435 = vst [vmem:[#allocation147_spill] sm:$0xff] %v15306_v52  ;;  %9030 = vpow2.f32 %v5988_v4  ;;  %v6067_v12 = vsel %vm1062_vm2, %v15284_v21, 0.0  ;;  %v6085_v28 = vsel %vm1062_vm2, %v15279_v16, 0.0 }
 0xc4e   : > { %6029 = vadd.xlane.f32.xlu2 %v6028_v14  ;;  %v6133_v61 = vor.u32 1.1754944e-38, %v6132_v55  ;;  %vm6131_vm11 = vcmp.eq.f32.partialorder %v6130_v15, 8.507059e+37  ;;  %v6147_v4 = vand.u32 2147483648, %v15265_v44  ;;  %v6255_v41 = vmul.f32 %v15062_v1, %v6254_v17 }
 0xc4f   : > { %v9025_v38 = vpop.eup %9024  ;;  %v6125_v2 = vadd.f32 %v15260_v37, %v6124_v13  ;;  %v6004_v13 = vmul.f32 1.442695, %v5943_v53  ;;  %v6145_v55 = vand.u32 2147483647, %v15265_v44  ;;  %v6265_v1 = vand.u32 2147483647, %v15273_v63 }
 0xc50   : > { %v6137_v43 = vmul.f32 %v9025_v38, %v15265_v44  ;;  %v15313_v59 = vpop.xlane.xlu2 %5888  ;;  %v9027_v45 = vpop.eup %9026  ;;  %vm6142_vm13 = vweird.f32 %v9025_v38  ;;  %v6148_v44 = vor.u32 1.1754944e-38, %v6147_v4  ;;  %vm6261_vm4 = vweird.f32 %v15273_v63 }
 0xc51   : > { %v15315_v54 = vpop.xlane.xlu0 %6020  ;;  %v6129_v11 = vsel %vm15308_vm9, %v15260_v37, %v6125_v2  ;;  %v6257_v14 = vmul.f32 %v9027_v45, %v15273_v63  ;;  %v6267_v2 = vand.u32 2147483648, %v15273_v63  ;;  %vm6262_vm15 = vweird.f32 %v9027_v45  ;;  %vm15339_vm3 = vmor %vm6141_vm14, %vm6142_vm13 }
 0xc52   : > { %v6138_v10 = vsub.f32 1.0, %v6137_v43  ;;  %9032 = vrcp.f32 %v15315_v54  ;;  %v6134_v37 = vsel %vm6131_vm11, %v6133_v61, %v6129_v11  ;;  %v15333_v53 = vpop.eup %9028  ;;  %vm6146_vm7 = vcmp.eq.f32.partialorder %v6145_v55, 8.507059e+37  ;;  %vm6263_vm8 = vmor %vm6261_vm4, %vm6262_vm15 }
 0xc53   : > { %v6258_v58 = vsub.f32 1.0, %v6257_v14  ;;  %v6135_v51 = vmul.f32 %v15086_v32, %v6134_v37  ;;  %v15336_v17 = vpop.eup %9030  ;;  %9034 = vpow2.f32 %v6004_v13  ;;  %vm6266_vm5 = vcmp.eq.f32.partialorder %v6265_v1, 8.507059e+37 }
 0xc54   : > { %v6139_v25 = vmul.f32 %v9025_v38, %v6138_v10  ;;  %6068 = vadd.xlane.f32.xlu0 %v6067_v12  ;;  %v6073_v63 = vsel %vm1062_vm2, %v15336_v17, 0.0  ;;  %vm6156_vm12 = vweird.f32 %v15315_v54  ;;  %vm7358_vm6 = vcmask 130048   ;;  %v17440_v12 = vld [vmem:[#allocation78_spill] sm:$0xff] }
 0xc55   : > { %8159 = vmatmul.msk.f32.gmra.mxu1 %vm1062_vm2, %v6255_v41  ;;  %v6259_v43 = vmul.f32 %v9027_v45, %v6258_v58  ;;  %8151 = vmatmul.msk.f32.gmra.mxu0 %vm1062_vm2, %v6135_v51 }
 0xc56   : > { %v6140_v15 = vadd.f32 %v9025_v38, %v6139_v25  ;;  %6086 = vadd.xlane.f32.xlu2 %v6085_v28  ;;  %v6268_v28 = vor.u32 1.1754944e-38, %v6267_v2 }
 0xc57   : > { %v6260_v11 = vadd.f32 %v9027_v45, %v6259_v43 }
 0xc58   : > { %v9033_v32 = vpop.eup %9032  ;;  %v6981_v61 = vpop.permute.xlu1 %6980  ;;  %v6144_v10 = vsel %vm15339_vm3, %v9025_v38, %v6140_v15  ;;  %v6162_v38 = vand.u32 2147483648, %v15315_v54  ;;  %v6160_v15 = vand.u32 2147483647, %v15315_v54 }
 0xc59   : > { %v8577_v58 = vpop.permute.xlu2 %8576  ;;  %v6152_v14 = vmul.f32 %v9033_v32, %v15315_v54  ;;  %v6149_v25 = vsel %vm6146_vm7, %v6148_v44, %v6144_v10  ;;  %v6264_v37 = vsel %vm6263_vm8, %v9027_v45, %v6260_v11  ;;  %vm6157_vm10 = vweird.f32 %v9033_v32  ;;  %v15358_v1 = vpop.eup %9034  ;;  %v17442_v10 = vld [vmem:[#allocation86_spill] sm:$0xff] }
 0xc5a   : > { %v8578_v41 = vunpack.i.l.bf16 %v8577_v58  ;;  %v6150_v51 = vmul.f32 %v15100_v33, %v6149_v25  ;;  %v6269_v43 = vsel %vm6266_vm5, %v6268_v28, %v6264_v37  ;;  %v8579_v13 = vunpack.i.h.bf16 %v8577_v58  ;;  %vm6158_vm9 = vmor %vm6156_vm12, %vm6157_vm10  ;;  %v17443_v37 = vld [vmem:[#allocation57_spill] sm:$0xff] }
 0xc5b   : > { %v6153_v4 = vsub.f32 1.0, %v6152_v14  ;;  %v6270_v55 = vmul.f32 %v15102_v36, %v6269_v43  ;;  %v6091_v45 = vsel %vm1062_vm2, %v15333_v53, 0.0  ;;  %v6163_v36 = vor.u32 1.1754944e-38, %v6162_v38  ;;  %v17445_v43 = vld [vmem:[#allocation134_spill] sm:$0xff] }
 0xc5c   : > { %6074 = vadd.xlane.f32.xlu0 %v6073_v63  ;;  %6915 = vmatpush.msra.mxu3 %v8578_v41  ;;  %v7329_v44 = vsel %vm633_vm1, %v17440_v12, %v6981_v61  ;;  %vm6161_vm11 = vcmp.eq.f32.partialorder %v6160_v15, 8.507059e+37  ;;  %v6097_v54 = vsel %vm1062_vm2, %v15358_v1, 0.0  ;;  %v17447_v15 = vld [vmem:[#allocation74_spill] sm:$0xff] }
 0xc5d   : > { %v6154_v2 = vmul.f32 %v9033_v32, %v6153_v4  ;;  %8160 = vmatmul.msk.f32.gmra.mxu1 %vm1062_vm2, %v6270_v55  ;;  %8152 = vmatmul.msk.f32.gmra.mxu0 %vm1062_vm2, %v6150_v51 }
 0xc5e   : > { %6916 = vmatpush.msra.mxu3 %v8579_v13  ;;  %6092 = vadd.xlane.f32.xlu2 %v6091_v45 }
 0xc5f   : > { %v6155_v33 = vadd.f32 %v9033_v32, %v6154_v2 }
 0xc60   : > { %v7109_v11 = vpop.permute.xlu1 %7108 }
 0xc61   : > { %v15365_v58 = vsel %vm7358_vm6, %v7329_v44, %v7109_v11  ;;  %6986 = vrot.lane.b32.xlu1 %v17442_v10, %s9209_s29  ;;  %v6159_v28 = vsel %vm6158_vm9, %v9033_v32, %v6155_v33 }
 0xc62   : > { %17441 = vst [vmem:[#allocation157_spill] sm:$0xff] %v15365_v58  ;;  %v6164_v14 = vsel %vm6161_vm11, %v6163_v36, %v6159_v28  ;;  %v7113_v36 = vpop.permute.xlu2 %7112 }
 0xc63   : > { %v6165_v41 = vmul.f32 %v15114_v3, %v6164_v14  ;;  %v5937_v3 = vsub.f32 %v15112_v18, %v15313_v59 }
 0xc64   : > { %6098 = vadd.xlane.f32.xlu0 %v6097_v54  ;;  %v6979_v25 = vpop.permute.xlu0 %6978 }
 0xc65   : > { %8153 = vmatmul.msk.f32.gmra.mxu0 %vm1062_vm2, %v6165_v41  ;;  %v7328_v4 = vsel %vm633_vm1, %v17443_v37, %v6979_v25  ;;  %v5992_v55 = vmul.f32 1.442695, %v5937_v3 }
 0xc67   : > { %9036 = vpow2.f32 %v5992_v55 }
 0xc68   : > { %v6983_v61 = vpop.permute.xlu1 %6982 }
 0xc69   : > { %v7330_v32 = vsel %vm633_vm1, %v17445_v43, %v6983_v61 }
 0xc6c   : > { %v7107_v63 = vpop.permute.xlu0 %7106 }
 0xc6d   : > { %v15376_v51 = vsel %vm7358_vm6, %v7328_v4, %v7107_v63  ;;  %v15389_v33 = vpop.eup %9036 }
 0xc6e   : > { %17444 = vst [vmem:[#allocation6_spill] sm:$0xff] %v15376_v51  ;;  %v6079_v44 = vsel %vm1062_vm2, %v15389_v33, 0.0 }
 0xc6f   : > { %17448 = vst [vmem:[#allocation47_spill] sm:$0xff] %v15389_v33 }
 0xc70   : > { %v7111_v38 = vpop.permute.xlu1 %7110 }
 0xc71   : > { %v15381_v13 = vsel %vm7358_vm6, %v7330_v32, %v7111_v38 }
 0xc72   : > { %17446 = vst [vmem:[#allocation99_spill] sm:$0xff] %v15381_v13 }
 0xc74   : > { %v6985_v2 = vpop.permute.xlu0 %6984 }
 0xc75   : > { %v7331_v45 = vsel %vm633_vm1, %v17447_v15, %v6985_v2 }
 0xc76   : > { %7114 = vrot.lane.b32.xlu2 %v14637_v26, %s9210_s8  ;;  %v15392_v12 = vsel %vm7358_vm6, %v7331_v45, %v7113_v36  ;;  %v5936_v26 = vsub.f32 %v15083_v39, %v15240_v6 }
 0xc77   : > { %17449 = vst [vmem:[#allocation55_spill] sm:$0xff] %v15392_v12 }
 0xc78   : > { %v5990_v18 = vmul.f32 1.442695, %v5936_v26 }
 0xc7a   : > { %9038 = vpow2.f32 %v5990_v18 }
 0xc80   : > { %v15400_v10 = vpop.eup %9038 }
 0xc81   : > { %17450 = vst [vmem:[#allocation148_spill] sm:$0xff] %v15400_v10  ;;  %v6076_v14 = vsel %vm1062_vm2, %v15400_v10, 0.0 }
 0xc8b   : > { %6080 = vadd.xlane.f32.xlu1 %v6079_v44 }
 0xc99   : > { %v6045_v59 = vpop.xlane.xlu2 %6044 }
 0xc9a   : > { %9040 = vrcp.f32 %v6045_v59  ;;  %v6282_v38 = vand.u32 2147483648, %v6045_v59  ;;  %v6280_v3 = vand.u32 2147483647, %v6045_v59  ;;  %vm6276_vm14 = vweird.f32 %v6045_v59 }
 0xc9b   : > { %v15398_v11 = vpop.xlane.xlu1 %6032 }
 0xc9c   : > { %v6222_v36 = vand.u32 2147483648, %v15398_v11  ;;  %vm6281_vm3 = vcmp.eq.f32.partialorder %v6280_v3, 8.507059e+37 }
 0xc9f   : > { %v15402_v28 = vpop.xlane.xlu0 %6053  ;;  %6077 = vadd.xlane.f32.xlu2 %v6076_v14  ;;  %v6283_v14 = vor.u32 1.1754944e-38, %v6282_v38  ;;  %v15440_v38 = vor.u32 1.1754944e-38, %v6222_v36 }
 0xca0   : > { %v9041_v54 = vpop.eup %9040 }
 0xca1   : > { %v6272_v41 = vmul.f32 %v9041_v54, %v6045_v59  ;;  %v15406_v25 = vpop.xlane.xlu2 %6023  ;;  %vm6277_vm13 = vweird.f32 %v9041_v54 }
 0xca2   : > { %9042 = vrcp.f32 %v15406_v25  ;;  %vm15421_vm15 = vmor %vm6276_vm14, %vm6277_vm13  ;;  %vm6171_vm10 = vweird.f32 %v15406_v25 }
 0xca3   : > { %v15409_v39 = vpop.xlane.xlu1 %6056  ;;  %v6273_v6 = vsub.f32 1.0, %v6272_v41 }
 0xca4   : > { %v6342_v58 = vand.u32 2147483648, %v15409_v39 }
 0xca5   : > { %v6274_v4 = vmul.f32 %v9041_v54, %v6273_v6 }
 0xca6   : > { %v15542_v31 = vor.u32 1.1754944e-38, %v6342_v58 }
 0xca7   : > { %v6084_v61 = vpop.xlane.xlu0 %6083  ;;  %v6275_v32 = vadd.f32 %v9041_v54, %v6274_v4 }
 0xca8   : > { %v15411_v37 = vpop.eup %9042  ;;  %9044 = vrcp.f32 %v6084_v61  ;;  %v6477_v13 = vand.u32 2147483648, %v6084_v61  ;;  %vm6471_vm7 = vweird.f32 %v6084_v61 }
 0xca9   : > { %v15413_v63 = vpop.xlane.xlu2 %6047  ;;  %9046 = vrcp.f32 %v15398_v11  ;;  %v6167_v43 = vmul.f32 %v15411_v37, %v15406_v25  ;;  %v6279_v41 = vsel %vm15421_vm15, %v9041_v54, %v6275_v32  ;;  %v6475_v54 = vand.u32 2147483647, %v6084_v61 }
 0xcaa   : > { %9048 = vrcp.f32 %v15413_v63  ;;  %v6284_v50 = vsel %vm6281_vm3, %v6283_v14, %v6279_v41  ;;  %vm6172_vm8 = vweird.f32 %v15411_v37 }
 0xcab   : > { %v15419_v55 = vpop.xlane.xlu1 %6065  ;;  %v6168_v15 = vsub.f32 1.0, %v6167_v43  ;;  %v6175_v43 = vand.u32 2147483647, %v15406_v25  ;;  %vm6476_vm12 = vcmp.eq.f32.partialorder %v6475_v54, 8.507059e+37  ;;  %vm15468_vm9 = vmor %vm6171_vm10, %vm6172_vm8 }
 0xcad   : > { %v6169_v12 = vmul.f32 %v15411_v37, %v6168_v15  ;;  %v6177_v15 = vand.u32 2147483648, %v15406_v25  ;;  %vm15472_vm11 = vcmp.eq.f32.partialorder %v6175_v43, 8.507059e+37 }
 0xcae   : > { %v9045_v2 = vpop.eup %9044 }
 0xcaf   : > { %v6467_v44 = vmul.f32 %v9045_v2, %v6084_v61  ;;  %v15426_v26 = vpop.xlane.xlu0 %6059  ;;  %v15428_v18 = vpop.eup %9046  ;;  %vm6472_vm4 = vweird.f32 %v9045_v2  ;;  %v6170_v41 = vadd.f32 %v15411_v37, %v6169_v12 }
 0xcb0   : > { %9050 = vrcp.f32 %v15426_v26  ;;  %v15433_v6 = vpop.eup %9048  ;;  %v6212_v32 = vmul.f32 %v15428_v18, %v15398_v11  ;;  %vm6473_vm5 = vmor %vm6471_vm7, %vm6472_vm4  ;;  %vm6351_vm14 = vweird.f32 %v15426_v26  ;;  %vm6291_vm7 = vweird.f32 %v15413_v63 }
 0xcb1   : > { %9052 = vrcp.f32 %v15402_v28  ;;  %v6468_v59 = vsub.f32 1.0, %v6467_v44  ;;  %v15436_v4 = vpop.xlane.xlu2 %6026  ;;  %v6287_v3 = vmul.f32 %v15433_v6, %v15413_v63  ;;  %v6285_v44 = vmul.f32 %v15158_v42, %v6284_v50 }
 0xcb2   : > { %9054 = vrcp.f32 %v15436_v4  ;;  %v6213_v8 = vsub.f32 1.0, %v6212_v32  ;;  %v6174_v43 = vsel %vm15468_vm9, %v15411_v37, %v6170_v41  ;;  %v6327_v41 = vand.u32 2147483648, %v15402_v28 }
 0xcb3   : > { %v6469_v45 = vmul.f32 %v9045_v2, %v6468_v59  ;;  %9056 = vrcp.f32 %v15409_v39  ;;  %v6478_v59 = vor.u32 1.1754944e-38, %v6477_v13  ;;  %8161 = vmatmul.msk.f32.gmra.mxu1 %vm1062_vm2, %v6285_v44  ;;  %v6288_v9 = vsub.f32 1.0, %v6287_v3 }
 0xcb4   : > { %9058 = vrcp.f32 %v15419_v55  ;;  %v6214_v62 = vmul.f32 %v15428_v18, %v6213_v8  ;;  %vm6292_vm4 = vweird.f32 %v15433_v6 }
 0xcb5   : > { %v6470_v14 = vadd.f32 %v9045_v2, %v6469_v45  ;;  %v15461_v45 = vpop.xlane.xlu1 %6095  ;;  %v6289_v13 = vmul.f32 %v15433_v6, %v6288_v9  ;;  %vm6293_vm8 = vmor %vm6291_vm7, %vm6292_vm4 }
 0xcb6   : > { %v15450_v36 = vpop.eup %9050 }
 0xcb7   : > { %v15456_v50 = vpop.eup %9052  ;;  %v6474_v42 = vsel %vm6473_vm5, %v9045_v2, %v6470_v14  ;;  %v6347_v61 = vmul.f32 %v15450_v36, %v15426_v26  ;;  %v15463_v12 = vpop.xlane.xlu0 %6062  ;;  %v6178_v2 = vor.u32 1.1754944e-38, %v6177_v15  ;;  %vm6352_vm13 = vweird.f32 %v15450_v36 }
 0xcb8   : > { %v6479_v24 = vsel %vm6476_vm12, %v6478_v59, %v6474_v42  ;;  %v15479_v32 = vpop.eup %9054  ;;  %v6317_v3 = vmul.f32 %v15456_v50, %v15402_v28  ;;  %v6357_v59 = vand.u32 2147483648, %v15426_v26  ;;  %9060 = vrcp.f32 %v15463_v12  ;;  %vm6353_vm15 = vmor %vm6351_vm14, %vm6352_vm13 }
 0xcb9   : > { %v6480_v54 = vmul.f32 %v15182_v48, %v6479_v24  ;;  %v6348_v44 = vsub.f32 1.0, %v6347_v61  ;;  %v15477_v14 = vpop.xlane.xlu2 %6050  ;;  %v6355_v24 = vand.u32 2147483647, %v15426_v26  ;;  %v6182_v48 = vmul.f32 %v15479_v32, %v15436_v4  ;;  %v15495_v61 = vpop.eup %9056 }
 0xcba   : > { %v6651_v42 = vpop.f32.mrf.mxu0  ;;  %v6358_v37 = vor.u32 1.1754944e-38, %v6357_v59  ;;  %9062 = vrcp.f32 %v15477_v14  ;;  %v6318_v25 = vsub.f32 1.0, %v6317_v3  ;;  %v6332_v8 = vmul.f32 %v15495_v61, %v15409_v39 }
 0xcbb   : > { %v6349_v15 = vmul.f32 %v15450_v36, %v6348_v44  ;;  %8174 = vmatmul.msk.f32.vlgmr.msra.gmra.mxu3 %vm1062_vm2, %v6480_v54  ;;  %7230 = vrot.lane.b32.xlu2 %v6651_v42, %s9211_s26  ;;  %v6179_v44 = vsel %vm15472_vm11, %v6178_v2, %v6174_v43  ;;  %v15506_v42 = vpop.eup %9058  ;;  %v6183_v51 = vsub.f32 1.0, %v6182_v48  ;;  %vm6356_vm3 = vcmp.eq.f32.partialorder %v6355_v24, 8.507059e+37 }
 0xcbc   : > { %v6180_v9 = vmul.f32 %v15170_v49, %v6179_v44  ;;  %v6297_v59 = vand.u32 2147483648, %v15413_v63  ;;  %v6295_v3 = vand.u32 2147483647, %v15413_v63  ;;  %v6377_v48 = vmul.f32 %v15506_v42, %v15419_v55 }
 0xcbd   : > { %v6350_v54 = vadd.f32 %v15450_v36, %v6349_v15  ;;  %v6290_v15 = vadd.f32 %v15433_v6, %v6289_v13  ;;  %v15529_v44 = vpop.xlane.xlu1 %6071  ;;  %v6190_v63 = vand.u32 2147483647, %v15436_v4  ;;  %vm6187_vm10 = vweird.f32 %v15479_v32 }
 0xcbe   : > { %v15517_v26 = vpop.eup %9060  ;;  %8154 = vmatmul.msk.f32.gmra.mxu0 %vm1062_vm2, %v6180_v9  ;;  %v6184_v9 = vmul.f32 %v15479_v32, %v6183_v51  ;;  %9064 = vrcp.f32 %v15529_v44  ;;  %vm6296_vm5 = vcmp.eq.f32.partialorder %v6295_v3, 8.507059e+37  ;;  %vm6186_vm12 = vweird.f32 %v15436_v4 }
 0xcbf   : > { %v6354_v2 = vsel %vm6353_vm15, %v15450_v36, %v6350_v54  ;;  %v15515_v43 = vpop.xlane.xlu0 %6089  ;;  %v6362_v24 = vmul.f32 %v15517_v26, %v15463_v12  ;;  %v15533_v54 = vor.u32 1.1754944e-38, %v6327_v41  ;;  %v6294_v51 = vsel %vm6293_vm8, %v15433_v6, %v6290_v15  ;;  %vm15569_vm9 = vmor %vm6186_vm12, %vm6187_vm10 }
 0xcc0   : > { %v6359_v49 = vsel %vm6356_vm3, %v6358_v37, %v6354_v2  ;;  %v15539_v2 = vadd.f32 %v15428_v18, %v6214_v62  ;;  %v15547_v41 = vpop.eup %9062  ;;  %v6298_v37 = vor.u32 1.1754944e-38, %v6297_v59  ;;  %v6378_v62 = vsub.f32 1.0, %v6377_v48 }
 0xcc1   : > { %v6360_v36 = vmul.f32 %v15207_v30, %v6359_v49  ;;  %v15531_v13 = vpop.xlane.xlu2 %6029  ;;  %v6319_v30 = vmul.f32 %v15456_v50, %v6318_v25  ;;  %v6333_v49 = vsub.f32 1.0, %v6332_v8  ;;  %v6363_v34 = vsub.f32 1.0, %v6362_v24 }
 0xcc2   : > { %v6302_v58 = vmul.f32 %v15547_v41, %v15477_v14  ;;  %v6185_v25 = vadd.f32 %v15479_v32, %v6184_v9  ;;  %v6192_v8 = vand.u32 2147483648, %v15436_v4  ;;  %v6385_v6 = vand.u32 2147483647, %v15419_v55 }
 0xcc3   : > { %8166 = vmatmul.msk.f32.vlgmr.msrb.gmra.mxu2 %vm1062_vm2, %v6360_v36  ;;  %v6299_v36 = vsel %vm6296_vm5, %v6298_v37, %v6294_v51  ;;  %v15558_v59 = vadd.f32 %v15456_v50, %v6319_v30  ;;  %v6334_v24 = vmul.f32 %v15495_v61, %v6333_v49  ;;  %v6364_v48 = vmul.f32 %v15517_v26, %v6363_v34 }
 0xcc4   : > { %v6303_v15 = vsub.f32 1.0, %v6302_v58  ;;  %v6300_v9 = vmul.f32 %v15193_v5, %v6299_v36  ;;  %9066 = vrcp.f32 %v15531_v13  ;;  %v6379_v37 = vmul.f32 %v15506_v42, %v6378_v62  ;;  %v15581_v34 = vpop.eup %9064 }
 0xcc5   : > { %vm15573_vm11 = vcmp.eq.f32.partialorder %v6190_v63, 8.507059e+37  ;;  %9068 = vrcp.f32 %v15461_v45  ;;  %v6193_v5 = vor.u32 1.1754944e-38, %v6192_v8  ;;  %v6370_v58 = vand.u32 2147483647, %v15463_v12 }
 0xcc6   : > { %v6304_v4 = vmul.f32 %v15547_v41, %v6303_v15  ;;  %8162 = vmatmul.msk.f32.gmra.mxu1 %vm1062_vm2, %v6300_v9  ;;  %v6189_v62 = vsel %vm15569_vm9, %v15479_v32, %v6185_v25  ;;  %vm6367_vm13 = vweird.f32 %v15517_v26  ;;  %v6372_v63 = vand.u32 2147483648, %v15463_v12 }
 0xcc7   : > { %v15562_v3 = vpop.xlane.xlu0 %6068  ;;  %v6312_v36 = vand.u32 2147483648, %v15477_v14  ;;  %v6365_v8 = vadd.f32 %v15517_v26, %v6364_v48  ;;  %vm6307_vm14 = vweird.f32 %v15547_v41  ;;  %v6194_v9 = vsel %vm15573_vm11, %v6193_v5, %v6189_v62 }
 0xcc8   : > { %9070 = vrcp.f32 %v15562_v3  ;;  %v6305_v15 = vadd.f32 %v15547_v41, %v6304_v4  ;;  %vm6381_vm15 = vweird.f32 %v15419_v55  ;;  %vm6366_vm3 = vweird.f32 %v15463_v12 }
 0xcc9   : > { %v15579_v51 = vpop.xlane.xlu2 %6086  ;;  %9072 = vrcp.f32 %v15515_v43  ;;  %v6310_v32 = vand.u32 2147483647, %v15477_v14  ;;  %v6407_v25 = vmul.f32 %v15581_v34, %v15529_v44  ;;  %v6195_v30 = vmul.f32 %v15216_v29, %v6194_v9  ;;  %vm15613_vm7 = vmor %vm6366_vm3, %vm6367_vm13 }
 0xcca   : > { %v15604_v33 = vpop.eup %9066  ;;  %vm6322_vm4 = vweird.f32 %v15456_v50  ;;  %v15608_v48 = vadd.f32 %v15495_v61, %v6334_v24  ;;  %v6387_v49 = vand.u32 2147483648, %v15419_v55  ;;  %vm6306_vm8 = vweird.f32 %v15477_v14 }
 0xccb   : > { %9074 = vrcp.f32 %v15579_v51  ;;  %v15619_v29 = vpop.eup %9068  ;;  %v15622_v4 = vadd.f32 %v15506_v42, %v6379_v37  ;;  %vm6382_vm5 = vweird.f32 %v15506_v42  ;;  %vm15625_vm10 = vcmp.eq.f32.partialorder %v6385_v6, 8.507059e+37  ;;  %vm15635_vm9 = vmor %vm6306_vm8, %vm6307_vm14  ;;  %8155 = vmatmul.msk.f32.gmra.mxu0 %vm1062_vm2, %v6195_v30 }
 0xccc   : > { %vm15629_vm12 = vcmp.eq.f32.partialorder %v6370_v58, 8.507059e+37  ;;  %v6197_v37 = vmul.f32 %v15604_v33, %v15531_v13  ;;  %vm6321_vm11 = vweird.f32 %v15402_v28  ;;  %v6373_v58 = vor.u32 1.1754944e-38, %v6372_v63 }
 0xccd   : > { %v6313_v9 = vor.u32 1.1754944e-38, %v6312_v36  ;;  %v6369_v10 = vsel %vm15613_vm7, %v15517_v26, %v6365_v8  ;;  %v6309_v60 = vsel %vm15635_vm9, %v15547_v41, %v6305_v15  ;;  %vm6217_vm13 = vweird.f32 %v15428_v18 }
 0xcce   : > { %v15644_v6 = vpop.eup %9070  ;;  %vm6311_vm14 = vcmp.eq.f32.partialorder %v6310_v32, 8.507059e+37  ;;  %v6408_v30 = vsub.f32 1.0, %v6407_v25  ;;  %v6198_v20 = vsub.f32 1.0, %v6197_v37  ;;  %v6205_v63 = vand.u32 2147483647, %v15531_v13 }
 0xccf   : > { %v15642_v62 = vpop.xlane.xlu0 %6074  ;;  %v15653_v27 = vpop.eup %9072  ;;  %v6392_v52 = vmul.f32 %v15644_v6, %v15562_v3  ;;  %v6374_v36 = vsel %vm15629_vm12, %v6373_v58, %v6369_v10  ;;  %v6314_v26 = vsel %vm6311_vm14, %v6313_v9, %v6309_v60  ;;  %vm6216_vm3 = vweird.f32 %v15398_v11  ;;  %vm15696_vm14 = vmor %vm6381_vm15, %vm6382_vm5 }
 0xcd0   : > { %9076 = vrcp.f32 %v15642_v62  ;;  %v17469_v41 = vand.u32 2147483647, %v15402_v28  ;;  %v6199_v32 = vmul.f32 %v15604_v33, %v6198_v20  ;;  %v6375_v10 = vmul.f32 %v15230_v46, %v6374_v36 }
 0xcd1   : > { %v15662_v8 = vpop.xlane.xlu2 %6092  ;;  %v6393_v25 = vsub.f32 1.0, %v6392_v52  ;;  %v6315_v60 = vmul.f32 %v15242_v56, %v6314_v26  ;;  %v15675_v12 = vpop.eup %9074  ;;  %v6497_v5 = vmul.f32 %v15653_v27, %v15515_v43  ;;  %vm6202_vm12 = vweird.f32 %v15604_v33 }
 0xcd2   : > { %vm15667_vm7 = vcmp.eq.f32.partialorder %v17469_v41, 8.507059e+37  ;;  %v6207_v14 = vand.u32 2147483648, %v15531_v13  ;;  %9078 = vrcp.f32 %v15662_v8  ;;  %v6654_v37 = vpop.f32.mrf.mxu0  ;;  %v6388_v20 = vor.u32 1.1754944e-38, %v6387_v49  ;;  %8167 = vmatmul.msk.f32.gmra.mxu2 %vm1062_vm2, %v6375_v10 }
 0xcd3   : > { %v15685_v46 = vmul.f32 %v15619_v29, %v15461_v45  ;;  %v6200_v56 = vadd.f32 %v15604_v33, %v6199_v32  ;;  %v6482_v52 = vmul.f32 %v15675_v12, %v15579_v51  ;;  %8163 = vmatmul.msk.f32.gmra.mxu1 %vm1062_vm2, %v6315_v60  ;;  %vm6201_vm0 = vweird.f32 %v15531_v13  ;;  %7232 = vrot.lane.b32.xlu2 %v6654_v37, %s9211_s26  ;;  %v6987_v37 = vpop.permute.xlu1 %6986 }
 0xcd4   : > { %v6394_v49 = vmul.f32 %v15644_v6, %v6393_v25  ;;  %vm6396_vm9 = vweird.f32 %v15562_v3  ;;  %v6400_v9 = vand.u32 2147483647, %v15562_v3  ;;  %v6409_v36 = vmul.f32 %v15581_v34, %v6408_v30  ;;  %vm15708_vm8 = vmor %vm6201_vm0, %vm6202_vm12 }
 0xcd5   : > { %vm15712_vm15 = vcmp.eq.f32.partialorder %v6205_v63, 8.507059e+37  ;;  %v6483_v13 = vsub.f32 1.0, %v6482_v52  ;;  %v6384_v41 = vsel %vm15696_vm14, %v15506_v42, %v15622_v4  ;;  %v17478_v30 = vand.u32 2147483647, %v15398_v11  ;;  %vm15738_vm12 = vmor %vm6321_vm11, %vm6322_vm4 }
 0xcd6   : > { %v15720_v32 = vpop.eup %9076  ;;  %vm6412_vm0 = vweird.f32 %v15581_v34  ;;  %v6498_v63 = vsub.f32 1.0, %v6497_v5  ;;  %v6208_v10 = vor.u32 1.1754944e-38, %v6207_v14  ;;  %v6389_v60 = vsel %vm15625_vm10, %v6388_v20, %v6384_v41 }
 0xcd7   : > { %vm15724_vm5 = vcmp.eq.f32.partialorder %v17478_v30, 8.507059e+37  ;;  %v6204_v42 = vsel %vm15708_vm8, %v15604_v33, %v6200_v56  ;;  %v17483_v52 = vand.u32 2147483647, %v15409_v39  ;;  %v6402_v24 = vand.u32 2147483648, %v15562_v3  ;;  %vm15773_vm8 = vmor %vm6216_vm3, %vm6217_vm13 }
 0xcd8   : > { %v6484_v14 = vmul.f32 %v15675_v12, %v6483_v13  ;;  %v6490_v33 = vand.u32 2147483647, %v15579_v51  ;;  %v6492_v20 = vand.u32 2147483648, %v15579_v51  ;;  %v15752_v56 = vpop.eup %9078  ;;  %vm6411_vm4 = vweird.f32 %v15529_v44 }
 0xcd9   : > { %vm15744_vm14 = vcmp.eq.f32.partialorder %v17483_v52, 8.507059e+37  ;;  %v6395_v28 = vadd.f32 %v15644_v6, %v6394_v49  ;;  %vm6397_vm10 = vweird.f32 %v15644_v6  ;;  %v6209_v58 = vsel %vm15712_vm15, %v6208_v10, %v6204_v42  ;;  %v7115_v13 = vpop.permute.xlu2 %7114  ;;  %v17486_v52 = vld [vmem:[#allocation92_spill] sm:$0xff] }
 0xcda   : > { %v6324_v55 = vsel %vm15738_vm12, %v15456_v50, %v15558_v59  ;;  %vm6487_vm11 = vweird.f32 %v15675_v12  ;;  %v6422_v41 = vmul.f32 %v15720_v32, %v15642_v62  ;;  %v6390_v30 = vmul.f32 %v15199_v57, %v6389_v60  ;;  %v6657_v60 = vpop.f32.mrf.mxu0  ;;  %vm15789_vm13 = vmor %vm6396_vm9, %vm6397_vm10 }
 0xcdb   : > { %v7332_v49 = vsel %vm633_vm1, %v17486_v52, %v6987_v37  ;;  %v6485_v50 = vadd.f32 %v15675_v12, %v6484_v14  ;;  %v6512_v59 = vmul.f32 %v15752_v56, %v15662_v8  ;;  %v6210_v10 = vmul.f32 %v15267_v23, %v6209_v58  ;;  %7234 = vrot.lane.b32.xlu1 %v6657_v60, %s9211_s26 }
 0xcdc   : > { %v6329_v57 = vsel %vm15667_vm7, %v15533_v54, %v6324_v55  ;;  %v6499_v37 = vmul.f32 %v15653_v27, %v6498_v63  ;;  %v6403_v42 = vor.u32 1.1754944e-38, %v6402_v24  ;;  %8168 = vmatmul.msk.f32.gmra.mxu2 %vm1062_vm2, %v6390_v30  ;;  %v15796_v4 = vsel %vm7358_vm6, %v7332_v49, %v7115_v13  ;;  %v15833_v24 = vpop.xlane.xlu0 %6098 }
 0xcdd   : > { %v6330_v23 = vmul.f32 %v15168_v47, %v6329_v57  ;;  %vm17491_vm3 = vweird.f32 %v15495_v61  ;;  %vm17492_vm7 = vweird.f32 %v15409_v39  ;;  %vm6401_vm9 = vcmp.eq.f32.partialorder %v6400_v9, 8.507059e+37  ;;  %8156 = vmatmul.msk.f32.gmra.mxu0 %vm1062_vm2, %v6210_v10 }
 0xcde   : > { %vm15803_vm15 = vmor %vm17492_vm7, %vm17491_vm3  ;;  %vm6486_vm12 = vweird.f32 %v15579_v51  ;;  %v6399_v47 = vsel %vm15789_vm13, %v15644_v6, %v6395_v28  ;;  %v6219_v3 = vsel %vm15773_vm8, %v15428_v18, %v15539_v2  ;;  %v6410_v39 = vadd.f32 %v15581_v34, %v6409_v36 }
 0xcdf   : > { %vm6502_vm10 = vweird.f32 %v15653_v27  ;;  %vm15820_vm3 = vmor %vm6486_vm12, %vm6487_vm11  ;;  %v6493_v51 = vor.u32 1.1754944e-38, %v6492_v20  ;;  %8164 = vmatmul.msk.f32.gmra.mxu1 %vm1062_vm2, %v6330_v23  ;;  %v6404_v9 = vsel %vm6401_vm9, %v6403_v42, %v6399_v47  ;;  %v6423_v6 = vsub.f32 1.0, %v6422_v41 }
 0xce0   : > { %v6513_v63 = vsub.f32 1.0, %v6512_v59  ;;  %v6339_v18 = vsel %vm15803_vm15, %v15495_v61, %v15608_v48  ;;  %v6489_v2 = vsel %vm15820_vm3, %v15675_v12, %v6485_v50  ;;  %v6500_v36 = vadd.f32 %v15653_v27, %v6499_v37  ;;  %vm15848_vm8 = vmor %vm6411_vm4, %vm6412_vm0 }
 0xce1   : > { %vm6491_vm11 = vcmp.eq.f32.partialorder %v6490_v33, 8.507059e+37  ;;  %v6405_v14 = vmul.f32 %v15284_v21, %v6404_v9  ;;  %v6224_v20 = vsel %vm15724_vm5, %v15440_v38, %v6219_v3  ;;  %v6417_v28 = vand.u32 2147483648, %v15529_v44 }
 0xce2   : > { %v6507_v58 = vand.u32 2147483648, %v15515_v43  ;;  %v6344_v61 = vsel %vm15744_vm14, %v15542_v31, %v6339_v18  ;;  %v6494_v48 = vsel %vm6491_vm11, %v6493_v51, %v6489_v2  ;;  %v6415_v21 = vand.u32 2147483647, %v15529_v44  ;;  %v6660_v55 = vpop.f32.mrf.mxu0  ;;  %v17506_v31 = vld [vmem:[#allocation149_spill] sm:$0xff] }
 0xce3   : > { %vm6501_vm5 = vweird.f32 %v15515_v43  ;;  %v6505_v38 = vand.u32 2147483647, %v15515_v43  ;;  %v6495_v25 = vmul.f32 %v15279_v16, %v6494_v48  ;;  %v6424_v5 = vmul.f32 %v15720_v32, %v6423_v6  ;;  %7236 = vrot.lane.b32.xlu1 %v6660_v55, %s9211_s26  ;;  %v17508_v55 = vld [vmem:[#allocation10_spill] sm:$0xff] }
 0xce4   : > { %vm15858_vm14 = vmor %vm6501_vm5, %vm6502_vm10  ;;  %v6514_v33 = vmul.f32 %v15752_v56, %v6513_v63  ;;  %9080 = vrcp.f32 %v15833_v24  ;;  %v6225_v44 = vmul.f32 %v15160_v35, %v6224_v20  ;;  %8169 = vmatmul.msk.f32.gmra.mxu2 %vm1062_vm2, %v6405_v14  ;;  %v6345_v43 = vmul.f32 %v15175_v7, %v6344_v61  ;;  %v7426_v14 = vld [vmem:[%s16366_s5 + $0x10] sm:$0xff]  ;;  %v7424_v20 = vld [vmem:[%s16366_s5] sm:$0xff] }
 0xce5   : > { %8175 = vmatmul.msk.f32.gmra.mxu3 %vm1062_vm2, %v6495_v25  ;;  %v6414_v16 = vsel %vm15848_vm8, %v15581_v34, %v6410_v39  ;;  %v6504_v13 = vsel %vm15858_vm14, %v15653_v27, %v6500_v36  ;;  %v6418_v41 = vor.u32 1.1754944e-38, %v6417_v28  ;;  %v6508_v30 = vor.u32 1.1754944e-38, %v6507_v58  ;;  %v17504_v58 = vld [vmem:[#allocation147_spill] sm:$0xff]  ;;  %v17505_v61 = vld [vmem:[#allocation154_spill] sm:$0xff] }
 0xce6   : > { %8157 = vmatmul.msk.f32.gmra.mxu0 %vm1062_vm2, %v6225_v44  ;;  %vm6416_vm0 = vcmp.eq.f32.partialorder %v6415_v21, 8.507059e+37  ;;  %vm6506_vm4 = vcmp.eq.f32.partialorder %v6505_v38, 8.507059e+37  ;;  %v6528_v35 = vsub.f32 1.0, %v15685_v46  ;;  %vm6427_vm13 = vweird.f32 %v15720_v32 }
 0xce7   : > { %8165 = vmatmul.msk.f32.gmra.mxu1 %vm1062_vm2, %v6345_v43  ;;  %v6419_v7 = vsel %vm6416_vm0, %v6418_v41, %v6414_v16  ;;  %v6509_v34 = vsel %vm6506_vm4, %v6508_v30, %v6504_v13  ;;  %v6425_v52 = vadd.f32 %v15720_v32, %v6424_v5  ;;  %v6515_v27 = vadd.f32 %v15752_v56, %v6514_v33  ;;  %v17507_v5 = vld [vmem:[#allocation3_spill] sm:$0xff] }
 0xce8   : > { %vm6517_vm7 = vweird.f32 %v15752_v56  ;;  %vm6426_vm15 = vweird.f32 %v15642_v62  ;;  %v6430_v26 = vand.u32 2147483647, %v15642_v62  ;;  %v6432_v50 = vand.u32 2147483648, %v15642_v62 }
 0xce9   : > { %v6522_v59 = vand.u32 2147483648, %v15662_v8  ;;  %vm15887_vm9 = vmor %vm6426_vm15, %vm6427_vm13  ;;  %vm6516_vm12 = vweird.f32 %v15662_v8  ;;  %v6520_v10 = vand.u32 2147483647, %v15662_v8  ;;  %v6420_v57 = vmul.f32 %v15249_v19, %v6419_v7  ;;  %v17503_v19 = vld [vmem:[#allocation87_spill] sm:$0xff] }
 0xcea   : > { %v9081_v49 = vpop.eup %9080  ;;  %v6510_v60 = vmul.f32 %v15254_v22, %v6509_v34  ;;  %v6529_v37 = vmul.f32 %v15619_v29, %v6528_v35  ;;  %vm6518_vm10 = vmor %vm6516_vm12, %vm6517_vm7  ;;  %v6429_v62 = vsel %vm15887_vm9, %v15720_v32, %v6425_v52  ;;  %v6433_v8 = vor.u32 1.1754944e-38, %v6432_v50 }
 0xceb   : > { %v6542_v11 = vmul.f32 %v9081_v49, %v15833_v24  ;;  %v6519_v42 = vsel %vm6518_vm10, %v15752_v56, %v6515_v27  ;;  %v6523_v23 = vor.u32 1.1754944e-38, %v6522_v59  ;;  %6988 = vrot.lane.b32.xlu1 %v17503_v19, %s9209_s29  ;;  %vm6431_vm3 = vcmp.eq.f32.partialorder %v6430_v26, 8.507059e+37 }
 0xcec   : > { %8170 = vmatmul.msk.f32.gmra.mxu2 %vm1062_vm2, %v6420_v57  ;;  %vm6521_vm11 = vcmp.eq.f32.partialorder %v6520_v10, 8.507059e+37  ;;  %v6434_v22 = vsel %vm6431_vm3, %v6433_v8, %v6429_v62  ;;  %v6530_v47 = vadd.f32 %v15619_v29, %v6529_v37  ;;  %vm6532_vm8 = vweird.f32 %v15619_v29  ;;  %v17510_v37 = vld [vmem:[#allocation148_spill] sm:$0xff] }
 0xced   : > { %8176 = vmatmul.msk.f32.gmra.mxu3 %vm1062_vm2, %v6510_v60  ;;  %v6524_v54 = vsel %vm6521_vm11, %v6523_v23, %v6519_v42  ;;  %v6543_v3 = vsub.f32 1.0, %v6542_v11  ;;  %v6537_v39 = vand.u32 2147483648, %v15461_v45  ;;  %vm6531_vm5 = vweird.f32 %v15461_v45  ;;  %v17511_v23 = vld [vmem:[#allocation47_spill] sm:$0xff] }
 0xcee   : > { %v6535_v32 = vand.u32 2147483647, %v15461_v45  ;;  %v6435_v56 = vmul.f32 %v15336_v17, %v6434_v22  ;;  %v6525_v15 = vmul.f32 %v15333_v53, %v6524_v54  ;;  %vm6533_vm14 = vmor %vm6531_vm5, %vm6532_vm8  ;;  %vm6547_vm4 = vweird.f32 %v9081_v49  ;;  %v6740_v22 = vpop.f32.mrf.mxu1  ;;  %v17512_v54 = vld [vmem:[#allocation31_spill] sm:$0xff] }
 0xcef   : > { %v6544_v51 = vmul.f32 %v9081_v49, %v6543_v3  ;;  %v6534_v9 = vsel %vm6533_vm14, %v15619_v29, %v6530_v47  ;;  %v6538_v6 = vor.u32 1.1754944e-38, %v6537_v39  ;;  %v6552_v17 = vand.u32 2147483648, %v15833_v24  ;;  %v17513_v47 = vld [vmem:[#allocation69_spill] sm:$0xff]  ;;  %v17514_v39 = vld [vmem:[#allocation91_spill] sm:$0xff] }
 0xcf0   : > { %vm6536_vm0 = vcmp.eq.f32.partialorder %v6535_v32, 8.507059e+37  ;;  %vm6546_vm13 = vweird.f32 %v15833_v24  ;;  %v6550_v53 = vand.u32 2147483647, %v15833_v24  ;;  %v5945_v48 = vsub.f32 %v17505_v61, %v17504_v58  ;;  %v17527_v58 = vld [vmem:[#allocation155_spill] sm:$0xff]  ;;  %v17528_v61 = vld [vmem:[#allocation54_spill] sm:$0xff] }
 0xcf1   : > { %v6539_v63 = vsel %vm6536_vm0, %v6538_v6, %v6534_v9  ;;  %v6545_v18 = vadd.f32 %v9081_v49, %v6544_v51  ;;  %vm6548_vm7 = vmor %vm6546_vm13, %vm6547_vm4  ;;  %v6553_v2 = vor.u32 1.1754944e-38, %v6552_v17  ;;  %vm7391_vm9 = vcmask 195584   ;;  %v17516_v6 = vld [vmem:[#allocation167_spill] sm:$0xff] }
 0xcf2   : > { %v6540_v45 = vmul.f32 %v15223_v40, %v6539_v63  ;;  %vm6551_vm15 = vcmp.eq.f32.partialorder %v6550_v53, 8.507059e+37  ;;  %v7425_v40 = vld [vmem:[%s16366_s5 + $0x8] sm:$0xff]  ;;  %v6008_v12 = vmul.f32 1.442695, %v5945_v48  ;;  %v7326_v33 = vsel %vm633_vm1, %v17507_v5, %v17506_v31  ;;  %v17517_v63 = vld [vmem:[#allocation160_spill] sm:$0xff]  ;;  %v17518_v53 = vld [vmem:[#allocation6_spill] sm:$0xff] }
 0xcf3   : > { %7116 = vrot.lane.b32.xlu1 %v14646_v0, %s9210_s8  ;;  %v6549_v29 = vsel %vm6548_vm7, %v9081_v49, %v6545_v18  ;;  %v7427_v0 = vld [vmem:[%s16366_s5 + $0x18] sm:$0xff]  ;;  %v7359_v43 = vsel %vm7358_vm6, %v7326_v33, %v17508_v55  ;;  %vm17509_vm12 = vcmask 261120   ;;  %v7327_v3 = vsel %vm633_vm1, %v17513_v47, %v17512_v54  ;;  %v17533_v5 = vld [vmem:[#allocation131_spill] sm:$0xff]  ;;  %v17534_v33 = vld [vmem:[#allocation2_spill] sm:$0xff] }
 0xcf4   : > { %8171 = vmatmul.msk.f32.gmra.mxu2 %vm1062_vm2, %v6435_v56  ;;  %v6554_v36 = vsel %vm6551_vm15, %v6553_v2, %v6549_v29  ;;  %7540 = vmatpush.msra.mxu0 %v7427_v0  ;;  %v7360_v32 = vsel %vm7358_vm6, %v7327_v3, %v17514_v39  ;;  %vm17515_vm13 = vmmov %vm17509_vm12  ;;  %v17519_v29 = vld [vmem:[#allocation77_spill] sm:$0xff]  ;;  %v17521_v2 = vld [vmem:[#allocation50_spill] sm:$0xff] }
 0xcf5   : > { %8177 = vmatmul.msk.f32.gmra.mxu3 %vm1062_vm2, %v6525_v15  ;;  %v6555_v24 = vmul.f32 %v15358_v1, %v6554_v36  ;;  %vm17520_vm7 = vmmov %vm17509_vm12  ;;  %v17522_v0 = vld [vmem:[#allocation157_spill] sm:$0xff]  ;;  %v17554_v47 = vld [vmem:[#allocation159_spill] sm:$0xff] }
 0xcf6   : > { %7541 = vmatpush.msra.mxu0 %v7426_v14  ;;  %v6743_v51 = vpop.f32.mrf.mxu1  ;;  %vm17524_vm15 = vmmov %vm17520_vm7  ;;  %v17555_v3 = vld [vmem:[#allocation48_spill] sm:$0xff] }
 0xcf8   : > { %7542 = vmatpush.msra.mxu0 %v7425_v40 }
 0xcfa   : > { %7543 = vmatpush.msra.mxu0 %v7424_v20  ;;  %v17525_v20 = vld [vmem:[#allocation40_spill] sm:$0xff] }
 0xcfd   : > { %8178 = vmatmul.msk.f32.gmra.mxu3 %vm1062_vm2, %v6540_v45 }
 0xcfe   : > { %v6081_v28 = vpop.xlane.xlu1 %6080 }
 0xcff   : > { %9082 = vrcp.f32 %v6081_v28  ;;  %v6462_v10 = vand.u32 2147483648, %v6081_v28  ;;  %vm6456_vm14 = vweird.f32 %v6081_v28  ;;  %v6460_v60 = vand.u32 2147483647, %v6081_v28 }
 0xd01   : > { %v6463_v42 = vor.u32 1.1754944e-38, %v6462_v10  ;;  %vm6461_vm4 = vcmp.eq.f32.partialorder %v6460_v60, 8.507059e+37  ;;  %v17546_v10 = vld [vmem:[#allocation88_spill] sm:$0xff]  ;;  %v17548_v60 = vld [vmem:[#allocation35_spill] sm:$0xff] }
 0xd05   : > { %8179 = vmatmul.msk.f32.gmra.mxu3 %vm1062_vm2, %v6555_v24  ;;  %v9083_v21 = vpop.eup %9082  ;;  %v17523_v24 = vld [vmem:[#allocation83_spill] sm:$0xff] }
 0xd06   : > { %v6452_v38 = vmul.f32 %v9083_v21, %v6081_v28  ;;  %vm6457_vm8 = vweird.f32 %v9083_v21  ;;  %v17526_v28 = vld [vmem:[#allocation8_spill] sm:$0xff] }
 0xd07   : > { %vm6458_vm0 = vmor %vm6456_vm14, %vm6457_vm8 }
 0xd08   : > { %v6453_v16 = vsub.f32 1.0, %v6452_v38 }
 0xd0a   : > { %v6454_v52 = vmul.f32 %v9083_v21, %v6453_v16  ;;  %v6746_v16 = vpop.f32.mrf.mxu1 }
 0xd0c   : > { %v6455_v59 = vadd.f32 %v9083_v21, %v6454_v52  ;;  %v17540_v52 = vld [vmem:[#allocation97_spill] sm:$0xff] }
 0xd0e   : > { %v6459_v62 = vsel %vm6458_vm0, %v9083_v21, %v6455_v59  ;;  %v17531_v21 = vld [vmem:[#allocation129_spill] sm:$0xff] }
 0xd0f   : > { %v6464_v8 = vsel %vm6461_vm4, %v6463_v42, %v6459_v62  ;;  %v17544_v59 = vld [vmem:[#allocation45_spill] sm:$0xff] }
 0xd10   : > { %v6465_v19 = vmul.f32 %v17511_v23, %v6464_v8  ;;  %v17549_v8 = vld [vmem:[#allocation99_spill] sm:$0xff] }
 0xd12   : > { %v6078_v1 = vpop.xlane.xlu2 %6077 }
 0xd13   : > { %9084 = vrcp.f32 %v6078_v1  ;;  %v6447_v7 = vand.u32 2147483648, %v6078_v1  ;;  %v6445_v49 = vand.u32 2147483647, %v6078_v1  ;;  %vm6441_vm3 = vweird.f32 %v6078_v1 }
 0xd14   : > { %9086 = vpow2.f32 %v6008_v12  ;;  %v17529_v12 = vld [vmem:[#allocation33_spill] sm:$0xff] }
 0xd15   : > { %v6448_v50 = vor.u32 1.1754944e-38, %v6447_v7  ;;  %vm6446_vm5 = vcmp.eq.f32.partialorder %v6445_v49, 8.507059e+37  ;;  %v17539_v7 = vld [vmem:[#allocation23_spill] sm:$0xff] }
 0xd19   : > { %v9085_v25 = vpop.eup %9084 }
 0xd1a   : > { %v15941_v44 = vpop.eup %9086  ;;  %v6437_v13 = vmul.f32 %v9085_v25, %v6078_v1  ;;  %v7231_v41 = vpop.permute.xlu2 %7230  ;;  %vm6442_vm10 = vweird.f32 %v9085_v25  ;;  %v17530_v1 = vld [vmem:[#allocation141_spill] sm:$0xff] }
 0xd1b   : > { %v7392_v30 = vsel %vm7391_vm9, %v7359_v43, %v7231_v41  ;;  %v6103_v34 = vsel %vm1062_vm2, %v15941_v44, 0.0  ;;  %vm6443_vm11 = vmor %vm6441_vm3, %vm6442_vm10  ;;  %v5944_v38 = vsub.f32 %v17531_v21, %v17530_v1  ;;  %v17535_v43 = vld [vmem:[#allocation12_spill] sm:$0xff]  ;;  %v17536_v41 = vld [vmem:[#allocation93_spill] sm:$0xff] }
 0xd1c   : > { %v6438_v35 = vsub.f32 1.0, %v6437_v13  ;;  %8182 = vmatmul.msk.f32.vlgmr.msra.gmra.mxu0 %vm17509_vm12, %v7392_v30  ;;  %v17537_v30 = vld [vmem:[#allocation120_spill] sm:$0xff]  ;;  %vm17542_vm12 = vmmov %vm17520_vm7  ;;  %v17568_v1 = vld [vmem:[#allocation126_spill] sm:$0xff] }
 0xd1d   : > { %6104 = vadd.xlane.f32.xlu1 %v6103_v34  ;;  %v6006_v31 = vmul.f32 1.442695, %v5944_v38  ;;  %v16017_v34 = vld [vmem:[%s16367_s6] ss:$0 sm:$0xff]  ;;  %vm17551_vm10 = vmmov %vm17520_vm7 }
 0xd1e   : > { %v6439_v27 = vmul.f32 %v9085_v25, %v6438_v35  ;;  %v17538_v35 = vld [vmem:[#allocation165_spill] sm:$0xff]  ;;  %vm17552_vm3 = vmmov %vm17520_vm7  ;;  %v17569_v21 = vld [vmem:[#allocation38_spill] sm:$0xff] }
 0xd1f   : > { %9088 = vpow2.f32 %v6006_v31  ;;  %vm17560_vm8 = vmmov %vm17552_vm3 }
 0xd20   : > { %v6440_v26 = vadd.f32 %v9085_v25, %v6439_v27  ;;  %vm17567_vm14 = vmmov %vm17552_vm3 }
 0xd21   : > { %vm17570_vm0 = vmmov %vm17552_vm3 }
 0xd22   : > { %v6444_v46 = vsel %vm6443_vm11, %v9085_v25, %v6440_v26  ;;  %v17532_v25 = vld [vmem:[#allocation124_spill] sm:$0xff]  ;;  %v17541_v26 = vld [vmem:[#allocation29_spill] sm:$0xff]  ;;  %vm17557_vm11 = vmmov %vm17552_vm3 }
 0xd23   : > { %v6449_v57 = vsel %vm6446_vm5, %v6448_v50, %v6444_v46  ;;  %v17543_v50 = vld [vmem:[#allocation16_spill] sm:$0xff]  ;;  %v17545_v46 = vld [vmem:[#allocation145_spill] sm:$0xff]  ;;  %vm17563_vm5 = vmmov %vm17552_vm3 }
 0xd24   : > { %v6450_v11 = vmul.f32 %v17510_v37, %v6449_v57  ;;  %v17547_v57 = vld [vmem:[#allocation119_spill] sm:$0xff]  ;;  %vm17576_vm4 = vmmov %vm17570_vm0 }
 0xd25   : > { %v15999_v55 = vpop.eup %9088 }
 0xd26   : > { %8172 = vmatmul.msk.f32.gmra.mxu2 %vm1062_vm2, %v6450_v11  ;;  %v6100_v13 = vsel %vm1062_vm2, %v15999_v55, 0.0 }
 0xd2d   : > { %v7233_v56 = vpop.permute.xlu2 %7232 }
 0xd2e   : > { %8173 = vmatmul.msk.f32.gmra.mxu2 %vm1062_vm2, %v6465_v19  ;;  %v7393_v15 = vsel %vm7391_vm9, %v7360_v32, %v7233_v56  ;;  %v17550_v19 = vld [vmem:[#allocation156_spill] sm:$0xff]  ;;  %v17556_v56 = vld [vmem:[#allocation55_spill] sm:$0xff] }
 0xd2f   : > { %8183 = vmatmul.msk.f32.gmra.mxu0 %vm17515_vm13, %v7393_v15 }
 0xd30   : > { %v6749_v11 = vpop.f32.mrf.mxu1 }
 0xd36   : > { %7248 = vrot.lane.b32.xlu1 %v6743_v51, %s9211_s26  ;;  %v17558_v51 = vld [vmem:[#allocation68_spill] sm:$0xff] }
 0xd3b   : > { %v6663_v9 = vpop.f32.mrf.mxu0 }
 0xd3c   : > { %7238 = vrot.lane.b32.xlu0 %v6663_v9, %s9211_s26 }
 0xd3e   : > { %6998 = vrot.lane.b32.xlu1 %v17516_v6, %s9209_s29  ;;  %v17559_v6 = vld [vmem:[#allocation28_spill] sm:$0xff] }
 0xd43   : > { %v6752_v54 = vpop.f32.mrf.mxu1 }
 0xd46   : > { %7000 = vrot.lane.b32.xlu1 %v17517_v63, %s9209_s29 }
 0xd48   : > { %v6666_v18 = vpop.f32.mrf.mxu0 }
 0xd49   : > { %7240 = vrot.lane.b32.xlu0 %v6666_v18, %s9211_s26 }
 0xd4d   : > { %v7235_v17 = vpop.permute.xlu1 %7234 }
 0xd4e   : > { %v7394_v45 = vsel %vm7391_vm9, %v17518_v53, %v7235_v17  ;;  %7002 = vrot.lane.b32.xlu1 %v17519_v29, %s9209_s29  ;;  %v17561_v17 = vld [vmem:[#allocation75_spill] sm:$0xff] }
 0xd4f   : > { %8184 = vmatmul.msk.f32.gmra.mxu0 %vm17520_vm7, %v7394_v45  ;;  %v17562_v45 = vld [vmem:[#allocation26_spill] sm:$0xff] }
 0xd50   : > { %v6755_v32 = vpop.f32.mrf.mxu1 }
 0xd51   : > { %6990 = vrot.lane.b32.xlu0 %v17521_v2, %s9209_s29 }
 0xd55   : > { %v7237_v36 = vpop.permute.xlu1 %7236 }
 0xd56   : > { %v7395_v14 = vsel %vm7391_vm9, %v17522_v0, %v7237_v36  ;;  %7004 = vrot.lane.b32.xlu1 %v17523_v24, %s9209_s29  ;;  %v6829_v0 = vpop.f32.mrf.mxu2 }
 0xd57   : > { %8185 = vmatmul.msk.f32.gmra.mxu0 %vm17524_vm15, %v7395_v14 }
 0xd59   : > { %7118 = vrot.lane.b32.xlu0 %v17525_v20, %s9210_s8 }
 0xd5a   : > { %v6669_v40 = vpop.f32.mrf.mxu0 }
 0xd5b   : > { %7242 = vrot.lane.b32.xlu2 %v6669_v40, %s9211_s26  ;;  %v17565_v40 = vld [vmem:[#allocation139_spill] sm:$0xff] }
 0xd5c   : > { %v6758_v53 = vpop.f32.mrf.mxu1 }
 0xd5d   : > { %v6989_v14 = vpop.permute.xlu1 %6988 }
 0xd5e   : > { %7006 = vrot.lane.b32.xlu1 %v17526_v28, %s9209_s29  ;;  %v7333_v38 = vsel %vm633_vm1, %v17569_v21, %v6989_v14 }
 0xd61   : > { %6992 = vrot.lane.b32.xlu0 %v17527_v58, %s9209_s29 }
 0xd63   : > { %v6672_v48 = vpop.f32.mrf.mxu0 }
 0xd64   : > { %v6761_v24 = vpop.f32.mrf.mxu1 }
 0xd66   : > { %7008 = vrot.lane.b32.xlu1 %v17528_v61, %s9209_s29  ;;  %v17566_v61 = vld [vmem:[#allocation116_spill] sm:$0xff] }
 0xd69   : > { %7244 = vrot.lane.b32.xlu0 %v6672_v48, %s9211_s26  ;;  %v6832_v48 = vpop.f32.mrf.mxu2 }
 0xd6e   : > { %7010 = vrot.lane.b32.xlu1 %v17529_v12, %s9209_s29  ;;  %v7117_v12 = vpop.permute.xlu1 %7116 }
 0xd71   : > { %7120 = vrot.lane.b32.xlu0 %v17532_v25, %s9210_s8  ;;  %v7366_v25 = vsel %vm7358_vm6, %v7333_v38, %v7117_v12 }
 0xd76   : > { %7012 = vrot.lane.b32.xlu1 %v17533_v5, %s9209_s29 }
 0xd79   : > { %6994 = vrot.lane.b32.xlu0 %v17534_v33, %s9209_s29  ;;  %v6835_v33 = vpop.f32.mrf.mxu2 }
 0xd7e   : > { %7014 = vrot.lane.b32.xlu1 %v17535_v43, %s9209_s29  ;;  %v17571_v43 = vld [vmem:[#allocation17_spill] sm:$0xff] }
 0xd81   : > { %7250 = vrot.lane.b32.xlu0 %v6746_v16, %s9211_s26 }
 0xd84   : > { %6101 = vadd.xlane.f32.xlu2 %v6100_v13 }
 0xd86   : > { %7016 = vrot.lane.b32.xlu1 %v17536_v41, %s9209_s29  ;;  %v17572_v41 = vld [vmem:[#allocation90_spill] sm:$0xff] }
 0xd89   : > { %7124 = vrot.lane.b32.xlu0 %v17537_v30, %s9210_s8  ;;  %v6838_v30 = vpop.f32.mrf.mxu2 }
 0xd8e   : > { %7018 = vrot.lane.b32.xlu1 %v17538_v35, %s9209_s29 }
 0xd90   : > { %v16102_v16 = vpop.xlane.xlu1 %6104 }
 0xd91   : > { %7126 = vrot.lane.b32.xlu0 %v17539_v7, %s9210_s8  ;;  %9090 = vrcp.f32 %v16102_v16 }
 0xd96   : > { %7020 = vrot.lane.b32.xlu1 %v17540_v52, %s9209_s29  ;;  %v17573_v52 = vld [vmem:[#allocation42_spill] sm:$0xff] }
 0xd99   : > { %v7545_v27 = vpop.f32.mrf.mxu0  ;;  %7128 = vrot.lane.b32.xlu0 %v17541_v26, %s9210_s8 }
 0xd9a   : > { %v7546_v49 = vadd.f32 %v16017_v34, %v7545_v27 }
 0xd9c   : > { %7246 = vrot.lane.b32.xlu2 %v6740_v22, %s9211_s26  ;;  %7641 = vst.msk [vmem:[%s16026_s19] sm:$0xff] %vm17542_vm12, %v7546_v49  ;;  %v17553_v22 = vld [vmem:[#allocation136_spill] sm:$0xff]  ;;  %v6841_v49 = vpop.f32.mrf.mxu2 }
 0xd9e   : > { %7022 = vrot.lane.b32.xlu1 %v17543_v50, %s9209_s29  ;;  %v9091_v50 = vpop.eup %9090 }
 0xd9f   : > { %vm6577_vm12 = vweird.f32 %v9091_v50 }
 0xda1   : > { %7130 = vrot.lane.b32.xlu0 %v17544_v59, %s9210_s8 }
 0xda4   : > { %7122 = vrot.lane.b32.xlu2 %v17545_v46, %s9210_s8  ;;  %v6572_v46 = vmul.f32 %v9091_v50, %v16102_v16 }
 0xda6   : > { %7024 = vrot.lane.b32.xlu1 %v17546_v10, %s9209_s29  ;;  %v17574_v10 = vld [vmem:[#allocation128_spill] sm:$0xff] }
 0xda8   : > { %v7249_v35 = vpop.permute.xlu1 %7248 }
 0xda9   : > { %7132 = vrot.lane.b32.xlu0 %v17547_v57, %s9210_s8 }
 0xdac   : > { %6996 = vrot.lane.b32.xlu2 %v17548_v60, %s9209_s29  ;;  %v7548_v37 = vpop.f32.mrf.mxu0  ;;  %v17575_v60 = vld [vmem:[#allocation46_spill] sm:$0xff] }
 0xdad   : > { %v7549_v42 = vadd.f32 %v16017_v34, %v7548_v37 }
 0xdae   : > { %v7239_v62 = vpop.permute.xlu0 %7238  ;;  %7026 = vrot.lane.b32.xlu1 %v17550_v19, %s9209_s29 }
 0xdaf   : > { %v7396_v23 = vsel %vm7391_vm9, %v17549_v8, %v7239_v62  ;;  %7642 = vst.msk [vmem:[%s16026_s19 + $0x8] sm:$0xff] %vm17552_vm3, %v7549_v42  ;;  %v6573_v62 = vsub.f32 1.0, %v6572_v46  ;;  %vm6576_vm3 = vweird.f32 %v16102_v16 }
 0xdb0   : > { %8186 = vmatmul.msk.f32.gmra.mxu0 %vm17551_vm10, %v7396_v23  ;;  %v16111_v59 = vpop.permute.xlu1 %6998 }
 0xdb1   : > { %7134 = vrot.lane.b32.xlu0 %v17553_v22, %s9210_s8  ;;  %v6844_v22 = vpop.f32.mrf.mxu2 }
 0xdb4   : > { %7252 = vrot.lane.b32.xlu2 %v6749_v11, %s9211_s26 }
 0xdb5   : > { %v7243_v9 = vpop.permute.xlu2 %7242 }
 0xdb6   : > { %7028 = vrot.lane.b32.xlu1 %v17554_v47, %s9209_s29  ;;  %v7398_v18 = vsel %vm7391_vm9, %v15796_v4, %v7243_v9  ;;  %v17564_v4 = vld [vmem:[#allocation96_spill] sm:$0xff] }
 0xdb7   : > { %v17578_v9 = vld [vmem:[#allocation84_spill] sm:$0xff] }
 0xdb8   : > { %v16124_v47 = vpop.permute.xlu1 %7000 }
 0xdb9   : > { %7136 = vrot.lane.b32.xlu0 %v17555_v3, %s9210_s8  ;;  %v6847_v14 = vpop.f32.mrf.mxu2 }
 0xdbb   : > { %v7241_v39 = vpop.permute.xlu0 %7240 }
 0xdbc   : > { %7254 = vrot.lane.b32.xlu2 %v6752_v54, %s9211_s26  ;;  %v7397_v15 = vsel %vm7391_vm9, %v17556_v56, %v7241_v39  ;;  %v6574_v39 = vmul.f32 %v9091_v50, %v6573_v62 }
 0xdbd   : > { %8187 = vmatmul.msk.f32.gmra.mxu0 %vm17557_vm11, %v7397_v15  ;;  %v17577_v15 = vld [vmem:[#allocation59_spill] sm:$0xff]  ;;  %vm17579_vm11 = vmmov %vm17570_vm0 }
 0xdbe   : > { %7030 = vrot.lane.b32.xlu1 %v17558_v51, %s9209_s29 }
 0xdc1   : > { %7138 = vrot.lane.b32.xlu0 %v17559_v6, %s9210_s8 }
 0xdc3   : > { %v6991_v63 = vpop.permute.xlu0 %6990 }
 0xdc4   : > { %7256 = vrot.lane.b32.xlu2 %v6755_v32, %s9211_s26  ;;  %v7334_v37 = vsel %vm633_vm1, %v17575_v60, %v6991_v63  ;;  %v17588_v60 = vld [vmem:[#allocation137_spill] sm:$0xff] }
 0xdc5   : > { %8188 = vmatmul.msk.f32.gmra.mxu0 %vm17560_vm8, %v7398_v18  ;;  %vm6578_vm8 = vmor %vm6576_vm3, %vm6577_vm12 }
 0xdc6   : > { %7032 = vrot.lane.b32.xlu1 %v17561_v17, %s9209_s29  ;;  %vm17598_vm12 = vmmov %vm17570_vm0 }
 0xdc7   : > { %vm17601_vm3 = vmmov %vm17570_vm0 }
 0xdc9   : > { %7140 = vrot.lane.b32.xlu0 %v17562_v45, %s9210_s8 }
 0xdcb   : > { %v7119_v2 = vpop.permute.xlu0 %7118 }
 0xdcc   : > { %7258 = vrot.lane.b32.xlu2 %v6758_v53, %s9211_s26  ;;  %v7551_v29 = vpop.f32.mrf.mxu0  ;;  %v7367_v42 = vsel %vm7358_vm6, %v7334_v37, %v7119_v2  ;;  %v6575_v53 = vadd.f32 %v9091_v50, %v6574_v39  ;;  %v6582_v2 = vand.u32 2147483648, %v16102_v16 }
 0xdcd   : > { %v7552_v36 = vadd.f32 %v16017_v34, %v7551_v29 }
 0xdce   : > { %7034 = vrot.lane.b32.xlu1 %v17564_v4, %s9209_s29  ;;  %v6580_v4 = vand.u32 2147483647, %v16102_v16  ;;  %v17584_v16 = vld [vmem:[#allocation64_spill] sm:$0xff] }
 0xdcf   : > { %7643 = vst.msk [vmem:[%s16026_s19 + $0x10] sm:$0xff] %vm17563_vm5, %v7552_v36 }
 0xdd0   : > { %vm6581_vm5 = vcmp.eq.f32.partialorder %v6580_v4, 8.507059e+37 }
 0xdd1   : > { %7142 = vrot.lane.b32.xlu0 %v17565_v40, %s9210_s8  ;;  %v6579_v40 = vsel %vm6578_vm8, %v9091_v50, %v6575_v53  ;;  %vm17604_vm8 = vmmov %vm17570_vm0 }
 0xdd3   : > { %v6993_v20 = vpop.permute.xlu0 %6992 }
 0xdd4   : > { %7260 = vrot.lane.b32.xlu2 %v6761_v24, %s9211_s26  ;;  %v7554_v28 = vpop.f32.mrf.mxu0  ;;  %v7335_v51 = vsel %vm633_vm1, %v17577_v15, %v6993_v20  ;;  %v6583_v20 = vor.u32 1.1754944e-38, %v6582_v2 }
 0xdd5   : > { %v7555_v58 = vadd.f32 %v16017_v34, %v7554_v28  ;;  %v7003_v28 = vpop.permute.xlu1 %7002 }
 0xdd6   : > { %7036 = vrot.lane.b32.xlu1 %v17566_v61, %s9209_s29  ;;  %v6584_v21 = vsel %vm6581_vm5, %v6583_v20, %v6579_v40  ;;  %vm17606_vm5 = vmmov %vm17570_vm0 }
 0xdd7   : > { %7644 = vst.msk [vmem:[%s16026_s19 + $0x18] sm:$0xff] %vm17567_vm14, %v7555_v58  ;;  %v17580_v58 = vld [vmem:[#allocation18_spill] sm:$0xff]  ;;  %vm17582_vm14 = vmmov %vm17570_vm0 }
 0xdd9   : > { %7144 = vrot.lane.b32.xlu0 %v17568_v1, %s9210_s8 }
 0xddb   : > { %v7245_v31 = vpop.permute.xlu0 %7244 }
 0xddc   : > { %7262 = vrot.lane.b32.xlu2 %v6829_v0, %s9211_s26  ;;  %v7399_v5 = vsel %vm7391_vm9, %v7366_v25, %v7245_v31  ;;  %v6585_v25 = vmul.f32 %v15941_v44, %v6584_v21  ;;  %v6918_v31 = vpop.f32.mrf.mxu3 }
 0xddd   : > { %8189 = vmatmul.msk.f32.gmra.mxu0 %vm17570_vm0, %v7399_v5  ;;  %v6850_v5 = vpop.f32.mrf.mxu2 }
 0xde1   : > { %7146 = vrot.lane.b32.xlu0 %v17571_v43, %s9210_s8 }
 0xde3   : > { %v7121_v13 = vpop.permute.xlu0 %7120 }
 0xde4   : > { %7264 = vrot.lane.b32.xlu2 %v6832_v48, %s9211_s26  ;;  %v7368_v6 = vsel %vm7358_vm6, %v7335_v51, %v7121_v13  ;;  %v17581_v48 = vld [vmem:[#allocation146_spill] sm:$0xff]  ;;  %v7005_v13 = vpop.permute.xlu1 %7004 }
 0xde5   : > { %v7401_v36 = vsel %vm7391_vm9, %v7368_v6, %v7249_v35 }
 0xde9   : > { %7148 = vrot.lane.b32.xlu0 %v17572_v41, %s9210_s8 }
 0xdeb   : > { %v6995_v7 = vpop.permute.xlu0 %6994 }
 0xdec   : > { %7266 = vrot.lane.b32.xlu2 %v6835_v33, %s9211_s26  ;;  %v7336_v61 = vsel %vm633_vm1, %v17580_v58, %v6995_v7  ;;  %v17583_v33 = vld [vmem:[#allocation13_spill] sm:$0xff]  ;;  %v6921_v7 = vpop.f32.mrf.mxu3 }
 0xdf1   : > { %7150 = vrot.lane.b32.xlu0 %v17573_v52, %s9210_s8  ;;  %v17585_v52 = vld [vmem:[#allocation122_spill] sm:$0xff] }
 0xdf3   : > { %v7251_v27 = vpop.permute.xlu0 %7250 }
 0xdf4   : > { %7268 = vrot.lane.b32.xlu2 %v6838_v30, %s9211_s26  ;;  %v6924_v37 = vpop.f32.mrf.mxu3 }
 0xdf7   : > { %v6102_v26 = vpop.xlane.xlu2 %6101 }
 0xdf8   : > { %9092 = vrcp.f32 %v6102_v26  ;;  %v6567_v3 = vand.u32 2147483648, %v6102_v26  ;;  %v6565_v56 = vand.u32 2147483647, %v6102_v26  ;;  %vm6561_vm7 = vweird.f32 %v6102_v26 }
 0xdf9   : > { %7152 = vrot.lane.b32.xlu0 %v17574_v10, %s9210_s8  ;;  %v7007_v10 = vpop.permute.xlu1 %7006 }
 0xdfa   : > { %v6568_v18 = vor.u32 1.1754944e-38, %v6567_v3  ;;  %vm6566_vm10 = vcmp.eq.f32.partialorder %v6565_v56, 8.507059e+37 }
 0xdfb   : > { %v16119_v11 = vpop.permute.xlu0 %7124 }
 0xdfc   : > { %7270 = vrot.lane.b32.xlu2 %v6841_v49, %s9211_s26 }
 0xdfe   : > { %v9093_v57 = vpop.eup %9092 }
 0xdff   : > { %v6557_v8 = vmul.f32 %v9093_v57, %v6102_v26  ;;  %v7247_v23 = vpop.permute.xlu2 %7246  ;;  %vm6562_vm13 = vweird.f32 %v9093_v57 }
 0xe00   : > { %v7400_v19 = vsel %vm7391_vm9, %v7367_v42, %v7247_v23  ;;  %vm6563_vm15 = vmor %vm6561_vm7, %vm6562_vm13 }
 0xe01   : > { %v6558_v54 = vsub.f32 1.0, %v6557_v8  ;;  %8190 = vmatmul.msk.f32.gmra.mxu0 %vm17576_vm4, %v7400_v19  ;;  %7154 = vrot.lane.b32.xlu0 %v17578_v9, %s9210_s8  ;;  %vm17590_vm4 = vmmov %vm17570_vm0  ;;  %v7009_v19 = vpop.permute.xlu1 %7008 }
 0xe02   : > { %vm17593_vm13 = vmmov %vm17570_vm0 }
 0xe03   : > { %v6559_v32 = vmul.f32 %v9093_v57, %v6558_v54  ;;  %v7127_v17 = vpop.permute.xlu0 %7126  ;;  %v17592_v54 = vld [vmem:[#allocation102_spill] sm:$0xff]  ;;  %vm17594_vm7 = vmmov %vm17570_vm0 }
 0xe04   : > { %7272 = vrot.lane.b32.xlu2 %v6844_v22, %s9211_s26  ;;  %v17591_v22 = vld [vmem:[#allocation151_spill] sm:$0xff]  ;;  %v7340_v3 = vsel %vm633_vm1, %v17592_v54, %v7003_v28 }
 0xe05   : > { %v6560_v63 = vadd.f32 %v9093_v57, %v6559_v32  ;;  %v6927_v32 = vpop.f32.mrf.mxu3 }
 0xe07   : > { %v7123_v45 = vpop.permute.xlu2 %7122  ;;  %v6564_v29 = vsel %vm6563_vm15, %v9093_v57, %v6560_v63  ;;  %v17595_v63 = vld [vmem:[#allocation111_spill] sm:$0xff]  ;;  %vm17596_vm15 = vmmov %vm17570_vm0 }
 0xe08   : > { %v6569_v0 = vsel %vm6566_vm10, %v6568_v18, %v6564_v29  ;;  %v7369_v12 = vsel %vm7358_vm6, %v7336_v61, %v7123_v45  ;;  %v7341_v18 = vsel %vm633_vm1, %v17595_v63, %v7005_v13  ;;  %vm17599_vm10 = vmmov %vm17570_vm0 }
 0xe09   : > { %8191 = vmatmul.msk.f32.gmra.mxu0 %vm17579_vm11, %v7401_v36  ;;  %v6570_v24 = vmul.f32 %v15999_v55, %v6569_v0  ;;  %7156 = vrot.lane.b32.xlu0 %v17581_v48, %s9210_s8  ;;  %v7402_v38 = vsel %vm7391_vm9, %v7369_v12, %v7251_v27  ;;  %v17586_v27 = vld [vmem:[#allocation114_spill] sm:$0xff]  ;;  %v7011_v6 = vpop.permute.xlu1 %7010  ;;  %v17600_v12 = vld [vmem:[#allocation104_spill] sm:$0xff]  ;;  %vm17602_vm11 = vmmov %vm17570_vm0 }
 0xe0a   : > { %v7338_v49 = vsel %vm633_vm1, %v17586_v27, %v16111_v59  ;;  %v17597_v0 = vld [vmem:[#allocation106_spill] sm:$0xff] }
 0xe0b   : > { %8180 = vmatmul.msk.f32.gmra.mxu3 %vm1062_vm2, %v6570_v24  ;;  %v7129_v1 = vpop.permute.xlu0 %7128  ;;  %v7371_v50 = vsel %vm7358_vm6, %v7338_v49, %v7127_v17  ;;  %v7342_v4 = vsel %vm633_vm1, %v17597_v0, %v7007_v10 }
 0xe0c   : > { %7274 = vrot.lane.b32.xlu2 %v6847_v14, %s9211_s26 }
 0xe0d   : > { %v6930_v2 = vpop.f32.mrf.mxu3 }
 0xe0f   : > { %v6997_v55 = vpop.permute.xlu2 %6996 }
 0xe10   : > { %v7337_v43 = vsel %vm633_vm1, %v17583_v33, %v6997_v55  ;;  %v17603_v33 = vld [vmem:[#allocation103_spill] sm:$0xff] }
 0xe11   : > { %8192 = vmatmul.msk.f32.gmra.mxu0 %vm17582_vm14, %v7402_v38  ;;  %7158 = vrot.lane.b32.xlu0 %v17584_v16, %s9210_s8  ;;  %v7370_v35 = vsel %vm7358_vm6, %v7337_v43, %v16119_v11  ;;  %v17589_v11 = vld [vmem:[#allocation109_spill] sm:$0xff]  ;;  %v7013_v14 = vpop.permute.xlu1 %7012  ;;  %v7344_v43 = vsel %vm633_vm1, %v17603_v33, %v7011_v6  ;;  %vm17608_vm14 = vmmov %vm17570_vm0 }
 0xe12   : > { %v7339_v62 = vsel %vm633_vm1, %v17589_v11, %v16124_v47 }
 0xe13   : > { %8181 = vmatmul.msk.f32.gmra.mxu3 %vm1062_vm2, %v6585_v25  ;;  %v7131_v41 = vpop.permute.xlu0 %7130  ;;  %vm17587_vm2 = vmmov %vm17570_vm0  ;;  %v7372_v42 = vsel %vm7358_vm6, %v7339_v62, %v7129_v1  ;;  %v7343_v1 = vsel %vm633_vm1, %v17600_v12, %v7009_v19 }
 0xe14   : > { %7276 = vrot.lane.b32.xlu2 %v6850_v5, %s9211_s26  ;;  %v7373_v56 = vsel %vm7358_vm6, %v7340_v3, %v7131_v41  ;;  %v17611_v3 = vld [vmem:[#allocation49_spill] sm:$0xff] }
 0xe15   : > { %v6933_v61 = vpop.f32.mrf.mxu3 }
 0xe17   : > { %v7253_v30 = vpop.permute.xlu2 %7252 }
 0xe18   : > { %v7403_v44 = vsel %vm7391_vm9, %v7370_v35, %v7253_v30 }
 0xe19   : > { %8193 = vmatmul.msk.f32.gmra.mxu0 %vm17570_vm0, %v7403_v44  ;;  %7160 = vrot.lane.b32.xlu0 %v17585_v52, %s9210_s8  ;;  %v7015_v25 = vpop.permute.xlu1 %7014  ;;  %v17605_v44 = vld [vmem:[#allocation133_spill] sm:$0xff] }
 0xe1b   : > { %v7133_v26 = vpop.permute.xlu0 %7132 }
 0xe1c   : > { %7278 = vrot.lane.b32.xlu2 %v6918_v31, %s9211_s26  ;;  %v7374_v53 = vsel %vm7358_vm6, %v7341_v18, %v7133_v26 }
 0xe1f   : > { %v7255_v46 = vpop.permute.xlu2 %7254 }
 0xe20   : > { %v7404_v57 = vsel %vm7391_vm9, %v7371_v50, %v7255_v46  ;;  %v17607_v46 = vld [vmem:[#allocation30_spill] sm:$0xff] }
 0xe21   : > { %8194 = vmatmul.msk.f32.gmra.mxu0 %vm17587_vm2, %v7404_v57  ;;  %7162 = vrot.lane.b32.xlu0 %v17588_v60, %s9210_s8  ;;  %v7017_v30 = vpop.permute.xlu1 %7016  ;;  %v7346_v10 = vsel %vm633_vm1, %v17607_v46, %v7015_v25  ;;  %vm17610_vm2 = vmmov %vm17570_vm0 }
 0xe23   : > { %v7135_v59 = vpop.permute.xlu0 %7134 }
 0xe24   : > { %7280 = vrot.lane.b32.xlu2 %v6921_v7, %s9211_s26  ;;  %v7375_v40 = vsel %vm7358_vm6, %v7342_v4, %v7135_v59  ;;  %v7345_v7 = vsel %vm633_vm1, %v17605_v44, %v7013_v14  ;;  %v17609_v59 = vld [vmem:[#allocation142_spill] sm:$0xff] }
 0xe27   : > { %v7257_v8 = vpop.permute.xlu2 %7256 }
 0xe28   : > { %v7405_v23 = vsel %vm7391_vm9, %v7372_v42, %v7257_v8  ;;  %v7347_v42 = vsel %vm633_vm1, %v17609_v59, %v7017_v30  ;;  %v17624_v30 = vld [vmem:[#allocation110_spill] sm:$0xff] }
 0xe29   : > { %8195 = vmatmul.msk.f32.gmra.mxu0 %vm17590_vm4, %v7405_v23  ;;  %7164 = vrot.lane.b32.xlu0 %v17591_v22, %s9210_s8  ;;  %v7019_v26 = vpop.permute.xlu1 %7018  ;;  %vm17612_vm4 = vmmov %vm17570_vm0 }
 0xe2b   : > { %v7137_v47 = vpop.permute.xlu0 %7136 }
 0xe2c   : > { %7282 = vrot.lane.b32.xlu2 %v6924_v37, %s9211_s26  ;;  %v7376_v55 = vsel %vm7358_vm6, %v7343_v1, %v7137_v47 }
 0xe2d   : > { %v7557_v39 = vpop.f32.mrf.mxu0 }
 0xe2e   : > { %v7558_v15 = vadd.f32 %v16017_v34, %v7557_v39  ;;  %v7348_v39 = vsel %vm633_vm1, %v17611_v3, %v7019_v26 }
 0xe2f   : > { %v7259_v51 = vpop.permute.xlu2 %7258 }
 0xe30   : > { %v7406_v9 = vsel %vm7391_vm9, %v7373_v56, %v7259_v51  ;;  %7645 = vst.msk [vmem:[%s16026_s19 + $0x20] sm:$0xff] %vm17593_vm13, %v7558_v15  ;;  %vm17614_vm13 = vmmov %vm17570_vm0 }
 0xe31   : > { %8196 = vmatmul.msk.f32.gmra.mxu0 %vm17594_vm7, %v7406_v9  ;;  %v7021_v8 = vpop.permute.xlu1 %7020  ;;  %v17613_v9 = vld [vmem:[#allocation95_spill] sm:$0xff]  ;;  %vm17616_vm7 = vmmov %vm17570_vm0 }
 0xe32   : > { %v7349_v6 = vsel %vm633_vm1, %v17613_v9, %v7021_v8 }
 0xe33   : > { %v7139_v17 = vpop.permute.xlu0 %7138 }
 0xe34   : > { %7284 = vrot.lane.b32.xlu2 %v6927_v32, %s9211_s26  ;;  %v7377_v16 = vsel %vm7358_vm6, %v7344_v43, %v7139_v17 }
 0xe37   : > { %v7261_v45 = vpop.permute.xlu2 %7260 }
 0xe38   : > { %v7407_v29 = vsel %vm7391_vm9, %v7374_v53, %v7261_v45 }
 0xe39   : > { %8197 = vmatmul.msk.f32.gmra.mxu0 %vm17596_vm15, %v7407_v29  ;;  %v7023_v56 = vpop.permute.xlu1 %7022  ;;  %v17615_v29 = vld [vmem:[#allocation144_spill] sm:$0xff]  ;;  %vm17617_vm15 = vmmov %vm17570_vm0 }
 0xe3a   : > { %v7560_v36 = vpop.f32.mrf.mxu0 }
 0xe3b   : > { %v7561_v24 = vadd.f32 %v16017_v34, %v7560_v36  ;;  %v7141_v28 = vpop.permute.xlu0 %7140 }
 0xe3c   : > { %7286 = vrot.lane.b32.xlu2 %v6930_v2, %s9211_s26  ;;  %v7378_v52 = vsel %vm7358_vm6, %v7345_v7, %v7141_v28  ;;  %v7350_v2 = vsel %vm633_vm1, %v17615_v29, %v7023_v56 }
 0xe3d   : > { %7646 = vst.msk [vmem:[%s16026_s19 + $0x28] sm:$0xff] %vm17598_vm12, %v7561_v24  ;;  %vm17619_vm12 = vmmov %vm17570_vm0 }
 0xe3f   : > { %v7263_v20 = vpop.permute.xlu2 %7262 }
 0xe40   : > { %v7408_v58 = vsel %vm7391_vm9, %v7375_v40, %v7263_v20  ;;  %v17618_v20 = vld [vmem:[#allocation56_spill] sm:$0xff] }
 0xe41   : > { %8198 = vmatmul.msk.f32.gmra.mxu0 %vm17599_vm10, %v7408_v58  ;;  %v7025_v53 = vpop.permute.xlu1 %7024  ;;  %vm17620_vm10 = vmmov %vm17570_vm0 }
 0xe42   : > { %v7563_v48 = vpop.f32.mrf.mxu0  ;;  %v7351_v28 = vsel %vm633_vm1, %v17618_v20, %v7025_v53 }
 0xe43   : > { %v7564_v21 = vadd.f32 %v16017_v34, %v7563_v48  ;;  %v7143_v5 = vpop.permute.xlu0 %7142 }
 0xe44   : > { %7288 = vrot.lane.b32.xlu2 %v6933_v61, %s9211_s26  ;;  %v7379_v37 = vsel %vm7358_vm6, %v7346_v10, %v7143_v5  ;;  %v17627_v10 = vld [vmem:[#allocation115_spill] sm:$0xff] }
 0xe45   : > { %7647 = vst.msk [vmem:[%s16026_s19 + $0x30] sm:$0xff] %vm17601_vm3, %v7564_v21  ;;  %vm17622_vm3 = vmmov %vm17570_vm0 }
 0xe47   : > { %v7265_v38 = vpop.permute.xlu2 %7264 }
 0xe48   : > { %v7409_v31 = vsel %vm7391_vm9, %v7376_v55, %v7265_v38  ;;  %v17621_v55 = vld [vmem:[#allocation15_spill] sm:$0xff] }
 0xe49   : > { %8199 = vmatmul.msk.f32.gmra.mxu0 %vm17602_vm11, %v7409_v31  ;;  %v7027_v40 = vpop.permute.xlu1 %7026  ;;  %vm17623_vm11 = vmmov %vm17570_vm0 }
 0xe4a   : > { %v7352_v38 = vsel %vm633_vm1, %v17621_v55, %v7027_v40 }
 0xe4b   : > { %v7145_v35 = vpop.permute.xlu0 %7144 }
 0xe4c   : > { %v7380_v23 = vsel %vm7358_vm6, %v7347_v42, %v7145_v35 }
 0xe4f   : > { %v7267_v13 = vpop.permute.xlu2 %7266 }
 0xe50   : > { %v7410_v41 = vsel %vm7391_vm9, %v7377_v16, %v7267_v13 }
 0xe51   : > { %8200 = vmatmul.msk.f32.gmra.mxu0 %vm17604_vm8, %v7410_v41  ;;  %v7029_v25 = vpop.permute.xlu1 %7028  ;;  %vm17625_vm8 = vmmov %vm17570_vm0 }
 0xe52   : > { %v7353_v35 = vsel %vm633_vm1, %v17624_v30, %v7029_v25 }
 0xe53   : > { %v7147_v57 = vpop.permute.xlu0 %7146 }
 0xe54   : > { %v7381_v47 = vsel %vm7358_vm6, %v7348_v39, %v7147_v57 }
 0xe57   : > { %v7269_v27 = vpop.permute.xlu2 %7268 }
 0xe58   : > { %v7411_v49 = vsel %vm7391_vm9, %v7378_v52, %v7269_v27 }
 0xe59   : > { %8201 = vmatmul.msk.f32.gmra.mxu0 %vm17606_vm5, %v7411_v49  ;;  %vm17626_vm5 = vmmov %vm17570_vm0 }
 0xe5a   : > { %v7566_v50 = vpop.f32.mrf.mxu0 }
 0xe5b   : > { %v7567_v60 = vadd.f32 %v16017_v34, %v7566_v50  ;;  %v7149_v22 = vpop.permute.xlu0 %7148  ;;  %v7031_v50 = vpop.permute.xlu1 %7030 }
 0xe5c   : > { %v7382_v63 = vsel %vm7358_vm6, %v7349_v6, %v7149_v22  ;;  %v7354_v57 = vsel %vm633_vm1, %v17627_v10, %v7031_v50 }
 0xe5d   : > { %7648 = vst.msk [vmem:[%s16026_s19 + $0x38] sm:$0xff] %vm17608_vm14, %v7567_v60  ;;  %vm17628_vm14 = vmmov %vm17570_vm0 }
 0xe5f   : > { %v7271_v11 = vpop.permute.xlu2 %7270 }
 0xe60   : > { %v7412_v62 = vsel %vm7391_vm9, %v7379_v37, %v7271_v11 }
 0xe61   : > { %8202 = vmatmul.msk.f32.gmra.mxu0 %vm17570_vm0, %v7412_v62 }
 0xe63   : > { %v7151_v51 = vpop.permute.xlu0 %7150  ;;  %v7033_v42 = vpop.permute.xlu1 %7032 }
 0xe64   : > { %v7383_v0 = vsel %vm7358_vm6, %v7350_v2, %v7151_v51 }
 0xe67   : > { %v7273_v19 = vpop.permute.xlu2 %7272 }
 0xe68   : > { %v7413_v54 = vsel %vm7391_vm9, %v7380_v23, %v7273_v19  ;;  %v17629_v23 = vld [vmem:[#allocation118_spill] sm:$0xff] }
 0xe69   : > { %8203 = vmatmul.msk.f32.gmra.mxu0 %vm17610_vm2, %v7413_v54  ;;  %v7355_v19 = vsel %vm633_vm1, %v17629_v23, %v7033_v42  ;;  %vm17630_vm2 = vmmov %vm17570_vm0 }
 0xe6b   : > { %v7153_v45 = vpop.permute.xlu0 %7152 }
 0xe6c   : > { %v7384_v48 = vsel %vm7358_vm6, %v7351_v28, %v7153_v45 }
 0xe6f   : > { %v7275_v32 = vpop.permute.xlu2 %7274 }
 0xe70   : > { %v7414_v15 = vsel %vm7391_vm9, %v7381_v47, %v7275_v32 }
 0xe71   : > { %8204 = vmatmul.msk.f32.gmra.mxu0 %vm17612_vm4, %v7414_v15  ;;  %vm17631_vm4 = vmmov %vm17570_vm0 }
 0xe73   : > { %v7155_v58 = vpop.permute.xlu0 %7154 }
 0xe74   : > { %v7385_v5 = vsel %vm7358_vm6, %v7352_v38, %v7155_v58 }
 0xe77   : > { %v7277_v18 = vpop.permute.xlu2 %7276 }
 0xe78   : > { %v7415_v17 = vsel %vm7391_vm9, %v7382_v63, %v7277_v18 }
 0xe79   : > { %8205 = vmatmul.msk.f32.gmra.mxu0 %vm17614_vm13, %v7415_v17  ;;  %vm17632_vm13 = vmmov %vm17570_vm0 }
 0xe7b   : > { %v7157_v16 = vpop.permute.xlu0 %7156 }
 0xe7c   : > { %v7386_v7 = vsel %vm7358_vm6, %v7353_v35, %v7157_v16 }
 0xe7e   : > { %v7569_v36 = vpop.f32.mrf.mxu0 }
 0xe7f   : > { %v7570_v4 = vadd.f32 %v16017_v34, %v7569_v36  ;;  %v7279_v14 = vpop.permute.xlu2 %7278 }
 0xe80   : > { %v7416_v24 = vsel %vm7391_vm9, %v7383_v0, %v7279_v14  ;;  %v7035_v0 = vpop.permute.xlu1 %7034 }
 0xe81   : > { %7649 = vst.msk [vmem:[%s16026_s19 + $0x40] sm:$0xff] %vm17616_vm7, %v7570_v4  ;;  %8206 = vmatmul.msk.f32.gmra.mxu0 %vm17617_vm15, %v7416_v24  ;;  %vm17633_vm7 = vmmov %vm17570_vm0  ;;  %v17639_v24 = vld [vmem:[#allocation21_spill] sm:$0xff] }
 0xe82   : > { %vm17634_vm15 = vmmov %vm17570_vm0  ;;  %v7356_v40 = vsel %vm633_vm1, %v17639_v24, %v7035_v0 }
 0xe83   : > { %v7159_v46 = vpop.permute.xlu0 %7158 }
 0xe84   : > { %v7387_v60 = vsel %vm7358_vm6, %v7354_v57, %v7159_v46 }
 0xe86   : > { %v7572_v61 = vpop.f32.mrf.mxu0 }
 0xe87   : > { %v7573_v12 = vadd.f32 %v16017_v34, %v7572_v61  ;;  %v7281_v1 = vpop.permute.xlu2 %7280 }
 0xe88   : > { %v7417_v21 = vsel %vm7391_vm9, %v7384_v48, %v7281_v1  ;;  %v7037_v48 = vpop.permute.xlu1 %7036 }
 0xe89   : > { %7650 = vst.msk [vmem:[%s16026_s19 + $0x48] sm:$0xff] %vm17619_vm12, %v7573_v12  ;;  %8207 = vmatmul.msk.f32.gmra.mxu0 %vm17620_vm10, %v7417_v21  ;;  %vm17635_vm12 = vmmov %vm17570_vm0  ;;  %v17642_v21 = vld [vmem:[#allocation81_spill] sm:$0xff] }
 0xe8a   : > { %vm17636_vm10 = vmmov %vm17570_vm0  ;;  %v7357_v55 = vsel %vm633_vm1, %v17642_v21, %v7037_v48 }
 0xe8b   : > { %v7161_v8 = vpop.permute.xlu0 %7160  ;;  %vm17645_vm1 = vmmov %vm17570_vm0 }
 0xe8c   : > { %v7388_v22 = vsel %vm7358_vm6, %v7355_v19, %v7161_v8 }
 0xe8e   : > { %v6936_v31 = vpop.f32.mrf.mxu3  ;;  %v7575_v33 = vpop.f32.mrf.mxu0 }
 0xe8f   : > { %7290 = vrot.lane.b32.xlu2 %v6936_v31, %s9211_s26  ;;  %v7283_v43 = vpop.permute.xlu2 %7282  ;;  %v7576_v13 = vadd.f32 %v16017_v34, %v7575_v33 }
 0xe90   : > { %v7418_v41 = vsel %vm7391_vm9, %v7385_v5, %v7283_v43 }
 0xe91   : > { %8208 = vmatmul.msk.f32.gmra.mxu0 %vm17622_vm3, %v7418_v41  ;;  %7651 = vst.msk [vmem:[%s16026_s19 + $0x50] sm:$0xff] %vm17623_vm11, %v7576_v13  ;;  %vm17637_vm3 = vmmov %vm17570_vm0 }
 0xe92   : > { %vm17638_vm11 = vmmov %vm17570_vm0 }
 0xe93   : > { %v7163_v4 = vpop.permute.xlu0 %7162 }
 0xe94   : > { %v7389_v28 = vsel %vm7358_vm6, %v7356_v40, %v7163_v4 }
 0xe96   : > { %v6939_v44 = vpop.f32.mrf.mxu3  ;;  %v7578_v52 = vpop.f32.mrf.mxu0 }
 0xe97   : > { %7292 = vrot.lane.b32.xlu2 %v6939_v44, %s9211_s26  ;;  %v7285_v27 = vpop.permute.xlu2 %7284  ;;  %v7579_v49 = vadd.f32 %v16017_v34, %v7578_v52 }
 0xe98   : > { %v7419_v26 = vsel %vm7391_vm9, %v7386_v7, %v7285_v27 }
 0xe99   : > { %8209 = vmatmul.msk.f32.gmra.mxu0 %vm17625_vm8, %v7419_v26  ;;  %7652 = vst.msk [vmem:[%s16026_s19 + $0x58] sm:$0xff] %vm17626_vm5, %v7579_v49  ;;  %vm17640_vm8 = vmmov %vm17570_vm0 }
 0xe9a   : > { %vm17641_vm5 = vmmov %vm17570_vm0 }
 0xe9b   : > { %v7165_v12 = vpop.permute.xlu0 %7164 }
 0xe9c   : > { %v7390_v25 = vsel %vm7358_vm6, %v7357_v55, %v7165_v12  ;;  %vm17646_vm6 = vmmov %vm17570_vm0 }
 0xe9e   : > { %v7581_v37 = vpop.f32.mrf.mxu0 }
 0xe9f   : > { %v7287_v11 = vpop.permute.xlu2 %7286  ;;  %v7582_v62 = vadd.f32 %v16017_v34, %v7581_v37 }
 0xea0   : > { %v7420_v59 = vsel %vm7391_vm9, %v7387_v60, %v7287_v11 }
 0xea1   : > { %8210 = vmatmul.msk.f32.gmra.mxu0 %vm17628_vm14, %v7420_v59  ;;  %7653 = vst.msk [vmem:[%s16026_s19 + $0x60] sm:$0xff] %vm17570_vm0, %v7582_v62  ;;  %vm17643_vm14 = vmmov %vm17570_vm0 }
 0xea6   : > { %v7584_v54 = vpop.f32.mrf.mxu0 }
 0xea7   : > { %v7289_v3 = vpop.permute.xlu2 %7288  ;;  %v7585_v39 = vadd.f32 %v16017_v34, %v7584_v54 }
 0xea8   : > { %v7421_v47 = vsel %vm7391_vm9, %v7388_v22, %v7289_v3 }
 0xea9   : > { %8211 = vmatmul.msk.f32.gmra.mxu0 %vm17630_vm2, %v7421_v47  ;;  %7654 = vst.msk [vmem:[%s16026_s19 + $0x68] sm:$0xff] %vm17631_vm4, %v7585_v39  ;;  %vm17644_vm2 = vmmov %vm17570_vm0 }
 0xeaa   : > { %vm17648_vm4 = vmmov %vm17570_vm0 }
 0xeae   : > { %v7587_v32 = vpop.f32.mrf.mxu0 }
 0xeaf   : > { %v7588_v56 = vadd.f32 %v16017_v34, %v7587_v32 }
 0xeb1   : > { %7655 = vst.msk [vmem:[%s16026_s19 + $0x70] sm:$0xff] %vm17632_vm13, %v7588_v56  ;;  %vm17649_vm13 = vmmov %vm17570_vm0 }
 0xeb6   : > { %v7590_v15 = vpop.f32.mrf.mxu0 }
 0xeb7   : > { %v7591_v51 = vadd.f32 %v16017_v34, %v7590_v15 }
 0xeb9   : > { %7656 = vst.msk [vmem:[%s16026_s19 + $0x78] sm:$0xff] %vm17633_vm7, %v7591_v51  ;;  %vm17650_vm7 = vmmov %vm17570_vm0 }
 0xebe   : > { %v7593_v9 = vpop.f32.mrf.mxu0 }
 0xebf   : > { %v7594_v6 = vadd.f32 %v16017_v34, %v7593_v9 }
 0xec1   : > { %7657 = vst.msk [vmem:[%s16026_s19 + $0x80] sm:$0xff] %vm17634_vm15, %v7594_v6  ;;  %vm17651_vm15 = vmmov %vm17570_vm0 }
 0xec6   : > { %v7596_v63 = vpop.f32.mrf.mxu0 }
 0xec7   : > { %v7597_v18 = vadd.f32 %v16017_v34, %v7596_v63 }
 0xec9   : > { %7658 = vst.msk [vmem:[%s16026_s19 + $0x88] sm:$0xff] %vm17635_vm12, %v7597_v18  ;;  %vm17652_vm12 = vmmov %vm17570_vm0 }
 0xece   : > { %v7599_v17 = vpop.f32.mrf.mxu0 }
 0xecf   : > { %v7600_v53 = vadd.f32 %v16017_v34, %v7599_v17 }
 0xed1   : > { %7659 = vst.msk [vmem:[%s16026_s19 + $0x90] sm:$0xff] %vm17636_vm10, %v7600_v53 }
 0xed6   : > { %v7602_v45 = vpop.f32.mrf.mxu0 }
 0xed7   : > { %v7603_v29 = vadd.f32 %v16017_v34, %v7602_v45 }
 0xed9   : > { %7660 = vst.msk [vmem:[%s16026_s19 + $0x98] sm:$0xff] %vm17637_vm3, %v7603_v29 }
 0xede   : > { %v7605_v2 = vpop.f32.mrf.mxu0 }
 0xedf   : > { %v7606_v36 = vadd.f32 %v16017_v34, %v7605_v2 }
 0xee1   : > { %7661 = vst.msk [vmem:[%s16026_s19 + $0xa0] sm:$0xff] %vm17638_vm11, %v7606_v36 }
 0xee6   : > { %v7608_v14 = vpop.f32.mrf.mxu0 }
 0xee7   : > { %v7609_v20 = vadd.f32 %v16017_v34, %v7608_v14 }
 0xee9   : > { %v7291_v58 = vpop.permute.xlu2 %7290  ;;  %7662 = vst.msk [vmem:[%s16026_s19 + $0xa8] sm:$0xff] %vm17640_vm8, %v7609_v20 }
 0xeea   : > { %v7422_v61 = vsel %vm7391_vm9, %v7389_v28, %v7291_v58 }
 0xeeb   : > { %8212 = vmatmul.msk.f32.gmra.mxu0 %vm17641_vm5, %v7422_v61 }
 0xeee   : > { %v7611_v1 = vpop.f32.mrf.mxu0 }
 0xeef   : > { %v7612_v38 = vadd.f32 %v16017_v34, %v7611_v1 }
 0xef1   : > { %v7293_v31 = vpop.permute.xlu2 %7292  ;;  %7663 = vst.msk [vmem:[%s16026_s19 + $0xb0] sm:$0xff] %vm17643_vm14, %v7612_v38 }
 0xef2   : > { %v7423_v5 = vsel %vm7391_vm9, %v7390_v25, %v7293_v31  ;;  %vm17647_vm9 = vmmov %vm17570_vm0 }
 0xef3   : > { %8213 = vmatmul.msk.f32.gmra.mxu0 %vm17570_vm0, %v7423_v5 }
 0xef6   : > { %v7614_v33 = vpop.f32.mrf.mxu0 }
 0xef7   : > { %v7615_v43 = vadd.f32 %v16017_v34, %v7614_v33 }
 0xef9   : > { %7664 = vst.msk [vmem:[%s16026_s19 + $0xb8] sm:$0xff] %vm17644_vm2, %v7615_v43 }
 0xefe   : > { %v7617_v16 = vpop.f32.mrf.mxu0 }
 0xeff   : > { %v7618_v13 = vadd.f32 %v16017_v34, %v7617_v16 }
 0xf01   : > { %7665 = vst.msk [vmem:[%s16026_s19 + $0xc0] sm:$0xff] %vm17645_vm1, %v7618_v13 }
 0xf06   : > { %v7620_v41 = vpop.f32.mrf.mxu0 }
 0xf07   : > { %v7621_v30 = vadd.f32 %v16017_v34, %v7620_v41 }
 0xf09   : > { %7666 = vst.msk [vmem:[%s16026_s19 + $0xc8] sm:$0xff] %vm17646_vm6, %v7621_v30 }
 0xf0e   : > { %v7623_v35 = vpop.f32.mrf.mxu0 }
 0xf0f   : > { %v7624_v44 = vadd.f32 %v16017_v34, %v7623_v35 }
 0xf11   : > { %7667 = vst.msk [vmem:[%s16026_s19 + $0xd0] sm:$0xff] %vm17647_vm9, %v7624_v44 }
 0xf16   : > { %v7626_v7 = vpop.f32.mrf.mxu0 }
 0xf17   : > { %v7627_v52 = vadd.f32 %v16017_v34, %v7626_v7 }
 0xf19   : > { %7668 = vst.msk [vmem:[%s16026_s19 + $0xd8] sm:$0xff] %vm17648_vm4, %v7627_v52 }
 0xf1e   : > { %v7629_v27 = vpop.f32.mrf.mxu0 }
 0xf1f   : > { %v7630_v49 = vadd.f32 %v16017_v34, %v7629_v27 }
 0xf21   : > { %7669 = vst.msk [vmem:[%s16026_s19 + $0xe0] sm:$0xff] %vm17649_vm13, %v7630_v49 }
 0xf26   : > { %v7632_v26 = vpop.f32.mrf.mxu0 }
 0xf27   : > { %v7633_v50 = vadd.f32 %v16017_v34, %v7632_v26 }
 0xf29   : > { %7670 = vst.msk [vmem:[%s16026_s19 + $0xe8] sm:$0xff] %vm17650_vm7, %v7633_v50 }
 0xf68   : > { %v7635_v46 = vpop.f32.mrf.mxu0 }
 0xf69   : > { %v7636_v10 = vadd.f32 %v16017_v34, %v7635_v46 }
 0xf6b   : > { %7671 = vst.msk [vmem:[%s16026_s19 + $0xf0] sm:$0xff] %vm17651_vm15, %v7636_v10 }
 0xf70   : > { %v7638_v57 = vpop.f32.mrf.mxu0 }
 0xf71   : > { %v7639_v60 = vadd.f32 %v16017_v34, %v7638_v57 }
 0xf73   : > { %7672 = vst.msk [vmem:[%s16026_s19 + $0xf8] sm:$0xff] %vm17652_vm12, %v7639_v60 }
 0xf74 PF: > { %s17_s24 = sadd.s32 1, %s9196_s24  }
 0xf75   : > { %p14_p4 = scmp.ge.s32.totalorder %s17_s24, 4  }
 0xf77   :  { %16 = sbr.rel (!%p14_p4) target bundleno = 1 (0x1), region = 81 }

</bundles_post_ra>
